<compile_context>
chip_gen: v5e
topology: v5e:2x2
jax: 0.10.0
libtpu: 0.0.40
codegen_flags: <defaults>
</compile_context>

<pallas_src>
import numpy as np
import jax
import jax.numpy as jnp
from jax.experimental import pallas as pl
from jax.experimental.pallas import tpu as pltpu

F32 = jnp.float32


def _round_up(v, m):
    return (v + m - 1) // m * m


def _weight_norm_eff(v, g):
    # torch weight_norm (dim=0): w = g * v / ||v||, norm over all dims but 0.
    norm = jnp.sqrt(jnp.sum(v * v, axis=tuple(range(1, v.ndim)), keepdims=True))
    return v * (g.reshape((-1,) + (1,) * (v.ndim - 1)) / norm)


# ---------------------------------------------------------------------------
# Fused kernel: whole TCN + attention + regression for one batch block.
# Activation layout: [M, C] with M = L * BB, row r = t * BB + b
# (time-major, batch-minor).  BB is always a multiple of 8.
# ---------------------------------------------------------------------------
def _make_kernel(layer_cfg, L, BB, ksz, c_last):
    M = L * BB

    def shifted_matmul(x, w, rows, cout):
        # (shift x down by `rows` rows, zero-filling the top) @ w, computed on
        # the valid slice only.  `rows` is a static multiple of 8.
        if rows >= M:
            return jnp.zeros((M, cout), F32)
        contrib = jnp.dot(x[:M - rows, :], w, preferred_element_type=F32)
        return jnp.concatenate([jnp.zeros((rows, cout), F32), contrib], axis=0)

    def causal_conv(x, w_ref, b_ref, d):
        # Causal dilated Conv1d(kernel=ksz, dilation=d, padding=d) + Chomp1d,
        # expressed on the time-major / batch-minor [M, Cin] layout.
        cout = w_ref.shape[2]
        acc = jnp.dot(x, w_ref[ksz - 1], preferred_element_type=F32) + b_ref[...]
        for j in range(ksz - 1):
            acc = acc + shifted_matmul(x, w_ref[j], (ksz - 1 - j) * d * BB, cout)
        return acc

    def kernel(*refs):
        x_ref, out_ref = refs[0], refs[-1]
        w = refs[1:-1]
        idx = 0
        h = x_ref[...]                                          # [M, C_in]

        # ---- TCN: stack of TemporalBlocks ---------------------------------
        for (ci, co, d, has_down) in layer_cfg:
            w1, b1, w2, b2 = w[idx:idx + 4]; idx += 4
            c1 = jnp.maximum(causal_conv(h, w1, b1, d), 0.0)
            c2 = jnp.maximum(causal_conv(c1, w2, b2, d), 0.0)
            if has_down:
                wd, bd = w[idx:idx + 2]; idx += 2
                res = jnp.dot(h, wd[...], preferred_element_type=F32) + bd[...]
            else:
                res = h
            h = jnp.maximum(c2 + res, 0.0)                      # [M, co]

        # ---- attention over time (softmax along t, per sample) ------------
        wa1, ba1, wa2, ba2 = w[idx:idx + 4]; idx += 4
        hid = jnp.tanh(jnp.dot(h, wa1[...], preferred_element_type=F32)
                       + ba1[...])                              # [M, Ha]
        score = (jnp.dot(hid, wa2[...], preferred_element_type=F32)
                 + ba2[...])                                    # [M, 1]

        # rows t*BB : (t+1)*BB hold time step t for all BB samples; every
        # slice below is static and sublane-aligned (BB % 8 == 0).
        def trow(a, t):
            return a[t * BB:(t + 1) * BB]

        m = trow(score, 0)
        for t in range(1, L):
            m = jnp.maximum(m, trow(score, t))                  # [BB, 1]
        den = jnp.zeros((BB, 1), F32)
        pooled = jnp.zeros((BB, c_last), F32)
        for t in range(L):
            e_t = jnp.exp(trow(score, t) - m)                   # [BB, 1]
            den = den + e_t
            pooled = pooled + e_t * trow(h, t)                  # [BB, c_last]
        pooled = pooled / den          # softmax-weighted sumpooling over time

        # ---- regression head ----------------------------------------------
        wr1, br1, wr2, br2, wr3, br3 = w[idx:idx + 6]
        r = jnp.maximum(jnp.dot(pooled, wr1[...], preferred_element_type=F32)
                        + br1[...], 0.0)
        r = jnp.maximum(jnp.dot(r, wr2[...], preferred_element_type=F32)
                        + br2[...], 0.0)
        out_ref[...] = (jnp.dot(r, wr3[...], preferred_element_type=F32)
                        + br3[...])                             # [BB, P]

    return kernel


# ---------------------------------------------------------------------------
# Wrapper: layout plumbing + weight_norm folding + pallas_call.
# ---------------------------------------------------------------------------
def tcn_attention_forward(x, params, *, num_channels, kernel_size=2,
                          block_batch=None):
    B, L, c_in = x.shape
    chans = (c_in,) + tuple(num_channels)
    c_last = chans[-1]
    layer_cfg = tuple((chans[i], chans[i + 1], 2 ** i, chans[i] != chans[i + 1])
                      for i in range(len(num_channels)))

    # ---- batch blocking: batch lives on the matmul M / sublane axis --------
    if block_batch is None:
        block_batch = 128
    BB = min(_round_up(B, 8), _round_up(block_batch, 8))
    Gb = -(-B // BB)
    Bp = Gb * BB
    M = L * BB

    xp = jnp.pad(x.astype(F32), ((0, Bp - B), (0, 0), (0, 0)))
    # [Bp, L, Cin] -> [Gb, L*BB, Cin]   (time-major, batch-minor rows)
    xk = (xp.reshape(Gb, BB, L, c_in)
            .transpose(0, 2, 1, 3)
            .reshape(Gb, M, c_in))

    # ---- parameter re-layout (plain-JAX glue; weight_norm folded in) -------
    weights = []
    for i, (ci, co, d, has_down) in enumerate(layer_cfg):
        lp = params['layers'][i]
        w1 = _weight_norm_eff(lp['conv1_v'], lp['conv1_g'])     # [co, ci, k]
        w2 = _weight_norm_eff(lp['conv2_v'], lp['conv2_g'])     # [co, co, k]
        weights += [jnp.transpose(w1, (2, 1, 0)),               # [k, ci, co]
                    lp['conv1_b'].reshape(1, co),
                    jnp.transpose(w2, (2, 1, 0)),               # [k, co, co]
                    lp['conv2_b'].reshape(1, co)]
        if has_down:
            weights += [lp['down_w'][:, :, 0].T,                # [ci, co]
                        lp['down_b'].reshape(1, co)]
    ha = params['att1_w'].shape[0]
    h1 = params['reg1_w'].shape[0]
    h2 = params['reg2_w'].shape[0]
    pdim = params['reg3_w'].shape[0]
    weights += [params['att1_w'].T, params['att1_b'].reshape(1, ha),
                params['att2_w'].T, params['att2_b'].reshape(1, 1),
                params['reg1_w'].T, params['reg1_b'].reshape(1, h1),
                params['reg2_w'].T, params['reg2_b'].reshape(1, h2),
                params['reg3_w'].T, params['reg3_b'].reshape(1, pdim)]
    weights = [w.astype(F32) for w in weights]

    kernel = _make_kernel(layer_cfg, L, BB, kernel_size, c_last)

    in_specs = [pl.BlockSpec((None, M, c_in), lambda g: (g, 0, 0))]
    for wgt in weights:
        in_specs.append(pl.BlockSpec(wgt.shape, lambda g, _n=wgt.ndim: (0,) * _n))

    # Advisory cost estimate so XLA schedules the surrounding glue sensibly.
    flops = 0
    for (ci, co, d, has_down) in layer_cfg:
        flops += 2 * M * ci * co * kernel_size + 2 * M * co * co * kernel_size
        if has_down:
            flops += 2 * M * ci * co
    flops += 2 * M * c_last * ha + 2 * M * ha + 2 * M * c_last
    flops += 2 * BB * (c_last * h1 + h1 * h2 + h2 * pdim)
    flops *= Gb
    transcendentals = Gb * M * (ha + 1)
    bytes_accessed = 4 * (int(xk.size) + Gb * BB * pdim
                          + sum(int(w.size) for w in weights))

    out = pl.pallas_call(
        kernel,
        out_shape=jax.ShapeDtypeStruct((Gb, BB, pdim), F32),
        grid=(Gb,),
        in_specs=in_specs,
        out_specs=pl.BlockSpec((None, BB, pdim), lambda g: (g, 0, 0)),
        compiler_params=pltpu.CompilerParams(
            dimension_semantics=("parallel",)),
        cost_estimate=pl.CostEstimate(flops=flops,
                                      transcendentals=transcendentals,
                                      bytes_accessed=bytes_accessed),
    )(xk, *weights)

    return out.reshape(Bp, pdim)[:B]


# ---------------------------------------------------------------------------
# Deterministic parameter init (torch shapes: conv [Cout, Cin, k], lin [out, in])
# ---------------------------------------------------------------------------
def init_params(key, num_inputs, num_channels, kernel_size=2,
                attention_hidden_size=64, linear_hidden_1=64,
                linear_hidden_2=32, predict_sensor=9):
    chans = (num_inputs,) + tuple(num_channels)
    n_layers = len(num_channels)
    keys = iter(jax.random.split(key, 12 * n_layers + 16))

    def nrm(shape, scale):
        return (scale * jax.random.normal(next(keys), shape)).astype(F32)

    def uni(shape, lo, hi):
        return jax.random.uniform(next(keys), shape, F32, lo, hi)

    layers = []
    for i in range(n_layers):
        ci, co = chans[i], chans[i + 1]
        lp = {'conv1_v': nrm((co, ci, kernel_size), 0.1),
              'conv1_g': uni((co,), 0.5, 1.5),
              'conv1_b': nrm((co,), 0.1),
              'conv2_v': nrm((co, co, kernel_size), 0.1),
              'conv2_g': uni((co,), 0.5, 1.5),
              'conv2_b': nrm((co,), 0.1)}
        if ci != co:
            lp['down_w'] = nrm((co, ci, 1), 0.3)
            lp['down_b'] = nrm((co,), 0.1)
        layers.append(lp)

    c_last = chans[-1]
    return {'layers': layers,
            'att1_w': nrm((attention_hidden_size, c_last), 1.0 / np.sqrt(c_last)),
            'att1_b': nrm((attention_hidden_size,), 0.1),
            'att2_w': nrm((1, attention_hidden_size),
                          1.0 / np.sqrt(attention_hidden_size)),
            'att2_b': nrm((1,), 0.1),
            'reg1_w': nrm((linear_hidden_1, c_last), 1.0 / np.sqrt(c_last)),
            'reg1_b': nrm((linear_hidden_1,), 0.1),
            'reg2_w': nrm((linear_hidden_2, linear_hidden_1),
                          1.0 / np.sqrt(linear_hidden_1)),
            'reg2_b': nrm((linear_hidden_2,), 0.1),
            'reg3_w': nrm((predict_sensor, linear_hidden_2),
                          1.0 / np.sqrt(linear_hidden_2)),
            'reg3_b': nrm((predict_sensor,), 0.1)}


# ---------------------------------------------------------------------------
# Pure-JAX reference (mirrors the torch forward) for a sanity check.
# ---------------------------------------------------------------------------
def ref_forward(x, params, *, num_channels, kernel_size=2):
    B, L, c_in = x.shape
    chans = (c_in,) + tuple(num_channels)
    h = jnp.transpose(x.astype(F32), (0, 2, 1))                 # [B, C, L]
    for i in range(len(num_channels)):
        ci, co, d = chans[i], chans[i + 1], 2 ** i
        lp = params['layers'][i]
        w1 = _weight_norm_eff(lp['conv1_v'], lp['conv1_g'])
        w2 = _weight_norm_eff(lp['conv2_v'], lp['conv2_g'])

        def cconv(a, w, b):
            ap = jnp.pad(a, ((0, 0), (0, 0), ((kernel_size - 1) * d, 0)))
            out = b[None, :, None]
            for j in range(kernel_size):
                out = out + jnp.einsum('oc,bcl->bol', w[:, :, j],
                                       ap[:, :, j * d:j * d + L])
            return out

        c1 = jax.nn.relu(cconv(h, w1, lp['conv1_b']))
        c2 = jax.nn.relu(cconv(c1, w2, lp['conv2_b']))
        if ci != co:
            res = (jnp.einsum('oc,bcl->bol', lp['down_w'][:, :, 0], h)
                   + lp['down_b'][None, :, None])
        else:
            res = h
        h = jax.nn.relu(c2 + res)

    atten_input = jnp.transpose(h, (0, 2, 1))                   # [B, L, C_last]
    hid = jnp.tanh(atten_input @ params['att1_w'].T + params['att1_b'])
    score = (hid @ params['att2_w'].T + params['att2_b'])[..., 0]
    wts = jax.nn.softmax(score, axis=1)
    pooled = jnp.einsum('bcl,bl->bc', h, wts)
    r = jax.nn.relu(pooled @ params['reg1_w'].T + params['reg1_b'])
    r = jax.nn.relu(r @ params['reg2_w'].T + params['reg2_b'])
    return r @ params['reg3_w'].T + params['reg3_b']


if __name__ == "__main__":
    # Small but representative config: 8 input sensors, seq_len=24, TCN
    # channels (16, 16, 32) -> dilations 1, 2, 4 (layer 1 exercises the
    # identity residual, layers 0/2 the 1x1 downsample path).  batch=24 with
    # block_batch=16 exercises batch padding and a multi-block parallel grid.
    num_inputs, num_channels, seq_len, batch = 8, (16, 16, 32), 24, 24

    key = jax.random.PRNGKey(0)
    kx, kp = jax.random.split(key)
    x = jax.random.normal(kx, (batch, seq_len, num_inputs), F32)
    params = init_params(kp, num_inputs, num_channels)

    fwd = jax.jit(lambda xx, pp: tcn_attention_forward(
        xx, pp, num_channels=num_channels, kernel_size=2, block_batch=16))
    out = jax.block_until_ready(fwd(x, params))
    assert out.shape == (batch, 9)

    ref = jax.block_until_ready(
        ref_forward(x, params, num_channels=num_channels, kernel_size=2))
    # TPU f32 matmuls default to bf16-based MXU passes on both the XLA and
    # Mosaic paths, so expect ~1e-3-level agreement rather than exact f32.
    np.testing.assert_allclose(np.asarray(out), np.asarray(ref),
                               rtol=1e-2, atol=1e-3)
    print("KERNEL_OK")
</pallas_src>

<mosaic_0001>
module attributes {stable_mosaic.version = 11 : i64} {
  func.func @kernel(%arg0: i32, %arg1: memref<1x384x8xf32, #tpu.memory_space<vmem>>, %arg2: memref<2x8x16xf32, #tpu.memory_space<vmem>>, %arg3: memref<1x16xf32, #tpu.memory_space<vmem>>, %arg4: memref<2x16x16xf32, #tpu.memory_space<vmem>>, %arg5: memref<1x16xf32, #tpu.memory_space<vmem>>, %arg6: memref<8x16xf32, #tpu.memory_space<vmem>>, %arg7: memref<1x16xf32, #tpu.memory_space<vmem>>, %arg8: memref<2x16x16xf32, #tpu.memory_space<vmem>>, %arg9: memref<1x16xf32, #tpu.memory_space<vmem>>, %arg10: memref<2x16x16xf32, #tpu.memory_space<vmem>>, %arg11: memref<1x16xf32, #tpu.memory_space<vmem>>, %arg12: memref<2x16x32xf32, #tpu.memory_space<vmem>>, %arg13: memref<1x32xf32, #tpu.memory_space<vmem>>, %arg14: memref<2x32x32xf32, #tpu.memory_space<vmem>>, %arg15: memref<1x32xf32, #tpu.memory_space<vmem>>, %arg16: memref<16x32xf32, #tpu.memory_space<vmem>>, %arg17: memref<1x32xf32, #tpu.memory_space<vmem>>, %arg18: memref<32x64xf32, #tpu.memory_space<vmem>>, %arg19: memref<1x64xf32, #tpu.memory_space<vmem>>, %arg20: memref<64x1xf32, #tpu.memory_space<vmem>>, %arg21: memref<1x1xf32, #tpu.memory_space<vmem>>, %arg22: memref<32x64xf32, #tpu.memory_space<vmem>>, %arg23: memref<1x64xf32, #tpu.memory_space<vmem>>, %arg24: memref<64x32xf32, #tpu.memory_space<vmem>>, %arg25: memref<1x32xf32, #tpu.memory_space<vmem>>, %arg26: memref<32x9xf32, #tpu.memory_space<vmem>>, %arg27: memref<1x9xf32, #tpu.memory_space<vmem>>, %arg28: memref<1x16x9xf32, #tpu.memory_space<vmem>>) attributes {dimension_semantics = [#tpu.dimension_semantics<parallel>], iteration_bounds = array<i64: 2>, scalar_prefetch = 0 : i64, scratch_operands = 0 : i64, tpu.core_type = #tpu.core_type<tc>, window_params = [{transform_indices = @transform_0, window_bounds = array<i64: 1, 384, 8>}, {pipeline_mode = #tpu.pipeline_mode<synchronous>, transform_indices = @transform_1, window_bounds = array<i64: 2, 8, 16>}, {pipeline_mode = #tpu.pipeline_mode<synchronous>, transform_indices = @transform_2, window_bounds = array<i64: 1, 16>}, {pipeline_mode = #tpu.pipeline_mode<synchronous>, transform_indices = @transform_3, window_bounds = array<i64: 2, 16, 16>}, {pipeline_mode = #tpu.pipeline_mode<synchronous>, transform_indices = @transform_4, window_bounds = array<i64: 1, 16>}, {pipeline_mode = #tpu.pipeline_mode<synchronous>, transform_indices = @transform_5, window_bounds = array<i64: 8, 16>}, {pipeline_mode = #tpu.pipeline_mode<synchronous>, transform_indices = @transform_6, window_bounds = array<i64: 1, 16>}, {pipeline_mode = #tpu.pipeline_mode<synchronous>, transform_indices = @transform_7, window_bounds = array<i64: 2, 16, 16>}, {pipeline_mode = #tpu.pipeline_mode<synchronous>, transform_indices = @transform_8, window_bounds = array<i64: 1, 16>}, {pipeline_mode = #tpu.pipeline_mode<synchronous>, transform_indices = @transform_9, window_bounds = array<i64: 2, 16, 16>}, {pipeline_mode = #tpu.pipeline_mode<synchronous>, transform_indices = @transform_10, window_bounds = array<i64: 1, 16>}, {pipeline_mode = #tpu.pipeline_mode<synchronous>, transform_indices = @transform_11, window_bounds = array<i64: 2, 16, 32>}, {pipeline_mode = #tpu.pipeline_mode<synchronous>, transform_indices = @transform_12, window_bounds = array<i64: 1, 32>}, {pipeline_mode = #tpu.pipeline_mode<synchronous>, transform_indices = @transform_13, window_bounds = array<i64: 2, 32, 32>}, {pipeline_mode = #tpu.pipeline_mode<synchronous>, transform_indices = @transform_14, window_bounds = array<i64: 1, 32>}, {pipeline_mode = #tpu.pipeline_mode<synchronous>, transform_indices = @transform_15, window_bounds = array<i64: 16, 32>}, {pipeline_mode = #tpu.pipeline_mode<synchronous>, transform_indices = @transform_16, window_bounds = array<i64: 1, 32>}, {pipeline_mode = #tpu.pipeline_mode<synchronous>, transform_indices = @transform_17, window_bounds = array<i64: 32, 64>}, {pipeline_mode = #tpu.pipeline_mode<synchronous>, transform_indices = @transform_18, window_bounds = array<i64: 1, 64>}, {pipeline_mode = #tpu.pipeline_mode<synchronous>, transform_indices = @transform_19, window_bounds = array<i64: 64, 1>}, {pipeline_mode = #tpu.pipeline_mode<synchronous>, transform_indices = @transform_20, window_bounds = array<i64: 1, 1>}, {pipeline_mode = #tpu.pipeline_mode<synchronous>, transform_indices = @transform_21, window_bounds = array<i64: 32, 64>}, {pipeline_mode = #tpu.pipeline_mode<synchronous>, transform_indices = @transform_22, window_bounds = array<i64: 1, 64>}, {pipeline_mode = #tpu.pipeline_mode<synchronous>, transform_indices = @transform_23, window_bounds = array<i64: 64, 32>}, {pipeline_mode = #tpu.pipeline_mode<synchronous>, transform_indices = @transform_24, window_bounds = array<i64: 1, 32>}, {pipeline_mode = #tpu.pipeline_mode<synchronous>, transform_indices = @transform_25, window_bounds = array<i64: 32, 9>}, {pipeline_mode = #tpu.pipeline_mode<synchronous>, transform_indices = @transform_26, window_bounds = array<i64: 1, 9>}, {transform_indices = @transform_27, window_bounds = array<i64: 1, 16, 9>}]} {
    %c0 = arith.constant 0 : index
    %c0_0 = arith.constant 0 : index
    %c0_1 = arith.constant 0 : index
    %0 = vector.load %arg1[%c0, %c0_0, %c0_1] : memref<1x384x8xf32, #tpu.memory_space<vmem>>, vector<1x384x8xf32>
    %1 = vector.shape_cast %0 : vector<1x384x8xf32> to vector<384x8xf32>
    %c1 = arith.constant 1 : index
    %c0_2 = arith.constant 0 : index
    %c0_3 = arith.constant 0 : index
    %2 = vector.load %arg2[%c1, %c0_2, %c0_3] : memref<2x8x16xf32, #tpu.memory_space<vmem>>, vector<1x8x16xf32>
    %3 = vector.shape_cast %2 : vector<1x8x16xf32> to vector<8x16xf32>
    %cst = arith.constant dense<0.000000e+00> : vector<384x16xf32>
    %4 = tpu.matmul %1, %3, %cst {dimension_numbers = #tpu.dot_dimension_numbers<[1], [0], [0], [1], [0, 0, 1, 1], [], []>} : vector<384x8xf32>, vector<8x16xf32>, vector<384x16xf32> -> vector<384x16xf32>
    %c0_4 = arith.constant 0 : index
    %c0_5 = arith.constant 0 : index
    %5 = vector.load %arg3[%c0_4, %c0_5] : memref<1x16xf32, #tpu.memory_space<vmem>>, vector<1x16xf32>
    %6 = vector.broadcast %5 : vector<1x16xf32> to vector<384x16xf32>
    %7 = arith.addf %4, %6 : vector<384x16xf32>
    %c0_6 = arith.constant 0 : index
    %c0_7 = arith.constant 0 : index
    %c0_8 = arith.constant 0 : index
    %8 = vector.load %arg2[%c0_6, %c0_7, %c0_8] : memref<2x8x16xf32, #tpu.memory_space<vmem>>, vector<1x8x16xf32>
    %9 = vector.shape_cast %8 : vector<1x8x16xf32> to vector<8x16xf32>
    %10 = vector.extract_strided_slice %1 {offsets = [0, 0], sizes = [368, 8], strides = [1, 1]} : vector<384x8xf32> to vector<368x8xf32>
    %cst_9 = arith.constant dense<0.000000e+00> : vector<368x16xf32>
    %11 = tpu.matmul %10, %9, %cst_9 {dimension_numbers = #tpu.dot_dimension_numbers<[1], [0], [0], [1], [0, 0, 1, 1], [], []>} : vector<368x8xf32>, vector<8x16xf32>, vector<368x16xf32> -> vector<368x16xf32>
    %cst_10 = arith.constant 0.000000e+00 : f32
    %12 = vector.broadcast %cst_10 : f32 to vector<16x16xf32>
    %13 = tpu.concatenate %12, %11 in 0 : vector<16x16xf32>, vector<368x16xf32> -> vector<384x16xf32>
    %14 = arith.addf %7, %13 : vector<384x16xf32>
    %cst_11 = arith.constant 0.000000e+00 : f32
    %15 = vector.broadcast %cst_11 : f32 to vector<384x16xf32>
    %16 = arith.maximumf %14, %15 : vector<384x16xf32>
    %c1_12 = arith.constant 1 : index
    %c0_13 = arith.constant 0 : index
    %c0_14 = arith.constant 0 : index
    %17 = vector.load %arg4[%c1_12, %c0_13, %c0_14] : memref<2x16x16xf32, #tpu.memory_space<vmem>>, vector<1x16x16xf32>
    %18 = vector.shape_cast %17 : vector<1x16x16xf32> to vector<16x16xf32>
    %cst_15 = arith.constant dense<0.000000e+00> : vector<384x16xf32>
    %19 = tpu.matmul %16, %18, %cst_15 {dimension_numbers = #tpu.dot_dimension_numbers<[1], [0], [0], [1], [0, 0, 1, 1], [], []>} : vector<384x16xf32>, vector<16x16xf32>, vector<384x16xf32> -> vector<384x16xf32>
    %c0_16 = arith.constant 0 : index
    %c0_17 = arith.constant 0 : index
    %20 = vector.load %arg5[%c0_16, %c0_17] : memref<1x16xf32, #tpu.memory_space<vmem>>, vector<1x16xf32>
    %21 = vector.broadcast %20 : vector<1x16xf32> to vector<384x16xf32>
    %22 = arith.addf %19, %21 : vector<384x16xf32>
    %c0_18 = arith.constant 0 : index
    %c0_19 = arith.constant 0 : index
    %c0_20 = arith.constant 0 : index
    %23 = vector.load %arg4[%c0_18, %c0_19, %c0_20] : memref<2x16x16xf32, #tpu.memory_space<vmem>>, vector<1x16x16xf32>
    %24 = vector.shape_cast %23 : vector<1x16x16xf32> to vector<16x16xf32>
    %25 = vector.extract_strided_slice %16 {offsets = [0, 0], sizes = [368, 16], strides = [1, 1]} : vector<384x16xf32> to vector<368x16xf32>
    %cst_21 = arith.constant dense<0.000000e+00> : vector<368x16xf32>
    %26 = tpu.matmul %25, %24, %cst_21 {dimension_numbers = #tpu.dot_dimension_numbers<[1], [0], [0], [1], [0, 0, 1, 1], [], []>} : vector<368x16xf32>, vector<16x16xf32>, vector<368x16xf32> -> vector<368x16xf32>
    %cst_22 = arith.constant 0.000000e+00 : f32
    %27 = vector.broadcast %cst_22 : f32 to vector<16x16xf32>
    %28 = tpu.concatenate %27, %26 in 0 : vector<16x16xf32>, vector<368x16xf32> -> vector<384x16xf32>
    %29 = arith.addf %22, %28 : vector<384x16xf32>
    %cst_23 = arith.constant 0.000000e+00 : f32
    %30 = vector.broadcast %cst_23 : f32 to vector<384x16xf32>
    %31 = arith.maximumf %29, %30 : vector<384x16xf32>
    %c0_24 = arith.constant 0 : index
    %c0_25 = arith.constant 0 : index
    %32 = vector.load %arg6[%c0_24, %c0_25] : memref<8x16xf32, #tpu.memory_space<vmem>>, vector<8x16xf32>
    %cst_26 = arith.constant dense<0.000000e+00> : vector<384x16xf32>
    %33 = tpu.matmul %1, %32, %cst_26 {dimension_numbers = #tpu.dot_dimension_numbers<[1], [0], [0], [1], [0, 0, 1, 1], [], []>} : vector<384x8xf32>, vector<8x16xf32>, vector<384x16xf32> -> vector<384x16xf32>
    %c0_27 = arith.constant 0 : index
    %c0_28 = arith.constant 0 : index
    %34 = vector.load %arg7[%c0_27, %c0_28] : memref<1x16xf32, #tpu.memory_space<vmem>>, vector<1x16xf32>
    %35 = vector.broadcast %34 : vector<1x16xf32> to vector<384x16xf32>
    %36 = arith.addf %33, %35 : vector<384x16xf32>
    %37 = arith.addf %31, %36 : vector<384x16xf32>
    %cst_29 = arith.constant 0.000000e+00 : f32
    %38 = vector.broadcast %cst_29 : f32 to vector<384x16xf32>
    %39 = arith.maximumf %37, %38 : vector<384x16xf32>
    %c1_30 = arith.constant 1 : index
    %c0_31 = arith.constant 0 : index
    %c0_32 = arith.constant 0 : index
    %40 = vector.load %arg8[%c1_30, %c0_31, %c0_32] : memref<2x16x16xf32, #tpu.memory_space<vmem>>, vector<1x16x16xf32>
    %41 = vector.shape_cast %40 : vector<1x16x16xf32> to vector<16x16xf32>
    %cst_33 = arith.constant dense<0.000000e+00> : vector<384x16xf32>
    %42 = tpu.matmul %39, %41, %cst_33 {dimension_numbers = #tpu.dot_dimension_numbers<[1], [0], [0], [1], [0, 0, 1, 1], [], []>} : vector<384x16xf32>, vector<16x16xf32>, vector<384x16xf32> -> vector<384x16xf32>
    %c0_34 = arith.constant 0 : index
    %c0_35 = arith.constant 0 : index
    %43 = vector.load %arg9[%c0_34, %c0_35] : memref<1x16xf32, #tpu.memory_space<vmem>>, vector<1x16xf32>
    %44 = vector.broadcast %43 : vector<1x16xf32> to vector<384x16xf32>
    %45 = arith.addf %42, %44 : vector<384x16xf32>
    %c0_36 = arith.constant 0 : index
    %c0_37 = arith.constant 0 : index
    %c0_38 = arith.constant 0 : index
    %46 = vector.load %arg8[%c0_36, %c0_37, %c0_38] : memref<2x16x16xf32, #tpu.memory_space<vmem>>, vector<1x16x16xf32>
    %47 = vector.shape_cast %46 : vector<1x16x16xf32> to vector<16x16xf32>
    %48 = vector.extract_strided_slice %39 {offsets = [0, 0], sizes = [352, 16], strides = [1, 1]} : vector<384x16xf32> to vector<352x16xf32>
    %cst_39 = arith.constant dense<0.000000e+00> : vector<352x16xf32>
    %49 = tpu.matmul %48, %47, %cst_39 {dimension_numbers = #tpu.dot_dimension_numbers<[1], [0], [0], [1], [0, 0, 1, 1], [], []>} : vector<352x16xf32>, vector<16x16xf32>, vector<352x16xf32> -> vector<352x16xf32>
    %cst_40 = arith.constant 0.000000e+00 : f32
    %50 = vector.broadcast %cst_40 : f32 to vector<32x16xf32>
    %51 = tpu.concatenate %50, %49 in 0 : vector<32x16xf32>, vector<352x16xf32> -> vector<384x16xf32>
    %52 = arith.addf %45, %51 : vector<384x16xf32>
    %cst_41 = arith.constant 0.000000e+00 : f32
    %53 = vector.broadcast %cst_41 : f32 to vector<384x16xf32>
    %54 = arith.maximumf %52, %53 : vector<384x16xf32>
    %c1_42 = arith.constant 1 : index
    %c0_43 = arith.constant 0 : index
    %c0_44 = arith.constant 0 : index
    %55 = vector.load %arg10[%c1_42, %c0_43, %c0_44] : memref<2x16x16xf32, #tpu.memory_space<vmem>>, vector<1x16x16xf32>
    %56 = vector.shape_cast %55 : vector<1x16x16xf32> to vector<16x16xf32>
    %cst_45 = arith.constant dense<0.000000e+00> : vector<384x16xf32>
    %57 = tpu.matmul %54, %56, %cst_45 {dimension_numbers = #tpu.dot_dimension_numbers<[1], [0], [0], [1], [0, 0, 1, 1], [], []>} : vector<384x16xf32>, vector<16x16xf32>, vector<384x16xf32> -> vector<384x16xf32>
    %c0_46 = arith.constant 0 : index
    %c0_47 = arith.constant 0 : index
    %58 = vector.load %arg11[%c0_46, %c0_47] : memref<1x16xf32, #tpu.memory_space<vmem>>, vector<1x16xf32>
    %59 = vector.broadcast %58 : vector<1x16xf32> to vector<384x16xf32>
    %60 = arith.addf %57, %59 : vector<384x16xf32>
    %c0_48 = arith.constant 0 : index
    %c0_49 = arith.constant 0 : index
    %c0_50 = arith.constant 0 : index
    %61 = vector.load %arg10[%c0_48, %c0_49, %c0_50] : memref<2x16x16xf32, #tpu.memory_space<vmem>>, vector<1x16x16xf32>
    %62 = vector.shape_cast %61 : vector<1x16x16xf32> to vector<16x16xf32>
    %63 = vector.extract_strided_slice %54 {offsets = [0, 0], sizes = [352, 16], strides = [1, 1]} : vector<384x16xf32> to vector<352x16xf32>
    %cst_51 = arith.constant dense<0.000000e+00> : vector<352x16xf32>
    %64 = tpu.matmul %63, %62, %cst_51 {dimension_numbers = #tpu.dot_dimension_numbers<[1], [0], [0], [1], [0, 0, 1, 1], [], []>} : vector<352x16xf32>, vector<16x16xf32>, vector<352x16xf32> -> vector<352x16xf32>
    %cst_52 = arith.constant 0.000000e+00 : f32
    %65 = vector.broadcast %cst_52 : f32 to vector<32x16xf32>
    %66 = tpu.concatenate %65, %64 in 0 : vector<32x16xf32>, vector<352x16xf32> -> vector<384x16xf32>
    %67 = arith.addf %60, %66 : vector<384x16xf32>
    %cst_53 = arith.constant 0.000000e+00 : f32
    %68 = vector.broadcast %cst_53 : f32 to vector<384x16xf32>
    %69 = arith.maximumf %67, %68 : vector<384x16xf32>
    %70 = arith.addf %69, %39 : vector<384x16xf32>
    %cst_54 = arith.constant 0.000000e+00 : f32
    %71 = vector.broadcast %cst_54 : f32 to vector<384x16xf32>
    %72 = arith.maximumf %70, %71 : vector<384x16xf32>
    %c1_55 = arith.constant 1 : index
    %c0_56 = arith.constant 0 : index
    %c0_57 = arith.constant 0 : index
    %73 = vector.load %arg12[%c1_55, %c0_56, %c0_57] : memref<2x16x32xf32, #tpu.memory_space<vmem>>, vector<1x16x32xf32>
    %74 = vector.shape_cast %73 : vector<1x16x32xf32> to vector<16x32xf32>
    %cst_58 = arith.constant dense<0.000000e+00> : vector<384x32xf32>
    %75 = tpu.matmul %72, %74, %cst_58 {dimension_numbers = #tpu.dot_dimension_numbers<[1], [0], [0], [1], [0, 0, 1, 1], [], []>} : vector<384x16xf32>, vector<16x32xf32>, vector<384x32xf32> -> vector<384x32xf32>
    %c0_59 = arith.constant 0 : index
    %c0_60 = arith.constant 0 : index
    %76 = vector.load %arg13[%c0_59, %c0_60] : memref<1x32xf32, #tpu.memory_space<vmem>>, vector<1x32xf32>
    %77 = vector.broadcast %76 : vector<1x32xf32> to vector<384x32xf32>
    %78 = arith.addf %75, %77 : vector<384x32xf32>
    %c0_61 = arith.constant 0 : index
    %c0_62 = arith.constant 0 : index
    %c0_63 = arith.constant 0 : index
    %79 = vector.load %arg12[%c0_61, %c0_62, %c0_63] : memref<2x16x32xf32, #tpu.memory_space<vmem>>, vector<1x16x32xf32>
    %80 = vector.shape_cast %79 : vector<1x16x32xf32> to vector<16x32xf32>
    %81 = vector.extract_strided_slice %72 {offsets = [0, 0], sizes = [320, 16], strides = [1, 1]} : vector<384x16xf32> to vector<320x16xf32>
    %cst_64 = arith.constant dense<0.000000e+00> : vector<320x32xf32>
    %82 = tpu.matmul %81, %80, %cst_64 {dimension_numbers = #tpu.dot_dimension_numbers<[1], [0], [0], [1], [0, 0, 1, 1], [], []>} : vector<320x16xf32>, vector<16x32xf32>, vector<320x32xf32> -> vector<320x32xf32>
    %cst_65 = arith.constant 0.000000e+00 : f32
    %83 = vector.broadcast %cst_65 : f32 to vector<64x32xf32>
    %84 = tpu.concatenate %83, %82 in 0 : vector<64x32xf32>, vector<320x32xf32> -> vector<384x32xf32>
    %85 = arith.addf %78, %84 : vector<384x32xf32>
    %cst_66 = arith.constant 0.000000e+00 : f32
    %86 = vector.broadcast %cst_66 : f32 to vector<384x32xf32>
    %87 = arith.maximumf %85, %86 : vector<384x32xf32>
    %c1_67 = arith.constant 1 : index
    %c0_68 = arith.constant 0 : index
    %c0_69 = arith.constant 0 : index
    %88 = vector.load %arg14[%c1_67, %c0_68, %c0_69] : memref<2x32x32xf32, #tpu.memory_space<vmem>>, vector<1x32x32xf32>
    %89 = vector.shape_cast %88 : vector<1x32x32xf32> to vector<32x32xf32>
    %cst_70 = arith.constant dense<0.000000e+00> : vector<384x32xf32>
    %90 = tpu.matmul %87, %89, %cst_70 {dimension_numbers = #tpu.dot_dimension_numbers<[1], [0], [0], [1], [0, 0, 1, 1], [], []>} : vector<384x32xf32>, vector<32x32xf32>, vector<384x32xf32> -> vector<384x32xf32>
    %c0_71 = arith.constant 0 : index
    %c0_72 = arith.constant 0 : index
    %91 = vector.load %arg15[%c0_71, %c0_72] : memref<1x32xf32, #tpu.memory_space<vmem>>, vector<1x32xf32>
    %92 = vector.broadcast %91 : vector<1x32xf32> to vector<384x32xf32>
    %93 = arith.addf %90, %92 : vector<384x32xf32>
    %c0_73 = arith.constant 0 : index
    %c0_74 = arith.constant 0 : index
    %c0_75 = arith.constant 0 : index
    %94 = vector.load %arg14[%c0_73, %c0_74, %c0_75] : memref<2x32x32xf32, #tpu.memory_space<vmem>>, vector<1x32x32xf32>
    %95 = vector.shape_cast %94 : vector<1x32x32xf32> to vector<32x32xf32>
    %96 = vector.extract_strided_slice %87 {offsets = [0, 0], sizes = [320, 32], strides = [1, 1]} : vector<384x32xf32> to vector<320x32xf32>
    %cst_76 = arith.constant dense<0.000000e+00> : vector<320x32xf32>
    %97 = tpu.matmul %96, %95, %cst_76 {dimension_numbers = #tpu.dot_dimension_numbers<[1], [0], [0], [1], [0, 0, 1, 1], [], []>} : vector<320x32xf32>, vector<32x32xf32>, vector<320x32xf32> -> vector<320x32xf32>
    %cst_77 = arith.constant 0.000000e+00 : f32
    %98 = vector.broadcast %cst_77 : f32 to vector<64x32xf32>
    %99 = tpu.concatenate %98, %97 in 0 : vector<64x32xf32>, vector<320x32xf32> -> vector<384x32xf32>
    %100 = arith.addf %93, %99 : vector<384x32xf32>
    %cst_78 = arith.constant 0.000000e+00 : f32
    %101 = vector.broadcast %cst_78 : f32 to vector<384x32xf32>
    %102 = arith.maximumf %100, %101 : vector<384x32xf32>
    %c0_79 = arith.constant 0 : index
    %c0_80 = arith.constant 0 : index
    %103 = vector.load %arg16[%c0_79, %c0_80] : memref<16x32xf32, #tpu.memory_space<vmem>>, vector<16x32xf32>
    %cst_81 = arith.constant dense<0.000000e+00> : vector<384x32xf32>
    %104 = tpu.matmul %72, %103, %cst_81 {dimension_numbers = #tpu.dot_dimension_numbers<[1], [0], [0], [1], [0, 0, 1, 1], [], []>} : vector<384x16xf32>, vector<16x32xf32>, vector<384x32xf32> -> vector<384x32xf32>
    %c0_82 = arith.constant 0 : index
    %c0_83 = arith.constant 0 : index
    %105 = vector.load %arg17[%c0_82, %c0_83] : memref<1x32xf32, #tpu.memory_space<vmem>>, vector<1x32xf32>
    %106 = vector.broadcast %105 : vector<1x32xf32> to vector<384x32xf32>
    %107 = arith.addf %104, %106 : vector<384x32xf32>
    %108 = arith.addf %102, %107 : vector<384x32xf32>
    %cst_84 = arith.constant 0.000000e+00 : f32
    %109 = vector.broadcast %cst_84 : f32 to vector<384x32xf32>
    %110 = arith.maximumf %108, %109 : vector<384x32xf32>
    %c0_85 = arith.constant 0 : index
    %c0_86 = arith.constant 0 : index
    %111 = vector.load %arg18[%c0_85, %c0_86] : memref<32x64xf32, #tpu.memory_space<vmem>>, vector<32x64xf32>
    %cst_87 = arith.constant dense<0.000000e+00> : vector<384x64xf32>
    %112 = tpu.matmul %110, %111, %cst_87 {dimension_numbers = #tpu.dot_dimension_numbers<[1], [0], [0], [1], [0, 0, 1, 1], [], []>} : vector<384x32xf32>, vector<32x64xf32>, vector<384x64xf32> -> vector<384x64xf32>
    %c0_88 = arith.constant 0 : index
    %c0_89 = arith.constant 0 : index
    %113 = vector.load %arg19[%c0_88, %c0_89] : memref<1x64xf32, #tpu.memory_space<vmem>>, vector<1x64xf32>
    %114 = vector.broadcast %113 : vector<1x64xf32> to vector<384x64xf32>
    %115 = arith.addf %112, %114 : vector<384x64xf32>
    %116 = math.tanh %115 : vector<384x64xf32>
    %c0_90 = arith.constant 0 : index
    %c0_91 = arith.constant 0 : index
    %117 = vector.load %arg20[%c0_90, %c0_91] : memref<64x1xf32, #tpu.memory_space<vmem>>, vector<64x1xf32>
    %cst_92 = arith.constant dense<0.000000e+00> : vector<384x1xf32>
    %118 = tpu.matmul %116, %117, %cst_92 {dimension_numbers = #tpu.dot_dimension_numbers<[1], [0], [0], [1], [0, 0, 1, 1], [], []>} : vector<384x64xf32>, vector<64x1xf32>, vector<384x1xf32> -> vector<384x1xf32>
    %c0_93 = arith.constant 0 : index
    %c0_94 = arith.constant 0 : index
    %119 = vector.load %arg21[%c0_93, %c0_94] : memref<1x1xf32, #tpu.memory_space<vmem>>, vector<1x1xf32>
    %120 = vector.broadcast %119 : vector<1x1xf32> to vector<384x1xf32>
    %121 = arith.addf %118, %120 : vector<384x1xf32>
    %122 = vector.extract_strided_slice %121 {offsets = [0, 0], sizes = [16, 1], strides = [1, 1]} : vector<384x1xf32> to vector<16x1xf32>
    %123 = vector.extract_strided_slice %121 {offsets = [16, 0], sizes = [16, 1], strides = [1, 1]} : vector<384x1xf32> to vector<16x1xf32>
    %124 = arith.maximumf %122, %123 : vector<16x1xf32>
    %125 = vector.extract_strided_slice %121 {offsets = [32, 0], sizes = [16, 1], strides = [1, 1]} : vector<384x1xf32> to vector<16x1xf32>
    %126 = arith.maximumf %124, %125 : vector<16x1xf32>
    %127 = vector.extract_strided_slice %121 {offsets = [48, 0], sizes = [16, 1], strides = [1, 1]} : vector<384x1xf32> to vector<16x1xf32>
    %128 = arith.maximumf %126, %127 : vector<16x1xf32>
    %129 = vector.extract_strided_slice %121 {offsets = [64, 0], sizes = [16, 1], strides = [1, 1]} : vector<384x1xf32> to vector<16x1xf32>
    %130 = arith.maximumf %128, %129 : vector<16x1xf32>
    %131 = vector.extract_strided_slice %121 {offsets = [80, 0], sizes = [16, 1], strides = [1, 1]} : vector<384x1xf32> to vector<16x1xf32>
    %132 = arith.maximumf %130, %131 : vector<16x1xf32>
    %133 = vector.extract_strided_slice %121 {offsets = [96, 0], sizes = [16, 1], strides = [1, 1]} : vector<384x1xf32> to vector<16x1xf32>
    %134 = arith.maximumf %132, %133 : vector<16x1xf32>
    %135 = vector.extract_strided_slice %121 {offsets = [112, 0], sizes = [16, 1], strides = [1, 1]} : vector<384x1xf32> to vector<16x1xf32>
    %136 = arith.maximumf %134, %135 : vector<16x1xf32>
    %137 = vector.extract_strided_slice %121 {offsets = [128, 0], sizes = [16, 1], strides = [1, 1]} : vector<384x1xf32> to vector<16x1xf32>
    %138 = arith.maximumf %136, %137 : vector<16x1xf32>
    %139 = vector.extract_strided_slice %121 {offsets = [144, 0], sizes = [16, 1], strides = [1, 1]} : vector<384x1xf32> to vector<16x1xf32>
    %140 = arith.maximumf %138, %139 : vector<16x1xf32>
    %141 = vector.extract_strided_slice %121 {offsets = [160, 0], sizes = [16, 1], strides = [1, 1]} : vector<384x1xf32> to vector<16x1xf32>
    %142 = arith.maximumf %140, %141 : vector<16x1xf32>
    %143 = vector.extract_strided_slice %121 {offsets = [176, 0], sizes = [16, 1], strides = [1, 1]} : vector<384x1xf32> to vector<16x1xf32>
    %144 = arith.maximumf %142, %143 : vector<16x1xf32>
    %145 = vector.extract_strided_slice %121 {offsets = [192, 0], sizes = [16, 1], strides = [1, 1]} : vector<384x1xf32> to vector<16x1xf32>
    %146 = arith.maximumf %144, %145 : vector<16x1xf32>
    %147 = vector.extract_strided_slice %121 {offsets = [208, 0], sizes = [16, 1], strides = [1, 1]} : vector<384x1xf32> to vector<16x1xf32>
    %148 = arith.maximumf %146, %147 : vector<16x1xf32>
    %149 = vector.extract_strided_slice %121 {offsets = [224, 0], sizes = [16, 1], strides = [1, 1]} : vector<384x1xf32> to vector<16x1xf32>
    %150 = arith.maximumf %148, %149 : vector<16x1xf32>
    %151 = vector.extract_strided_slice %121 {offsets = [240, 0], sizes = [16, 1], strides = [1, 1]} : vector<384x1xf32> to vector<16x1xf32>
    %152 = arith.maximumf %150, %151 : vector<16x1xf32>
    %153 = vector.extract_strided_slice %121 {offsets = [256, 0], sizes = [16, 1], strides = [1, 1]} : vector<384x1xf32> to vector<16x1xf32>
    %154 = arith.maximumf %152, %153 : vector<16x1xf32>
    %155 = vector.extract_strided_slice %121 {offsets = [272, 0], sizes = [16, 1], strides = [1, 1]} : vector<384x1xf32> to vector<16x1xf32>
    %156 = arith.maximumf %154, %155 : vector<16x1xf32>
    %157 = vector.extract_strided_slice %121 {offsets = [288, 0], sizes = [16, 1], strides = [1, 1]} : vector<384x1xf32> to vector<16x1xf32>
    %158 = arith.maximumf %156, %157 : vector<16x1xf32>
    %159 = vector.extract_strided_slice %121 {offsets = [304, 0], sizes = [16, 1], strides = [1, 1]} : vector<384x1xf32> to vector<16x1xf32>
    %160 = arith.maximumf %158, %159 : vector<16x1xf32>
    %161 = vector.extract_strided_slice %121 {offsets = [320, 0], sizes = [16, 1], strides = [1, 1]} : vector<384x1xf32> to vector<16x1xf32>
    %162 = arith.maximumf %160, %161 : vector<16x1xf32>
    %163 = vector.extract_strided_slice %121 {offsets = [336, 0], sizes = [16, 1], strides = [1, 1]} : vector<384x1xf32> to vector<16x1xf32>
    %164 = arith.maximumf %162, %163 : vector<16x1xf32>
    %165 = vector.extract_strided_slice %121 {offsets = [352, 0], sizes = [16, 1], strides = [1, 1]} : vector<384x1xf32> to vector<16x1xf32>
    %166 = arith.maximumf %164, %165 : vector<16x1xf32>
    %167 = vector.extract_strided_slice %121 {offsets = [368, 0], sizes = [16, 1], strides = [1, 1]} : vector<384x1xf32> to vector<16x1xf32>
    %168 = arith.maximumf %166, %167 : vector<16x1xf32>
    %cst_95 = arith.constant 0.000000e+00 : f32
    %169 = vector.broadcast %cst_95 : f32 to vector<16x1xf32>
    %cst_96 = arith.constant 0.000000e+00 : f32
    %170 = vector.broadcast %cst_96 : f32 to vector<16x32xf32>
    %171 = vector.extract_strided_slice %121 {offsets = [0, 0], sizes = [16, 1], strides = [1, 1]} : vector<384x1xf32> to vector<16x1xf32>
    %172 = arith.subf %171, %168 : vector<16x1xf32>
    %173 = math.exp %172 : vector<16x1xf32>
    %174 = arith.addf %169, %173 : vector<16x1xf32>
    %175 = vector.extract_strided_slice %110 {offsets = [0, 0], sizes = [16, 32], strides = [1, 1]} : vector<384x32xf32> to vector<16x32xf32>
    %176 = vector.broadcast %173 : vector<16x1xf32> to vector<16x32xf32>
    %177 = arith.mulf %176, %175 : vector<16x32xf32>
    %178 = arith.addf %170, %177 : vector<16x32xf32>
    %179 = vector.extract_strided_slice %121 {offsets = [16, 0], sizes = [16, 1], strides = [1, 1]} : vector<384x1xf32> to vector<16x1xf32>
    %180 = arith.subf %179, %168 : vector<16x1xf32>
    %181 = math.exp %180 : vector<16x1xf32>
    %182 = arith.addf %174, %181 : vector<16x1xf32>
    %183 = vector.extract_strided_slice %110 {offsets = [16, 0], sizes = [16, 32], strides = [1, 1]} : vector<384x32xf32> to vector<16x32xf32>
    %184 = vector.broadcast %181 : vector<16x1xf32> to vector<16x32xf32>
    %185 = arith.mulf %184, %183 : vector<16x32xf32>
    %186 = arith.addf %178, %185 : vector<16x32xf32>
    %187 = vector.extract_strided_slice %121 {offsets = [32, 0], sizes = [16, 1], strides = [1, 1]} : vector<384x1xf32> to vector<16x1xf32>
    %188 = arith.subf %187, %168 : vector<16x1xf32>
    %189 = math.exp %188 : vector<16x1xf32>
    %190 = arith.addf %182, %189 : vector<16x1xf32>
    %191 = vector.extract_strided_slice %110 {offsets = [32, 0], sizes = [16, 32], strides = [1, 1]} : vector<384x32xf32> to vector<16x32xf32>
    %192 = vector.broadcast %189 : vector<16x1xf32> to vector<16x32xf32>
    %193 = arith.mulf %192, %191 : vector<16x32xf32>
    %194 = arith.addf %186, %193 : vector<16x32xf32>
    %195 = vector.extract_strided_slice %121 {offsets = [48, 0], sizes = [16, 1], strides = [1, 1]} : vector<384x1xf32> to vector<16x1xf32>
    %196 = arith.subf %195, %168 : vector<16x1xf32>
    %197 = math.exp %196 : vector<16x1xf32>
    %198 = arith.addf %190, %197 : vector<16x1xf32>
    %199 = vector.extract_strided_slice %110 {offsets = [48, 0], sizes = [16, 32], strides = [1, 1]} : vector<384x32xf32> to vector<16x32xf32>
    %200 = vector.broadcast %197 : vector<16x1xf32> to vector<16x32xf32>
    %201 = arith.mulf %200, %199 : vector<16x32xf32>
    %202 = arith.addf %194, %201 : vector<16x32xf32>
    %203 = vector.extract_strided_slice %121 {offsets = [64, 0], sizes = [16, 1], strides = [1, 1]} : vector<384x1xf32> to vector<16x1xf32>
    %204 = arith.subf %203, %168 : vector<16x1xf32>
    %205 = math.exp %204 : vector<16x1xf32>
    %206 = arith.addf %198, %205 : vector<16x1xf32>
    %207 = vector.extract_strided_slice %110 {offsets = [64, 0], sizes = [16, 32], strides = [1, 1]} : vector<384x32xf32> to vector<16x32xf32>
    %208 = vector.broadcast %205 : vector<16x1xf32> to vector<16x32xf32>
    %209 = arith.mulf %208, %207 : vector<16x32xf32>
    %210 = arith.addf %202, %209 : vector<16x32xf32>
    %211 = vector.extract_strided_slice %121 {offsets = [80, 0], sizes = [16, 1], strides = [1, 1]} : vector<384x1xf32> to vector<16x1xf32>
    %212 = arith.subf %211, %168 : vector<16x1xf32>
    %213 = math.exp %212 : vector<16x1xf32>
    %214 = arith.addf %206, %213 : vector<16x1xf32>
    %215 = vector.extract_strided_slice %110 {offsets = [80, 0], sizes = [16, 32], strides = [1, 1]} : vector<384x32xf32> to vector<16x32xf32>
    %216 = vector.broadcast %213 : vector<16x1xf32> to vector<16x32xf32>
    %217 = arith.mulf %216, %215 : vector<16x32xf32>
    %218 = arith.addf %210, %217 : vector<16x32xf32>
    %219 = vector.extract_strided_slice %121 {offsets = [96, 0], sizes = [16, 1], strides = [1, 1]} : vector<384x1xf32> to vector<16x1xf32>
    %220 = arith.subf %219, %168 : vector<16x1xf32>
    %221 = math.exp %220 : vector<16x1xf32>
    %222 = arith.addf %214, %221 : vector<16x1xf32>
    %223 = vector.extract_strided_slice %110 {offsets = [96, 0], sizes = [16, 32], strides = [1, 1]} : vector<384x32xf32> to vector<16x32xf32>
    %224 = vector.broadcast %221 : vector<16x1xf32> to vector<16x32xf32>
    %225 = arith.mulf %224, %223 : vector<16x32xf32>
    %226 = arith.addf %218, %225 : vector<16x32xf32>
    %227 = vector.extract_strided_slice %121 {offsets = [112, 0], sizes = [16, 1], strides = [1, 1]} : vector<384x1xf32> to vector<16x1xf32>
    %228 = arith.subf %227, %168 : vector<16x1xf32>
    %229 = math.exp %228 : vector<16x1xf32>
    %230 = arith.addf %222, %229 : vector<16x1xf32>
    %231 = vector.extract_strided_slice %110 {offsets = [112, 0], sizes = [16, 32], strides = [1, 1]} : vector<384x32xf32> to vector<16x32xf32>
    %232 = vector.broadcast %229 : vector<16x1xf32> to vector<16x32xf32>
    %233 = arith.mulf %232, %231 : vector<16x32xf32>
    %234 = arith.addf %226, %233 : vector<16x32xf32>
    %235 = vector.extract_strided_slice %121 {offsets = [128, 0], sizes = [16, 1], strides = [1, 1]} : vector<384x1xf32> to vector<16x1xf32>
    %236 = arith.subf %235, %168 : vector<16x1xf32>
    %237 = math.exp %236 : vector<16x1xf32>
    %238 = arith.addf %230, %237 : vector<16x1xf32>
    %239 = vector.extract_strided_slice %110 {offsets = [128, 0], sizes = [16, 32], strides = [1, 1]} : vector<384x32xf32> to vector<16x32xf32>
    %240 = vector.broadcast %237 : vector<16x1xf32> to vector<16x32xf32>
    %241 = arith.mulf %240, %239 : vector<16x32xf32>
    %242 = arith.addf %234, %241 : vector<16x32xf32>
    %243 = vector.extract_strided_slice %121 {offsets = [144, 0], sizes = [16, 1], strides = [1, 1]} : vector<384x1xf32> to vector<16x1xf32>
    %244 = arith.subf %243, %168 : vector<16x1xf32>
    %245 = math.exp %244 : vector<16x1xf32>
    %246 = arith.addf %238, %245 : vector<16x1xf32>
    %247 = vector.extract_strided_slice %110 {offsets = [144, 0], sizes = [16, 32], strides = [1, 1]} : vector<384x32xf32> to vector<16x32xf32>
    %248 = vector.broadcast %245 : vector<16x1xf32> to vector<16x32xf32>
    %249 = arith.mulf %248, %247 : vector<16x32xf32>
    %250 = arith.addf %242, %249 : vector<16x32xf32>
    %251 = vector.extract_strided_slice %121 {offsets = [160, 0], sizes = [16, 1], strides = [1, 1]} : vector<384x1xf32> to vector<16x1xf32>
    %252 = arith.subf %251, %168 : vector<16x1xf32>
    %253 = math.exp %252 : vector<16x1xf32>
    %254 = arith.addf %246, %253 : vector<16x1xf32>
    %255 = vector.extract_strided_slice %110 {offsets = [160, 0], sizes = [16, 32], strides = [1, 1]} : vector<384x32xf32> to vector<16x32xf32>
    %256 = vector.broadcast %253 : vector<16x1xf32> to vector<16x32xf32>
    %257 = arith.mulf %256, %255 : vector<16x32xf32>
    %258 = arith.addf %250, %257 : vector<16x32xf32>
    %259 = vector.extract_strided_slice %121 {offsets = [176, 0], sizes = [16, 1], strides = [1, 1]} : vector<384x1xf32> to vector<16x1xf32>
    %260 = arith.subf %259, %168 : vector<16x1xf32>
    %261 = math.exp %260 : vector<16x1xf32>
    %262 = arith.addf %254, %261 : vector<16x1xf32>
    %263 = vector.extract_strided_slice %110 {offsets = [176, 0], sizes = [16, 32], strides = [1, 1]} : vector<384x32xf32> to vector<16x32xf32>
    %264 = vector.broadcast %261 : vector<16x1xf32> to vector<16x32xf32>
    %265 = arith.mulf %264, %263 : vector<16x32xf32>
    %266 = arith.addf %258, %265 : vector<16x32xf32>
    %267 = vector.extract_strided_slice %121 {offsets = [192, 0], sizes = [16, 1], strides = [1, 1]} : vector<384x1xf32> to vector<16x1xf32>
    %268 = arith.subf %267, %168 : vector<16x1xf32>
    %269 = math.exp %268 : vector<16x1xf32>
    %270 = arith.addf %262, %269 : vector<16x1xf32>
    %271 = vector.extract_strided_slice %110 {offsets = [192, 0], sizes = [16, 32], strides = [1, 1]} : vector<384x32xf32> to vector<16x32xf32>
    %272 = vector.broadcast %269 : vector<16x1xf32> to vector<16x32xf32>
    %273 = arith.mulf %272, %271 : vector<16x32xf32>
    %274 = arith.addf %266, %273 : vector<16x32xf32>
    %275 = vector.extract_strided_slice %121 {offsets = [208, 0], sizes = [16, 1], strides = [1, 1]} : vector<384x1xf32> to vector<16x1xf32>
    %276 = arith.subf %275, %168 : vector<16x1xf32>
    %277 = math.exp %276 : vector<16x1xf32>
    %278 = arith.addf %270, %277 : vector<16x1xf32>
    %279 = vector.extract_strided_slice %110 {offsets = [208, 0], sizes = [16, 32], strides = [1, 1]} : vector<384x32xf32> to vector<16x32xf32>
    %280 = vector.broadcast %277 : vector<16x1xf32> to vector<16x32xf32>
    %281 = arith.mulf %280, %279 : vector<16x32xf32>
    %282 = arith.addf %274, %281 : vector<16x32xf32>
    %283 = vector.extract_strided_slice %121 {offsets = [224, 0], sizes = [16, 1], strides = [1, 1]} : vector<384x1xf32> to vector<16x1xf32>
    %284 = arith.subf %283, %168 : vector<16x1xf32>
    %285 = math.exp %284 : vector<16x1xf32>
    %286 = arith.addf %278, %285 : vector<16x1xf32>
    %287 = vector.extract_strided_slice %110 {offsets = [224, 0], sizes = [16, 32], strides = [1, 1]} : vector<384x32xf32> to vector<16x32xf32>
    %288 = vector.broadcast %285 : vector<16x1xf32> to vector<16x32xf32>
    %289 = arith.mulf %288, %287 : vector<16x32xf32>
    %290 = arith.addf %282, %289 : vector<16x32xf32>
    %291 = vector.extract_strided_slice %121 {offsets = [240, 0], sizes = [16, 1], strides = [1, 1]} : vector<384x1xf32> to vector<16x1xf32>
    %292 = arith.subf %291, %168 : vector<16x1xf32>
    %293 = math.exp %292 : vector<16x1xf32>
    %294 = arith.addf %286, %293 : vector<16x1xf32>
    %295 = vector.extract_strided_slice %110 {offsets = [240, 0], sizes = [16, 32], strides = [1, 1]} : vector<384x32xf32> to vector<16x32xf32>
    %296 = vector.broadcast %293 : vector<16x1xf32> to vector<16x32xf32>
    %297 = arith.mulf %296, %295 : vector<16x32xf32>
    %298 = arith.addf %290, %297 : vector<16x32xf32>
    %299 = vector.extract_strided_slice %121 {offsets = [256, 0], sizes = [16, 1], strides = [1, 1]} : vector<384x1xf32> to vector<16x1xf32>
    %300 = arith.subf %299, %168 : vector<16x1xf32>
    %301 = math.exp %300 : vector<16x1xf32>
    %302 = arith.addf %294, %301 : vector<16x1xf32>
    %303 = vector.extract_strided_slice %110 {offsets = [256, 0], sizes = [16, 32], strides = [1, 1]} : vector<384x32xf32> to vector<16x32xf32>
    %304 = vector.broadcast %301 : vector<16x1xf32> to vector<16x32xf32>
    %305 = arith.mulf %304, %303 : vector<16x32xf32>
    %306 = arith.addf %298, %305 : vector<16x32xf32>
    %307 = vector.extract_strided_slice %121 {offsets = [272, 0], sizes = [16, 1], strides = [1, 1]} : vector<384x1xf32> to vector<16x1xf32>
    %308 = arith.subf %307, %168 : vector<16x1xf32>
    %309 = math.exp %308 : vector<16x1xf32>
    %310 = arith.addf %302, %309 : vector<16x1xf32>
    %311 = vector.extract_strided_slice %110 {offsets = [272, 0], sizes = [16, 32], strides = [1, 1]} : vector<384x32xf32> to vector<16x32xf32>
    %312 = vector.broadcast %309 : vector<16x1xf32> to vector<16x32xf32>
    %313 = arith.mulf %312, %311 : vector<16x32xf32>
    %314 = arith.addf %306, %313 : vector<16x32xf32>
    %315 = vector.extract_strided_slice %121 {offsets = [288, 0], sizes = [16, 1], strides = [1, 1]} : vector<384x1xf32> to vector<16x1xf32>
    %316 = arith.subf %315, %168 : vector<16x1xf32>
    %317 = math.exp %316 : vector<16x1xf32>
    %318 = arith.addf %310, %317 : vector<16x1xf32>
    %319 = vector.extract_strided_slice %110 {offsets = [288, 0], sizes = [16, 32], strides = [1, 1]} : vector<384x32xf32> to vector<16x32xf32>
    %320 = vector.broadcast %317 : vector<16x1xf32> to vector<16x32xf32>
    %321 = arith.mulf %320, %319 : vector<16x32xf32>
    %322 = arith.addf %314, %321 : vector<16x32xf32>
    %323 = vector.extract_strided_slice %121 {offsets = [304, 0], sizes = [16, 1], strides = [1, 1]} : vector<384x1xf32> to vector<16x1xf32>
    %324 = arith.subf %323, %168 : vector<16x1xf32>
    %325 = math.exp %324 : vector<16x1xf32>
    %326 = arith.addf %318, %325 : vector<16x1xf32>
    %327 = vector.extract_strided_slice %110 {offsets = [304, 0], sizes = [16, 32], strides = [1, 1]} : vector<384x32xf32> to vector<16x32xf32>
    %328 = vector.broadcast %325 : vector<16x1xf32> to vector<16x32xf32>
    %329 = arith.mulf %328, %327 : vector<16x32xf32>
    %330 = arith.addf %322, %329 : vector<16x32xf32>
    %331 = vector.extract_strided_slice %121 {offsets = [320, 0], sizes = [16, 1], strides = [1, 1]} : vector<384x1xf32> to vector<16x1xf32>
    %332 = arith.subf %331, %168 : vector<16x1xf32>
    %333 = math.exp %332 : vector<16x1xf32>
    %334 = arith.addf %326, %333 : vector<16x1xf32>
    %335 = vector.extract_strided_slice %110 {offsets = [320, 0], sizes = [16, 32], strides = [1, 1]} : vector<384x32xf32> to vector<16x32xf32>
    %336 = vector.broadcast %333 : vector<16x1xf32> to vector<16x32xf32>
    %337 = arith.mulf %336, %335 : vector<16x32xf32>
    %338 = arith.addf %330, %337 : vector<16x32xf32>
    %339 = vector.extract_strided_slice %121 {offsets = [336, 0], sizes = [16, 1], strides = [1, 1]} : vector<384x1xf32> to vector<16x1xf32>
    %340 = arith.subf %339, %168 : vector<16x1xf32>
    %341 = math.exp %340 : vector<16x1xf32>
    %342 = arith.addf %334, %341 : vector<16x1xf32>
    %343 = vector.extract_strided_slice %110 {offsets = [336, 0], sizes = [16, 32], strides = [1, 1]} : vector<384x32xf32> to vector<16x32xf32>
    %344 = vector.broadcast %341 : vector<16x1xf32> to vector<16x32xf32>
    %345 = arith.mulf %344, %343 : vector<16x32xf32>
    %346 = arith.addf %338, %345 : vector<16x32xf32>
    %347 = vector.extract_strided_slice %121 {offsets = [352, 0], sizes = [16, 1], strides = [1, 1]} : vector<384x1xf32> to vector<16x1xf32>
    %348 = arith.subf %347, %168 : vector<16x1xf32>
    %349 = math.exp %348 : vector<16x1xf32>
    %350 = arith.addf %342, %349 : vector<16x1xf32>
    %351 = vector.extract_strided_slice %110 {offsets = [352, 0], sizes = [16, 32], strides = [1, 1]} : vector<384x32xf32> to vector<16x32xf32>
    %352 = vector.broadcast %349 : vector<16x1xf32> to vector<16x32xf32>
    %353 = arith.mulf %352, %351 : vector<16x32xf32>
    %354 = arith.addf %346, %353 : vector<16x32xf32>
    %355 = vector.extract_strided_slice %121 {offsets = [368, 0], sizes = [16, 1], strides = [1, 1]} : vector<384x1xf32> to vector<16x1xf32>
    %356 = arith.subf %355, %168 : vector<16x1xf32>
    %357 = math.exp %356 : vector<16x1xf32>
    %358 = arith.addf %350, %357 : vector<16x1xf32>
    %359 = vector.extract_strided_slice %110 {offsets = [368, 0], sizes = [16, 32], strides = [1, 1]} : vector<384x32xf32> to vector<16x32xf32>
    %360 = vector.broadcast %357 : vector<16x1xf32> to vector<16x32xf32>
    %361 = arith.mulf %360, %359 : vector<16x32xf32>
    %362 = arith.addf %354, %361 : vector<16x32xf32>
    %363 = vector.broadcast %358 : vector<16x1xf32> to vector<16x32xf32>
    %364 = arith.divf %362, %363 : vector<16x32xf32>
    %c0_97 = arith.constant 0 : index
    %c0_98 = arith.constant 0 : index
    %365 = vector.load %arg22[%c0_97, %c0_98] : memref<32x64xf32, #tpu.memory_space<vmem>>, vector<32x64xf32>
    %cst_99 = arith.constant dense<0.000000e+00> : vector<16x64xf32>
    %366 = tpu.matmul %364, %365, %cst_99 {dimension_numbers = #tpu.dot_dimension_numbers<[1], [0], [0], [1], [0, 0, 1, 1], [], []>} : vector<16x32xf32>, vector<32x64xf32>, vector<16x64xf32> -> vector<16x64xf32>
    %c0_100 = arith.constant 0 : index
    %c0_101 = arith.constant 0 : index
    %367 = vector.load %arg23[%c0_100, %c0_101] : memref<1x64xf32, #tpu.memory_space<vmem>>, vector<1x64xf32>
    %368 = vector.broadcast %367 : vector<1x64xf32> to vector<16x64xf32>
    %369 = arith.addf %366, %368 : vector<16x64xf32>
    %cst_102 = arith.constant 0.000000e+00 : f32
    %370 = vector.broadcast %cst_102 : f32 to vector<16x64xf32>
    %371 = arith.maximumf %369, %370 : vector<16x64xf32>
    %c0_103 = arith.constant 0 : index
    %c0_104 = arith.constant 0 : index
    %372 = vector.load %arg24[%c0_103, %c0_104] : memref<64x32xf32, #tpu.memory_space<vmem>>, vector<64x32xf32>
    %cst_105 = arith.constant dense<0.000000e+00> : vector<16x32xf32>
    %373 = tpu.matmul %371, %372, %cst_105 {dimension_numbers = #tpu.dot_dimension_numbers<[1], [0], [0], [1], [0, 0, 1, 1], [], []>} : vector<16x64xf32>, vector<64x32xf32>, vector<16x32xf32> -> vector<16x32xf32>
    %c0_106 = arith.constant 0 : index
    %c0_107 = arith.constant 0 : index
    %374 = vector.load %arg25[%c0_106, %c0_107] : memref<1x32xf32, #tpu.memory_space<vmem>>, vector<1x32xf32>
    %375 = vector.broadcast %374 : vector<1x32xf32> to vector<16x32xf32>
    %376 = arith.addf %373, %375 : vector<16x32xf32>
    %cst_108 = arith.constant 0.000000e+00 : f32
    %377 = vector.broadcast %cst_108 : f32 to vector<16x32xf32>
    %378 = arith.maximumf %376, %377 : vector<16x32xf32>
    %c0_109 = arith.constant 0 : index
    %c0_110 = arith.constant 0 : index
    %379 = vector.load %arg26[%c0_109, %c0_110] : memref<32x9xf32, #tpu.memory_space<vmem>>, vector<32x9xf32>
    %cst_111 = arith.constant dense<0.000000e+00> : vector<16x9xf32>
    %380 = tpu.matmul %378, %379, %cst_111 {dimension_numbers = #tpu.dot_dimension_numbers<[1], [0], [0], [1], [0, 0, 1, 1], [], []>} : vector<16x32xf32>, vector<32x9xf32>, vector<16x9xf32> -> vector<16x9xf32>
    %c0_112 = arith.constant 0 : index
    %c0_113 = arith.constant 0 : index
    %381 = vector.load %arg27[%c0_112, %c0_113] : memref<1x9xf32, #tpu.memory_space<vmem>>, vector<1x9xf32>
    %382 = vector.broadcast %381 : vector<1x9xf32> to vector<16x9xf32>
    %383 = arith.addf %380, %382 : vector<16x9xf32>
    %c0_114 = arith.constant 0 : index
    %c0_115 = arith.constant 0 : index
    %c0_116 = arith.constant 0 : index
    %384 = vector.load %arg28[%c0_114, %c0_115, %c0_116] : memref<1x16x9xf32, #tpu.memory_space<vmem>>, vector<1x16x9xf32>
    %385 = vector.shape_cast %384 : vector<1x16x9xf32> to vector<16x9xf32>
    %386 = vector.shape_cast %383 : vector<16x9xf32> to vector<1x16x9xf32>
    tpu.vector_store %arg28[%c0_114, %c0_115, %c0_116], %386 {strides = array<i32>} : memref<1x16x9xf32, #tpu.memory_space<vmem>>, vector<1x16x9xf32>,
    return
  }
  func.func @transform_0(%arg0: i32) -> (i32, i32, i32) {
    %c0_i32 = arith.constant 0 : i32
    %c0_i32_0 = arith.constant 0 : i32
    %c0_i32_1 = arith.constant 0 : i32
    return %arg0, %c0_i32, %c0_i32_0 : i32, i32, i32
  }
  func.func @transform_1(%arg0: i32) -> (i32, i32, i32) {
    %c0_i32 = arith.constant 0 : i32
    %c0_i32_0 = arith.constant 0 : i32
    %c0_i32_1 = arith.constant 0 : i32
    %c0_i32_2 = arith.constant 0 : i32
    return %c0_i32, %c0_i32_0, %c0_i32_1 : i32, i32, i32
  }
  func.func @transform_2(%arg0: i32) -> (i32, i32) {
    %c0_i32 = arith.constant 0 : i32
    %c0_i32_0 = arith.constant 0 : i32
    %c0_i32_1 = arith.constant 0 : i32
    return %c0_i32, %c0_i32_0 : i32, i32
  }
  func.func @transform_3(%arg0: i32) -> (i32, i32, i32) {
    %c0_i32 = arith.constant 0 : i32
    %c0_i32_0 = arith.constant 0 : i32
    %c0_i32_1 = arith.constant 0 : i32
    %c0_i32_2 = arith.constant 0 : i32
    return %c0_i32, %c0_i32_0, %c0_i32_1 : i32, i32, i32
  }
  func.func @transform_4(%arg0: i32) -> (i32, i32) {
    %c0_i32 = arith.constant 0 : i32
    %c0_i32_0 = arith.constant 0 : i32
    %c0_i32_1 = arith.constant 0 : i32
    return %c0_i32, %c0_i32_0 : i32, i32
  }
  func.func @transform_5(%arg0: i32) -> (i32, i32) {
    %c0_i32 = arith.constant 0 : i32
    %c0_i32_0 = arith.constant 0 : i32
    %c0_i32_1 = arith.constant 0 : i32
    return %c0_i32, %c0_i32_0 : i32, i32
  }
  func.func @transform_6(%arg0: i32) -> (i32, i32) {
    %c0_i32 = arith.constant 0 : i32
    %c0_i32_0 = arith.constant 0 : i32
    %c0_i32_1 = arith.constant 0 : i32
    return %c0_i32, %c0_i32_0 : i32, i32
  }
  func.func @transform_7(%arg0: i32) -> (i32, i32, i32) {
    %c0_i32 = arith.constant 0 : i32
    %c0_i32_0 = arith.constant 0 : i32
    %c0_i32_1 = arith.constant 0 : i32
    %c0_i32_2 = arith.constant 0 : i32
    return %c0_i32, %c0_i32_0, %c0_i32_1 : i32, i32, i32
  }
  func.func @transform_8(%arg0: i32) -> (i32, i32) {
    %c0_i32 = arith.constant 0 : i32
    %c0_i32_0 = arith.constant 0 : i32
    %c0_i32_1 = arith.constant 0 : i32
    return %c0_i32, %c0_i32_0 : i32, i32
  }
  func.func @transform_9(%arg0: i32) -> (i32, i32, i32) {
    %c0_i32 = arith.constant 0 : i32
    %c0_i32_0 = arith.constant 0 : i32
    %c0_i32_1 = arith.constant 0 : i32
    %c0_i32_2 = arith.constant 0 : i32
    return %c0_i32, %c0_i32_0, %c0_i32_1 : i32, i32, i32
  }
  func.func @transform_10(%arg0: i32) -> (i32, i32) {
    %c0_i32 = arith.constant 0 : i32
    %c0_i32_0 = arith.constant 0 : i32
    %c0_i32_1 = arith.constant 0 : i32
    return %c0_i32, %c0_i32_0 : i32, i32
  }
  func.func @transform_11(%arg0: i32) -> (i32, i32, i32) {
    %c0_i32 = arith.constant 0 : i32
    %c0_i32_0 = arith.constant 0 : i32
    %c0_i32_1 = arith.constant 0 : i32
    %c0_i32_2 = arith.constant 0 : i32
    return %c0_i32, %c0_i32_0, %c0_i32_1 : i32, i32, i32
  }
  func.func @transform_12(%arg0: i32) -> (i32, i32) {
    %c0_i32 = arith.constant 0 : i32
    %c0_i32_0 = arith.constant 0 : i32
    %c0_i32_1 = arith.constant 0 : i32
    return %c0_i32, %c0_i32_0 : i32, i32
  }
  func.func @transform_13(%arg0: i32) -> (i32, i32, i32) {
    %c0_i32 = arith.constant 0 : i32
    %c0_i32_0 = arith.constant 0 : i32
    %c0_i32_1 = arith.constant 0 : i32
    %c0_i32_2 = arith.constant 0 : i32
    return %c0_i32, %c0_i32_0, %c0_i32_1 : i32, i32, i32
  }
  func.func @transform_14(%arg0: i32) -> (i32, i32) {
    %c0_i32 = arith.constant 0 : i32
    %c0_i32_0 = arith.constant 0 : i32
    %c0_i32_1 = arith.constant 0 : i32
    return %c0_i32, %c0_i32_0 : i32, i32
  }
  func.func @transform_15(%arg0: i32) -> (i32, i32) {
    %c0_i32 = arith.constant 0 : i32
    %c0_i32_0 = arith.constant 0 : i32
    %c0_i32_1 = arith.constant 0 : i32
    return %c0_i32, %c0_i32_0 : i32, i32
  }
  func.func @transform_16(%arg0: i32) -> (i32, i32) {
    %c0_i32 = arith.constant 0 : i32
    %c0_i32_0 = arith.constant 0 : i32
    %c0_i32_1 = arith.constant 0 : i32
    return %c0_i32, %c0_i32_0 : i32, i32
  }
  func.func @transform_17(%arg0: i32) -> (i32, i32) {
    %c0_i32 = arith.constant 0 : i32
    %c0_i32_0 = arith.constant 0 : i32
    %c0_i32_1 = arith.constant 0 : i32
    return %c0_i32, %c0_i32_0 : i32, i32
  }
  func.func @transform_18(%arg0: i32) -> (i32, i32) {
    %c0_i32 = arith.constant 0 : i32
    %c0_i32_0 = arith.constant 0 : i32
    %c0_i32_1 = arith.constant 0 : i32
    return %c0_i32, %c0_i32_0 : i32, i32
  }
  func.func @transform_19(%arg0: i32) -> (i32, i32) {
    %c0_i32 = arith.constant 0 : i32
    %c0_i32_0 = arith.constant 0 : i32
    %c0_i32_1 = arith.constant 0 : i32
    return %c0_i32, %c0_i32_0 : i32, i32
  }
  func.func @transform_20(%arg0: i32) -> (i32, i32) {
    %c0_i32 = arith.constant 0 : i32
    %c0_i32_0 = arith.constant 0 : i32
    %c0_i32_1 = arith.constant 0 : i32
    return %c0_i32, %c0_i32_0 : i32, i32
  }
  func.func @transform_21(%arg0: i32) -> (i32, i32) {
    %c0_i32 = arith.constant 0 : i32
    %c0_i32_0 = arith.constant 0 : i32
    %c0_i32_1 = arith.constant 0 : i32
    return %c0_i32, %c0_i32_0 : i32, i32
  }
  func.func @transform_22(%arg0: i32) -> (i32, i32) {
    %c0_i32 = arith.constant 0 : i32
    %c0_i32_0 = arith.constant 0 : i32
    %c0_i32_1 = arith.constant 0 : i32
    return %c0_i32, %c0_i32_0 : i32, i32
  }
  func.func @transform_23(%arg0: i32) -> (i32, i32) {
    %c0_i32 = arith.constant 0 : i32
    %c0_i32_0 = arith.constant 0 : i32
    %c0_i32_1 = arith.constant 0 : i32
    return %c0_i32, %c0_i32_0 : i32, i32
  }
  func.func @transform_24(%arg0: i32) -> (i32, i32) {
    %c0_i32 = arith.constant 0 : i32
    %c0_i32_0 = arith.constant 0 : i32
    %c0_i32_1 = arith.constant 0 : i32
    return %c0_i32, %c0_i32_0 : i32, i32
  }
  func.func @transform_25(%arg0: i32) -> (i32, i32) {
    %c0_i32 = arith.constant 0 : i32
    %c0_i32_0 = arith.constant 0 : i32
    %c0_i32_1 = arith.constant 0 : i32
    return %c0_i32, %c0_i32_0 : i32, i32
  }
  func.func @transform_26(%arg0: i32) -> (i32, i32) {
    %c0_i32 = arith.constant 0 : i32
    %c0_i32_0 = arith.constant 0 : i32
    %c0_i32_1 = arith.constant 0 : i32
    return %c0_i32, %c0_i32_0 : i32, i32
  }
  func.func @transform_27(%arg0: i32) -> (i32, i32, i32) {
    %c0_i32 = arith.constant 0 : i32
    %c0_i32_0 = arith.constant 0 : i32
    %c0_i32_1 = arith.constant 0 : i32
    return %arg0, %c0_i32, %c0_i32_0 : i32, i32, i32
  }
}

</mosaic_0001>

<bundles_post_ra>
// kernel: _lambda_.1
= control target key start
LH: loop header
LB: loop body
LE: loop exit
PB: predicated region body
PF: predicated region fallthrough
CT: control target
= control target key end

     0   :  { %s11789_s0 = inlined_call_operand.vmem [shape: f32[2,384,8], index: 0, kind: input, shape index: {}]   ;;  %s11790_s1 = inlined_call_operand.vmem [shape: f32[2,8,16], index: 1, kind: input, shape index: {}]   ;;  %s11791_s2 = inlined_call_operand.vmem [shape: f32[1,16], index: 2, kind: input, shape index: {}]   ;;  %s11792_s3 = inlined_call_operand.vmem [shape: f32[2,16,16], index: 3, kind: input, shape index: {}]   ;;  %s11793_s4 = inlined_call_operand.vmem [shape: f32[1,16], index: 4, kind: input, shape index: {}]   ;;  %s11794_s5 = inlined_call_operand.vmem [shape: f32[8,16], index: 5, kind: input, shape index: {}]   ;;  %s11795_s6 = inlined_call_operand.vmem [shape: f32[1,16], index: 6, kind: input, shape index: {}]   ;;  %s11796_s7 = inlined_call_operand.vmem [shape: f32[2,16,16], index: 7, kind: input, shape index: {}]   ;;  %s11797_s8 = inlined_call_operand.vmem [shape: f32[1,16], index: 8, kind: input, shape index: {}]   ;;  %s11798_s9 = inlined_call_operand.vmem [shape: f32[2,16,16], index: 9, kind: input, shape index: {}]   ;;  %s11799_s10 = inlined_call_operand.vmem [shape: f32[1,16], index: 10, kind: input, shape index: {}]   ;;  %s11800_s11 = inlined_call_operand.vmem [shape: f32[2,16,32], index: 11, kind: input, shape index: {}]   ;;  %s11801_s12 = inlined_call_operand.vmem [shape: f32[1,32], index: 12, kind: input, shape index: {}]   ;;  %s11802_s13 = inlined_call_operand.vmem [shape: f32[2,32,32], index: 13, kind: input, shape index: {}]   ;;  %s11803_s14 = inlined_call_operand.vmem [shape: f32[1,32], index: 14, kind: input, shape index: {}]   ;;  %s11804_s15 = inlined_call_operand.vmem [shape: f32[16,32], index: 15, kind: input, shape index: {}]   ;;  %s11805_s16 = inlined_call_operand.vmem [shape: f32[1,32], index: 16, kind: input, shape index: {}]   ;;  %s11806_s17 = inlined_call_operand.vmem [shape: f32[32,64], index: 17, kind: input, shape index: {}]   ;;  %s11807_s18 = inlined_call_operand.vmem [shape: f32[1,64], index: 18, kind: input, shape index: {}]   ;;  %s11808_s19 = inlined_call_operand.vmem [shape: f32[64,1], index: 19, kind: input, shape index: {}]   ;;  %s11809_s20 = inlined_call_operand.<no memory space> [shape: f32[1,1], index: 20, kind: input, shape index: {}]   ;;  %s11810_s21 = inlined_call_operand.vmem [shape: f32[32,64], index: 21, kind: input, shape index: {}]   ;;  %s11811_s22 = inlined_call_operand.vmem [shape: f32[1,64], index: 22, kind: input, shape index: {}]   ;;  %s11812_s23 = inlined_call_operand.vmem [shape: f32[64,32], index: 23, kind: input, shape index: {}]   ;;  %s11813_s24 = inlined_call_operand.vmem [shape: f32[1,32], index: 24, kind: input, shape index: {}]   ;;  %s11814_s25 = inlined_call_operand.vmem [shape: f32[32,9], index: 25, kind: input, shape index: {}]   ;;  %s11815_s26 = inlined_call_operand.vmem [shape: f32[1,9], index: 26, kind: input, shape index: {}]   ;;  %s11816_s27 = inlined_call_operand.vmem [shape: f32[2,16,9], index: 27, kind: output, shape index: {}]  }
   0x1   :  { %12059 = sst [smem:[#allocation74_spill]] %s11789_s0  ;;  %v32_v0 = vstv %s11809_s20 }
   0x2   :  { %12060 = sst [smem:[#allocation75_spill]] %s11790_s1  ;;  %33 = vst [vmem:[#allocation2] sm:$0x1] %v32_v0 }
   0x3   :  { %12061 = sst [smem:[#allocation76_spill]] %s11791_s2 }
   0x4   :  { %12062 = sst [smem:[#allocation77_spill]] %s11792_s3 }
   0x5   :  { %12063 = sst [smem:[#allocation78_spill]] %s11793_s4 }
   0x6   :  { %12064 = sst [smem:[#allocation79_spill]] %s11794_s5 }
   0x7   :  { %12065 = sst [smem:[#allocation80_spill]] %s11795_s6 }
   0x8   :  { %12066 = sst [smem:[#allocation81_spill]] %s11796_s7 }
   0x9   :  { %12067 = sst [smem:[#allocation82_spill]] %s11797_s8  ;;  %s7464_s8 = smov 0  }
   0xa   :  { %12068 = sst [smem:[#allocation83_spill]] %s11798_s9 }
   0xb   :  { %12069 = sst [smem:[#allocation84_spill]] %s11799_s10 }
   0xc   :  { %12070 = sst [smem:[#allocation85_spill]] %s11800_s11 }
   0xd LB: > { %s6307_s30 = sadd.s32 4294967295, %s7318_s8   ;;  %p6311_p0 = scmp.ge.s32.totalorder %s7318_s8, 1  ;;  %s7318_s8 = sphi %s7464_s8, %s39_s8  }
   0xe   : > { %p739_p1 = scmp.lt.s32.totalorder %s7318_s8, 3 }
  0x10   : > { %p740_p2 = pnand %p6311_p0, %p739_p1 }
  0x12   : > { %743 = sbr.rel (%p740_p2) target bundleno = 3007 (0xbbf), region = 128 }
  0x17   : > { %s12071_s28 = sld [smem:[#allocation75_spill]]  ;;  %p811_p3 = scmp.lt.s32.totalorder %s6307_s30, 1  ;;  %vm875_vm0 = vcmask 64512   ;;  %vm1440_vm1 = vcmask 130048   ;;  %vm4031_vm2 = vcmask 261120   ;;  %vm5210_vm3 = vcmask 523264  }
  0x18   : > { %s12072_s6 = sld [smem:[#allocation74_spill]]  ;;  %vm6249_vm12 = vcmask 72704  }
  0x19   : > { %s12586_s30 = smov (!%p811_p3, %s6307_s30), 1  ;;  %s12073_s7 = sld [smem:[#allocation77_spill]] }
  0x1a   : > { %s7080_s10 = smul.u32 384, %s12586_s30  ;;  %s12074_s0 = sld [smem:[#allocation76_spill]] }
  0x1b   : > { %s12110_s1 = sld [smem:[#allocation79_spill]] }
  0x1c   : > { %s12142_s2 = sld [smem:[#allocation81_spill]] }
  0x1d   : > { %v6315_v1 = vld [vmem:[%s12071_s28 + $0x8] sm:$0xff]  ;;  %v1181_v2 = vld [vmem:[%s12071_s28] sm:$0xff]  ;;  %s12146_s29 = sld [smem:[#allocation78_spill]] }
  0x1e   : > { %1035 = vmatpush.msra.mxu0 %v6315_v1  ;;  %7077 = vmatpush.msra.mxu1 %v1181_v2  ;;  %s7484_s11 = scalar_lea.vmem %s12072_s6, %s7080_s10  ;;  %s12147_s4 = sld [smem:[#allocation80_spill]] }
  0x1f   : > { %v7487_v3 = vld [vmem:[%s7484_s11] sm:$0xff]  ;;  %v7490_v4 = vld [vmem:[%s7484_s11 + $0x18] sm:$0xff]  ;;  %v7497_v5 = vld [vmem:[%s7484_s11 + $0x8] sm:$0xff]  ;;  %s12232_s6 = sld [smem:[#allocation85_spill]] }
  0x20   : > { %1197 = vmatpush.msrb.mxu0 %v1181_v2  ;;  %6367 = vmatmul.msk.f32.vlgmr.msra.gmra.mxu1 %vm875_vm0, %v7490_v4  ;;  %v7500_v6 = vld [vmem:[%s7484_s11 + $0x20] sm:$0xff]  ;;  %v7507_v7 = vld [vmem:[%s7484_s11 + $0x10] sm:$0xff]  ;;  %v7510_v8 = vld [vmem:[%s7484_s11 + $0x28] sm:$0xff]  ;;  %s12266_s9 = sld [smem:[#allocation82_spill]] }
  0x21   : > { %6316 = vmatmul.msk.f32.vlgmr.msra.gmra.mxu0 %vm875_vm0, %v7487_v3  ;;  %v7517_v9 = vld [vmem:[%s7484_s11 + $0x30] sm:$0xff]  ;;  %v7524_v10 = vld [vmem:[%s7484_s11 + $0x38] sm:$0xff]  ;;  %v7531_v11 = vld [vmem:[%s7484_s11 + $0x40] sm:$0xff] }
  0x22   : > { %v7538_v12 = vld [vmem:[%s7484_s11 + $0x48] sm:$0xff]  ;;  %v7545_v13 = vld [vmem:[%s7484_s11 + $0x50] sm:$0xff]  ;;  %v7552_v14 = vld [vmem:[%s7484_s11 + $0x58] sm:$0xff] }
  0x23   : > { %v7559_v15 = vld [vmem:[%s7484_s11 + $0x60] sm:$0xff]  ;;  %v7566_v16 = vld [vmem:[%s7484_s11 + $0x68] sm:$0xff]  ;;  %v7573_v17 = vld [vmem:[%s7484_s11 + $0x70] sm:$0xff] }
  0x24   : > { %v7580_v18 = vld [vmem:[%s7484_s11 + $0x78] sm:$0xff]  ;;  %v6410_v20 = vld [vmem:[%s12073_s7 + $0x10] sm:$0xff]  ;;  %v7593_v21 = vld [vmem:[%s7484_s11 + $0x80] sm:$0xff] }
  0x25   : > { %v6411_v19 = vld [vmem:[%s12073_s7 + $0x18] sm:$0xff]  ;;  %v7600_v22 = vld [vmem:[%s7484_s11 + $0x88] sm:$0xff]  ;;  %v7607_v23 = vld [vmem:[%s7484_s11 + $0x90] sm:$0xff] }
  0x26   : > { %1599 = vmatpush.msra.mxu2 %v6411_v19  ;;  %7078 = vmatpush.msra.mxu3 %v6411_v19  ;;  %v7616_v24 = vld [vmem:[%s12074_s0] ss:$0 sm:$0xff]  ;;  %v7621_v27 = vld [vmem:[%s7484_s11 + $0x98] sm:$0xff]  ;;  %v7655_v37 = vld [vmem:[%s7484_s11 + $0xa8] sm:$0xff] }
  0x27   : > { %v7637_v32 = vld [vmem:[%s7484_s11 + $0xa0] sm:$0xff]  ;;  %v7666_v40 = vld [vmem:[%s7484_s11 + $0xb0] sm:$0xff]  ;;  %v7677_v43 = vld [vmem:[%s7484_s11 + $0xb8] sm:$0xff] }
  0x28   : > { %6368 = vmatmul.msk.f32.gmra.mxu1 %vm875_vm0, %v7500_v6  ;;  %1600 = vmatpush.msra.mxu2 %v6410_v20  ;;  %v7688_v46 = vld [vmem:[%s7484_s11 + $0xc0] sm:$0xff]  ;;  %v7699_v49 = vld [vmem:[%s7484_s11 + $0xc8] sm:$0xff]  ;;  %v7710_v52 = vld [vmem:[%s7484_s11 + $0xd0] sm:$0xff] }
  0x29   : > { %6317 = vmatmul.msk.f32.gmra.mxu0 %vm875_vm0, %v7497_v5  ;;  %7079 = vmatpush.msra.mxu3 %v6410_v20  ;;  %12075 = vst [vmem:[#allocation3_spill] sm:$0xff] %v7710_v52  ;;  %v7721_v55 = vld [vmem:[%s7484_s11 + $0xd8] sm:$0xff]  ;;  %v7732_v58 = vld [vmem:[%s7484_s11 + $0xe0] sm:$0xff]  ;;  %v7743_v61 = vld [vmem:[%s7484_s11 + $0xe8] sm:$0xff] }
  0x2a   : > { %12076 = vst [vmem:[#allocation4_spill] sm:$0xff] %v7721_v55  ;;  %v7754_v0 = vld [vmem:[%s7484_s11 + $0xf0] sm:$0xff]  ;;  %v7765_v19 = vld [vmem:[%s7484_s11 + $0xf8] sm:$0xff] }
  0x2b   : > { %12077 = vst [vmem:[#allocation5_spill] sm:$0xff] %v7732_v58 }
  0x2c   : > { %12078 = vst [vmem:[#allocation6_spill] sm:$0xff] %v7743_v61 }
  0x2d   : > { %12080 = vst [vmem:[#allocation8_spill] sm:$0xff] %v7754_v0 }
  0x2e   : > { %12082 = vst [vmem:[#allocation10_spill] sm:$0xff] %v7765_v19 }
  0x30   : > { %6369 = vmatmul.msk.f32.gmra.mxu1 %vm875_vm0, %v7510_v8 }
  0x31   : > { %6318 = vmatmul.msk.f32.gmra.mxu0 %vm875_vm0, %v7507_v7 }
  0x38   : > { %6370 = vmatmul.msk.f32.gmra.mxu1 %vm875_vm0, %v7517_v9 }
  0x39   : > { %6319 = vmatmul.msk.f32.gmra.mxu0 %vm875_vm0, %v7490_v4 }
  0x40   : > { %6371 = vmatmul.msk.f32.gmra.mxu1 %vm875_vm0, %v7524_v10 }
  0x41   : > { %6320 = vmatmul.msk.f32.gmra.mxu0 %vm875_vm0, %v7500_v6 }
  0x48   : > { %6372 = vmatmul.msk.f32.gmra.mxu1 %vm875_vm0, %v7531_v11 }
  0x49   : > { %6321 = vmatmul.msk.f32.gmra.mxu0 %vm875_vm0, %v7510_v8 }
  0x50   : > { %6373 = vmatmul.msk.f32.gmra.mxu1 %vm875_vm0, %v7538_v12 }
  0x51   : > { %6322 = vmatmul.msk.f32.gmra.mxu0 %vm875_vm0, %v7517_v9 }
  0x58   : > { %6374 = vmatmul.msk.f32.gmra.mxu1 %vm875_vm0, %v7545_v13 }
  0x59   : > { %6323 = vmatmul.msk.f32.gmra.mxu0 %vm875_vm0, %v7524_v10 }
  0x60   : > { %6375 = vmatmul.msk.f32.gmra.mxu1 %vm875_vm0, %v7552_v14 }
  0x61   : > { %6324 = vmatmul.msk.f32.gmra.mxu0 %vm875_vm0, %v7531_v11 }
  0x68   : > { %6376 = vmatmul.msk.f32.gmra.mxu1 %vm875_vm0, %v7559_v15 }
  0x69   : > { %6325 = vmatmul.msk.f32.gmra.mxu0 %vm875_vm0, %v7538_v12 }
  0x70   : > { %6377 = vmatmul.msk.f32.gmra.mxu1 %vm875_vm0, %v7566_v16 }
  0x71   : > { %6326 = vmatmul.msk.f32.gmra.mxu0 %vm875_vm0, %v7545_v13 }
  0x78   : > { %6378 = vmatmul.msk.f32.gmra.mxu1 %vm875_vm0, %v7573_v17 }
  0x79   : > { %6327 = vmatmul.msk.f32.gmra.mxu0 %vm875_vm0, %v7552_v14 }
  0x80   : > { %6379 = vmatmul.msk.f32.gmra.mxu1 %vm875_vm0, %v7580_v18 }
  0x81   : > { %6328 = vmatmul.msk.f32.gmra.mxu0 %vm875_vm0, %v7559_v15 }
  0x88   : > { %6380 = vmatmul.msk.f32.gmra.mxu1 %vm875_vm0, %v7593_v21 }
  0x89   : > { %6329 = vmatmul.msk.f32.gmra.mxu0 %vm875_vm0, %v7566_v16 }
  0x90   : > { %6381 = vmatmul.msk.f32.gmra.mxu1 %vm875_vm0, %v7600_v22 }
  0x91   : > { %6330 = vmatmul.msk.f32.gmra.mxu0 %vm875_vm0, %v7573_v17 }
  0x98   : > { %6382 = vmatmul.msk.f32.gmra.mxu1 %vm875_vm0, %v7607_v23 }
  0x99   : > { %6331 = vmatmul.msk.f32.gmra.mxu0 %vm875_vm0, %v7580_v18 }
  0x9d   : > { %v7618_v26 = vpop.f32.mrf.mxu1 }
  0x9e   : > { %v1037_v25 = vpop.f32.mrf.mxu0 }
  0x9f   : > { %v7624_v28 = vadd.f32 %v7616_v24, %v1037_v25 }
  0xa0   : > { %6383 = vmatmul.msk.f32.gmra.mxu1 %vm875_vm0, %v7621_v27 }
  0xa1   : > { %v11828_v29 = vmax.f32 %v7624_v28, 0.0  ;;  %6332 = vmatmul.msk.f32.gmra.mxu0 %vm875_vm0, %v7593_v21 }
  0xa3   : > { %6412 = vmatmul.msk.f32.vlgmr.msra.gmra.mxu2 %vm1440_vm1, %v11828_v29 }
  0xa5   : > { %v7634_v31 = vpop.f32.mrf.mxu1 }
  0xa6   : > { %v1040_v30 = vpop.f32.mrf.mxu0 }
  0xa7   : > { %v7640_v33 = vadd.f32 %v7616_v24, %v1040_v30  ;;  %v7776_v30 = vld [vmem:[%s7484_s11 + $0x100] sm:$0xff] }
  0xa8   : > { %6384 = vmatmul.msk.f32.gmra.mxu1 %vm875_vm0, %v7637_v32  ;;  %12084 = vst [vmem:[#allocation12_spill] sm:$0xff] %v7776_v30 }
  0xa9   : > { %v11827_v34 = vmax.f32 %v7640_v33, 0.0  ;;  %6333 = vmatmul.msk.f32.gmra.mxu0 %vm875_vm0, %v7600_v22 }
  0xab   : > { %6413 = vmatmul.msk.f32.gmra.mxu2 %vm1440_vm1, %v11827_v34 }
  0xad   : > { %v7652_v36 = vpop.f32.mrf.mxu1 }
  0xae   : > { %v7650_v35 = vpop.f32.mrf.mxu0 }
  0xb0   : > { %6385 = vmatmul.msk.f32.gmra.mxu1 %vm875_vm0, %v7655_v37 }
  0xb1   : > { %6334 = vmatmul.msk.f32.gmra.mxu0 %vm875_vm0, %v7607_v23 }
  0xb5   : > { %v7663_v39 = vpop.f32.mrf.mxu1 }
  0xb6   : > { %v7661_v38 = vpop.f32.mrf.mxu0 }
  0xb8   : > { %6386 = vmatmul.msk.f32.gmra.mxu1 %vm875_vm0, %v7666_v40 }
  0xb9   : > { %6335 = vmatmul.msk.f32.gmra.mxu0 %vm875_vm0, %v7621_v27 }
  0xbd   : > { %v7674_v42 = vpop.f32.mrf.mxu1 }
  0xbe   : > { %v7672_v41 = vpop.f32.mrf.mxu0 }
  0xc0   : > { %6387 = vmatmul.msk.f32.gmra.mxu1 %vm875_vm0, %v7677_v43 }
  0xc1   : > { %6336 = vmatmul.msk.f32.gmra.mxu0 %vm875_vm0, %v7637_v32 }
  0xc5   : > { %v7685_v45 = vpop.f32.mrf.mxu1 }
  0xc6   : > { %v7683_v44 = vpop.f32.mrf.mxu0 }
  0xc8   : > { %6388 = vmatmul.msk.f32.gmra.mxu1 %vm875_vm0, %v7688_v46 }
  0xc9   : > { %6337 = vmatmul.msk.f32.gmra.mxu0 %vm875_vm0, %v7655_v37 }
  0xcd   : > { %v7696_v48 = vpop.f32.mrf.mxu1 }
  0xce   : > { %v7694_v47 = vpop.f32.mrf.mxu0 }
  0xd0   : > { %6389 = vmatmul.msk.f32.gmra.mxu1 %vm875_vm0, %v7699_v49 }
  0xd1   : > { %6338 = vmatmul.msk.f32.gmra.mxu0 %vm875_vm0, %v7666_v40 }
  0xd5   : > { %v7707_v51 = vpop.f32.mrf.mxu1 }
  0xd6   : > { %v7705_v50 = vpop.f32.mrf.mxu0 }
  0xd8   : > { %6390 = vmatmul.msk.f32.gmra.mxu1 %vm875_vm0, %v7710_v52 }
  0xd9   : > { %6339 = vmatmul.msk.f32.gmra.mxu0 %vm875_vm0, %v7677_v43 }
  0xdd   : > { %v7718_v54 = vpop.f32.mrf.mxu1 }
  0xde   : > { %v7716_v53 = vpop.f32.mrf.mxu0 }
  0xe0   : > { %6391 = vmatmul.msk.f32.gmra.mxu1 %vm875_vm0, %v7721_v55 }
  0xe1   : > { %6340 = vmatmul.msk.f32.gmra.mxu0 %vm875_vm0, %v7688_v46 }
  0xe5   : > { %v7729_v57 = vpop.f32.mrf.mxu1 }
  0xe6   : > { %v7727_v56 = vpop.f32.mrf.mxu0 }
  0xe8   : > { %6392 = vmatmul.msk.f32.gmra.mxu1 %vm875_vm0, %v7732_v58 }
  0xe9   : > { %6341 = vmatmul.msk.f32.gmra.mxu0 %vm875_vm0, %v7699_v49 }
  0xed   : > { %v7740_v60 = vpop.f32.mrf.mxu1 }
  0xee   : > { %v7738_v59 = vpop.f32.mrf.mxu0 }
  0xf0   : > { %6393 = vmatmul.msk.f32.gmra.mxu1 %vm875_vm0, %v7743_v61 }
  0xf1   : > { %6342 = vmatmul.msk.f32.gmra.mxu0 %vm875_vm0, %v7710_v52 }
  0xf5   : > { %v7751_v63 = vpop.f32.mrf.mxu1 }
  0xf6   : > { %v7749_v62 = vpop.f32.mrf.mxu0  ;;  %12079 = vst [vmem:[#allocation7_spill] sm:$0xff] %v7751_v63 }
  0xf8   : > { %6394 = vmatmul.msk.f32.gmra.mxu1 %vm875_vm0, %v7754_v0 }
  0xf9   : > { %6343 = vmatmul.msk.f32.gmra.mxu0 %vm875_vm0, %v7721_v55 }
  0xfd   : > { %v7762_v2 = vpop.f32.mrf.mxu1 }
  0xfe   : > { %v7760_v1 = vpop.f32.mrf.mxu0  ;;  %12081 = vst [vmem:[#allocation9_spill] sm:$0xff] %v7762_v2 }
 0x100   : > { %6395 = vmatmul.msk.f32.gmra.mxu1 %vm875_vm0, %v7765_v19 }
 0x101   : > { %6344 = vmatmul.msk.f32.gmra.mxu0 %vm875_vm0, %v7732_v58  ;;  %v7787_v58 = vld [vmem:[%s7484_s11 + $0x108] sm:$0xff] }
 0x102   : > { %12086 = vst [vmem:[#allocation14_spill] sm:$0xff] %v7787_v58 }
 0x105   : > { %v7773_v25 = vpop.f32.mrf.mxu1 }
 0x106   : > { %v7771_v20 = vpop.f32.mrf.mxu0  ;;  %12083 = vst [vmem:[#allocation11_spill] sm:$0xff] %v7773_v25 }
 0x108   : > { %6396 = vmatmul.msk.f32.gmra.mxu1 %vm875_vm0, %v7776_v30 }
 0x109   : > { %6345 = vmatmul.msk.f32.gmra.mxu0 %vm875_vm0, %v7743_v61  ;;  %v7798_v61 = vld [vmem:[%s7484_s11 + $0x110] sm:$0xff] }
 0x10a   : > { %12088 = vst [vmem:[#allocation16_spill] sm:$0xff] %v7798_v61 }
 0x10d   : > { %v7784_v29 = vpop.f32.mrf.mxu1 }
 0x10e   : > { %v7782_v34 = vpop.f32.mrf.mxu0  ;;  %12085 = vst [vmem:[#allocation13_spill] sm:$0xff] %v7784_v29 }
 0x110   : > { %6397 = vmatmul.msk.f32.gmra.mxu1 %vm875_vm0, %v7787_v58 }
 0x111   : > { %6346 = vmatmul.msk.f32.gmra.mxu0 %vm875_vm0, %v7754_v0  ;;  %v7809_v0 = vld [vmem:[%s7484_s11 + $0x118] sm:$0xff] }
 0x112   : > { %12091 = vst [vmem:[#allocation19_spill] sm:$0xff] %v7809_v0 }
 0x115   : > { %v7795_v2 = vpop.f32.mrf.mxu1 }
 0x116   : > { %v7793_v25 = vpop.f32.mrf.mxu0  ;;  %12087 = vst [vmem:[#allocation15_spill] sm:$0xff] %v7795_v2 }
 0x118   : > { %6398 = vmatmul.msk.f32.gmra.mxu1 %vm875_vm0, %v7798_v61 }
 0x119   : > { %6347 = vmatmul.msk.f32.gmra.mxu0 %vm875_vm0, %v7765_v19  ;;  %v7820_v19 = vld [vmem:[%s7484_s11 + $0x120] sm:$0xff] }
 0x11a   : > { %12094 = vst [vmem:[#allocation22_spill] sm:$0xff] %v7820_v19 }
 0x11d   : > { %v7806_v55 = vpop.f32.mrf.mxu1 }
 0x11e   : > { %v7804_v29 = vpop.f32.mrf.mxu0  ;;  %12090 = vst [vmem:[#allocation18_spill] sm:$0xff] %v7806_v55 }
 0x11f   : > { %12089 = vst [vmem:[#allocation17_spill] sm:$0xff] %v7804_v29  ;;  %v7900_v29 = vld [vmem:[%s7484_s11 + $0x158] sm:$0xff] }
 0x120   : > { %6399 = vmatmul.msk.f32.gmra.mxu1 %vm875_vm0, %v7809_v0  ;;  %12115 = vst [vmem:[#allocation42_spill] sm:$0xff] %v7900_v29 }
 0x121   : > { %6348 = vmatmul.msk.f32.gmra.mxu0 %vm875_vm0, %v7776_v30  ;;  %v7831_v30 = vld [vmem:[%s7484_s11 + $0x128] sm:$0xff] }
 0x122   : > { %12097 = vst [vmem:[#allocation25_spill] sm:$0xff] %v7831_v30 }
 0x125   : > { %v7817_v63 = vpop.f32.mrf.mxu1 }
 0x126   : > { %v7815_v2 = vpop.f32.mrf.mxu0  ;;  %12093 = vst [vmem:[#allocation21_spill] sm:$0xff] %v7817_v63 }
 0x127   : > { %12092 = vst [vmem:[#allocation20_spill] sm:$0xff] %v7815_v2 }
 0x128   : > { %6400 = vmatmul.msk.f32.gmra.mxu1 %vm875_vm0, %v7820_v19 }
 0x129   : > { %6349 = vmatmul.msk.f32.gmra.mxu0 %vm875_vm0, %v7787_v58  ;;  %v7842_v58 = vld [vmem:[%s7484_s11 + $0x130] sm:$0xff] }
 0x12a   : > { %12100 = vst [vmem:[#allocation28_spill] sm:$0xff] %v7842_v58 }
 0x12d   : > { %v7828_v52 = vpop.f32.mrf.mxu1 }
 0x12e   : > { %v7826_v55 = vpop.f32.mrf.mxu0  ;;  %12096 = vst [vmem:[#allocation24_spill] sm:$0xff] %v7828_v52 }
 0x12f   : > { %12095 = vst [vmem:[#allocation23_spill] sm:$0xff] %v7826_v55 }
 0x130   : > { %6401 = vmatmul.msk.f32.gmra.mxu1 %vm875_vm0, %v7831_v30 }
 0x131   : > { %6350 = vmatmul.msk.f32.gmra.mxu0 %vm875_vm0, %v7798_v61  ;;  %v7853_v61 = vld [vmem:[%s7484_s11 + $0x138] sm:$0xff] }
 0x132   : > { %12103 = vst [vmem:[#allocation31_spill] sm:$0xff] %v7853_v61 }
 0x135   : > { %v7839_v2 = vpop.f32.mrf.mxu1 }
 0x136   : > { %v7837_v63 = vpop.f32.mrf.mxu0  ;;  %12099 = vst [vmem:[#allocation27_spill] sm:$0xff] %v7839_v2 }
 0x137   : > { %12098 = vst [vmem:[#allocation26_spill] sm:$0xff] %v7837_v63 }
 0x138   : > { %6402 = vmatmul.msk.f32.gmra.mxu1 %vm875_vm0, %v7842_v58 }
 0x139   : > { %6351 = vmatmul.msk.f32.gmra.mxu0 %vm875_vm0, %v7809_v0  ;;  %v7864_v0 = vld [vmem:[%s7484_s11 + $0x140] sm:$0xff] }
 0x13a   : > { %12106 = vst [vmem:[#allocation34_spill] sm:$0xff] %v7864_v0 }
 0x13d   : > { %v7850_v55 = vpop.f32.mrf.mxu1 }
 0x13e   : > { %v7848_v52 = vpop.f32.mrf.mxu0  ;;  %12102 = vst [vmem:[#allocation30_spill] sm:$0xff] %v7850_v55 }
 0x13f   : > { %12101 = vst [vmem:[#allocation29_spill] sm:$0xff] %v7848_v52  ;;  %v7875_v52 = vld [vmem:[%s7484_s11 + $0x148] sm:$0xff] }
 0x140   : > { %6403 = vmatmul.msk.f32.gmra.mxu1 %vm875_vm0, %v7853_v61  ;;  %12109 = vst [vmem:[#allocation37_spill] sm:$0xff] %v7875_v52 }
 0x141   : > { %6352 = vmatmul.msk.f32.gmra.mxu0 %vm875_vm0, %v7820_v19 }
 0x145   : > { %v7861_v63 = vpop.f32.mrf.mxu1 }
 0x146   : > { %v7859_v2 = vpop.f32.mrf.mxu0  ;;  %12105 = vst [vmem:[#allocation33_spill] sm:$0xff] %v7861_v63 }
 0x147   : > { %12104 = vst [vmem:[#allocation32_spill] sm:$0xff] %v7859_v2 }
 0x148   : > { %6404 = vmatmul.msk.f32.gmra.mxu1 %vm875_vm0, %v7864_v0 }
 0x149   : > { %6353 = vmatmul.msk.f32.gmra.mxu0 %vm875_vm0, %v7831_v30  ;;  %v1999_v30 = vld [vmem:[%s12110_s1] sm:$0xff]  ;;  %s12169_s1 = sld [smem:[#allocation83_spill]] }
 0x14a   : > { %2019 = vmatpush.msrb.mxu1 %v1999_v30 }
 0x14d   : > { %v7872_v19 = vpop.f32.mrf.mxu1 }
 0x14e   : > { %v7870_v55 = vpop.f32.mrf.mxu0  ;;  %12108 = vst [vmem:[#allocation36_spill] sm:$0xff] %v7872_v19  ;;  %v7889_v19 = vld [vmem:[%s7484_s11 + $0x150] sm:$0xff] }
 0x14f   : > { %12107 = vst [vmem:[#allocation35_spill] sm:$0xff] %v7870_v55 }
 0x150   : > { %6405 = vmatmul.msk.f32.gmra.mxu1 %vm875_vm0, %v7875_v52  ;;  %12112 = vst [vmem:[#allocation39_spill] sm:$0xff] %v7889_v19 }
 0x151   : > { %6354 = vmatmul.msk.f32.gmra.mxu0 %vm875_vm0, %v7842_v58 }
 0x155   : > { %v7886_v2 = vpop.f32.mrf.mxu1 }
 0x156   : > { %v7884_v63 = vpop.f32.mrf.mxu0  ;;  %12111 = vst [vmem:[#allocation38_spill] sm:$0xff] %v7886_v2 }
 0x158   : > { %6406 = vmatmul.msk.f32.gmra.mxu1 %vm875_vm0, %v7889_v19 }
 0x159   : > { %6355 = vmatmul.msk.f32.gmra.mxu0 %vm875_vm0, %v7853_v61  ;;  %v7911_v61 = vld [vmem:[%s7484_s11 + $0x160] sm:$0xff] }
 0x15a   : > { %12118 = vst [vmem:[#allocation45_spill] sm:$0xff] %v7911_v61 }
 0x15d   : > { %v7897_v55 = vpop.f32.mrf.mxu1 }
 0x15e   : > { %v7895_v58 = vpop.f32.mrf.mxu0  ;;  %12114 = vst [vmem:[#allocation41_spill] sm:$0xff] %v7897_v55 }
 0x15f   : > { %12113 = vst [vmem:[#allocation40_spill] sm:$0xff] %v7895_v58 }
 0x160   : > { %6407 = vmatmul.msk.f32.gmra.mxu1 %vm875_vm0, %v7900_v29 }
 0x161   : > { %6356 = vmatmul.msk.f32.gmra.mxu0 %vm875_vm0, %v7864_v0  ;;  %v7922_v0 = vld [vmem:[%s7484_s11 + $0x168] sm:$0xff] }
 0x162   : > { %12120 = vst [vmem:[#allocation47_spill] sm:$0xff] %v7922_v0 }
 0x165   : > { %v7908_v2 = vpop.f32.mrf.mxu1 }
 0x166   : > { %v7906_v30 = vpop.f32.mrf.mxu0  ;;  %12117 = vst [vmem:[#allocation44_spill] sm:$0xff] %v7908_v2 }
 0x167   : > { %12116 = vst [vmem:[#allocation43_spill] sm:$0xff] %v7906_v30 }
 0x168   : > { %6408 = vmatmul.msk.f32.gmra.mxu1 %vm875_vm0, %v7911_v61 }
 0x169   : > { %6357 = vmatmul.msk.f32.gmra.mxu0 %vm875_vm0, %v7875_v52 }
 0x16d   : > { %v7919_v58 = vpop.f32.mrf.mxu1 }
 0x16e   : > { %v7917_v55 = vpop.f32.mrf.mxu0  ;;  %12119 = vst [vmem:[#allocation46_spill] sm:$0xff] %v7919_v58 }
 0x170   : > { %6409 = vmatmul.msk.f32.gmra.mxu1 %vm875_vm0, %v7922_v0 }
 0x171   : > { %6358 = vmatmul.msk.f32.gmra.mxu0 %vm875_vm0, %v7889_v19 }
 0x175   : > { %v7930_v30 = vpop.f32.mrf.mxu1 }
 0x176   : > { %v7928_v2 = vpop.f32.mrf.mxu0  ;;  %12121 = vst [vmem:[#allocation48_spill] sm:$0xff] %v7930_v30 }
 0x178   : > { %6506 = vmatmul.msk.f32.vlgmr.msrb.gmra.mxu1 %vm875_vm0, %v7487_v3 }
 0x179   : > { %6359 = vmatmul.msk.f32.gmra.mxu0 %vm875_vm0, %v7900_v29 }
 0x17d   : > { %v7938_v52 = vpop.f32.mrf.mxu1 }
 0x17e   : > { %v7936_v58 = vpop.f32.mrf.mxu0  ;;  %12123 = vst [vmem:[#allocation50_spill] sm:$0xff] %v7938_v52  ;;  %v7957_v52 = vld [vmem:[%s7484_s11 + $0x170] sm:$0xff] }
 0x17f   : > { %12122 = vst [vmem:[#allocation49_spill] sm:$0xff] %v7936_v58 }
 0x180   : > { %6507 = vmatmul.msk.f32.gmra.mxu1 %vm875_vm0, %v7497_v5  ;;  %12127 = vst [vmem:[#allocation54_spill] sm:$0xff] %v7957_v52 }
 0x181   : > { %6360 = vmatmul.msk.f32.gmra.mxu0 %vm875_vm0, %v7911_v61 }
 0x185   : > { %v7946_v30 = vpop.f32.mrf.mxu1 }
 0x186   : > { %v7944_v19 = vpop.f32.mrf.mxu0  ;;  %12124 = vst [vmem:[#allocation51_spill] sm:$0xff] %v7946_v30 }
 0x188   : > { %6508 = vmatmul.msk.f32.gmra.mxu1 %vm875_vm0, %v7507_v7 }
 0x189   : > { %6361 = vmatmul.msk.f32.gmra.mxu0 %vm875_vm0, %v7922_v0  ;;  %v7968_v0 = vld [vmem:[%s7484_s11 + $0x178] sm:$0xff]  ;;  %s12276_s11 = sld [smem:[#allocation84_spill]] }
 0x18a   : > { %12129 = vst [vmem:[#allocation56_spill] sm:$0xff] %v7968_v0 }
 0x18d   : > { %v7954_v58 = vpop.f32.mrf.mxu1 }
 0x18e   : > { %v7952_v29 = vpop.f32.mrf.mxu0  ;;  %12126 = vst [vmem:[#allocation53_spill] sm:$0xff] %v7954_v58 }
 0x18f   : > { %12125 = vst [vmem:[#allocation52_spill] sm:$0xff] %v7952_v29 }
 0x190   : > { %6509 = vmatmul.msk.f32.gmra.mxu1 %vm875_vm0, %v7490_v4 }
 0x191   : > { %6362 = vmatmul.msk.f32.gmra.mxu0 %vm875_vm0, %v7957_v52 }
 0x195   : > { %v7965_v30 = vpop.f32.mrf.mxu1 }
 0x196   : > { %v7963_v61 = vpop.f32.mrf.mxu0  ;;  %12128 = vst [vmem:[#allocation55_spill] sm:$0xff] %v7965_v30 }
 0x198   : > { %6510 = vmatmul.msk.f32.gmra.mxu1 %vm875_vm0, %v7500_v6 }
 0x199   : > { %6363 = vmatmul.msk.f32.gmra.mxu0 %vm875_vm0, %v7968_v0 }
 0x19d   : > { %v7976_v29 = vpop.f32.mrf.mxu1 }
 0x19e   : > { %v7974_v58 = vpop.f32.mrf.mxu0  ;;  %12130 = vst [vmem:[#allocation57_spill] sm:$0xff] %v7976_v29  ;;  %v8046_v29 = vld [vmem:[%s12146_s29] ss:$0 sm:$0xff] }
 0x1a0   : > { %6511 = vmatmul.msk.f32.gmra.mxu1 %vm875_vm0, %v7510_v8 }
 0x1a1   : > { %6364 = vmatmul.msk.f32.vlgmr.msrb.gmra.mxu0 %vm875_vm0, %v7487_v3 }
 0x1a5   : > { %v7984_v30 = vpop.f32.mrf.mxu1 }
 0x1a6   : > { %v7982_v4 = vpop.f32.mrf.mxu0  ;;  %12131 = vst [vmem:[#allocation58_spill] sm:$0xff] %v7984_v30 }
 0x1a8   : > { %6512 = vmatmul.msk.f32.gmra.mxu1 %vm875_vm0, %v7517_v9 }
 0x1a9   : > { %6365 = vmatmul.msk.f32.gmra.mxu0 %vm875_vm0, %v7497_v5 }
 0x1ad   : > { %v7992_v0 = vpop.f32.mrf.mxu1 }
 0x1ae   : > { %v7990_v6 = vpop.f32.mrf.mxu0  ;;  %12133 = vst [vmem:[#allocation60_spill] sm:$0xff] %v7992_v0 }
 0x1af   : > { %12132 = vst [vmem:[#allocation59_spill] sm:$0xff] %v7990_v6 }
 0x1b0   : > { %6513 = vmatmul.msk.f32.gmra.mxu1 %vm875_vm0, %v7524_v10 }
 0x1b1   : > { %6366 = vmatmul.msk.f32.gmra.mxu0 %vm875_vm0, %v7507_v7 }
 0x1b5   : > { %v8000_v8 = vpop.f32.mrf.mxu1 }
 0x1b6   : > { %v7998_v3 = vpop.f32.mrf.mxu0  ;;  %12135 = vst [vmem:[#allocation62_spill] sm:$0xff] %v8000_v8 }
 0x1b7   : > { %12134 = vst [vmem:[#allocation61_spill] sm:$0xff] %v7998_v3 }
 0x1b8   : > { %6514 = vmatmul.msk.f32.gmra.mxu1 %vm875_vm0, %v7531_v11 }
 0x1bd   : > { %v8006_v9 = vpop.f32.mrf.mxu1 }
 0x1be   : > { %v8004_v5 = vpop.f32.mrf.mxu0  ;;  %12137 = vst [vmem:[#allocation64_spill] sm:$0xff] %v8006_v9 }
 0x1bf   : > { %12136 = vst [vmem:[#allocation63_spill] sm:$0xff] %v8004_v5 }
 0x1c0   : > { %6515 = vmatmul.msk.f32.gmra.mxu1 %vm875_vm0, %v7538_v12  ;;  %v2574_v12 = vld [vmem:[%s12142_s2 + $0x8] sm:$0xff] }
 0x1c1   : > { %2589 = vmatpush.msra.mxu0 %v2574_v12  ;;  %v1602_v12 = vpop.f32.mrf.mxu2 }
 0x1c5   : > { %v8012_v7 = vpop.f32.mrf.mxu1 }
 0x1c6   : > { %v8010_v0 = vpop.f32.mrf.mxu0  ;;  %12139 = vst [vmem:[#allocation66_spill] sm:$0xff] %v8012_v7 }
 0x1c7   : > { %12138 = vst [vmem:[#allocation65_spill] sm:$0xff] %v8010_v0 }
 0x1c8   : > { %6516 = vmatmul.msk.f32.gmra.mxu1 %vm875_vm0, %v7545_v13  ;;  %v2573_v13 = vld [vmem:[%s12142_s2] sm:$0xff] }
 0x1c9   : > { %2590 = vmatpush.msra.mxu0 %v2573_v13  ;;  %v1605_v5 = vpop.f32.mrf.mxu2 }
 0x1cd   : > { %v1322_v8 = vpop.f32.mrf.mxu1 }
 0x1ce   : > { %v8016_v10 = vpop.f32.mrf.mxu0 }
 0x1cf   : > { %12140 = vst [vmem:[#allocation67_spill] sm:$0xff] %v8016_v10 }
 0x1d0   : > { %6517 = vmatmul.msk.f32.gmra.mxu1 %vm875_vm0, %v7552_v14  ;;  %v1747_v14 = vld [vmem:[%s12073_s7 + $0x8] sm:$0xff] }
 0x1d1   : > { %1762 = vmatpush.msrb.mxu3 %v1747_v14  ;;  %v1746_v14 = vld [vmem:[%s12073_s7] sm:$0xff] }
 0x1d3   : > { %1763 = vmatpush.msrb.mxu3 %v1746_v14 }
 0x1d5   : > { %v1325_v30 = vpop.f32.mrf.mxu1 }
 0x1d6   : > { %v8020_v11 = vpop.f32.mrf.mxu0 }
 0x1d7   : > { %12141 = vst [vmem:[#allocation68_spill] sm:$0xff] %v8020_v11 }
 0x1d8   : > { %6518 = vmatmul.msk.f32.gmra.mxu1 %vm875_vm0, %v7559_v15 }
 0x1dd   : > { %v1328_v9 = vpop.f32.mrf.mxu1 }
 0x1de   : > { %v8033_v7 = vpop.f32.mrf.mxu0 }
 0x1df   : > { %12143 = vst [vmem:[#allocation69_spill] sm:$0xff] %v8033_v7 }
 0x1e0   : > { %6519 = vmatmul.msk.f32.gmra.mxu1 %vm875_vm0, %v7566_v16  ;;  %v1603_v16 = vadd.f32 %v8046_v29, %v1602_v12 }
 0x1e2   : > { %v1951_v7 = vmax.f32 %v1603_v16, 0.0 }
 0x1e5   : > { %v1331_v11 = vpop.f32.mrf.mxu1 }
 0x1e6   : > { %v8037_v15 = vpop.f32.mrf.mxu0 }
 0x1e7   : > { %12144 = vst [vmem:[#allocation70_spill] sm:$0xff] %v8037_v15 }
 0x1e8   : > { %6520 = vmatmul.msk.f32.gmra.mxu1 %vm875_vm0, %v7573_v17  ;;  %v8057_v17 = vld [vmem:[%s12147_s4] ss:$0 sm:$0xff] }
 0x1ed   : > { %v1334_v13 = vpop.f32.mrf.mxu1 }
 0x1ee   : > { %v8041_v10 = vpop.f32.mrf.mxu0 }
 0x1ef   : > { %12145 = vst [vmem:[#allocation71_spill] sm:$0xff] %v8041_v10 }
 0x1f0   : > { %6521 = vmatmul.msk.f32.gmra.mxu1 %vm875_vm0, %v7580_v18  ;;  %v1606_v18 = vadd.f32 %v8046_v29, %v1605_v5 }
 0x1f5   : > { %v2021_v15 = vpop.f32.mrf.mxu1 }
 0x1f6   : > { %v1166_v10 = vpop.f32.mrf.mxu0  ;;  %v2022_v52 = vadd.f32 %v8057_v17, %v2021_v15 }
 0x1f7   : > { %v1167_v0 = vadd.f32 %v7616_v24, %v1166_v10 }
 0x1f8   : > { %v2165_v6 = vadd.f32 %v2022_v52, %v1951_v7  ;;  %6522 = vmatmul.msk.f32.gmra.mxu1 %vm875_vm0, %v7593_v21 }
 0x1f9   : > { %v8061_v3 = vadd.f32 %v1322_v8, %v1167_v0  ;;  %v1952_v8 = vmax.f32 %v1606_v18, 0.0 }
 0x1fa   : > { %v8066_v12 = vmax.f32 %v2165_v6, 0.0 }
 0x1fb   : > { %v11853_v14 = vmax.f32 %v8061_v3, 0.0 }
 0x1fc   : > { %12148 = vst [vmem:[#allocation72_spill] sm:$0xff] %v8066_v12  ;;  %6604 = vmatmul.msk.f32.vlgmr.msra.gmra.mxu0 %vm1440_vm1, %v8066_v12 }
 0x1fd   : > { %6455 = vmatmul.msk.f32.vlgmr.msra.gmra.mxu3 %vm1440_vm1, %v11853_v14  ;;  %v2024_v0 = vpop.f32.mrf.mxu1 }
 0x1fe   : > { %v1169_v10 = vpop.f32.mrf.mxu0  ;;  %v2025_v21 = vadd.f32 %v8057_v17, %v2024_v0 }
 0x1ff   : > { %v1170_v52 = vadd.f32 %v7616_v24, %v1169_v10 }
 0x200   : > { %v2166_v6 = vadd.f32 %v2025_v21, %v1952_v8  ;;  %6523 = vmatmul.msk.f32.gmra.mxu1 %vm875_vm0, %v7600_v22 }
 0x201   : > { %v8076_v7 = vadd.f32 %v1325_v30, %v1170_v52  ;;  %v6555_v30 = vld [vmem:[%s12142_s2 + $0x18] sm:$0xff] }
 0x202   : > { %v8080_v5 = vmax.f32 %v2166_v6, 0.0  ;;  %2426 = vmatpush.msra.mxu3 %v6555_v30 }
 0x203   : > { %v11852_v15 = vmax.f32 %v8076_v7, 0.0 }
 0x204   : > { %12149 = vst [vmem:[#allocation73_spill] sm:$0xff] %v8080_v5  ;;  %6605 = vmatmul.msk.f32.gmra.mxu0 %vm1440_vm1, %v8080_v5 }
 0x205   : > { %6456 = vmatmul.msk.f32.gmra.mxu3 %vm1440_vm1, %v11852_v15 }
 0x206   : > { %v1172_v16 = vpop.f32.mrf.mxu0 }
 0x207   : > { %v1173_v18 = vadd.f32 %v7616_v24, %v1172_v16  ;;  %v1044_v16 = vadd.f32 %v7616_v24, %v7650_v35 }
 0x208   : > { %6524 = vmatmul.msk.f32.gmra.mxu1 %vm875_vm0, %v7607_v23 }
 0x209   : > { %v8092_v22 = vadd.f32 %v1328_v9, %v1173_v18 }
 0x20b   : > { %v11851_v10 = vmax.f32 %v8092_v22, 0.0 }
 0x20d   : > { %6457 = vmatmul.msk.f32.gmra.mxu3 %vm1440_vm1, %v11851_v10 }
 0x20e   : > { %v1175_v0 = vpop.f32.mrf.mxu0 }
 0x20f   : > { %v1176_v8 = vadd.f32 %v7616_v24, %v1175_v0 }
 0x210   : > { %6525 = vmatmul.msk.f32.gmra.mxu1 %vm875_vm0, %v7621_v27  ;;  %v1047_v27 = vadd.f32 %v7616_v24, %v7661_v38 }
 0x211   : > { %v1383_v52 = vadd.f32 %v1331_v11, %v1176_v8 }
 0x213   : > { %v1431_v21 = vmax.f32 %v1383_v52, 0.0  ;;  %v12151_v52 = vmax.f32 %v7640_v33, 0.0  ;;  %v1056_v33 = vadd.f32 %v7616_v24, %v7694_v47 }
 0x215   : > { %6458 = vmatmul.msk.f32.gmra.mxu3 %vm1440_vm1, %v1431_v21 }
 0x216   : > { %v1178_v9 = vpop.f32.mrf.mxu0 }
 0x217   : > { %v1179_v6 = vadd.f32 %v7616_v24, %v1178_v9 }
 0x218   : > { %6526 = vmatmul.msk.f32.gmra.mxu1 %vm875_vm0, %v7637_v32 }
 0x219   : > { %v1384_v23 = vadd.f32 %v1334_v13, %v1179_v6  ;;  %v12150_v13 = vmax.f32 %v7624_v28, 0.0  ;;  %v1053_v28 = vadd.f32 %v7616_v24, %v7683_v44  ;;  %v1343_v44 = vadd.f32 %v7634_v31, %v1056_v33 }
 0x21b   : > { %v1432_v30 = vmax.f32 %v1384_v23, 0.0  ;;  %v1391_v6 = vmax.f32 %v1343_v44, 0.0  ;;  %v12158_v44 = vld [vmem:[#allocation23_spill] sm:$0xff] }
 0x21d   : > { %6459 = vmatmul.msk.f32.gmra.mxu3 %vm1440_vm1, %v1432_v30 }
 0x21e   : > { %v1199_v11 = vpop.f32.mrf.mxu0 }
 0x21f   : > { %v1339_v18 = vadd.f32 %v1199_v11, %v1044_v16 }
 0x220   : > { %6527 = vmatmul.msk.f32.gmra.mxu1 %vm875_vm0, %v7655_v37  ;;  %v1050_v37 = vadd.f32 %v7616_v24, %v7672_v41 }
 0x221   : > { %v1387_v0 = vmax.f32 %v1339_v18, 0.0 }
 0x223   : > { %6414 = vmatmul.msk.f32.gmra.mxu2 %vm1440_vm1, %v1387_v0 }
 0x225   : > { %6460 = vmatmul.msk.f32.vlgmr.msrb.gmra.mxu3 %vm1440_vm1, %v12150_v13  ;;  %v12152_v13 = vld [vmem:[#allocation17_spill] sm:$0xff] }
 0x226   : > { %v1202_v32 = vpop.f32.mrf.mxu0 }
 0x227   : > { %v1340_v8 = vadd.f32 %v1202_v32, %v1047_v27  ;;  %v1086_v32 = vadd.f32 %v7616_v24, %v12152_v13 }
 0x228   : > { %6528 = vmatmul.msk.f32.gmra.mxu1 %vm875_vm0, %v7666_v40  ;;  %v1342_v40 = vadd.f32 %v7618_v26, %v1053_v28 }
 0x229   : > { %v1388_v35 = vmax.f32 %v1340_v8, 0.0  ;;  %v2027_v8 = vpop.f32.mrf.mxu1 }
 0x22a   : > { %v1390_v41 = vmax.f32 %v1342_v40, 0.0  ;;  %v12157_v40 = vld [vmem:[#allocation9_spill] sm:$0xff] }
 0x22b   : > { %6415 = vmatmul.msk.f32.gmra.mxu2 %vm1440_vm1, %v1388_v35 }
 0x22d   : > { %6461 = vmatmul.msk.f32.gmra.mxu3 %vm1440_vm1, %v12151_v52 }
 0x22e   : > { %v1205_v38 = vpop.f32.mrf.mxu0 }
 0x22f   : > { %v1341_v21 = vadd.f32 %v1205_v38, %v1050_v37 }
 0x230   : > { %6529 = vmatmul.msk.f32.gmra.mxu1 %vm875_vm0, %v7677_v43  ;;  %v1059_v43 = vadd.f32 %v7616_v24, %v7705_v50  ;;  %v1065_v50 = vadd.f32 %v7616_v24, %v7727_v56  ;;  %v1071_v56 = vadd.f32 %v7616_v24, %v7749_v62  ;;  %v1077_v62 = vadd.f32 %v7616_v24, %v7771_v20 }
 0x231   : > { %v1389_v9 = vmax.f32 %v1341_v21, 0.0  ;;  %v1083_v20 = vadd.f32 %v7616_v24, %v7793_v25  ;;  %v12154_v25 = vld [vmem:[#allocation7_spill] sm:$0xff]  ;;  %v2030_v28 = vpop.f32.mrf.mxu1 }
 0x232   : > { %v1344_v26 = vadd.f32 %v7652_v36, %v1059_v43  ;;  %v1346_v36 = vadd.f32 %v7674_v42, %v1065_v50  ;;  %v1348_v42 = vadd.f32 %v7696_v48, %v1071_v56  ;;  %v1350_v48 = vadd.f32 %v7718_v54, %v1077_v62  ;;  %v12163_v56 = vld [vmem:[#allocation13_spill] sm:$0xff] }
 0x233   : > { %6416 = vmatmul.msk.f32.gmra.mxu2 %vm1440_vm1, %v1389_v9  ;;  %v1352_v54 = vadd.f32 %v7740_v60, %v1083_v20  ;;  %v1353_v37 = vadd.f32 %v12154_v25, %v1086_v32  ;;  %v12155_v60 = vld [vmem:[#allocation20_spill] sm:$0xff]  ;;  %v1092_v43 = vadd.f32 %v7616_v24, %v12158_v44  ;;  %v12170_v44 = vld [vmem:[#allocation10_spill] sm:$0xff] }
 0x234   : > { %v1392_v47 = vmax.f32 %v1344_v26, 0.0  ;;  %v1394_v23 = vmax.f32 %v1346_v36, 0.0  ;;  %v1396_v16 = vmax.f32 %v1348_v42, 0.0  ;;  %v1398_v18 = vmax.f32 %v1350_v48, 0.0  ;;  %v12165_v20 = vld [vmem:[#allocation8_spill] sm:$0xff] }
 0x235   : > { %6462 = vmatmul.msk.f32.gmra.mxu3 %vm1440_vm1, %v1387_v0  ;;  %v1089_v38 = vadd.f32 %v7616_v24, %v12155_v60  ;;  %v1401_v21 = vmax.f32 %v1353_v37, 0.0  ;;  %v2028_v48 = vadd.f32 %v8057_v17, %v2027_v8  ;;  %v12168_v25 = vld [vmem:[#allocation32_spill] sm:$0xff] }
 0x236   : > { %v1101_v37 = vadd.f32 %v7616_v24, %v12168_v25  ;;  %v12176_v25 = vld [vmem:[#allocation14_spill] sm:$0xff] }
 0x237   : > { %v1354_v33 = vadd.f32 %v12157_v40, %v1089_v38  ;;  %v2031_v38 = vadd.f32 %v8057_v17, %v2030_v28  ;;  %v6649_v40 = vld [vmem:[%s12169_s1 + $0x18] sm:$0xff] }
 0x238   : > { %6530 = vmatmul.msk.f32.gmra.mxu1 %vm875_vm0, %v7688_v46  ;;  %v1062_v46 = vadd.f32 %v7616_v24, %v7716_v53  ;;  %v1068_v53 = vadd.f32 %v7616_v24, %v7738_v59  ;;  %v1074_v59 = vadd.f32 %v7616_v24, %v7760_v1  ;;  %v1080_v1 = vadd.f32 %v7616_v24, %v7782_v34 }
 0x239   : > { %v2033_v26 = vpop.f32.mrf.mxu1  ;;  %2985 = vmatpush.msrb.mxu2 %v6649_v40 }
 0x23a   : > { %v1345_v31 = vadd.f32 %v7663_v39, %v1062_v46  ;;  %v1347_v39 = vadd.f32 %v7685_v45, %v1068_v53  ;;  %v1349_v45 = vadd.f32 %v7707_v51, %v1074_v59  ;;  %v1351_v51 = vadd.f32 %v7729_v57, %v1080_v1  ;;  %v12159_v46 = vld [vmem:[#allocation5_spill] sm:$0xff] }
 0x23b   : > { %6417 = vmatmul.msk.f32.gmra.mxu2 %vm1440_vm1, %v1390_v41  ;;  %v1400_v57 = vmax.f32 %v1352_v54, 0.0 }
 0x23c   : > { %v1395_v30 = vmax.f32 %v1347_v39, 0.0  ;;  %v1397_v11 = vmax.f32 %v1349_v45, 0.0  ;;  %v1399_v27 = vmax.f32 %v1351_v51, 0.0  ;;  %v12162_v39 = vld [vmem:[#allocation6_spill] sm:$0xff]  ;;  %v12164_v45 = vld [vmem:[#allocation29_spill] sm:$0xff] }
 0x23d   : > { %6463 = vmatmul.msk.f32.gmra.mxu3 %vm1440_vm1, %v1388_v35  ;;  %v12153_v35 = vld [vmem:[#allocation3_spill] sm:$0xff]  ;;  %v1098_v62 = vadd.f32 %v7616_v24, %v12164_v45  ;;  %v12174_v45 = vld [vmem:[#allocation21_spill] sm:$0xff] }
 0x240   : > { %6531 = vmatmul.msk.f32.gmra.mxu1 %vm875_vm0, %v7699_v49  ;;  %v1393_v49 = vmax.f32 %v1345_v31, 0.0 }
 0x243   : > { %6418 = vmatmul.msk.f32.gmra.mxu2 %vm1440_vm1, %v1391_v6 }
 0x245   : > { %6464 = vmatmul.msk.f32.gmra.mxu3 %vm1440_vm1, %v1389_v9  ;;  %v12156_v9 = vld [vmem:[#allocation4_spill] sm:$0xff] }
 0x248   : > { %6532 = vmatmul.msk.f32.gmra.mxu1 %vm875_vm0, %v12153_v35 }
 0x24b   : > { %6419 = vmatmul.msk.f32.gmra.mxu2 %vm1440_vm1, %v1392_v47 }
 0x24d   : > { %6465 = vmatmul.msk.f32.gmra.mxu3 %vm1440_vm1, %v1390_v41 }
 0x250   : > { %6533 = vmatmul.msk.f32.gmra.mxu1 %vm875_vm0, %v12156_v9 }
 0x253   : > { %6420 = vmatmul.msk.f32.gmra.mxu2 %vm1440_vm1, %v1393_v49 }
 0x255   : > { %6466 = vmatmul.msk.f32.gmra.mxu3 %vm1440_vm1, %v1391_v6  ;;  %v1402_v6 = vmax.f32 %v1354_v33, 0.0 }
 0x258   : > { %6534 = vmatmul.msk.f32.gmra.mxu1 %vm875_vm0, %v12159_v46 }
 0x25b   : > { %6421 = vmatmul.msk.f32.gmra.mxu2 %vm1440_vm1, %v1394_v23 }
 0x25d   : > { %6467 = vmatmul.msk.f32.gmra.mxu3 %vm1440_vm1, %v1392_v47  ;;  %v12160_v47 = vld [vmem:[#allocation11_spill] sm:$0xff] }
 0x25e   : > { %v1355_v31 = vadd.f32 %v12160_v47, %v1092_v43  ;;  %v12171_v43 = vld [vmem:[#allocation18_spill] sm:$0xff] }
 0x260   : > { %v1403_v53 = vmax.f32 %v1355_v31, 0.0 }
 0x263   : > { %6422 = vmatmul.msk.f32.gmra.mxu2 %vm1440_vm1, %v1395_v30 }
 0x265   : > { %6468 = vmatmul.msk.f32.gmra.mxu3 %vm1440_vm1, %v1393_v49  ;;  %v12161_v49 = vld [vmem:[#allocation26_spill] sm:$0xff] }
 0x266   : > { %v1095_v36 = vadd.f32 %v7616_v24, %v12161_v49 }
 0x26b   : > { %6423 = vmatmul.msk.f32.gmra.mxu2 %vm1440_vm1, %v1396_v16 }
 0x26d   : > { %6469 = vmatmul.msk.f32.gmra.mxu3 %vm1440_vm1, %v1394_v23  ;;  %v2036_v23 = vpop.f32.mrf.mxu1  ;;  %6535 = vmatmul.msk.f32.gmra.mxu1 %vm875_vm0, %v12162_v39 }
 0x273   : > { %6424 = vmatmul.msk.f32.gmra.mxu2 %vm1440_vm1, %v1397_v11 }
 0x275   : > { %6470 = vmatmul.msk.f32.gmra.mxu3 %vm1440_vm1, %v1395_v30  ;;  %v1356_v30 = vadd.f32 %v12163_v56, %v1095_v36  ;;  %v8230_v51 = vpop.f32.mrf.mxu1  ;;  %6536 = vmatmul.msk.f32.gmra.mxu1 %vm875_vm0, %v12165_v20  ;;  %v12172_v36 = vld [vmem:[#allocation35_spill] sm:$0xff] }
 0x276   : > { %v1104_v39 = vadd.f32 %v7616_v24, %v12172_v36  ;;  %v12181_v36 = vld [vmem:[#allocation27_spill] sm:$0xff] }
 0x277   : > { %v1404_v1 = vmax.f32 %v1356_v30, 0.0  ;;  %v2034_v30 = vadd.f32 %v8057_v17, %v2033_v26  ;;  %v6554_v26 = vld [vmem:[%s12142_s2 + $0x10] sm:$0xff] }
 0x278   : > { %2427 = vmatpush.msra.mxu3 %v6554_v26 }
 0x27b   : > { %6425 = vmatmul.msk.f32.gmra.mxu2 %vm1440_vm1, %v1398_v18 }
 0x27d   : > { %6471 = vmatmul.msk.f32.gmra.mxu3 %vm1440_vm1, %v1396_v16  ;;  %v8248_v33 = vpop.f32.mrf.mxu1  ;;  %6537 = vmatmul.msk.f32.gmra.mxu1 %vm875_vm0, %v12170_v44 }
 0x280   : > { %v8182_v0 = vpop.f32.mrf.mxu3 }
 0x283   : > { %6426 = vmatmul.msk.f32.gmra.mxu2 %vm1440_vm1, %v1399_v27 }
 0x285   : > { %6472 = vmatmul.msk.f32.gmra.mxu3 %vm1440_vm1, %v1397_v11 }
 0x288   : > { %v8189_v34 = vpop.f32.mrf.mxu3 }
 0x28b   : > { %6427 = vmatmul.msk.f32.gmra.mxu2 %vm1440_vm1, %v1400_v57 }
 0x28d   : > { %6473 = vmatmul.msk.f32.gmra.mxu3 %vm1440_vm1, %v1398_v18 }
 0x290   : > { %v8198_v52 = vpop.f32.mrf.mxu3 }
 0x293   : > { %6428 = vmatmul.msk.f32.gmra.mxu2 %vm1440_vm1, %v1401_v21 }
 0x295   : > { %6474 = vmatmul.msk.f32.gmra.mxu3 %vm1440_vm1, %v1399_v27  ;;  %v12166_v27 = vld [vmem:[#allocation15_spill] sm:$0xff] }
 0x296   : > { %v1357_v54 = vadd.f32 %v12166_v27, %v1098_v62  ;;  %v1359_v62 = vadd.f32 %v12174_v45, %v1104_v39 }
 0x298   : > { %v8207_v41 = vpop.f32.mrf.mxu3 }
 0x29b   : > { %6429 = vmatmul.msk.f32.gmra.mxu2 %vm1440_vm1, %v1402_v6 }
 0x29d   : > { %6475 = vmatmul.msk.f32.gmra.mxu3 %vm1440_vm1, %v1400_v57 }
 0x2a0   : > { %v8216_v50 = vpop.f32.mrf.mxu3 }
 0x2a3   : > { %6430 = vmatmul.msk.f32.gmra.mxu2 %vm1440_vm1, %v1403_v53 }
 0x2a5   : > { %6476 = vmatmul.msk.f32.gmra.mxu3 %vm1440_vm1, %v1401_v21  ;;  %v1405_v21 = vmax.f32 %v1357_v54, 0.0  ;;  %v1107_v54 = vadd.f32 %v7616_v24, %v7884_v63 }
 0x2a6   : > { %v1608_v42 = vpop.f32.mrf.mxu2 }
 0x2a7   : > { %v1609_v59 = vadd.f32 %v8046_v29, %v1608_v42 }
 0x2a8   : > { %v1765_v16 = vpop.f32.mrf.mxu3 }
 0x2a9   : > { %v1905_v11 = vadd.f32 %v1765_v16, %v1609_v59  ;;  %v12173_v16 = vld [vmem:[#allocation12_spill] sm:$0xff] }
 0x2ab   : > { %v1953_v18 = vmax.f32 %v1905_v11, 0.0  ;;  %6431 = vmatmul.msk.f32.gmra.mxu2 %vm1440_vm1, %v1404_v1 }
 0x2ad   : > { %v2167_v13 = vadd.f32 %v2028_v48, %v1953_v18  ;;  %6477 = vmatmul.msk.f32.gmra.mxu3 %vm1440_vm1, %v1402_v6  ;;  %v1358_v6 = vadd.f32 %v12171_v43, %v1101_v37  ;;  %v12177_v37 = vld [vmem:[#allocation24_spill] sm:$0xff] }
 0x2ae   : > { %v1611_v32 = vpop.f32.mrf.mxu2 }
 0x2af   : > { %v8236_v57 = vmax.f32 %v2167_v13, 0.0  ;;  %v1612_v35 = vadd.f32 %v8046_v29, %v1611_v32  ;;  %v1406_v42 = vmax.f32 %v1358_v6, 0.0  ;;  %v1407_v32 = vmax.f32 %v1359_v62, 0.0  ;;  %v12183_v62 = vld [vmem:[#allocation43_spill] sm:$0xff] }
 0x2b0   : > { %v1768_v8 = vpop.f32.mrf.mxu3 }
 0x2b1   : > { %12167 = vst [vmem:[#allocation17_spill] sm:$0xff] %v8236_v57  ;;  %v1906_v60 = vadd.f32 %v1768_v8, %v1612_v35  ;;  %6606 = vmatmul.msk.f32.gmra.mxu0 %vm1440_vm1, %v8236_v57 }
 0x2b3   : > { %v1954_v9 = vmax.f32 %v1906_v60, 0.0  ;;  %6432 = vmatmul.msk.f32.gmra.mxu2 %vm1440_vm1, %v1405_v21  ;;  %v1360_v60 = vadd.f32 %v12177_v37, %v1107_v54  ;;  %v12185_v54 = vld [vmem:[#allocation30_spill] sm:$0xff] }
 0x2b5   : > { %v2168_v46 = vadd.f32 %v2031_v38, %v1954_v9  ;;  %6478 = vmatmul.msk.f32.gmra.mxu3 %vm1440_vm1, %v1403_v53  ;;  %v8263_v53 = vpop.f32.mrf.mxu1  ;;  %6538 = vmatmul.msk.f32.gmra.mxu1 %vm875_vm0, %v12173_v16 }
 0x2b6   : > { %v1614_v28 = vpop.f32.mrf.mxu2 }
 0x2b7   : > { %v8254_v47 = vmax.f32 %v2168_v46, 0.0  ;;  %v1615_v31 = vadd.f32 %v8046_v29, %v1614_v28  ;;  %v2040_v46 = vadd.f32 %v8057_v17, %v8230_v51  ;;  %v1408_v28 = vmax.f32 %v1360_v60, 0.0 }
 0x2b8   : > { %v1771_v49 = vpop.f32.mrf.mxu3 }
 0x2b9   : > { %v1907_v56 = vadd.f32 %v1771_v49, %v1615_v31  ;;  %6607 = vmatmul.msk.f32.gmra.mxu0 %vm1440_vm1, %v8254_v47  ;;  %v12180_v49 = vld [vmem:[#allocation16_spill] sm:$0xff] }
 0x2bb   : > { %v1955_v59 = vmax.f32 %v1907_v56, 0.0  ;;  %6433 = vmatmul.msk.f32.gmra.mxu2 %vm1440_vm1, %v1406_v42 }
 0x2bd   : > { %v2169_v11 = vadd.f32 %v2034_v30, %v1955_v59  ;;  %6479 = vmatmul.msk.f32.gmra.mxu3 %vm1440_vm1, %v1404_v1  ;;  %v2037_v1 = vadd.f32 %v8057_v17, %v2036_v23  ;;  %v2048_v8 = vpop.f32.mrf.mxu1  ;;  %6539 = vmatmul.msk.f32.gmra.mxu1 %vm875_vm0, %v12176_v25  ;;  %v12179_v23 = vld [vmem:[#allocation40_spill] sm:$0xff] }
 0x2be   : > { %v1617_v48 = vpop.f32.mrf.mxu2  ;;  %v1110_v43 = vadd.f32 %v7616_v24, %v12179_v23  ;;  %v12187_v23 = vld [vmem:[#allocation22_spill] sm:$0xff] }
 0x2bf   : > { %v8269_v18 = vmax.f32 %v2169_v11, 0.0  ;;  %v1618_v20 = vadd.f32 %v8046_v29, %v1617_v48  ;;  %v1113_v11 = vadd.f32 %v7616_v24, %v12183_v62  ;;  %v12190_v62 = vld [vmem:[#allocation36_spill] sm:$0xff] }
 0x2c0   : > { %v1774_v27 = vpop.f32.mrf.mxu3  ;;  %v1361_v39 = vadd.f32 %v12181_v36, %v1110_v43  ;;  %v12188_v43 = vld [vmem:[#allocation33_spill] sm:$0xff] }
 0x2c1   : > { %12175 = vst [vmem:[#allocation3_spill] sm:$0xff] %v8269_v18  ;;  %v1908_v13 = vadd.f32 %v1774_v27, %v1618_v20  ;;  %6608 = vmatmul.msk.f32.gmra.mxu0 %vm1440_vm1, %v8269_v18  ;;  %v2043_v20 = vadd.f32 %v8057_v17, %v8248_v33  ;;  %v12184_v27 = vld [vmem:[#allocation19_spill] sm:$0xff]  ;;  %v1116_v33 = vadd.f32 %v7616_v24, %v7917_v55 }
 0x2c2   : > { %v1409_v51 = vmax.f32 %v1361_v39, 0.0 }
 0x2c3   : > { %v1956_v35 = vmax.f32 %v1908_v13, 0.0  ;;  %6434 = vmatmul.msk.f32.gmra.mxu2 %vm1440_vm1, %v1407_v32  ;;  %v1362_v13 = vadd.f32 %v12185_v54, %v1113_v11 }
 0x2c5   : > { %v2170_v38 = vadd.f32 %v2037_v1, %v1956_v35  ;;  %6480 = vmatmul.msk.f32.gmra.mxu3 %vm1440_vm1, %v1405_v21  ;;  %v2051_v21 = vpop.f32.mrf.mxu1  ;;  %6540 = vmatmul.msk.f32.gmra.mxu1 %vm875_vm0, %v12180_v49 }
 0x2c6   : > { %v1620_v63 = vpop.f32.mrf.mxu2 }
 0x2c7   : > { %v8285_v9 = vmax.f32 %v2170_v38, 0.0  ;;  %v1621_v40 = vadd.f32 %v8046_v29, %v1620_v63  ;;  %v1410_v38 = vmax.f32 %v1362_v13, 0.0 }
 0x2c8   : > { %v1777_v44 = vpop.f32.mrf.mxu3 }
 0x2c9   : > { %12178 = vst [vmem:[#allocation7_spill] sm:$0xff] %v8285_v9  ;;  %v1909_v6 = vadd.f32 %v1777_v44, %v1621_v40  ;;  %6609 = vmatmul.msk.f32.gmra.mxu0 %vm1440_vm1, %v8285_v9  ;;  %v2046_v40 = vadd.f32 %v8057_v17, %v8263_v53  ;;  %v1119_v53 = vadd.f32 %v7616_v24, %v7928_v2 }
 0x2cb   : > { %v1957_v31 = vmax.f32 %v1909_v6, 0.0  ;;  %6435 = vmatmul.msk.f32.gmra.mxu2 %vm1440_vm1, %v1408_v28  ;;  %v1363_v6 = vadd.f32 %v12188_v43, %v1116_v33  ;;  %v1364_v11 = vadd.f32 %v12190_v62, %v1119_v53  ;;  %v12194_v33 = vld [vmem:[#allocation38_spill] sm:$0xff]  ;;  %v12195_v53 = vld [vmem:[#allocation31_spill] sm:$0xff] }
 0x2cd   : > { %v2171_v56 = vadd.f32 %v2040_v46, %v1957_v31  ;;  %6481 = vmatmul.msk.f32.gmra.mxu3 %vm1440_vm1, %v1406_v42  ;;  %v2054_v42 = vpop.f32.mrf.mxu1  ;;  %6541 = vmatmul.msk.f32.gmra.mxu1 %vm875_vm0, %v12184_v27  ;;  %v1411_v39 = vmax.f32 %v1363_v6, 0.0  ;;  %v1412_v54 = vmax.f32 %v1364_v11, 0.0 }
 0x2ce   : > { %v1623_v30 = vpop.f32.mrf.mxu2 }
 0x2cf   : > { %v8299_v59 = vmax.f32 %v2171_v56, 0.0  ;;  %v1624_v16 = vadd.f32 %v8046_v29, %v1623_v30  ;;  %v2049_v30 = vadd.f32 %v8057_v17, %v2048_v8  ;;  %v12192_v8 = vld [vmem:[#allocation49_spill] sm:$0xff] }
 0x2d0   : > { %v1780_v45 = vpop.f32.mrf.mxu3  ;;  %v1122_v13 = vadd.f32 %v7616_v24, %v12192_v8 }
 0x2d1   : > { %12182 = vst [vmem:[#allocation20_spill] sm:$0xff] %v8299_v59  ;;  %v1910_v48 = vadd.f32 %v1780_v45, %v1624_v16  ;;  %6610 = vmatmul.msk.f32.gmra.mxu0 %vm1440_vm1, %v8299_v59  ;;  %v12189_v45 = vld [vmem:[#allocation25_spill] sm:$0xff] }
 0x2d3   : > { %v1958_v26 = vmax.f32 %v1910_v48, 0.0  ;;  %6436 = vmatmul.msk.f32.gmra.mxu2 %vm1440_vm1, %v1409_v51 }
 0x2d5   : > { %v2172_v1 = vadd.f32 %v2043_v20, %v1958_v26  ;;  %6482 = vmatmul.msk.f32.gmra.mxu3 %vm1440_vm1, %v1407_v32  ;;  %v2057_v32 = vpop.f32.mrf.mxu1  ;;  %6542 = vmatmul.msk.f32.gmra.mxu1 %vm875_vm0, %v12187_v23 }
 0x2d6   : > { %v1626_v35 = vpop.f32.mrf.mxu2 }
 0x2d7   : > { %v8313_v25 = vmax.f32 %v2172_v1, 0.0  ;;  %v1627_v37 = vadd.f32 %v8046_v29, %v1626_v35  ;;  %v2052_v35 = vadd.f32 %v8057_v17, %v2051_v21  ;;  %v8359_v21 = vld [vmem:[%s12074_s0] ss:$0 sm:$0xff]  ;;  %s7076_s0 = sshll.u32 %s12586_s30, 4 }
 0x2d8   : > { %v1783_v60 = vpop.f32.mrf.mxu3  ;;  %s820_s5 = scalar_lea.vmem %s11816_s27, %s7076_s0 }
 0x2d9   : > { %12186 = vst [vmem:[#allocation4_spill] sm:$0xff] %v8313_v25  ;;  %v1911_v63 = vadd.f32 %v1783_v60, %v1627_v37  ;;  %6611 = vmatmul.msk.f32.gmra.mxu0 %vm1440_vm1, %v8313_v25  ;;  %v12193_v60 = vld [vmem:[#allocation28_spill] sm:$0xff] }
 0x2db   : > { %v1959_v44 = vmax.f32 %v1911_v63, 0.0  ;;  %6437 = vmatmul.msk.f32.gmra.mxu2 %vm1440_vm1, %v1410_v38  ;;  %v1365_v63 = vadd.f32 %v12194_v33, %v1122_v13  ;;  %v12198_v13 = vld [vmem:[#allocation34_spill] sm:$0xff] }
 0x2dd   : > { %v2173_v46 = vadd.f32 %v2046_v40, %v1959_v44  ;;  %6483 = vmatmul.msk.f32.gmra.mxu3 %vm1440_vm1, %v1408_v28  ;;  %v2060_v28 = vpop.f32.mrf.mxu1  ;;  %6543 = vmatmul.msk.f32.gmra.mxu1 %vm875_vm0, %v12189_v45  ;;  %v1413_v6 = vmax.f32 %v1365_v63, 0.0 }
 0x2de   : > { %v1629_v55 = vpop.f32.mrf.mxu2 }
 0x2df   : > { %v8327_v31 = vmax.f32 %v2173_v46, 0.0  ;;  %v1630_v49 = vadd.f32 %v8046_v29, %v1629_v55  ;;  %v1125_v46 = vadd.f32 %v8359_v21, %v7944_v19 }
 0x2e0   : > { %v1786_v36 = vpop.f32.mrf.mxu3 }
 0x2e1   : > { %v1912_v56 = vadd.f32 %v1786_v36, %v1630_v49  ;;  %6612 = vmatmul.msk.f32.gmra.mxu0 %vm1440_vm1, %v8327_v31 }
 0x2e3   : > { %v1960_v16 = vmax.f32 %v1912_v56, 0.0  ;;  %6438 = vmatmul.msk.f32.gmra.mxu2 %vm1440_vm1, %v1411_v39  ;;  %v12196_v56 = vld [vmem:[#allocation41_spill] sm:$0xff] }
 0x2e5   : > { %v2174_v48 = vadd.f32 %v2049_v30, %v1960_v16  ;;  %6484 = vmatmul.msk.f32.gmra.mxu3 %vm1440_vm1, %v1409_v51  ;;  %v2063_v51 = vpop.f32.mrf.mxu1  ;;  %6544 = vmatmul.msk.f32.gmra.mxu1 %vm875_vm0, %v12193_v60  ;;  %v1366_v30 = vadd.f32 %v12196_v56, %v1125_v46 }
 0x2e6   : > { %v1632_v20 = vpop.f32.mrf.mxu2 }
 0x2e7   : > { %v8340_v2 = vmax.f32 %v2174_v48, 0.0  ;;  %v1633_v26 = vadd.f32 %v8046_v29, %v1632_v20  ;;  %v1414_v48 = vmax.f32 %v1366_v30, 0.0 }
 0x2e8   : > { %v1789_v27 = vpop.f32.mrf.mxu3 }
 0x2e9   : > { %12191 = vst [vmem:[#allocation9_spill] sm:$0xff] %v8340_v2  ;;  %v1913_v1 = vadd.f32 %v1789_v27, %v1633_v26  ;;  %6613 = vmatmul.msk.f32.gmra.mxu0 %vm1440_vm1, %v8340_v2  ;;  %v2058_v27 = vadd.f32 %v8057_v17, %v2057_v32  ;;  %v1131_v32 = vadd.f32 %v8359_v21, %v7963_v61 }
 0x2eb   : > { %v1961_v37 = vmax.f32 %v1913_v1, 0.0  ;;  %6439 = vmatmul.msk.f32.gmra.mxu2 %vm1440_vm1, %v1412_v54  ;;  %v12199_v1 = vld [vmem:[#allocation44_spill] sm:$0xff] }
 0x2ed   : > { %v2175_v40 = vadd.f32 %v2052_v35, %v1961_v37  ;;  %6485 = vmatmul.msk.f32.gmra.mxu3 %vm1440_vm1, %v1410_v38  ;;  %v2055_v38 = vadd.f32 %v8057_v17, %v2054_v42  ;;  %v2066_v36 = vpop.f32.mrf.mxu1  ;;  %6545 = vmatmul.msk.f32.gmra.mxu1 %vm875_vm0, %v12195_v53  ;;  %v12197_v42 = vld [vmem:[#allocation52_spill] sm:$0xff] }
 0x2ee   : > { %v1635_v44 = vpop.f32.mrf.mxu2  ;;  %v1128_v20 = vadd.f32 %v8359_v21, %v12197_v42 }
 0x2ef   : > { %v8353_v24 = vmax.f32 %v2175_v40, 0.0  ;;  %v1636_v23 = vadd.f32 %v8046_v29, %v1635_v44 }
 0x2f0   : > { %v1792_v43 = vpop.f32.mrf.mxu3  ;;  %v1367_v35 = vadd.f32 %v12199_v1, %v1128_v20  ;;  %v12202_v20 = vld [vmem:[#allocation39_spill] sm:$0xff] }
 0x2f1   : > { %v1914_v55 = vadd.f32 %v1792_v43, %v1636_v23  ;;  %6614 = vmatmul.msk.f32.gmra.mxu0 %vm1440_vm1, %v8353_v24  ;;  %v2061_v43 = vadd.f32 %v8057_v17, %v2060_v28  ;;  %v1134_v28 = vadd.f32 %v8359_v21, %v7974_v58 }
 0x2f2   : > { %v1415_v44 = vmax.f32 %v1367_v35, 0.0 }
 0x2f3   : > { %v1962_v49 = vmax.f32 %v1914_v55, 0.0  ;;  %6440 = vmatmul.msk.f32.gmra.mxu2 %vm1440_vm1, %v1413_v6  ;;  %v12200_v55 = vld [vmem:[#allocation37_spill] sm:$0xff] }
 0x2f5   : > { %v2176_v16 = vadd.f32 %v2055_v38, %v1962_v49  ;;  %6486 = vmatmul.msk.f32.gmra.mxu3 %vm1440_vm1, %v1411_v39  ;;  %v2069_v39 = vpop.f32.mrf.mxu1  ;;  %6546 = vmatmul.msk.f32.gmra.mxu1 %vm875_vm0, %v12198_v13  ;;  %v12201_v38 = vld [vmem:[#allocation46_spill] sm:$0xff] }
 0x2f6   : > { %v1638_v45 = vpop.f32.mrf.mxu2  ;;  %v1368_v49 = vadd.f32 %v12201_v38, %v1131_v32  ;;  %v12204_v32 = vld [vmem:[#allocation42_spill] sm:$0xff] }
 0x2f7   : > { %v8371_v19 = vmax.f32 %v2176_v16, 0.0  ;;  %v1639_v62 = vadd.f32 %v8046_v29, %v1638_v45 }
 0x2f8   : > { %v1795_v11 = vpop.f32.mrf.mxu3  ;;  %v1416_v45 = vmax.f32 %v1368_v49, 0.0 }
 0x2f9   : > { %v1915_v26 = vadd.f32 %v1795_v11, %v1639_v62  ;;  %6615 = vmatmul.msk.f32.gmra.mxu0 %vm1440_vm1, %v8371_v19  ;;  %v2064_v11 = vadd.f32 %v8057_v17, %v2063_v51 }
 0x2fb   : > { %v1963_v8 = vmax.f32 %v1915_v26, 0.0  ;;  %6441 = vmatmul.msk.f32.gmra.mxu2 %vm1440_vm1, %v1414_v48  ;;  %v12203_v26 = vld [vmem:[#allocation48_spill] sm:$0xff] }
 0x2fd   : > { %v2177_v37 = vadd.f32 %v2058_v27, %v1963_v8  ;;  %6487 = vmatmul.msk.f32.gmra.mxu3 %vm1440_vm1, %v1412_v54  ;;  %v2072_v54 = vpop.f32.mrf.mxu1  ;;  %6547 = vmatmul.msk.f32.gmra.mxu1 %vm875_vm0, %v12200_v55  ;;  %v1369_v27 = vadd.f32 %v12203_v26, %v1134_v28 }
 0x2fe   : > { %v1641_v60 = vpop.f32.mrf.mxu2 }
 0x2ff   : > { %v8384_v33 = vmax.f32 %v2177_v37, 0.0  ;;  %v1642_v63 = vadd.f32 %v8046_v29, %v1641_v60  ;;  %v1417_v51 = vmax.f32 %v1369_v27, 0.0  ;;  %v1137_v37 = vadd.f32 %v8359_v21, %v7982_v4 }
 0x300   : > { %v1798_v40 = vpop.f32.mrf.mxu3 }
 0x301   : > { %v1916_v23 = vadd.f32 %v1798_v40, %v1642_v63  ;;  %6616 = vmatmul.msk.f32.gmra.mxu0 %vm1440_vm1, %v8384_v33  ;;  %v2067_v63 = vadd.f32 %v8057_v17, %v2066_v36 }
 0x303   : > { %v1964_v46 = vmax.f32 %v1916_v23, 0.0  ;;  %6442 = vmatmul.msk.f32.gmra.mxu2 %vm1440_vm1, %v1415_v44  ;;  %v12205_v23 = vld [vmem:[#allocation50_spill] sm:$0xff] }
 0x305   : > { %v2178_v53 = vadd.f32 %v2061_v43, %v1964_v46  ;;  %6488 = vmatmul.msk.f32.gmra.mxu3 %vm1440_vm1, %v1413_v6  ;;  %v8406_v6 = vpop.f32.mrf.mxu1  ;;  %6548 = vmatmul.msk.f32.gmra.mxu1 %vm875_vm0, %v12202_v20  ;;  %v1370_v43 = vadd.f32 %v12205_v23, %v1137_v37  ;;  %v12211_v23 = vld [vmem:[#allocation53_spill] sm:$0xff] }
 0x306   : > { %v1644_v56 = vpop.f32.mrf.mxu2 }
 0x307   : > { %v8397_v61 = vmax.f32 %v2178_v53, 0.0  ;;  %v1645_v30 = vadd.f32 %v8046_v29, %v1644_v56  ;;  %v1418_v36 = vmax.f32 %v1370_v43, 0.0  ;;  %v12206_v53 = vld [vmem:[#allocation59_spill] sm:$0xff] }
 0x308   : > { %v1801_v16 = vpop.f32.mrf.mxu3  ;;  %v1140_v56 = vadd.f32 %v8359_v21, %v12206_v53 }
 0x309   : > { %v1917_v62 = vadd.f32 %v1801_v16, %v1645_v30  ;;  %6617 = vmatmul.msk.f32.gmra.mxu0 %vm1440_vm1, %v8397_v61  ;;  %v2070_v16 = vadd.f32 %v8057_v17, %v2069_v39 }
 0x30b   : > { %v1965_v42 = vmax.f32 %v1917_v62, 0.0  ;;  %6443 = vmatmul.msk.f32.gmra.mxu2 %vm1440_vm1, %v1416_v45  ;;  %v12207_v62 = vld [vmem:[#allocation45_spill] sm:$0xff] }
 0x30d   : > { %v2179_v8 = vadd.f32 %v2064_v11, %v1965_v42  ;;  %6489 = vmatmul.msk.f32.gmra.mxu3 %vm1440_vm1, %v1414_v48  ;;  %v8421_v48 = vpop.f32.mrf.mxu1  ;;  %6549 = vmatmul.msk.f32.gmra.mxu1 %vm875_vm0, %v12204_v32  ;;  %v8440_v11 = vpop.f32.mrf.mxu0  ;;  %v12208_v42 = vld [vmem:[#allocation51_spill] sm:$0xff] }
 0x30e   : > { %v1647_v58 = vpop.f32.mrf.mxu2  ;;  %v1371_v20 = vadd.f32 %v12208_v42, %v1140_v56  ;;  %v12210_v32 = vld [vmem:[#allocation47_spill] sm:$0xff] }
 0x30f   : > { %v8412_v13 = vmax.f32 %v2179_v8, 0.0  ;;  %v1648_v1 = vadd.f32 %v8046_v29, %v1647_v58 }
 0x310   : > { %v1804_v35 = vpop.f32.mrf.mxu3 }
 0x311   : > { %v1918_v60 = vadd.f32 %v1804_v35, %v1648_v1  ;;  %6618 = vmatmul.msk.f32.gmra.mxu0 %vm1440_vm1, %v8412_v13  ;;  %v1419_v1 = vmax.f32 %v1371_v20, 0.0  ;;  %v12209_v35 = vld [vmem:[#allocation61_spill] sm:$0xff]  ;;  %v12213_v20 = vld [vmem:[#allocation54_spill] sm:$0xff] }
 0x312   : > { %v1143_v37 = vadd.f32 %v8359_v21, %v12209_v35 }
 0x313   : > { %v1966_v40 = vmax.f32 %v1918_v60, 0.0  ;;  %6444 = vmatmul.msk.f32.gmra.mxu2 %vm1440_vm1, %v1417_v51 }
 0x314   : > { %v1372_v43 = vadd.f32 %v12211_v23, %v1143_v37 }
 0x315   : > { %v2180_v46 = vadd.f32 %v2067_v63, %v1966_v40  ;;  %6490 = vmatmul.msk.f32.gmra.mxu3 %vm1440_vm1, %v1415_v44  ;;  %v8436_v44 = vpop.f32.mrf.mxu1  ;;  %6550 = vmatmul.msk.f32.gmra.mxu1 %vm875_vm0, %v12207_v62  ;;  %v2073_v63 = vadd.f32 %v8057_v17, %v2072_v54  ;;  %v2076_v62 = vadd.f32 %v8057_v17, %v8406_v6 }
 0x316   : > { %v1650_v4 = vpop.f32.mrf.mxu2  ;;  %v1420_v56 = vmax.f32 %v1372_v43, 0.0 }
 0x317   : > { %v8427_v55 = vmax.f32 %v2180_v46, 0.0  ;;  %v1651_v38 = vadd.f32 %v8046_v29, %v1650_v4  ;;  %v8459_v4 = vpop.f32.mrf.mxu0 }
 0x318   : > { %v1807_v49 = vpop.f32.mrf.mxu3 }
 0x319   : > { %v1919_v30 = vadd.f32 %v1807_v49, %v1651_v38  ;;  %6619 = vmatmul.msk.f32.gmra.mxu0 %vm1440_vm1, %v8427_v55 }
 0x31b   : > { %v1967_v28 = vmax.f32 %v1919_v30, 0.0  ;;  %6445 = vmatmul.msk.f32.gmra.mxu2 %vm1440_vm1, %v1418_v36  ;;  %v12212_v30 = vld [vmem:[#allocation63_spill] sm:$0xff] }
 0x31d   : > { %v2181_v26 = vadd.f32 %v2070_v16, %v1967_v28  ;;  %6491 = vmatmul.msk.f32.gmra.mxu3 %vm1440_vm1, %v1416_v45  ;;  %v8453_v45 = vpop.f32.mrf.mxu1  ;;  %6551 = vmatmul.msk.f32.gmra.mxu1 %vm875_vm0, %v12210_v32  ;;  %v1146_v16 = vadd.f32 %v8359_v21, %v12212_v30  ;;  %v12215_v32 = vld [vmem:[#allocation65_spill] sm:$0xff] }
 0x31e   : > { %v1653_v27 = vpop.f32.mrf.mxu2  ;;  %v1149_v23 = vadd.f32 %v8359_v21, %v12215_v32 }
 0x31f   : > { %v8444_v8 = vmax.f32 %v2181_v26, 0.0  ;;  %v1654_v39 = vadd.f32 %v8046_v29, %v1653_v27  ;;  %v12214_v26 = vld [vmem:[#allocation55_spill] sm:$0xff] }
 0x320   : > { %v1810_v58 = vpop.f32.mrf.mxu3  ;;  %v1373_v27 = vadd.f32 %v12214_v26, %v1146_v16 }
 0x321   : > { %v1920_v60 = vadd.f32 %v1810_v58, %v1654_v39  ;;  %6620 = vmatmul.msk.f32.gmra.mxu0 %vm1440_vm1, %v8444_v8 }
 0x323   : > { %v1968_v40 = vmax.f32 %v1920_v60, 0.0  ;;  %6446 = vmatmul.msk.f32.gmra.mxu2 %vm1440_vm1, %v1419_v1  ;;  %v3133_v60 = vld [vmem:[%s12169_s1 + $0x8] sm:$0xff] }
 0x324   : > { %3148 = vmatpush.msrb.mxu0 %v3133_v60 }
 0x325   : > { %v2182_v46 = vadd.f32 %v2073_v63, %v1968_v40  ;;  %6492 = vmatmul.msk.f32.gmra.mxu3 %vm1440_vm1, %v1417_v51  ;;  %v8471_v42 = vpop.f32.mrf.mxu1  ;;  %6552 = vmatmul.msk.f32.gmra.mxu1 %vm875_vm0, %v12213_v20  ;;  %v1421_v40 = vmax.f32 %v1373_v27, 0.0  ;;  %v12218_v27 = vld [vmem:[#allocation67_spill] sm:$0xff] }
 0x326   : > { %v1656_v38 = vpop.f32.mrf.mxu2 }
 0x327   : > { %v8461_v49 = vmax.f32 %v2182_v46, 0.0  ;;  %v1657_v54 = vadd.f32 %v8046_v29, %v1656_v38 }
 0x328   : > { %v1813_v53 = vpop.f32.mrf.mxu3 }
 0x329   : > { %v1921_v28 = vadd.f32 %v1813_v53, %v1657_v54  ;;  %6621 = vmatmul.msk.f32.gmra.mxu0 %vm1440_vm1, %v8461_v49  ;;  %v12216_v54 = vld [vmem:[#allocation56_spill] sm:$0xff]  ;;  %v12217_v53 = vld [vmem:[#allocation57_spill] sm:$0xff] }
 0x32a   : > { %v1374_v30 = vadd.f32 %v12217_v53, %v1149_v23 }
 0x32b   : > { %v1969_v51 = vmax.f32 %v1921_v28, 0.0  ;;  %6447 = vmatmul.msk.f32.gmra.mxu2 %vm1440_vm1, %v1420_v56 }
 0x32c   : > { %v1422_v26 = vmax.f32 %v1374_v30, 0.0 }
 0x32d   : > { %v2183_v39 = vadd.f32 %v2076_v62, %v1969_v51  ;;  %6493 = vmatmul.msk.f32.gmra.mxu3 %vm1440_vm1, %v1418_v36  ;;  %v2079_v36 = vadd.f32 %v8057_v17, %v8421_v48  ;;  %v2090_v38 = vpop.f32.mrf.mxu1  ;;  %6553 = vmatmul.msk.f32.gmra.mxu1 %vm875_vm0, %v12216_v54 }
 0x32e   : > { %v1659_v58 = vpop.f32.mrf.mxu2  ;;  %v8477_v35 = vpop.f32.mrf.mxu0 }
 0x32f   : > { %v8479_v37 = vmax.f32 %v2183_v39, 0.0  ;;  %v1660_v6 = vadd.f32 %v8046_v29, %v1659_v58  ;;  %v1152_v39 = vadd.f32 %v8359_v21, %v12218_v27  ;;  %v12222_v27 = vld [vmem:[#allocation60_spill] sm:$0xff] }
 0x330   : > { %v1816_v63 = vpop.f32.mrf.mxu3 }
 0x331   : > { %v1922_v43 = vadd.f32 %v1816_v63, %v1660_v6  ;;  %6622 = vmatmul.msk.f32.gmra.mxu0 %vm1440_vm1, %v8479_v37  ;;  %v2082_v6 = vadd.f32 %v8057_v17, %v8436_v44  ;;  %v12219_v63 = vld [vmem:[#allocation58_spill] sm:$0xff]  ;;  %v12221_v44 = vld [vmem:[#allocation68_spill] sm:$0xff] }
 0x332   : > { %v1375_v32 = vadd.f32 %v12219_v63, %v1152_v39 }
 0x333   : > { %v1970_v46 = vmax.f32 %v1922_v43, 0.0  ;;  %6448 = vmatmul.msk.f32.gmra.mxu2 %vm1440_vm1, %v1421_v40 }
 0x334   : > { %v1423_v30 = vmax.f32 %v1375_v32, 0.0 }
 0x335   : > { %v2184_v16 = vadd.f32 %v2079_v36, %v1970_v46  ;;  %6494 = vmatmul.msk.f32.gmra.mxu3 %vm1440_vm1, %v1419_v1  ;;  %v8508_v60 = vpop.f32.mrf.mxu1 }
 0x336   : > { %v1662_v28 = vpop.f32.mrf.mxu2  ;;  %v8496_v62 = vpop.f32.mrf.mxu0 }
 0x337   : > { %v8498_v51 = vmax.f32 %v2184_v16, 0.0  ;;  %v1663_v20 = vadd.f32 %v8046_v29, %v1662_v28  ;;  %v1155_v16 = vadd.f32 %v8359_v21, %v12221_v44  ;;  %v2088_v44 = vadd.f32 %v8057_v17, %v8471_v42 }
 0x338   : > { %v1819_v48 = vpop.f32.mrf.mxu3 }
 0x339   : > { %v1923_v58 = vadd.f32 %v1819_v48, %v1663_v20  ;;  %6623 = vmatmul.msk.f32.gmra.mxu0 %vm1440_vm1, %v8498_v51  ;;  %v2085_v20 = vadd.f32 %v8057_v17, %v8453_v45  ;;  %v1376_v39 = vadd.f32 %v12222_v27, %v1155_v16  ;;  %v12223_v45 = vld [vmem:[#allocation69_spill] sm:$0xff] }
 0x33b   : > { %v1971_v1 = vmax.f32 %v1923_v58, 0.0  ;;  %6449 = vmatmul.msk.f32.gmra.mxu2 %vm1440_vm1, %v1422_v26 }
 0x33d   : > { %v2185_v23 = vadd.f32 %v2082_v6, %v1971_v1  ;;  %6495 = vmatmul.msk.f32.gmra.mxu3 %vm1440_vm1, %v1420_v56  ;;  %v8524_v48 = vpop.f32.mrf.mxu1 }
 0x33e   : > { %v1665_v43 = vpop.f32.mrf.mxu2  ;;  %v8512_v36 = vpop.f32.mrf.mxu0 }
 0x33f   : > { %v8514_v46 = vmax.f32 %v2185_v23, 0.0  ;;  %v1666_v54 = vadd.f32 %v8046_v29, %v1665_v43  ;;  %v1424_v43 = vmax.f32 %v1376_v39, 0.0 }
 0x340   : > { %v1822_v53 = vpop.f32.mrf.mxu3 }
 0x341   : > { %12220 = vst [vmem:[#allocation23_spill] sm:$0xff] %v8514_v46  ;;  %v1924_v28 = vadd.f32 %v1822_v53, %v1666_v54  ;;  %6624 = vmatmul.msk.f32.gmra.mxu0 %vm1440_vm1, %v8514_v46  ;;  %v1158_v54 = vadd.f32 %v8359_v21, %v12223_v45  ;;  %v12225_v45 = vld [vmem:[#allocation70_spill] sm:$0xff] }
 0x342   : > { %v1161_v42 = vadd.f32 %v8359_v21, %v12225_v45  ;;  %v12227_v45 = vld [vmem:[#allocation71_spill] sm:$0xff] }
 0x343   : > { %v1972_v56 = vmax.f32 %v1924_v28, 0.0  ;;  %6450 = vmatmul.msk.f32.gmra.mxu2 %vm1440_vm1, %v1423_v30  ;;  %v12224_v28 = vld [vmem:[#allocation62_spill] sm:$0xff] }
 0x345   : > { %v2186_v58 = vadd.f32 %v2085_v20, %v1972_v56  ;;  %6496 = vmatmul.msk.f32.gmra.mxu3 %vm1440_vm1, %v1421_v40  ;;  %v2099_v16 = vpop.f32.mrf.mxu1  ;;  %v1377_v20 = vadd.f32 %v12224_v28, %v1158_v54  ;;  %v2091_v54 = vadd.f32 %v8057_v17, %v2090_v38 }
 0x346   : > { %v1668_v6 = vpop.f32.mrf.mxu2  ;;  %v8528_v1 = vpop.f32.mrf.mxu0 }
 0x347   : > { %v8530_v63 = vmax.f32 %v2186_v58, 0.0  ;;  %v1669_v32 = vadd.f32 %v8046_v29, %v1668_v6 }
 0x348   : > { %v1825_v23 = vpop.f32.mrf.mxu3 }
 0x349   : > { %v1925_v53 = vadd.f32 %v1825_v23, %v1669_v32  ;;  %6625 = vmatmul.msk.f32.gmra.mxu0 %vm1440_vm1, %v8530_v63  ;;  %v1425_v23 = vmax.f32 %v1377_v20, 0.0 }
 0x34b   : > { %v1973_v40 = vmax.f32 %v1925_v53, 0.0  ;;  %6451 = vmatmul.msk.f32.gmra.mxu2 %vm1440_vm1, %v1424_v43 }
 0x34d   : > { %v2187_v56 = vadd.f32 %v2088_v44, %v1973_v40  ;;  %6497 = vmatmul.msk.f32.gmra.mxu3 %vm1440_vm1, %v1422_v26  ;;  %v2102_v26 = vpop.f32.mrf.mxu1  ;;  %v12226_v40 = vld [vmem:[#allocation64_spill] sm:$0xff] }
 0x34e   : > { %v1671_v27 = vpop.f32.mrf.mxu2  ;;  %v8542_v39 = vpop.f32.mrf.mxu0  ;;  %v1378_v28 = vadd.f32 %v12226_v40, %v1161_v42  ;;  %v1164_v42 = vadd.f32 %v8359_v21, %v12227_v45 }
 0x34f   : > { %v8544_v58 = vmax.f32 %v2187_v56, 0.0  ;;  %v1672_v6 = vadd.f32 %v8046_v29, %v1671_v27 }
 0x350   : > { %v1828_v32 = vpop.f32.mrf.mxu3 }
 0x351   : > { %v1926_v53 = vadd.f32 %v1828_v32, %v1672_v6  ;;  %6626 = vmatmul.msk.f32.gmra.mxu0 %vm1440_vm1, %v8544_v58  ;;  %v8562_v6 = vld [vmem:[%s12146_s29] ss:$0 sm:$0xff]  ;;  %v1426_v32 = vmax.f32 %v1378_v28, 0.0 }
 0x352   : > { %v12228_v28 = vld [vmem:[#allocation66_spill] sm:$0xff] }
 0x353   : > { %v1974_v44 = vmax.f32 %v1926_v53, 0.0  ;;  %6452 = vmatmul.msk.f32.gmra.mxu2 %vm1440_vm1, %v1425_v23 }
 0x355   : > { %v2188_v56 = vadd.f32 %v2091_v54, %v1974_v44  ;;  %6498 = vmatmul.msk.f32.gmra.mxu3 %vm1440_vm1, %v1423_v30  ;;  %v8572_v30 = vld [vmem:[%s12147_s4] ss:$0 sm:$0xff]  ;;  %v2105_v40 = vpop.f32.mrf.mxu1 }
 0x356   : > { %v1674_v29 = vpop.f32.mrf.mxu2  ;;  %v8555_v20 = vpop.f32.mrf.mxu0  ;;  %v2094_v54 = vadd.f32 %v8572_v30, %v8508_v60  ;;  %v6648_v60 = vld [vmem:[%s12169_s1 + $0x10] sm:$0xff] }
 0x357   : > { %v8557_v27 = vmax.f32 %v2188_v56, 0.0  ;;  %v1675_v17 = vadd.f32 %v8562_v6, %v1674_v29  ;;  %v1379_v56 = vadd.f32 %v12228_v28, %v1164_v42  ;;  %2986 = vmatpush.msrb.mxu2 %v6648_v60 }
 0x358   : > { %v1831_v38 = vpop.f32.mrf.mxu3 }
 0x359   : > { %v1927_v53 = vadd.f32 %v1831_v38, %v1675_v17  ;;  %6627 = vmatmul.msk.f32.gmra.mxu0 %vm1440_vm1, %v8557_v27  ;;  %v1427_v10 = vmax.f32 %v1379_v56, 0.0 }
 0x35b   : > { %v1975_v44 = vmax.f32 %v1927_v53, 0.0  ;;  %6453 = vmatmul.msk.f32.gmra.mxu2 %vm1440_vm1, %v1426_v32 }
 0x35d   : > { %v2189_v29 = vadd.f32 %v2094_v54, %v1975_v44  ;;  %6499 = vmatmul.msk.f32.gmra.mxu3 %vm1440_vm1, %v1424_v43  ;;  %v2097_v43 = vadd.f32 %v8572_v30, %v8524_v48  ;;  %v2108_v54 = vpop.f32.mrf.mxu1 }
 0x35e   : > { %v1677_v21 = vpop.f32.mrf.mxu2  ;;  %v8579_v17 = vpop.f32.mrf.mxu0 }
 0x35f   : > { %v8581_v38 = vmax.f32 %v2189_v29, 0.0  ;;  %v1678_v45 = vadd.f32 %v8562_v6, %v1677_v21 }
 0x360   : > { %v1834_v53 = vpop.f32.mrf.mxu3 }
 0x361   : > { %v1928_v15 = vadd.f32 %v1834_v53, %v1678_v45  ;;  %6628 = vmatmul.msk.f32.gmra.mxu0 %vm1440_vm1, %v8581_v38 }
 0x363   : > { %v1976_v42 = vmax.f32 %v1928_v15, 0.0  ;;  %6454 = vmatmul.msk.f32.gmra.mxu2 %vm1440_vm1, %v1427_v10  ;;  %v2100_v15 = vadd.f32 %v8572_v30, %v2099_v16 }
 0x365   : > { %v2190_v44 = vadd.f32 %v2097_v43, %v1976_v42  ;;  %6500 = vmatmul.msk.f32.gmra.mxu3 %vm1440_vm1, %v1425_v23  ;;  %v2111_v53 = vpop.f32.mrf.mxu1 }
 0x366   : > { %v1680_v28 = vpop.f32.mrf.mxu2  ;;  %v8593_v29 = vpop.f32.mrf.mxu0 }
 0x367   : > { %12229 = vst [vmem:[#allocation5_spill] sm:$0xff] %v8593_v29  ;;  %v8595_v21 = vmax.f32 %v2190_v44, 0.0  ;;  %v1681_v56 = vadd.f32 %v8562_v6, %v1680_v28 }
 0x368   : > { %v1837_v45 = vpop.f32.mrf.mxu3 }
 0x369   : > { %v1929_v60 = vadd.f32 %v1837_v45, %v1681_v56  ;;  %6629 = vmatmul.msk.f32.gmra.mxu0 %vm1440_vm1, %v8595_v21  ;;  %v2103_v56 = vadd.f32 %v8572_v30, %v2102_v26 }
 0x36b   : > { %v1977_v48 = vmax.f32 %v1929_v60, 0.0 }
 0x36d   : > { %v2191_v14 = vadd.f32 %v2100_v15, %v1977_v48  ;;  %6501 = vmatmul.msk.f32.gmra.mxu3 %vm1440_vm1, %v1426_v32  ;;  %v2114_v60 = vpop.f32.mrf.mxu1 }
 0x36e   : > { %v1683_v23 = vpop.f32.mrf.mxu2  ;;  %v8602_v43 = vpop.f32.mrf.mxu0 }
 0x36f   : > { %v8604_v42 = vmax.f32 %v2191_v14, 0.0  ;;  %v1684_v44 = vadd.f32 %v8562_v6, %v1683_v23  ;;  %v3788_v23 = vld [vmem:[%s12232_s6 + $0x8] sm:$0xff] }
 0x370   : > { %v1840_v28 = vpop.f32.mrf.mxu3  ;;  %3803 = vmatpush.msrb.mxu3 %v3788_v23 }
 0x371   : > { %v1930_v29 = vadd.f32 %v1840_v28, %v1684_v44  ;;  %6630 = vmatmul.msk.f32.gmra.mxu0 %vm1440_vm1, %v8604_v42 }
 0x373   : > { %v1978_v16 = vmax.f32 %v1930_v29, 0.0 }
 0x375   : > { %v2192_v45 = vadd.f32 %v2103_v56, %v1978_v16  ;;  %6502 = vmatmul.msk.f32.gmra.mxu3 %vm1440_vm1, %v1427_v10  ;;  %v2106_v10 = vadd.f32 %v8572_v30, %v2105_v40  ;;  %v12233_v56 = vmax.f32 %v8061_v3, 0.0  ;;  %v2117_v23 = vpop.f32.mrf.mxu1  ;;  %v2109_v40 = vadd.f32 %v8572_v30, %v2108_v54  ;;  %v6743_v3 = vld [vmem:[%s12232_s6 + $0x18] sm:$0xff] }
 0x376   : > { %v1686_v32 = vpop.f32.mrf.mxu2  ;;  %v8611_v15 = vpop.f32.mrf.mxu0  ;;  %3640 = vmatpush.msra.mxu1 %v6743_v3 }
 0x377   : > { %12230 = vst [vmem:[#allocation11_spill] sm:$0xff] %v8611_v15  ;;  %v8613_v48 = vmax.f32 %v2192_v45, 0.0  ;;  %v1687_v14 = vadd.f32 %v8562_v6, %v1686_v32 }
 0x378   : > { %v1843_v44 = vpop.f32.mrf.mxu3 }
 0x379   : > { %12231 = vst [vmem:[#allocation26_spill] sm:$0xff] %v8613_v48  ;;  %v1931_v28 = vadd.f32 %v1843_v44, %v1687_v14  ;;  %6631 = vmatmul.msk.f32.gmra.mxu0 %vm1440_vm1, %v8613_v48 }
 0x37b   : > { %v1979_v26 = vmax.f32 %v1931_v28, 0.0 }
 0x37d   : > { %v2193_v29 = vadd.f32 %v2106_v10, %v1979_v26  ;;  %6503 = vmatmul.msk.f32.gmra.mxu3 %vm1440_vm1, %v12233_v56  ;;  %v12235_v26 = vmax.f32 %v8076_v7, 0.0  ;;  %v2120_v3 = vpop.f32.mrf.mxu1  ;;  %v12238_v7 = vmax.f32 %v8092_v22, 0.0 }
 0x37e   : > { %v1689_v16 = vpop.f32.mrf.mxu2  ;;  %v8625_v45 = vpop.f32.mrf.mxu0 }
 0x37f   : > { %v8627_v32 = vmax.f32 %v2193_v29, 0.0  ;;  %v1690_v15 = vadd.f32 %v8562_v6, %v1689_v16 }
 0x380   : > { %v1846_v14 = vpop.f32.mrf.mxu3 }
 0x381   : > { %12234 = vst [vmem:[#allocation6_spill] sm:$0xff] %v8627_v32  ;;  %v1932_v44 = vadd.f32 %v1846_v14, %v1690_v15  ;;  %6632 = vmatmul.msk.f32.gmra.mxu0 %vm1440_vm1, %v8627_v32 }
 0x383   : > { %v1980_v28 = vmax.f32 %v1932_v44, 0.0  ;;  %v2112_v44 = vadd.f32 %v8572_v30, %v2111_v53  ;;  %v2115_v53 = vadd.f32 %v8572_v30, %v2114_v60  ;;  %v2118_v60 = vadd.f32 %v8572_v30, %v2117_v23 }
 0x384   : > { %v2121_v23 = vadd.f32 %v8572_v30, %v2120_v3 }
 0x385   : > { %v2194_v10 = vadd.f32 %v2109_v40, %v1980_v28  ;;  %6504 = vmatmul.msk.f32.gmra.mxu3 %vm1440_vm1, %v12235_v26 }
 0x386   : > { %v1692_v29 = vpop.f32.mrf.mxu2  ;;  %v8639_v56 = vpop.f32.mrf.mxu0 }
 0x387   : > { %12236 = vst [vmem:[#allocation13_spill] sm:$0xff] %v8639_v56  ;;  %v8641_v15 = vmax.f32 %v2194_v10, 0.0  ;;  %v1693_v16 = vadd.f32 %v8562_v6, %v1692_v29 }
 0x388   : > { %v1849_v14 = vpop.f32.mrf.mxu3 }
 0x389   : > { %12237 = vst [vmem:[#allocation29_spill] sm:$0xff] %v8641_v15  ;;  %v1933_v54 = vadd.f32 %v1849_v14, %v1693_v16  ;;  %6633 = vmatmul.msk.f32.gmra.mxu0 %vm1440_vm1, %v8641_v15 }
 0x38b   : > { %v1981_v40 = vmax.f32 %v1933_v54, 0.0 }
 0x38d   : > { %v2195_v28 = vadd.f32 %v2112_v44, %v1981_v40  ;;  %6505 = vmatmul.msk.f32.gmra.mxu3 %vm1440_vm1, %v12238_v7  ;;  %v2123_v44 = vpop.f32.mrf.mxu1 }
 0x38e   : > { %v1695_v26 = vpop.f32.mrf.mxu2  ;;  %v8650_v56 = vpop.f32.mrf.mxu0  ;;  %v2124_v3 = vadd.f32 %v8572_v30, %v2123_v44 }
 0x38f   : > { %12239 = vst [vmem:[#allocation8_spill] sm:$0xff] %v8650_v56  ;;  %v8652_v10 = vmax.f32 %v2195_v28, 0.0  ;;  %v1696_v29 = vadd.f32 %v8562_v6, %v1695_v26 }
 0x390   : > { %v1852_v16 = vpop.f32.mrf.mxu3 }
 0x391   : > { %12240 = vst [vmem:[#allocation15_spill] sm:$0xff] %v8652_v10  ;;  %v1934_v14 = vadd.f32 %v1852_v16, %v1696_v29  ;;  %6634 = vmatmul.msk.f32.gmra.mxu0 %vm1440_vm1, %v8652_v10 }
 0x393   : > { %v1982_v54 = vmax.f32 %v1934_v14, 0.0 }
 0x395   : > { %v2196_v40 = vadd.f32 %v2115_v53, %v1982_v54  ;;  %6556 = vmatmul.msk.f32.vlgmr.msra.gmra.mxu3 %vm1440_vm1, %v8066_v12  ;;  %v2126_v53 = vpop.f32.mrf.mxu1 }
 0x396   : > { %v1698_v22 = vpop.f32.mrf.mxu2  ;;  %v8660_v7 = vpop.f32.mrf.mxu0 }
 0x397   : > { %12241 = vst [vmem:[#allocation32_spill] sm:$0xff] %v8660_v7  ;;  %v8662_v28 = vmax.f32 %v2196_v40, 0.0  ;;  %v1699_v26 = vadd.f32 %v8562_v6, %v1698_v22 }
 0x398   : > { %v1855_v56 = vpop.f32.mrf.mxu3 }
 0x399   : > { %12242 = vst [vmem:[#allocation10_spill] sm:$0xff] %v8662_v28  ;;  %v1935_v29 = vadd.f32 %v1855_v56, %v1699_v26  ;;  %6635 = vmatmul.msk.f32.gmra.mxu0 %vm1440_vm1, %v8662_v28 }
 0x39b   : > { %v1983_v16 = vmax.f32 %v1935_v29, 0.0 }
 0x39d   : > { %v2197_v14 = vadd.f32 %v2118_v60, %v1983_v16  ;;  %6557 = vmatmul.msk.f32.gmra.mxu3 %vm1440_vm1, %v8080_v5 }
 0x39e   : > { %v1701_v54 = vpop.f32.mrf.mxu2  ;;  %v8670_v12 = vpop.f32.mrf.mxu0 }
 0x39f   : > { %12243 = vst [vmem:[#allocation18_spill] sm:$0xff] %v8670_v12  ;;  %v8672_v40 = vmax.f32 %v2197_v14, 0.0  ;;  %v1702_v22 = vadd.f32 %v8562_v6, %v1701_v54  ;;  %v2129_v54 = vpop.f32.mrf.mxu1 }
 0x3a0   : > { %v1858_v7 = vpop.f32.mrf.mxu3 }
 0x3a1   : > { %12244 = vst [vmem:[#allocation35_spill] sm:$0xff] %v8672_v40  ;;  %v1936_v56 = vadd.f32 %v1858_v7, %v1702_v22  ;;  %6636 = vmatmul.msk.f32.gmra.mxu0 %vm1440_vm1, %v8672_v40 }
 0x3a3   : > { %v1984_v26 = vmax.f32 %v1936_v56, 0.0 }
 0x3a5   : > { %v2198_v29 = vadd.f32 %v2121_v23, %v1984_v26  ;;  %6558 = vmatmul.msk.f32.gmra.mxu3 %vm1440_vm1, %v8236_v57 }
 0x3a6   : > { %v1704_v60 = vpop.f32.mrf.mxu2  ;;  %v8680_v16 = vpop.f32.mrf.mxu0 }
 0x3a7   : > { %12245 = vst [vmem:[#allocation12_spill] sm:$0xff] %v8680_v16  ;;  %v8682_v12 = vmax.f32 %v2198_v29, 0.0  ;;  %v1705_v14 = vadd.f32 %v8562_v6, %v1704_v60  ;;  %v2132_v44 = vpop.f32.mrf.mxu1 }
 0x3a8   : > { %v1861_v5 = vpop.f32.mrf.mxu3 }
 0x3a9   : > { %12246 = vst [vmem:[#allocation21_spill] sm:$0xff] %v8682_v12  ;;  %v1937_v7 = vadd.f32 %v1861_v5, %v1705_v14  ;;  %6637 = vmatmul.msk.f32.gmra.mxu0 %vm1440_vm1, %v8682_v12  ;;  %v2127_v5 = vadd.f32 %v8572_v30, %v2126_v53  ;;  %v2130_v53 = vadd.f32 %v8572_v30, %v2129_v54 }
 0x3aa   : > { %v2133_v54 = vadd.f32 %v8572_v30, %v2132_v44 }
 0x3ab   : > { %v1985_v22 = vmax.f32 %v1937_v7, 0.0 }
 0x3ad   : > { %v2199_v56 = vadd.f32 %v2124_v3, %v1985_v22  ;;  %6559 = vmatmul.msk.f32.gmra.mxu3 %vm1440_vm1, %v8254_v47 }
 0x3ae   : > { %v1707_v23 = vpop.f32.mrf.mxu2  ;;  %v8690_v26 = vpop.f32.mrf.mxu0 }
 0x3af   : > { %12247 = vst [vmem:[#allocation14_spill] sm:$0xff] %v8690_v26  ;;  %v8692_v29 = vmax.f32 %v2199_v56, 0.0  ;;  %v1708_v60 = vadd.f32 %v8562_v6, %v1707_v23 }
 0x3b0   : > { %v1864_v16 = vpop.f32.mrf.mxu3 }
 0x3b1   : > { %12248 = vst [vmem:[#allocation24_spill] sm:$0xff] %v8692_v29  ;;  %v1938_v57 = vadd.f32 %v1864_v16, %v1708_v60  ;;  %6638 = vmatmul.msk.f32.gmra.mxu0 %vm1440_vm1, %v8692_v29 }
 0x3b3   : > { %v1986_v14 = vmax.f32 %v1938_v57, 0.0  ;;  %v2135_v57 = vpop.f32.mrf.mxu1 }
 0x3b4   : > { %v2136_v44 = vadd.f32 %v8572_v30, %v2135_v57 }
 0x3b5   : > { %v2200_v7 = vadd.f32 %v2127_v5, %v1986_v14  ;;  %6560 = vmatmul.msk.f32.gmra.mxu3 %vm1440_vm1, %v8269_v18 }
 0x3b6   : > { %v1710_v3 = vpop.f32.mrf.mxu2  ;;  %v8700_v22 = vpop.f32.mrf.mxu0 }
 0x3b7   : > { %12249 = vst [vmem:[#allocation40_spill] sm:$0xff] %v8700_v22  ;;  %v8702_v56 = vmax.f32 %v2200_v7, 0.0  ;;  %v1711_v23 = vadd.f32 %v8562_v6, %v1710_v3 }
 0x3b8   : > { %v1867_v26 = vpop.f32.mrf.mxu3 }
 0x3b9   : > { %12250 = vst [vmem:[#allocation16_spill] sm:$0xff] %v8702_v56  ;;  %v1939_v16 = vadd.f32 %v1867_v26, %v1711_v23  ;;  %6639 = vmatmul.msk.f32.gmra.mxu0 %vm1440_vm1, %v8702_v56 }
 0x3bb   : > { %v1987_v60 = vmax.f32 %v1939_v16, 0.0 }
 0x3bd   : > { %v2201_v5 = vadd.f32 %v2130_v53, %v1987_v60  ;;  %6561 = vmatmul.msk.f32.gmra.mxu3 %vm1440_vm1, %v8285_v9  ;;  %v2138_v53 = vpop.f32.mrf.mxu1 }
 0x3be   : > { %v1713_v14 = vpop.f32.mrf.mxu2  ;;  %v8710_v18 = vpop.f32.mrf.mxu0  ;;  %v2139_v57 = vadd.f32 %v8572_v30, %v2138_v53 }
 0x3bf   : > { %12251 = vst [vmem:[#allocation27_spill] sm:$0xff] %v8710_v18  ;;  %v8712_v7 = vmax.f32 %v2201_v5, 0.0  ;;  %v1714_v3 = vadd.f32 %v8562_v6, %v1713_v14 }
 0x3c0   : > { %v1870_v22 = vpop.f32.mrf.mxu3 }
 0x3c1   : > { %12252 = vst [vmem:[#allocation43_spill] sm:$0xff] %v8712_v7  ;;  %v1940_v26 = vadd.f32 %v1870_v22, %v1714_v3  ;;  %6640 = vmatmul.msk.f32.gmra.mxu0 %vm1440_vm1, %v8712_v7 }
 0x3c3   : > { %v1988_v23 = vmax.f32 %v1940_v26, 0.0 }
 0x3c5   : > { %v2202_v16 = vadd.f32 %v2133_v54, %v1988_v23  ;;  %6562 = vmatmul.msk.f32.gmra.mxu3 %vm1440_vm1, %v8299_v59  ;;  %v2141_v59 = vpop.f32.mrf.mxu1 }
 0x3c6   : > { %v1716_v60 = vpop.f32.mrf.mxu2  ;;  %v8720_v9 = vpop.f32.mrf.mxu0 }
 0x3c7   : > { %12253 = vst [vmem:[#allocation19_spill] sm:$0xff] %v8720_v9  ;;  %v8722_v5 = vmax.f32 %v2202_v16, 0.0  ;;  %v1717_v14 = vadd.f32 %v8562_v6, %v1716_v60 }
 0x3c8   : > { %v1873_v18 = vpop.f32.mrf.mxu3 }
 0x3c9   : > { %12254 = vst [vmem:[#allocation30_spill] sm:$0xff] %v8722_v5  ;;  %v1941_v22 = vadd.f32 %v1873_v18, %v1717_v14  ;;  %6641 = vmatmul.msk.f32.gmra.mxu0 %vm1440_vm1, %v8722_v5 }
 0x3cb   : > { %v1989_v3 = vmax.f32 %v1941_v22, 0.0 }
 0x3cd   : > { %v2203_v26 = vadd.f32 %v2136_v44, %v1989_v3  ;;  %6563 = vmatmul.msk.f32.gmra.mxu3 %vm1440_vm1, %v8313_v25  ;;  %v2144_v53 = vpop.f32.mrf.mxu1 }
 0x3ce   : > { %v1719_v54 = vpop.f32.mrf.mxu2  ;;  %v8730_v23 = vpop.f32.mrf.mxu0 }
 0x3cf   : > { %12255 = vst [vmem:[#allocation22_spill] sm:$0xff] %v8730_v23  ;;  %v8732_v9 = vmax.f32 %v2203_v26, 0.0  ;;  %v1720_v16 = vadd.f32 %v8562_v6, %v1719_v54 }
 0x3d0   : > { %v1876_v60 = vpop.f32.mrf.mxu3 }
 0x3d1   : > { %12256 = vst [vmem:[#allocation33_spill] sm:$0xff] %v8732_v9  ;;  %v1942_v18 = vadd.f32 %v1876_v60, %v1720_v16  ;;  %6642 = vmatmul.msk.f32.gmra.mxu0 %vm1440_vm1, %v8732_v9  ;;  %v2142_v16 = vadd.f32 %v8572_v30, %v2141_v59 }
 0x3d3   : > { %v1990_v14 = vmax.f32 %v1942_v18, 0.0 }
 0x3d5   : > { %v2204_v22 = vadd.f32 %v2139_v57, %v1990_v14  ;;  %6564 = vmatmul.msk.f32.gmra.mxu3 %vm1440_vm1, %v8327_v31 }
 0x3d6   : > { %v1722_v44 = vpop.f32.mrf.mxu2  ;;  %v8740_v3 = vpop.f32.mrf.mxu0 }
 0x3d7   : > { %12257 = vst [vmem:[#allocation25_spill] sm:$0xff] %v8740_v3  ;;  %v8742_v26 = vmax.f32 %v2204_v22, 0.0  ;;  %v1723_v54 = vadd.f32 %v8562_v6, %v1722_v44 }
 0x3d8   : > { %v1879_v23 = vpop.f32.mrf.mxu3 }
 0x3d9   : > { %12258 = vst [vmem:[#allocation36_spill] sm:$0xff] %v8742_v26  ;;  %v1943_v25 = vadd.f32 %v1879_v23, %v1723_v54  ;;  %6643 = vmatmul.msk.f32.gmra.mxu0 %vm1440_vm1, %v8742_v26  ;;  %v3132_v23 = vld [vmem:[%s12169_s1] sm:$0xff] }
 0x3da   : > { %3149 = vmatpush.msrb.mxu0 %v3132_v23 }
 0x3db   : > { %v1991_v60 = vmax.f32 %v1943_v25, 0.0  ;;  %v2145_v25 = vadd.f32 %v8572_v30, %v2144_v53 }
 0x3dd   : > { %v2205_v18 = vadd.f32 %v2142_v16, %v1991_v60  ;;  %6565 = vmatmul.msk.f32.gmra.mxu3 %vm1440_vm1, %v8340_v2  ;;  %v2147_v60 = vpop.f32.mrf.mxu1 }
 0x3de   : > { %v1725_v57 = vpop.f32.mrf.mxu2  ;;  %v8750_v14 = vpop.f32.mrf.mxu0  ;;  %v2148_v53 = vadd.f32 %v8572_v30, %v2147_v60 }
 0x3df   : > { %12259 = vst [vmem:[#allocation49_spill] sm:$0xff] %v8750_v14  ;;  %v8752_v22 = vmax.f32 %v2205_v18, 0.0  ;;  %v1726_v44 = vadd.f32 %v8562_v6, %v1725_v57 }
 0x3e0   : > { %v1882_v54 = vpop.f32.mrf.mxu3 }
 0x3e1   : > { %12260 = vst [vmem:[#allocation28_spill] sm:$0xff] %v8752_v22  ;;  %v1944_v59 = vadd.f32 %v1882_v54, %v1726_v44  ;;  %6644 = vmatmul.msk.f32.gmra.mxu0 %vm1440_vm1, %v8752_v22 }
 0x3e3   : > { %v1992_v16 = vmax.f32 %v1944_v59, 0.0 }
 0x3e5   : > { %v2206_v3 = vadd.f32 %v2145_v25, %v1992_v16  ;;  %6566 = vmatmul.msk.f32.gmra.mxu3 %vm1440_vm1, %v8353_v24  ;;  %v2150_v16 = vpop.f32.mrf.mxu1 }
 0x3e6   : > { %v1728_v18 = vpop.f32.mrf.mxu2  ;;  %v8763_v57 = vpop.f32.mrf.mxu0  ;;  %v2151_v60 = vadd.f32 %v8572_v30, %v2150_v16  ;;  %v1738_v16 = vadd.f32 %v8562_v6, %v8198_v52  ;;  %v1744_v52 = vadd.f32 %v8562_v6, %v8216_v50 }
 0x3e7   : > { %12261 = vst [vmem:[#allocation38_spill] sm:$0xff] %v8763_v57  ;;  %v8765_v14 = vmax.f32 %v2206_v3, 0.0  ;;  %v1729_v2 = vadd.f32 %v8562_v6, %v1728_v18  ;;  %v1732_v3 = vadd.f32 %v8562_v6, %v8182_v0 }
 0x3e8   : > { %v1885_v23 = vpop.f32.mrf.mxu3 }
 0x3e9   : > { %12262 = vst [vmem:[#allocation31_spill] sm:$0xff] %v8765_v14  ;;  %v1945_v44 = vadd.f32 %v1885_v23, %v1729_v2  ;;  %6645 = vmatmul.msk.f32.gmra.mxu0 %vm1440_vm1, %v8765_v14 }
 0x3eb   : > { %v1993_v54 = vmax.f32 %v1945_v44, 0.0 }
 0x3ed   : > { %v2207_v59 = vadd.f32 %v2148_v53, %v1993_v54  ;;  %6567 = vmatmul.msk.f32.gmra.mxu3 %vm1440_vm1, %v8371_v19  ;;  %v1735_v54 = vadd.f32 %v8562_v6, %v8189_v34  ;;  %v1741_v34 = vadd.f32 %v8562_v6, %v8207_v41 }
 0x3ee   : > { %v8773_v25 = vpop.f32.mrf.mxu0 }
 0x3ef   : > { %12263 = vst [vmem:[#allocation41_spill] sm:$0xff] %v8773_v25  ;;  %v8777_v57 = vmax.f32 %v2207_v59, 0.0 }
 0x3f0   : > { %v1888_v18 = vpop.f32.mrf.mxu3 }
 0x3f1   : > { %12264 = vst [vmem:[#allocation52_spill] sm:$0xff] %v8777_v57  ;;  %v1946_v2 = vadd.f32 %v1888_v18, %v1732_v3  ;;  %6646 = vmatmul.msk.f32.gmra.mxu0 %vm1440_vm1, %v8777_v57 }
 0x3f3   : > { %v1994_v23 = vmax.f32 %v1946_v2, 0.0 }
 0x3f5   : > { %v2208_v44 = vadd.f32 %v2151_v60, %v1994_v23  ;;  %6568 = vmatmul.msk.f32.gmra.mxu3 %vm1440_vm1, %v8384_v33 }
 0x3f6   : > { %v8784_v53 = vpop.f32.mrf.mxu0 }
 0x3f7   : > { %v8788_v0 = vmax.f32 %v2208_v44, 0.0  ;;  %v6835_v44 = vld [vmem:[%s11802_s13 + $0x38] sm:$0xff] }
 0x3f8   : > { %v1891_v59 = vpop.f32.mrf.mxu3  ;;  %4188 = vmatpush.msra.mxu2 %v6835_v44 }
 0x3f9   : > { %12265 = vst [vmem:[#allocation34_spill] sm:$0xff] %v8788_v0  ;;  %v8790_v25 = vadd.f32 %v1891_v59, %v1735_v54  ;;  %6647 = vmatmul.msk.f32.gmra.mxu0 %vm1440_vm1, %v8788_v0 }
 0x3fd   : > { %6569 = vmatmul.msk.f32.gmra.mxu3 %vm1440_vm1, %v8397_v61 }
 0x3fe   : > { %v8796_v30 = vpop.f32.mrf.mxu0 }
 0x400   : > { %v1894_v3 = vpop.f32.mrf.mxu3 }
 0x401   : > { %v8800_v18 = vadd.f32 %v1894_v3, %v1738_v16  ;;  %v8826_v16 = vld [vmem:[%s12266_s9] ss:$0 sm:$0xff] }
 0x405   : > { %6570 = vmatmul.msk.f32.gmra.mxu3 %vm1440_vm1, %v8412_v13 }
 0x406   : > { %v8806_v2 = vpop.f32.mrf.mxu0 }
 0x408   : > { %v1897_v60 = vpop.f32.mrf.mxu3 }
 0x409   : > { %v8808_v23 = vadd.f32 %v1897_v60, %v1741_v34 }
 0x40d   : > { %6571 = vmatmul.msk.f32.gmra.mxu3 %vm1440_vm1, %v8427_v55 }
 0x40e   : > { %v8817_v59 = vpop.f32.mrf.mxu0 }
 0x410   : > { %v1900_v54 = vpop.f32.mrf.mxu3 }
 0x411   : > { %v8819_v41 = vadd.f32 %v1900_v54, %v1744_v52 }
 0x415   : > { %6572 = vmatmul.msk.f32.gmra.mxu3 %vm1440_vm1, %v8444_v8 }
 0x416   : > { %v8829_v60 = vpop.f32.mrf.mxu0 }
 0x417   : > { %12267 = vst [vmem:[#allocation44_spill] sm:$0xff] %v8829_v60 }
 0x418   : > { %v2429_v3 = vpop.f32.mrf.mxu3 }
 0x419   : > { %v2430_v34 = vadd.f32 %v8826_v16, %v2429_v3 }
 0x41b   : > { %v2772_v44 = vmax.f32 %v2430_v34, 0.0 }
 0x41d   : > { %6573 = vmatmul.msk.f32.gmra.mxu3 %vm1440_vm1, %v8461_v49  ;;  %6650 = vmatmul.msk.f32.vlgmr.msrb.gmra.mxu2 %vm1440_vm1, %v2772_v44 }
 0x41e   : > { %6698 = vmatmul.msk.f32.vlgmr.msrb.gmra.mxu0 %vm1440_vm1, %v2772_v44  ;;  %v8836_v54 = vpop.f32.mrf.mxu0 }
 0x41f   : > { %12268 = vst [vmem:[#allocation37_spill] sm:$0xff] %v8836_v54 }
 0x420   : > { %v2432_v50 = vpop.f32.mrf.mxu3 }
 0x421   : > { %v2433_v6 = vadd.f32 %v8826_v16, %v2432_v50 }
 0x423   : > { %v2773_v52 = vmax.f32 %v2433_v6, 0.0 }
 0x425   : > { %6574 = vmatmul.msk.f32.gmra.mxu3 %vm1440_vm1, %v8479_v37  ;;  %6651 = vmatmul.msk.f32.gmra.mxu2 %vm1440_vm1, %v2773_v52 }
 0x426   : > { %6699 = vmatmul.msk.f32.gmra.mxu0 %vm1440_vm1, %v2773_v52  ;;  %v8847_v44 = vpop.f32.mrf.mxu0  ;;  %v3787_v52 = vld [vmem:[%s12232_s6] sm:$0xff] }
 0x427   : > { %12269 = vst [vmem:[#allocation46_spill] sm:$0xff] %v8847_v44  ;;  %3804 = vmatpush.msrb.mxu3 %v3787_v52 }
 0x428   : > { %v2435_v3 = vpop.f32.mrf.mxu3 }
 0x429   : > { %v2436_v34 = vadd.f32 %v8826_v16, %v2435_v3 }
 0x42b   : > { %v2774_v60 = vmax.f32 %v2436_v34, 0.0 }
 0x42d   : > { %6575 = vmatmul.msk.f32.gmra.mxu3 %vm1440_vm1, %v8498_v51  ;;  %6652 = vmatmul.msk.f32.gmra.mxu2 %vm1440_vm1, %v2774_v60 }
 0x42e   : > { %6700 = vmatmul.msk.f32.gmra.mxu0 %vm1440_vm1, %v2774_v60  ;;  %v8857_v60 = vpop.f32.mrf.mxu0 }
 0x42f   : > { %12270 = vst [vmem:[#allocation39_spill] sm:$0xff] %v8857_v60 }
 0x430   : > { %v2438_v50 = vpop.f32.mrf.mxu3 }
 0x431   : > { %v2439_v6 = vadd.f32 %v8826_v16, %v2438_v50 }
 0x433   : > { %v2775_v54 = vmax.f32 %v2439_v6, 0.0 }
 0x435   : > { %6576 = vmatmul.msk.f32.gmra.mxu3 %vm1440_vm1, %v8514_v46  ;;  %6653 = vmatmul.msk.f32.gmra.mxu2 %vm1440_vm1, %v2775_v54 }
 0x436   : > { %6701 = vmatmul.msk.f32.gmra.mxu0 %vm1440_vm1, %v2775_v54  ;;  %v8866_v54 = vpop.f32.mrf.mxu0 }
 0x438   : > { %v2441_v3 = vpop.f32.mrf.mxu3 }
 0x439   : > { %v2442_v34 = vadd.f32 %v8826_v16, %v2441_v3 }
 0x43b   : > { %v2728_v50 = vadd.f32 %v8440_v11, %v2442_v34  ;;  %v6742_v11 = vld [vmem:[%s12232_s6 + $0x10] sm:$0xff] }
 0x43c   : > { %3641 = vmatpush.msra.mxu1 %v6742_v11 }
 0x43d   : > { %v2776_v6 = vmax.f32 %v2728_v50, 0.0  ;;  %6577 = vmatmul.msk.f32.gmra.mxu3 %vm1440_vm1, %v8530_v63 }
 0x43e   : > { %v8878_v50 = vpop.f32.mrf.mxu0 }
 0x43f   : > { %6654 = vmatmul.msk.f32.gmra.mxu2 %vm1440_vm1, %v2776_v6  ;;  %6702 = vmatmul.msk.f32.gmra.mxu0 %vm1440_vm1, %v2776_v6 }
 0x440   : > { %v2444_v46 = vpop.f32.mrf.mxu3 }
 0x441   : > { %v2445_v44 = vadd.f32 %v8826_v16, %v2444_v46 }
 0x443   : > { %v2729_v52 = vadd.f32 %v8459_v4, %v2445_v44 }
 0x445   : > { %v2777_v60 = vmax.f32 %v2729_v52, 0.0  ;;  %6578 = vmatmul.msk.f32.gmra.mxu3 %vm1440_vm1, %v8544_v58 }
 0x447   : > { %6655 = vmatmul.msk.f32.gmra.mxu2 %vm1440_vm1, %v2777_v60  ;;  %6703 = vmatmul.msk.f32.gmra.mxu0 %vm1440_vm1, %v2777_v60 }
 0x448   : > { %v2447_v3 = vpop.f32.mrf.mxu3 }
 0x449   : > { %v2448_v46 = vadd.f32 %v8826_v16, %v2447_v3 }
 0x44b   : > { %v2730_v34 = vadd.f32 %v8477_v35, %v2448_v46  ;;  %v8888_v35 = vpop.f32.mrf.mxu0 }
 0x44d   : > { %v2778_v4 = vmax.f32 %v2730_v34, 0.0  ;;  %6579 = vmatmul.msk.f32.gmra.mxu3 %vm1440_vm1, %v8557_v27 }
 0x44f   : > { %6656 = vmatmul.msk.f32.gmra.mxu2 %vm1440_vm1, %v2778_v4  ;;  %6704 = vmatmul.msk.f32.gmra.mxu0 %vm1440_vm1, %v2778_v4 }
 0x450   : > { %v2450_v44 = vpop.f32.mrf.mxu3 }
 0x451   : > { %v2451_v6 = vadd.f32 %v8826_v16, %v2450_v44 }
 0x453   : > { %v2731_v60 = vadd.f32 %v8496_v62, %v2451_v6  ;;  %v8898_v4 = vpop.f32.mrf.mxu0 }
 0x455   : > { %v2779_v52 = vmax.f32 %v2731_v60, 0.0  ;;  %6580 = vmatmul.msk.f32.gmra.mxu3 %vm1440_vm1, %v8581_v38 }
 0x457   : > { %6657 = vmatmul.msk.f32.gmra.mxu2 %vm1440_vm1, %v2779_v52  ;;  %6705 = vmatmul.msk.f32.gmra.mxu0 %vm1440_vm1, %v2779_v52 }
 0x458   : > { %v2453_v11 = vpop.f32.mrf.mxu3 }
 0x459   : > { %v2454_v3 = vadd.f32 %v8826_v16, %v2453_v11 }
 0x45b   : > { %v2732_v46 = vadd.f32 %v8512_v36, %v2454_v3  ;;  %v8907_v11 = vpop.f32.mrf.mxu0 }
 0x45d   : > { %v2780_v34 = vmax.f32 %v2732_v46, 0.0  ;;  %6581 = vmatmul.msk.f32.gmra.mxu3 %vm1440_vm1, %v8595_v21 }
 0x45f   : > { %6658 = vmatmul.msk.f32.gmra.mxu2 %vm1440_vm1, %v2780_v34  ;;  %6706 = vmatmul.msk.f32.gmra.mxu0 %vm1440_vm1, %v2780_v34 }
 0x460   : > { %v2456_v62 = vpop.f32.mrf.mxu3 }
 0x461   : > { %v2457_v44 = vadd.f32 %v8826_v16, %v2456_v62 }
 0x463   : > { %v2733_v6 = vadd.f32 %v8528_v1, %v2457_v44  ;;  %v6834_v1 = vld [vmem:[%s11802_s13 + $0x30] sm:$0xff] }
 0x464   : > { %4189 = vmatpush.msra.mxu2 %v6834_v1 }
 0x465   : > { %v2781_v60 = vmax.f32 %v2733_v6, 0.0  ;;  %6582 = vmatmul.msk.f32.gmra.mxu3 %vm1440_vm1, %v8604_v42  ;;  %v8919_v6 = vpop.f32.mrf.mxu0 }
 0x467   : > { %6659 = vmatmul.msk.f32.gmra.mxu2 %vm1440_vm1, %v2781_v60  ;;  %6707 = vmatmul.msk.f32.gmra.mxu0 %vm1440_vm1, %v2781_v60 }
 0x468   : > { %v2459_v36 = vpop.f32.mrf.mxu3 }
 0x469   : > { %v2460_v52 = vadd.f32 %v8826_v16, %v2459_v36 }
 0x46b   : > { %v2734_v3 = vadd.f32 %v8542_v39, %v2460_v52 }
 0x46d   : > { %v2782_v46 = vmax.f32 %v2734_v3, 0.0  ;;  %6583 = vmatmul.msk.f32.gmra.mxu3 %vm1440_vm1, %v8613_v48 }
 0x46f   : > { %6660 = vmatmul.msk.f32.gmra.mxu2 %vm1440_vm1, %v2782_v46  ;;  %6708 = vmatmul.msk.f32.gmra.mxu0 %vm1440_vm1, %v2782_v46 }
 0x470   : > { %v2462_v34 = vpop.f32.mrf.mxu3 }
 0x471   : > { %v2463_v62 = vadd.f32 %v8826_v16, %v2462_v34  ;;  %v12272_v34 = vld [vmem:[#allocation5_spill] sm:$0xff] }
 0x473   : > { %v2735_v44 = vadd.f32 %v8555_v20, %v2463_v62  ;;  %v8929_v20 = vpop.f32.mrf.mxu0 }
 0x474   : > { %12271 = vst [vmem:[#allocation48_spill] sm:$0xff] %v8929_v20 }
 0x475   : > { %v2783_v39 = vmax.f32 %v2735_v44, 0.0  ;;  %6584 = vmatmul.msk.f32.gmra.mxu3 %vm1440_vm1, %v8627_v32 }
 0x477   : > { %6661 = vmatmul.msk.f32.gmra.mxu2 %vm1440_vm1, %v2783_v39  ;;  %6709 = vmatmul.msk.f32.gmra.mxu0 %vm1440_vm1, %v2783_v39 }
 0x478   : > { %v2465_v60 = vpop.f32.mrf.mxu3 }
 0x479   : > { %v2466_v36 = vadd.f32 %v8826_v16, %v2465_v60 }
 0x47b   : > { %v2736_v52 = vadd.f32 %v8579_v17, %v2466_v36  ;;  %v8939_v39 = vpop.f32.mrf.mxu0 }
 0x47c   : > { %12273 = vst [vmem:[#allocation42_spill] sm:$0xff] %v8939_v39  ;;  %v12286_v39 = vld [vmem:[#allocation14_spill] sm:$0xff] }
 0x47d   : > { %v2784_v3 = vmax.f32 %v2736_v52, 0.0  ;;  %6585 = vmatmul.msk.f32.gmra.mxu3 %vm1440_vm1, %v8641_v15 }
 0x47f   : > { %6662 = vmatmul.msk.f32.gmra.mxu2 %vm1440_vm1, %v2784_v3  ;;  %6710 = vmatmul.msk.f32.gmra.mxu0 %vm1440_vm1, %v2784_v3 }
 0x480   : > { %v2468_v46 = vpop.f32.mrf.mxu3 }
 0x481   : > { %v2469_v1 = vadd.f32 %v8826_v16, %v2468_v46 }
 0x483   : > { %v2737_v62 = vadd.f32 %v12272_v34, %v2469_v1  ;;  %v8948_v1 = vpop.f32.mrf.mxu0  ;;  %v12275_v34 = vld [vmem:[#allocation11_spill] sm:$0xff] }
 0x484   : > { %12274 = vst [vmem:[#allocation50_spill] sm:$0xff] %v8948_v1 }
 0x485   : > { %v2785_v44 = vmax.f32 %v2737_v62, 0.0  ;;  %6586 = vmatmul.msk.f32.gmra.mxu3 %vm1440_vm1, %v8652_v10 }
 0x487   : > { %6663 = vmatmul.msk.f32.gmra.mxu2 %vm1440_vm1, %v2785_v44  ;;  %6711 = vmatmul.msk.f32.gmra.mxu0 %vm1440_vm1, %v2785_v44 }
 0x488   : > { %v2471_v17 = vpop.f32.mrf.mxu3 }
 0x489   : > { %v2472_v60 = vadd.f32 %v8826_v16, %v2471_v17 }
 0x48b   : > { %v2738_v36 = vadd.f32 %v8602_v43, %v2472_v60 }
 0x48d   : > { %v2786_v52 = vmax.f32 %v2738_v36, 0.0  ;;  %6587 = vmatmul.msk.f32.gmra.mxu3 %vm1440_vm1, %v8662_v28  ;;  %v12278_v28 = vld [vmem:[#allocation72_spill] sm:$0xff] }
 0x48f   : > { %6664 = vmatmul.msk.f32.gmra.mxu2 %vm1440_vm1, %v2786_v52  ;;  %6712 = vmatmul.msk.f32.gmra.mxu0 %vm1440_vm1, %v2786_v52 }
 0x490   : > { %v2474_v3 = vpop.f32.mrf.mxu3 }
 0x491   : > { %v2475_v46 = vadd.f32 %v8826_v16, %v2474_v3  ;;  %v8964_v3 = vld [vmem:[%s12276_s11] ss:$0 sm:$0xff] }
 0x493   : > { %v2739_v62 = vadd.f32 %v12275_v34, %v2475_v46  ;;  %v4575_v46 = vld [vmem:[%s11804_s15 + $0x8] sm:$0xff] }
 0x494   : > { %4594 = vmatpush.msra.mxu0 %v4575_v46 }
 0x495   : > { %v2787_v44 = vmax.f32 %v2739_v62, 0.0  ;;  %6588 = vmatmul.msk.f32.gmra.mxu3 %vm1440_vm1, %v8672_v40 }
 0x497   : > { %6665 = vmatmul.msk.f32.gmra.mxu2 %vm1440_vm1, %v2787_v44  ;;  %6713 = vmatmul.msk.f32.gmra.mxu0 %vm1440_vm1, %v2787_v44 }
 0x498   : > { %v2477_v43 = vpop.f32.mrf.mxu3 }
 0x499   : > { %v2478_v17 = vadd.f32 %v8826_v16, %v2477_v43  ;;  %v12277_v43 = vld [vmem:[#allocation13_spill] sm:$0xff] }
 0x49b   : > { %v2740_v60 = vadd.f32 %v8625_v45, %v2478_v17  ;;  %v8957_v36 = vpop.f32.mrf.mxu0 }
 0x49d   : > { %v2788_v52 = vmax.f32 %v2740_v60, 0.0  ;;  %6589 = vmatmul.msk.f32.gmra.mxu3 %vm1440_vm1, %v8682_v12 }
 0x49f   : > { %6666 = vmatmul.msk.f32.gmra.mxu2 %vm1440_vm1, %v2788_v52  ;;  %6714 = vmatmul.msk.f32.gmra.mxu0 %vm1440_vm1, %v2788_v52 }
 0x4a0   : > { %v2480_v45 = vpop.f32.mrf.mxu3  ;;  %v2988_v34 = vpop.f32.mrf.mxu2 }
 0x4a1   : > { %v2481_v62 = vadd.f32 %v8826_v16, %v2480_v45  ;;  %v2989_v44 = vadd.f32 %v8964_v3, %v2988_v34 }
 0x4a3   : > { %v2741_v17 = vadd.f32 %v12277_v43, %v2481_v62  ;;  %v3331_v60 = vmax.f32 %v2989_v44, 0.0  ;;  %v8974_v12 = vpop.f32.mrf.mxu0  ;;  %v12279_v44 = vld [vmem:[#allocation8_spill] sm:$0xff] }
 0x4a5   : > { %v2789_v40 = vmax.f32 %v2741_v17, 0.0  ;;  %v3379_v10 = vadd.f32 %v3331_v60, %v12278_v28  ;;  %6590 = vmatmul.msk.f32.gmra.mxu3 %vm1440_vm1, %v8692_v29  ;;  %v12280_v60 = vld [vmem:[#allocation73_spill] sm:$0xff] }
 0x4a7   : > { %v8979_v52 = vmax.f32 %v3379_v10, 0.0  ;;  %6667 = vmatmul.msk.f32.gmra.mxu2 %vm1440_vm1, %v2789_v40  ;;  %6715 = vmatmul.msk.f32.gmra.mxu0 %vm1440_vm1, %v2789_v40 }
 0x4a8   : > { %v2483_v46 = vpop.f32.mrf.mxu3  ;;  %v2991_v45 = vpop.f32.mrf.mxu2 }
 0x4a9   : > { %v2484_v34 = vadd.f32 %v8826_v16, %v2483_v46  ;;  %v2992_v62 = vadd.f32 %v8964_v3, %v2991_v45  ;;  %6744 = vmatmul.msk.f32.vlgmr.msra.gmra.mxu1 %vm1440_vm1, %v8979_v52 }
 0x4ab   : > { %v2742_v28 = vadd.f32 %v12279_v44, %v2484_v34  ;;  %v3332_v43 = vmax.f32 %v2992_v62, 0.0  ;;  %v8988_v17 = vpop.f32.mrf.mxu0  ;;  %v12281_v62 = vld [vmem:[#allocation32_spill] sm:$0xff] }
 0x4ad   : > { %v2790_v10 = vmax.f32 %v2742_v28, 0.0  ;;  %v3380_v29 = vadd.f32 %v3332_v43, %v12280_v60  ;;  %6591 = vmatmul.msk.f32.gmra.mxu3 %vm1440_vm1, %v8702_v56  ;;  %v12282_v60 = vld [vmem:[#allocation17_spill] sm:$0xff] }
 0x4af   : > { %v8993_v40 = vmax.f32 %v3380_v29, 0.0  ;;  %6668 = vmatmul.msk.f32.gmra.mxu2 %vm1440_vm1, %v2790_v10  ;;  %6716 = vmatmul.msk.f32.gmra.mxu0 %vm1440_vm1, %v2790_v10 }
 0x4b0   : > { %v2486_v46 = vpop.f32.mrf.mxu3  ;;  %v2994_v45 = vpop.f32.mrf.mxu2 }
 0x4b1   : > { %v2487_v1 = vadd.f32 %v8826_v16, %v2486_v46  ;;  %v2995_v34 = vadd.f32 %v8964_v3, %v2994_v45  ;;  %6745 = vmatmul.msk.f32.gmra.mxu1 %vm1440_vm1, %v8993_v40 }
 0x4b3   : > { %v2743_v44 = vadd.f32 %v12281_v62, %v2487_v1  ;;  %v3333_v28 = vmax.f32 %v2995_v34, 0.0  ;;  %v9002_v43 = vpop.f32.mrf.mxu0  ;;  %v12283_v34 = vld [vmem:[#allocation18_spill] sm:$0xff] }
 0x4b5   : > { %v2791_v29 = vmax.f32 %v2743_v44, 0.0  ;;  %v3381_v56 = vadd.f32 %v3333_v28, %v12282_v60  ;;  %6592 = vmatmul.msk.f32.gmra.mxu3 %vm1440_vm1, %v8712_v7 }
 0x4b7   : > { %v9007_v10 = vmax.f32 %v3381_v56, 0.0  ;;  %6669 = vmatmul.msk.f32.gmra.mxu2 %vm1440_vm1, %v2791_v29  ;;  %6717 = vmatmul.msk.f32.gmra.mxu0 %vm1440_vm1, %v2791_v29 }
 0x4b8   : > { %v2489_v46 = vpop.f32.mrf.mxu3  ;;  %v2997_v45 = vpop.f32.mrf.mxu2 }
 0x4b9   : > { %v2490_v15 = vadd.f32 %v8826_v16, %v2489_v46  ;;  %v2998_v1 = vadd.f32 %v8964_v3, %v2997_v45  ;;  %6746 = vmatmul.msk.f32.gmra.mxu1 %vm1440_vm1, %v9007_v10 }
 0x4bb   : > { %v2744_v62 = vadd.f32 %v12283_v34, %v2490_v15  ;;  %v3334_v44 = vmax.f32 %v2998_v1, 0.0  ;;  %v12284_v1 = vld [vmem:[#allocation12_spill] sm:$0xff] }
 0x4bc   : > { %v9016_v28 = vpop.f32.mrf.mxu0 }
 0x4bd   : > { %v2792_v56 = vmax.f32 %v2744_v62, 0.0  ;;  %v3382_v60 = vadd.f32 %v3334_v44, %v8254_v47  ;;  %6593 = vmatmul.msk.f32.gmra.mxu3 %vm1440_vm1, %v8722_v5  ;;  %v12285_v5 = vld [vmem:[#allocation3_spill] sm:$0xff] }
 0x4bf   : > { %v9021_v29 = vmax.f32 %v3382_v60, 0.0  ;;  %6670 = vmatmul.msk.f32.gmra.mxu2 %vm1440_vm1, %v2792_v56  ;;  %6718 = vmatmul.msk.f32.gmra.mxu0 %vm1440_vm1, %v2792_v56 }
 0x4c0   : > { %v2492_v46 = vpop.f32.mrf.mxu3 }
 0x4c1   : > { %v2493_v45 = vadd.f32 %v8826_v16, %v2492_v46  ;;  %6747 = vmatmul.msk.f32.gmra.mxu1 %vm1440_vm1, %v9021_v29 }
 0x4c2   : > { %v3000_v15 = vpop.f32.mrf.mxu2 }
 0x4c3   : > { %v2745_v34 = vadd.f32 %v12284_v1, %v2493_v45  ;;  %v3001_v47 = vadd.f32 %v8964_v3, %v3000_v15 }
 0x4c4   : > { %v9030_v62 = vpop.f32.mrf.mxu0 }
 0x4c5   : > { %v2793_v44 = vmax.f32 %v2745_v34, 0.0  ;;  %v3287_v60 = vadd.f32 %v8957_v36, %v3001_v47  ;;  %6594 = vmatmul.msk.f32.gmra.mxu3 %vm1440_vm1, %v8732_v9 }
 0x4c7   : > { %v3335_v56 = vmax.f32 %v3287_v60, 0.0  ;;  %6671 = vmatmul.msk.f32.gmra.mxu2 %vm1440_vm1, %v2793_v44  ;;  %6719 = vmatmul.msk.f32.gmra.mxu0 %vm1440_vm1, %v2793_v44  ;;  %v12287_v44 = vld [vmem:[#allocation7_spill] sm:$0xff] }
 0x4c8   : > { %v2495_v46 = vpop.f32.mrf.mxu3 }
 0x4c9   : > { %v3383_v7 = vadd.f32 %v3335_v56, %v12285_v5  ;;  %v2496_v45 = vadd.f32 %v8826_v16, %v2495_v46 }
 0x4ca   : > { %v3003_v1 = vpop.f32.mrf.mxu2 }
 0x4cb   : > { %v9039_v15 = vmax.f32 %v3383_v7, 0.0  ;;  %v2746_v34 = vadd.f32 %v12286_v39, %v2496_v45  ;;  %v3004_v36 = vadd.f32 %v8964_v3, %v3003_v1  ;;  %v6833_v7 = vld [vmem:[%s11802_s13 + $0x28] sm:$0xff] }
 0x4cc   : > { %v9043_v47 = vpop.f32.mrf.mxu0  ;;  %4190 = vmatpush.msra.mxu2 %v6833_v7  ;;  %v12288_v1 = vld [vmem:[#allocation40_spill] sm:$0xff] }
 0x4cd   : > { %v2794_v9 = vmax.f32 %v2746_v34, 0.0  ;;  %v3288_v60 = vadd.f32 %v8974_v12, %v3004_v36  ;;  %6595 = vmatmul.msk.f32.gmra.mxu3 %vm1440_vm1, %v8742_v26  ;;  %6748 = vmatmul.msk.f32.gmra.mxu1 %vm1440_vm1, %v9039_v15 }
 0x4cf   : > { %v3336_v5 = vmax.f32 %v3288_v60, 0.0  ;;  %6672 = vmatmul.msk.f32.gmra.mxu2 %vm1440_vm1, %v2794_v9  ;;  %6720 = vmatmul.msk.f32.gmra.mxu0 %vm1440_vm1, %v2794_v9 }
 0x4d0   : > { %v2498_v39 = vpop.f32.mrf.mxu3 }
 0x4d1   : > { %v3384_v56 = vadd.f32 %v3336_v5, %v12287_v44  ;;  %v2499_v12 = vadd.f32 %v8826_v16, %v2498_v39  ;;  %v12289_v39 = vld [vmem:[#allocation20_spill] sm:$0xff] }
 0x4d2   : > { %v3006_v46 = vpop.f32.mrf.mxu2 }
 0x4d3   : > { %v9057_v45 = vmax.f32 %v3384_v56, 0.0  ;;  %v2747_v34 = vadd.f32 %v12288_v1, %v2499_v12  ;;  %v3007_v36 = vadd.f32 %v8964_v3, %v3006_v46 }
 0x4d4   : > { %v9061_v26 = vpop.f32.mrf.mxu0 }
 0x4d5   : > { %v2795_v7 = vmax.f32 %v2747_v34, 0.0  ;;  %v3289_v60 = vadd.f32 %v8988_v17, %v3007_v36  ;;  %6596 = vmatmul.msk.f32.gmra.mxu3 %vm1440_vm1, %v8752_v22  ;;  %6749 = vmatmul.msk.f32.gmra.mxu1 %vm1440_vm1, %v9057_v45  ;;  %v12290_v17 = vld [vmem:[#allocation27_spill] sm:$0xff] }
 0x4d7   : > { %v3337_v9 = vmax.f32 %v3289_v60, 0.0  ;;  %6673 = vmatmul.msk.f32.gmra.mxu2 %vm1440_vm1, %v2795_v7  ;;  %6721 = vmatmul.msk.f32.gmra.mxu0 %vm1440_vm1, %v2795_v7 }
 0x4d8   : > { %v2501_v5 = vpop.f32.mrf.mxu3 }
 0x4d9   : > { %v3385_v44 = vadd.f32 %v3337_v9, %v12289_v39  ;;  %v2502_v56 = vadd.f32 %v8826_v16, %v2501_v5  ;;  %v2153_v5 = vpop.f32.mrf.mxu1  ;;  %v12291_v39 = vld [vmem:[#allocation4_spill] sm:$0xff] }
 0x4da   : > { %v3009_v12 = vpop.f32.mrf.mxu2 }
 0x4db   : > { %v9072_v46 = vmax.f32 %v3385_v44, 0.0  ;;  %v2748_v1 = vadd.f32 %v12290_v17, %v2502_v56  ;;  %v3010_v34 = vadd.f32 %v8964_v3, %v3009_v12 }
 0x4dc   : > { %v9076_v36 = vpop.f32.mrf.mxu0 }
 0x4dd   : > { %v2796_v22 = vmax.f32 %v2748_v1, 0.0  ;;  %v3290_v60 = vadd.f32 %v9002_v43, %v3010_v34  ;;  %6597 = vmatmul.msk.f32.gmra.mxu3 %vm1440_vm1, %v8765_v14  ;;  %6750 = vmatmul.msk.f32.gmra.mxu1 %vm1440_vm1, %v9072_v46  ;;  %v12292_v43 = vld [vmem:[#allocation19_spill] sm:$0xff] }
 0x4df   : > { %v3338_v7 = vmax.f32 %v3290_v60, 0.0  ;;  %6674 = vmatmul.msk.f32.gmra.mxu2 %vm1440_vm1, %v2796_v22  ;;  %6722 = vmatmul.msk.f32.gmra.mxu0 %vm1440_vm1, %v2796_v22 }
 0x4e0   : > { %v2504_v9 = vpop.f32.mrf.mxu3 }
 0x4e1   : > { %v3386_v44 = vadd.f32 %v3338_v7, %v12291_v39  ;;  %v2505_v56 = vadd.f32 %v8826_v16, %v2504_v9 }
 0x4e2   : > { %v3012_v12 = vpop.f32.mrf.mxu2 }
 0x4e3   : > { %v9087_v17 = vmax.f32 %v3386_v44, 0.0  ;;  %v2749_v1 = vadd.f32 %v12292_v43, %v2505_v56  ;;  %v3013_v34 = vadd.f32 %v8964_v3, %v3012_v12  ;;  %v1995_v44 = vmax.f32 %v8790_v25, 0.0  ;;  %v2156_v43 = vpop.f32.mrf.mxu1 }
 0x4e4   : > { %v9091_v14 = vpop.f32.mrf.mxu0 }
 0x4e5   : > { %v2797_v60 = vmax.f32 %v2749_v1, 0.0  ;;  %v3291_v32 = vadd.f32 %v9016_v28, %v3013_v34  ;;  %6598 = vmatmul.msk.f32.gmra.mxu3 %vm1440_vm1, %v8777_v57  ;;  %6751 = vmatmul.msk.f32.gmra.mxu1 %vm1440_vm1, %v9087_v17  ;;  %v7305_v28 = vld [vmem:[%s12147_s4] ss:$0 sm:$0xff] }
 0x4e6   : > { %v2154_v56 = vadd.f32 %v7305_v28, %v2153_v5 }
 0x4e7   : > { %v3339_v22 = vmax.f32 %v3291_v32, 0.0  ;;  %6675 = vmatmul.msk.f32.gmra.mxu2 %vm1440_vm1, %v2797_v60  ;;  %6723 = vmatmul.msk.f32.gmra.mxu0 %vm1440_vm1, %v2797_v60  ;;  %v12293_v32 = vld [vmem:[#allocation22_spill] sm:$0xff] }
 0x4e8   : > { %v2507_v7 = vpop.f32.mrf.mxu3  ;;  %v9117_v25 = vadd.f32 %v2154_v56, %v1995_v44  ;;  %v12295_v44 = vld [vmem:[#allocation25_spill] sm:$0xff] }
 0x4e9   : > { %v3387_v9 = vadd.f32 %v3339_v22, %v8327_v31  ;;  %v2508_v39 = vadd.f32 %v8826_v16, %v2507_v7 }
 0x4ea   : > { %v3015_v12 = vpop.f32.mrf.mxu2 }
 0x4eb   : > { %v9106_v1 = vmax.f32 %v3387_v9, 0.0  ;;  %v2750_v34 = vadd.f32 %v12293_v32, %v2508_v39  ;;  %v3016_v60 = vadd.f32 %v8964_v3, %v3015_v12  ;;  %v12294_v9 = vld [vmem:[#allocation9_spill] sm:$0xff]  ;;  %v2157_v32 = vadd.f32 %v7305_v28, %v2156_v43 }
 0x4ec   : > { %v9110_v57 = vpop.f32.mrf.mxu0 }
 0x4ed   : > { %v2798_v31 = vmax.f32 %v2750_v34, 0.0  ;;  %v3292_v22 = vadd.f32 %v9030_v62, %v3016_v60  ;;  %6599 = vmatmul.msk.f32.gmra.mxu3 %vm1440_vm1, %v8788_v0  ;;  %6752 = vmatmul.msk.f32.gmra.mxu1 %vm1440_vm1, %v9106_v1  ;;  %v11881_v62 = vmax.f32 %v9117_v25, 0.0  ;;  %v1996_v60 = vmax.f32 %v8800_v18, 0.0 }
 0x4ef   : > { %v3340_v5 = vmax.f32 %v3292_v22, 0.0  ;;  %6676 = vmatmul.msk.f32.gmra.mxu2 %vm1440_vm1, %v2798_v31  ;;  %6724 = vmatmul.msk.f32.gmra.mxu0 %vm1440_vm1, %v2798_v31  ;;  %v2159_v31 = vpop.f32.mrf.mxu1  ;;  %v9137_v18 = vadd.f32 %v2157_v32, %v1996_v60  ;;  %v12296_v32 = vld [vmem:[#allocation49_spill] sm:$0xff] }
 0x4f0   : > { %v2510_v7 = vpop.f32.mrf.mxu3 }
 0x4f1   : > { %v3388_v39 = vadd.f32 %v3340_v5, %v12294_v9  ;;  %v2511_v12 = vadd.f32 %v8826_v16, %v2510_v7 }
 0x4f2   : > { %v3018_v34 = vpop.f32.mrf.mxu2 }
 0x4f3   : > { %v9125_v0 = vmax.f32 %v3388_v39, 0.0  ;;  %v2751_v56 = vadd.f32 %v12295_v44, %v2511_v12  ;;  %v3019_v22 = vadd.f32 %v8964_v3, %v3018_v34  ;;  %v2160_v12 = vadd.f32 %v7305_v28, %v2159_v31 }
 0x4f4   : > { %v9129_v20 = vpop.f32.mrf.mxu0  ;;  %v11880_v44 = vmax.f32 %v9137_v18, 0.0 }
 0x4f5   : > { %v2799_v48 = vmax.f32 %v2751_v56, 0.0  ;;  %v3293_v5 = vadd.f32 %v9043_v47, %v3019_v22  ;;  %6600 = vmatmul.msk.f32.gmra.mxu3 %vm1440_vm1, %v11881_v62  ;;  %6753 = vmatmul.msk.f32.gmra.mxu1 %vm1440_vm1, %v9125_v0  ;;  %v1997_v47 = vmax.f32 %v8808_v23, 0.0 }
 0x4f7   : > { %v3341_v43 = vmax.f32 %v3293_v5, 0.0  ;;  %6677 = vmatmul.msk.f32.gmra.mxu2 %vm1440_vm1, %v2799_v48  ;;  %6725 = vmatmul.msk.f32.gmra.mxu0 %vm1440_vm1, %v2799_v48  ;;  %v4340_v48 = vld [vmem:[%s11802_s13 + $0x18] sm:$0xff]  ;;  %v9160_v31 = vadd.f32 %v2160_v12, %v1997_v47 }
 0x4f8   : > { %v2513_v7 = vpop.f32.mrf.mxu3  ;;  %4353 = vmatpush.msra.mxu3 %v4340_v48  ;;  %v12297_v47 = vld [vmem:[#allocation38_spill] sm:$0xff] }
 0x4f9   : > { %v3389_v9 = vadd.f32 %v3341_v43, %v8353_v24  ;;  %v2514_v39 = vadd.f32 %v8826_v16, %v2513_v7  ;;  %v2162_v43 = vpop.f32.mrf.mxu1 }
 0x4fa   : > { %v3021_v34 = vpop.f32.mrf.mxu2 }
 0x4fb   : > { %v9145_v56 = vmax.f32 %v3389_v9, 0.0  ;;  %v2752_v60 = vadd.f32 %v12296_v32, %v2514_v39  ;;  %v3022_v22 = vadd.f32 %v8964_v3, %v3021_v34  ;;  %v11884_v34 = vmax.f32 %v9160_v31, 0.0 }
 0x4fc   : > { %v9152_v5 = vpop.f32.mrf.mxu0  ;;  %v2163_v32 = vadd.f32 %v7305_v28, %v2162_v43 }
 0x4fd   : > { %v2800_v24 = vmax.f32 %v2752_v60, 0.0  ;;  %v3294_v23 = vadd.f32 %v9061_v26, %v3022_v22  ;;  %6601 = vmatmul.msk.f32.gmra.mxu3 %vm1440_vm1, %v11880_v44  ;;  %6754 = vmatmul.msk.f32.gmra.mxu1 %vm1440_vm1, %v9145_v56  ;;  %v1998_v22 = vmax.f32 %v8819_v41, 0.0 }
 0x4ff   : > { %v3342_v7 = vmax.f32 %v3294_v23, 0.0  ;;  %6678 = vmatmul.msk.f32.gmra.mxu2 %vm1440_vm1, %v2800_v24  ;;  %6726 = vmatmul.msk.f32.gmra.mxu0 %vm1440_vm1, %v2800_v24  ;;  %v9183_v41 = vadd.f32 %v2163_v32, %v1998_v22 }
 0x500   : > { %v2516_v9 = vpop.f32.mrf.mxu3 }
 0x501   : > { %v3390_v39 = vadd.f32 %v3342_v7, %v8371_v19  ;;  %v2517_v26 = vadd.f32 %v8826_v16, %v2516_v9  ;;  %v4840_v19 = vld [vmem:[%s11806_s17 + $0x18] sm:$0xff] }
 0x502   : > { %v3024_v60 = vpop.f32.mrf.mxu2  ;;  %5001 = vmatpush.msrb.mxu1 %v4840_v19 }
 0x503   : > { %v9168_v48 = vmax.f32 %v3390_v39, 0.0  ;;  %v2753_v12 = vadd.f32 %v12297_v47, %v2517_v26  ;;  %v3025_v23 = vadd.f32 %v8964_v3, %v3024_v60  ;;  %v11882_v39 = vmax.f32 %v9183_v41, 0.0  ;;  %v12298_v60 = vld [vmem:[#allocation41_spill] sm:$0xff] }
 0x504   : > { %v9172_v44 = vpop.f32.mrf.mxu0 }
 0x505   : > { %v2801_v24 = vmax.f32 %v2753_v12, 0.0  ;;  %v3295_v62 = vadd.f32 %v9076_v36, %v3025_v23  ;;  %6602 = vmatmul.msk.f32.gmra.mxu3 %vm1440_vm1, %v11884_v34  ;;  %6755 = vmatmul.msk.f32.gmra.mxu1 %vm1440_vm1, %v9168_v48 }
 0x507   : > { %v3343_v28 = vmax.f32 %v3295_v62, 0.0  ;;  %6679 = vmatmul.msk.f32.gmra.mxu2 %vm1440_vm1, %v2801_v24  ;;  %6727 = vmatmul.msk.f32.gmra.mxu0 %vm1440_vm1, %v2801_v24 }
 0x508   : > { %v2519_v36 = vpop.f32.mrf.mxu3 }
 0x509   : > { %v3391_v43 = vadd.f32 %v3343_v28, %v8384_v33  ;;  %v2520_v7 = vadd.f32 %v8826_v16, %v2519_v36 }
 0x50a   : > { %v3027_v9 = vpop.f32.mrf.mxu2 }
 0x50b   : > { %v9190_v26 = vmax.f32 %v3391_v43, 0.0  ;;  %v2754_v47 = vadd.f32 %v12298_v60, %v2520_v7  ;;  %v3028_v32 = vadd.f32 %v8964_v3, %v3027_v9 }
 0x50c   : > { %v9194_v22 = vpop.f32.mrf.mxu0 }
 0x50d   : > { %v2802_v62 = vmax.f32 %v2754_v47, 0.0  ;;  %v3296_v12 = vadd.f32 %v9091_v14, %v3028_v32  ;;  %6603 = vmatmul.msk.f32.gmra.mxu3 %vm1440_vm1, %v11882_v39  ;;  %6756 = vmatmul.msk.f32.gmra.mxu1 %vm1440_vm1, %v9190_v26 }
 0x50f   : > { %v3344_v33 = vmax.f32 %v3296_v12, 0.0  ;;  %6680 = vmatmul.msk.f32.gmra.mxu2 %vm1440_vm1, %v2802_v62  ;;  %6728 = vmatmul.msk.f32.gmra.mxu0 %vm1440_vm1, %v2802_v62 }
 0x510   : > { %v2522_v23 = vpop.f32.mrf.mxu3 }
 0x511   : > { %v3392_v24 = vadd.f32 %v3344_v33, %v8397_v61  ;;  %v2523_v19 = vadd.f32 %v8826_v16, %v2522_v23 }
 0x512   : > { %v3030_v28 = vpop.f32.mrf.mxu2 }
 0x513   : > { %v9206_v36 = vmax.f32 %v3392_v24, 0.0  ;;  %v2755_v14 = vadd.f32 %v8784_v53, %v2523_v19  ;;  %v3031_v43 = vadd.f32 %v8964_v3, %v3030_v28 }
 0x514   : > { %v9210_v7 = vpop.f32.mrf.mxu0 }
 0x515   : > { %v2803_v9 = vmax.f32 %v2755_v14, 0.0  ;;  %v3297_v60 = vadd.f32 %v9110_v57, %v3031_v43  ;;  %6757 = vmatmul.msk.f32.gmra.mxu1 %vm1440_vm1, %v9206_v36  ;;  %6792 = vmatmul.msk.f32.vlgmr.msrb.gmra.mxu3 %vm1440_vm1, %v8979_v52 }
 0x517   : > { %v3345_v61 = vmax.f32 %v3297_v60, 0.0  ;;  %6681 = vmatmul.msk.f32.gmra.mxu2 %vm1440_vm1, %v2803_v9  ;;  %6729 = vmatmul.msk.f32.gmra.mxu0 %vm1440_vm1, %v2803_v9 }
 0x518   : > { %v2525_v47 = vpop.f32.mrf.mxu3 }
 0x519   : > { %v3393_v53 = vadd.f32 %v3345_v61, %v8412_v13  ;;  %v2526_v32 = vadd.f32 %v8826_v16, %v2525_v47 }
 0x51a   : > { %v3033_v62 = vpop.f32.mrf.mxu2 }
 0x51b   : > { %v9221_v12 = vmax.f32 %v3393_v53, 0.0  ;;  %v2756_v57 = vadd.f32 %v8796_v30, %v2526_v32  ;;  %v3034_v33 = vadd.f32 %v8964_v3, %v3033_v62 }
 0x51c   : > { %v9225_v23 = vpop.f32.mrf.mxu0 }
 0x51d   : > { %v2804_v24 = vmax.f32 %v2756_v57, 0.0  ;;  %v3298_v19 = vadd.f32 %v9129_v20, %v3034_v33  ;;  %6758 = vmatmul.msk.f32.gmra.mxu1 %vm1440_vm1, %v9221_v12  ;;  %6793 = vmatmul.msk.f32.gmra.mxu3 %vm1440_vm1, %v8993_v40 }
 0x51f   : > { %v3346_v13 = vmax.f32 %v3298_v19, 0.0  ;;  %6682 = vmatmul.msk.f32.gmra.mxu2 %vm1440_vm1, %v2804_v24  ;;  %6730 = vmatmul.msk.f32.gmra.mxu0 %vm1440_vm1, %v2804_v24 }
 0x520   : > { %v2528_v28 = vpop.f32.mrf.mxu3 }
 0x521   : > { %v3394_v30 = vadd.f32 %v3346_v13, %v8427_v55  ;;  %v2529_v14 = vadd.f32 %v8826_v16, %v2528_v28 }
 0x522   : > { %v3036_v43 = vpop.f32.mrf.mxu2 }
 0x523   : > { %v9236_v9 = vmax.f32 %v3394_v30, 0.0  ;;  %v2757_v20 = vadd.f32 %v8806_v2, %v2529_v14  ;;  %v3037_v60 = vadd.f32 %v8964_v3, %v3036_v43 }
 0x524   : > { %v9240_v61 = vpop.f32.mrf.mxu0 }
 0x525   : > { %v2805_v47 = vmax.f32 %v2757_v20, 0.0  ;;  %v3299_v53 = vadd.f32 %v9152_v5, %v3037_v60  ;;  %6759 = vmatmul.msk.f32.gmra.mxu1 %vm1440_vm1, %v9236_v9  ;;  %6794 = vmatmul.msk.f32.gmra.mxu3 %vm1440_vm1, %v9007_v10 }
 0x526   : > { %v9247_v55 = vpop.f32.mrf.mxu1 }
 0x527   : > { %v3347_v32 = vmax.f32 %v3299_v53, 0.0  ;;  %6683 = vmatmul.msk.f32.gmra.mxu2 %vm1440_vm1, %v2805_v47  ;;  %6731 = vmatmul.msk.f32.gmra.mxu0 %vm1440_vm1, %v2805_v47  ;;  %v12299_v53 = vld [vmem:[#allocation44_spill] sm:$0xff] }
 0x528   : > { %v2531_v2 = vpop.f32.mrf.mxu3 }
 0x529   : > { %v3395_v62 = vadd.f32 %v3347_v32, %v8444_v8  ;;  %v2532_v57 = vadd.f32 %v8826_v16, %v2531_v2  ;;  %v6832_v8 = vld [vmem:[%s11802_s13 + $0x20] sm:$0xff] }
 0x52a   : > { %v3039_v33 = vpop.f32.mrf.mxu2  ;;  %4191 = vmatpush.msra.mxu2 %v6832_v8 }
 0x52b   : > { %v9253_v5 = vmax.f32 %v3395_v62, 0.0  ;;  %v2758_v24 = vadd.f32 %v8817_v59, %v2532_v57  ;;  %v3040_v19 = vadd.f32 %v8964_v3, %v3039_v33 }
 0x52c   : > { %v9257_v13 = vpop.f32.mrf.mxu0 }
 0x52d   : > { %v2806_v28 = vmax.f32 %v2758_v24, 0.0  ;;  %v3300_v30 = vadd.f32 %v9172_v44, %v3040_v19  ;;  %6760 = vmatmul.msk.f32.gmra.mxu1 %vm1440_vm1, %v9253_v5  ;;  %6795 = vmatmul.msk.f32.gmra.mxu3 %vm1440_vm1, %v9021_v29 }
 0x52e   : > { %v9267_v59 = vpop.f32.mrf.mxu1 }
 0x52f   : > { %v3348_v14 = vmax.f32 %v3300_v30, 0.0  ;;  %6684 = vmatmul.msk.f32.gmra.mxu2 %vm1440_vm1, %v2806_v28  ;;  %6732 = vmatmul.msk.f32.gmra.mxu0 %vm1440_vm1, %v2806_v28 }
 0x530   : > { %v2534_v43 = vpop.f32.mrf.mxu3 }
 0x531   : > { %v3396_v44 = vadd.f32 %v3348_v14, %v8461_v49  ;;  %v2535_v20 = vadd.f32 %v8826_v16, %v2534_v43  ;;  %v12300_v14 = vld [vmem:[#allocation37_spill] sm:$0xff] }
 0x532   : > { %v3042_v60 = vpop.f32.mrf.mxu2 }
 0x533   : > { %v9273_v47 = vmax.f32 %v3396_v44, 0.0  ;;  %v2759_v32 = vadd.f32 %v12299_v53, %v2535_v20  ;;  %v3043_v2 = vadd.f32 %v8964_v3, %v3042_v60 }
 0x534   : > { %v9277_v62 = vpop.f32.mrf.mxu0 }
 0x535   : > { %v2807_v57 = vmax.f32 %v2759_v32, 0.0  ;;  %v3301_v33 = vadd.f32 %v9194_v22, %v3043_v2  ;;  %6761 = vmatmul.msk.f32.gmra.mxu1 %vm1440_vm1, %v9273_v47  ;;  %6796 = vmatmul.msk.f32.gmra.mxu3 %vm1440_vm1, %v9039_v15 }
 0x536   : > { %v9287_v28 = vpop.f32.mrf.mxu1 }
 0x537   : > { %v3349_v49 = vmax.f32 %v3301_v33, 0.0  ;;  %6685 = vmatmul.msk.f32.gmra.mxu2 %vm1440_vm1, %v2807_v57  ;;  %6733 = vmatmul.msk.f32.gmra.mxu0 %vm1440_vm1, %v2807_v57 }
 0x538   : > { %v2537_v24 = vpop.f32.mrf.mxu3 }
 0x539   : > { %v3397_v19 = vadd.f32 %v3349_v49, %v8479_v37  ;;  %v2538_v30 = vadd.f32 %v8826_v16, %v2537_v24  ;;  %v12301_v24 = vld [vmem:[#allocation46_spill] sm:$0xff] }
 0x53a   : > { %v3045_v8 = vpop.f32.mrf.mxu2 }
 0x53b   : > { %v9290_v22 = vmax.f32 %v3397_v19, 0.0  ;;  %v2760_v43 = vadd.f32 %v12300_v14, %v2538_v30  ;;  %v3046_v44 = vadd.f32 %v8964_v3, %v3045_v8 }
 0x53c   : > { %v9294_v20 = vpop.f32.mrf.mxu0 }
 0x53d   : > { %v2808_v60 = vmax.f32 %v2760_v43, 0.0  ;;  %v3302_v53 = vadd.f32 %v9210_v7, %v3046_v44  ;;  %6762 = vmatmul.msk.f32.gmra.mxu1 %vm1440_vm1, %v9290_v22  ;;  %6797 = vmatmul.msk.f32.gmra.mxu3 %vm1440_vm1, %v9057_v45 }
 0x53e   : > { %v9307_v7 = vpop.f32.mrf.mxu1 }
 0x53f   : > { %v3350_v37 = vmax.f32 %v3302_v53, 0.0  ;;  %6686 = vmatmul.msk.f32.gmra.mxu2 %vm1440_vm1, %v2808_v60  ;;  %6734 = vmatmul.msk.f32.gmra.mxu0 %vm1440_vm1, %v2808_v60  ;;  %v12302_v60 = vld [vmem:[#allocation23_spill] sm:$0xff] }
 0x540   : > { %v2540_v32 = vpop.f32.mrf.mxu3 }
 0x541   : > { %v3398_v2 = vadd.f32 %v3350_v37, %v8498_v51  ;;  %v2541_v57 = vadd.f32 %v8826_v16, %v2540_v32 }
 0x542   : > { %v3048_v33 = vpop.f32.mrf.mxu2 }
 0x543   : > { %v9305_v49 = vmax.f32 %v3398_v2, 0.0  ;;  %v2761_v19 = vadd.f32 %v12301_v24, %v2541_v57  ;;  %v3049_v30 = vadd.f32 %v8964_v3, %v3048_v33 }
 0x544   : > { %v9311_v8 = vpop.f32.mrf.mxu0 }
 0x545   : > { %v2809_v14 = vmax.f32 %v2761_v19, 0.0  ;;  %v3303_v43 = vadd.f32 %v9225_v23, %v3049_v30  ;;  %6763 = vmatmul.msk.f32.gmra.mxu1 %vm1440_vm1, %v9305_v49  ;;  %6798 = vmatmul.msk.f32.gmra.mxu3 %vm1440_vm1, %v9072_v46  ;;  %v12303_v23 = vld [vmem:[#allocation39_spill] sm:$0xff]  ;;  %v4339_v19 = vld [vmem:[%s11802_s13 + $0x10] sm:$0xff] }
 0x546   : > { %4354 = vmatpush.msra.mxu3 %v4339_v19 }
 0x547   : > { %v3351_v51 = vmax.f32 %v3303_v43, 0.0  ;;  %6687 = vmatmul.msk.f32.gmra.mxu2 %vm1440_vm1, %v2809_v14  ;;  %6735 = vmatmul.msk.f32.gmra.mxu0 %vm1440_vm1, %v2809_v14 }
 0x548   : > { %v2543_v44 = vpop.f32.mrf.mxu3 }
 0x549   : > { %v3399_v53 = vadd.f32 %v3351_v51, %v12302_v60  ;;  %v2544_v37 = vadd.f32 %v8826_v16, %v2543_v44 }
 0x54a   : > { %v3051_v32 = vpop.f32.mrf.mxu2  ;;  %v9326_v24 = vpop.f32.mrf.mxu1 }
 0x54b   : > { %v9322_v2 = vmax.f32 %v3399_v53, 0.0  ;;  %v2762_v57 = vadd.f32 %v12303_v23, %v2544_v37  ;;  %v3052_v33 = vadd.f32 %v8964_v3, %v3051_v32 }
 0x54c   : > { %v9331_v30 = vpop.f32.mrf.mxu0 }
 0x54d   : > { %v2810_v14 = vmax.f32 %v2762_v57, 0.0  ;;  %v3304_v43 = vadd.f32 %v9240_v61, %v3052_v33  ;;  %6764 = vmatmul.msk.f32.gmra.mxu1 %vm1440_vm1, %v9322_v2  ;;  %6799 = vmatmul.msk.f32.gmra.mxu3 %vm1440_vm1, %v9087_v17  ;;  %v4574_v57 = vld [vmem:[%s11804_s15] sm:$0xff] }
 0x54e   : > { %4595 = vmatpush.msra.mxu0 %v4574_v57 }
 0x54f   : > { %v3352_v51 = vmax.f32 %v3304_v43, 0.0  ;;  %6688 = vmatmul.msk.f32.gmra.mxu2 %vm1440_vm1, %v2810_v14  ;;  %6736 = vmatmul.msk.f32.gmra.mxu0 %vm1440_vm1, %v2810_v14 }
 0x550   : > { %v2546_v44 = vpop.f32.mrf.mxu3 }
 0x551   : > { %v3400_v60 = vadd.f32 %v3352_v51, %v8530_v63  ;;  %v2547_v53 = vadd.f32 %v8826_v16, %v2546_v44 }
 0x552   : > { %v3054_v37 = vpop.f32.mrf.mxu2  ;;  %v9352_v63 = vpop.f32.mrf.mxu1 }
 0x553   : > { %v9342_v32 = vmax.f32 %v3400_v60, 0.0  ;;  %v2763_v61 = vadd.f32 %v8866_v54, %v2547_v53  ;;  %v3055_v23 = vadd.f32 %v8964_v3, %v3054_v37 }
 0x554   : > { %v9349_v33 = vpop.f32.mrf.mxu0 }
 0x555   : > { %v2811_v19 = vmax.f32 %v2763_v61, 0.0  ;;  %v3305_v14 = vadd.f32 %v9257_v13, %v3055_v23  ;;  %6765 = vmatmul.msk.f32.gmra.mxu1 %vm1440_vm1, %v9342_v32  ;;  %6800 = vmatmul.msk.f32.gmra.mxu3 %vm1440_vm1, %v9106_v1  ;;  %v9364_v13 = vld [vmem:[%s12266_s9] ss:$0 sm:$0xff] }
 0x557   : > { %v3353_v16 = vmax.f32 %v3305_v14, 0.0  ;;  %6689 = vmatmul.msk.f32.gmra.mxu2 %vm1440_vm1, %v2811_v19  ;;  %6737 = vmatmul.msk.f32.gmra.mxu0 %vm1440_vm1, %v2811_v19 }
 0x558   : > { %v2549_v54 = vpop.f32.mrf.mxu3 }
 0x559   : > { %v3401_v43 = vadd.f32 %v3353_v16, %v8544_v58  ;;  %v2550_v51 = vadd.f32 %v9364_v13, %v2549_v54 }
 0x55a   : > { %v3057_v44 = vpop.f32.mrf.mxu2  ;;  %v9378_v19 = vpop.f32.mrf.mxu1 }
 0x55b   : > { %v9367_v60 = vmax.f32 %v3401_v43, 0.0  ;;  %v2764_v53 = vadd.f32 %v8878_v50, %v2550_v51  ;;  %v3058_v37 = vadd.f32 %v8964_v3, %v3057_v44 }
 0x55c   : > { %v9371_v61 = vpop.f32.mrf.mxu0 }
 0x55d   : > { %12304 = vst [vmem:[#allocation59_spill] sm:$0xff] %v9367_v60  ;;  %v2812_v23 = vmax.f32 %v2764_v53, 0.0  ;;  %v3306_v57 = vadd.f32 %v9277_v62, %v3058_v37  ;;  %6766 = vmatmul.msk.f32.gmra.mxu1 %vm1440_vm1, %v9367_v60  ;;  %6801 = vmatmul.msk.f32.gmra.mxu3 %vm1440_vm1, %v9125_v0 }
 0x55f   : > { %v3354_v58 = vmax.f32 %v3306_v57, 0.0  ;;  %6690 = vmatmul.msk.f32.gmra.mxu2 %vm1440_vm1, %v2812_v23  ;;  %6738 = vmatmul.msk.f32.gmra.mxu0 %vm1440_vm1, %v2812_v23 }
 0x560   : > { %v2552_v50 = vpop.f32.mrf.mxu3 }
 0x561   : > { %v3402_v14 = vadd.f32 %v3354_v58, %v8557_v27  ;;  %v2553_v16 = vadd.f32 %v9364_v13, %v2552_v50  ;;  %v4839_v27 = vld [vmem:[%s11806_s17 + $0x10] sm:$0xff] }
 0x562   : > { %v3060_v54 = vpop.f32.mrf.mxu2  ;;  %5002 = vmatpush.msrb.mxu1 %v4839_v27 }
 0x563   : > { %v9384_v62 = vmax.f32 %v3402_v14, 0.0  ;;  %v2765_v43 = vadd.f32 %v8888_v35, %v2553_v16  ;;  %v3061_v51 = vadd.f32 %v8964_v3, %v3060_v54 }
 0x564   : > { %v9388_v44 = vpop.f32.mrf.mxu0 }
 0x565   : > { %12305 = vst [vmem:[#allocation45_spill] sm:$0xff] %v9384_v62  ;;  %v2813_v53 = vmax.f32 %v2765_v43, 0.0  ;;  %v3307_v37 = vadd.f32 %v9294_v20, %v3061_v51  ;;  %6767 = vmatmul.msk.f32.gmra.mxu1 %vm1440_vm1, %v9384_v62  ;;  %6802 = vmatmul.msk.f32.gmra.mxu3 %vm1440_vm1, %v9145_v56  ;;  %v9401_v20 = vpop.f32.mrf.mxu1 }
 0x567   : > { %v3355_v23 = vmax.f32 %v3307_v37, 0.0  ;;  %6691 = vmatmul.msk.f32.gmra.mxu2 %vm1440_vm1, %v2813_v53  ;;  %6739 = vmatmul.msk.f32.gmra.mxu0 %vm1440_vm1, %v2813_v53 }
 0x568   : > { %v2555_v35 = vpop.f32.mrf.mxu3 }
 0x569   : > { %v3403_v57 = vadd.f32 %v3355_v23, %v8581_v38  ;;  %v2556_v58 = vadd.f32 %v9364_v13, %v2555_v35 }
 0x56a   : > { %v3063_v50 = vpop.f32.mrf.mxu2 }
 0x56b   : > { %v9404_v14 = vmax.f32 %v3403_v57, 0.0  ;;  %v2766_v16 = vadd.f32 %v8898_v4, %v2556_v58  ;;  %v3064_v54 = vadd.f32 %v8964_v3, %v3063_v50 }
 0x56c   : > { %v9408_v43 = vpop.f32.mrf.mxu0 }
 0x56d   : > { %12306 = vst [vmem:[#allocation51_spill] sm:$0xff] %v9404_v14  ;;  %v2814_v51 = vmax.f32 %v2766_v16, 0.0  ;;  %v3308_v37 = vadd.f32 %v9311_v8, %v3064_v54  ;;  %6768 = vmatmul.msk.f32.gmra.mxu1 %vm1440_vm1, %v9404_v14  ;;  %6803 = vmatmul.msk.f32.gmra.mxu3 %vm1440_vm1, %v9168_v48  ;;  %v9421_v8 = vpop.f32.mrf.mxu1 }
 0x56f   : > { %v3356_v38 = vmax.f32 %v3308_v37, 0.0  ;;  %6692 = vmatmul.msk.f32.gmra.mxu2 %vm1440_vm1, %v2814_v51  ;;  %6740 = vmatmul.msk.f32.gmra.mxu0 %vm1440_vm1, %v2814_v51 }
 0x570   : > { %v2558_v53 = vpop.f32.mrf.mxu3 }
 0x571   : > { %v3404_v4 = vadd.f32 %v3356_v38, %v8595_v21  ;;  %v2559_v27 = vadd.f32 %v9364_v13, %v2558_v53 }
 0x572   : > { %v3066_v23 = vpop.f32.mrf.mxu2 }
 0x573   : > { %v9419_v35 = vmax.f32 %v3404_v4, 0.0  ;;  %v2767_v57 = vadd.f32 %v8907_v11, %v2559_v27  ;;  %v3067_v58 = vadd.f32 %v8964_v3, %v3066_v23 }
 0x574   : > { %v9425_v50 = vpop.f32.mrf.mxu0 }
 0x575   : > { %v2815_v16 = vmax.f32 %v2767_v57, 0.0  ;;  %v3309_v54 = vadd.f32 %v9331_v30, %v3067_v58  ;;  %6769 = vmatmul.msk.f32.gmra.mxu1 %vm1440_vm1, %v9419_v35  ;;  %6804 = vmatmul.msk.f32.gmra.mxu3 %vm1440_vm1, %v9190_v26  ;;  %v9442_v23 = vpop.f32.mrf.mxu1 }
 0x577   : > { %v3357_v21 = vmax.f32 %v3309_v54, 0.0  ;;  %6693 = vmatmul.msk.f32.gmra.mxu2 %vm1440_vm1, %v2815_v16  ;;  %6741 = vmatmul.msk.f32.gmra.mxu0 %vm1440_vm1, %v2815_v16  ;;  %v12307_v16 = vld [vmem:[#allocation26_spill] sm:$0xff] }
 0x578   : > { %v2561_v51 = vpop.f32.mrf.mxu3 }
 0x579   : > { %v3405_v11 = vadd.f32 %v3357_v21, %v8604_v42  ;;  %v2562_v37 = vadd.f32 %v9364_v13, %v2561_v51 }
 0x57a   : > { %v3069_v38 = vpop.f32.mrf.mxu2 }
 0x57b   : > { %v9436_v53 = vmax.f32 %v3405_v11, 0.0  ;;  %v2768_v30 = vadd.f32 %v8919_v6, %v2562_v37  ;;  %v3070_v4 = vadd.f32 %v8964_v3, %v3069_v38 }
 0x57c   : > { %v9440_v27 = vpop.f32.mrf.mxu0 }
 0x57d   : > { %v2816_v57 = vmax.f32 %v2768_v30, 0.0  ;;  %v3310_v58 = vadd.f32 %v9349_v33, %v3070_v4  ;;  %6770 = vmatmul.msk.f32.gmra.mxu1 %vm1440_vm1, %v9436_v53  ;;  %6805 = vmatmul.msk.f32.gmra.mxu3 %vm1440_vm1, %v9206_v36  ;;  %v12308_v33 = vld [vmem:[#allocation48_spill] sm:$0xff] }
 0x57f   : > { %v3358_v42 = vmax.f32 %v3310_v58, 0.0  ;;  %6694 = vmatmul.msk.f32.gmra.mxu2 %vm1440_vm1, %v2816_v57  ;;  %6924 = vmatmul.msk.f32.vlgmr.msra.gmra.mxu0 %vm1440_vm1, %v8979_v52  ;;  %v9465_v52 = vpop.f32.mrf.mxu1 }
 0x580   : > { %v2564_v6 = vpop.f32.mrf.mxu3 }
 0x581   : > { %v3406_v54 = vadd.f32 %v3358_v42, %v12307_v16  ;;  %v2565_v21 = vadd.f32 %v9364_v13, %v2564_v6  ;;  %v12309_v6 = vld [vmem:[#allocation6_spill] sm:$0xff] }
 0x582   : > { %v3072_v51 = vpop.f32.mrf.mxu2 }
 0x583   : > { %v9454_v11 = vmax.f32 %v3406_v54, 0.0  ;;  %v2769_v37 = vadd.f32 %v12308_v33, %v2565_v21  ;;  %v3073_v38 = vadd.f32 %v8964_v3, %v3072_v51  ;;  %v12310_v51 = vld [vmem:[#allocation42_spill] sm:$0xff] }
 0x584   : > { %v9458_v30 = vpop.f32.mrf.mxu0 }
 0x585   : > { %v2817_v4 = vmax.f32 %v2769_v37, 0.0  ;;  %v3311_v57 = vadd.f32 %v9371_v61, %v3073_v38  ;;  %6771 = vmatmul.msk.f32.gmra.mxu1 %vm1440_vm1, %v9454_v11  ;;  %6806 = vmatmul.msk.f32.gmra.mxu3 %vm1440_vm1, %v9221_v12  ;;  %v5205_v38 = vld [vmem:[%s11808_s19 + $0x38] sm:$0xff] }
 0x586   : > { %5363 = vmatpush.msrb.mxu2 %v5205_v38 }
 0x587   : > { %v3359_v58 = vmax.f32 %v3311_v57, 0.0  ;;  %6695 = vmatmul.msk.f32.gmra.mxu2 %vm1440_vm1, %v2817_v4  ;;  %6925 = vmatmul.msk.f32.gmra.mxu0 %vm1440_vm1, %v8993_v40 }
 0x588   : > { %v2567_v42 = vpop.f32.mrf.mxu3 }
 0x589   : > { %v3407_v16 = vadd.f32 %v3359_v58, %v12309_v6  ;;  %v2568_v54 = vadd.f32 %v9364_v13, %v2567_v42  ;;  %v9489_v6 = vpop.f32.mrf.mxu1 }
 0x58a   : > { %v3075_v61 = vpop.f32.mrf.mxu2 }
 0x58b   : > { %v9472_v21 = vmax.f32 %v3407_v16, 0.0  ;;  %v2770_v33 = vadd.f32 %v12310_v51, %v2568_v54  ;;  %v3076_v37 = vadd.f32 %v8964_v3, %v3075_v61  ;;  %v12311_v16 = vld [vmem:[#allocation29_spill] sm:$0xff] }
 0x58c   : > { %v9479_v4 = vpop.f32.mrf.mxu0 }
 0x58d   : > { %v2818_v40 = vmax.f32 %v2770_v33, 0.0  ;;  %v3312_v57 = vadd.f32 %v9388_v44, %v3076_v37  ;;  %6772 = vmatmul.msk.f32.gmra.mxu1 %vm1440_vm1, %v9472_v21  ;;  %6807 = vmatmul.msk.f32.gmra.mxu3 %vm1440_vm1, %v9236_v9  ;;  %v12312_v33 = vld [vmem:[#allocation50_spill] sm:$0xff] }
 0x58f   : > { %v3360_v58 = vmax.f32 %v3312_v57, 0.0  ;;  %6696 = vmatmul.msk.f32.gmra.mxu2 %vm1440_vm1, %v2818_v40  ;;  %6926 = vmatmul.msk.f32.gmra.mxu0 %vm1440_vm1, %v9007_v10  ;;  %v9502_v10 = vld [vmem:[%s11801_s12] ss:$0 sm:$0xff] }
 0x590   : > { %v2570_v42 = vpop.f32.mrf.mxu3 }
 0x591   : > { %v3408_v54 = vadd.f32 %v3360_v58, %v12311_v16  ;;  %v2571_v61 = vadd.f32 %v9364_v13, %v2570_v42  ;;  %v9516_v58 = vadd.f32 %v9502_v10, %v9247_v55  ;;  %v12314_v42 = vld [vmem:[#allocation15_spill] sm:$0xff] }
 0x592   : > { %v3078_v44 = vpop.f32.mrf.mxu2 }
 0x593   : > { %v9493_v51 = vmax.f32 %v3408_v54, 0.0  ;;  %v2771_v37 = vadd.f32 %v12312_v33, %v2571_v61  ;;  %v3079_v38 = vadd.f32 %v8964_v3, %v3078_v44  ;;  %12313 = vst [vmem:[#allocation61_spill] sm:$0xff] %v9516_v58  ;;  %v9519_v54 = vpop.f32.mrf.mxu1  ;;  %v4338_v44 = vld [vmem:[%s11802_s13 + $0x8] sm:$0xff]  ;;  %v11883_v33 = vmax.f32 %v9516_v58, 0.0 }
 0x594   : > { %v9497_v57 = vpop.f32.mrf.mxu0  ;;  %4355 = vmatpush.msra.mxu3 %v4338_v44 }
 0x595   : > { %v2819_v40 = vmax.f32 %v2771_v37, 0.0  ;;  %v3313_v39 = vadd.f32 %v9408_v43, %v3079_v38  ;;  %6773 = vmatmul.msk.f32.gmra.mxu1 %vm1440_vm1, %v9493_v51  ;;  %6808 = vmatmul.msk.f32.gmra.mxu3 %vm1440_vm1, %v9253_v5 }
 0x597   : > { %v3361_v13 = vmax.f32 %v3313_v39, 0.0  ;;  %6697 = vmatmul.msk.f32.gmra.mxu2 %vm1440_vm1, %v2819_v40  ;;  %6927 = vmatmul.msk.f32.gmra.mxu0 %vm1440_vm1, %v9021_v29  ;;  %v9526_v39 = vld [vmem:[%s12276_s11] ss:$0 sm:$0xff] }
 0x598   : > { %v9512_v3 = vpop.f32.mrf.mxu3 }
 0x599   : > { %v3409_v43 = vadd.f32 %v3361_v13, %v12314_v42  ;;  %v9549_v13 = vadd.f32 %v9502_v10, %v9267_v59 }
 0x59a   : > { %v3081_v16 = vpop.f32.mrf.mxu2 }
 0x59b   : > { %v9521_v61 = vmax.f32 %v3409_v43, 0.0  ;;  %v3082_v29 = vadd.f32 %v9526_v39, %v3081_v16  ;;  %12315 = vst [vmem:[#allocation47_spill] sm:$0xff] %v9549_v13 }
 0x59c   : > { %v9532_v55 = vpop.f32.mrf.mxu0 }
 0x59d   : > { %v3314_v37 = vadd.f32 %v9425_v50, %v3082_v29  ;;  %6774 = vmatmul.msk.f32.gmra.mxu1 %vm1440_vm1, %v9521_v61  ;;  %6809 = vmatmul.msk.f32.gmra.mxu3 %vm1440_vm1, %v9273_v47  ;;  %v12316_v50 = vld [vmem:[#allocation10_spill] sm:$0xff] }
 0x59f   : > { %v3362_v38 = vmax.f32 %v3314_v37, 0.0  ;;  %6836 = vmatmul.msk.f32.vlgmr.msra.gmra.mxu2 %vm4031_vm2, %v11883_v33  ;;  %6928 = vmatmul.msk.f32.gmra.mxu0 %vm1440_vm1, %v9039_v15  ;;  %v11885_v37 = vmax.f32 %v9549_v13, 0.0  ;;  %v9558_v33 = vpop.f32.mrf.mxu1 }
 0x5a0   : > { %v9545_v40 = vpop.f32.mrf.mxu3 }
 0x5a1   : > { %v3410_v42 = vadd.f32 %v3362_v38, %v12316_v50  ;;  %v9574_v50 = vadd.f32 %v9502_v10, %v9287_v28 }
 0x5a2   : > { %v3084_v43 = vpop.f32.mrf.mxu2 }
 0x5a3   : > { %v9552_v16 = vmax.f32 %v3410_v42, 0.0  ;;  %v3085_v29 = vadd.f32 %v9526_v39, %v3084_v43  ;;  %12317 = vst [vmem:[#allocation53_spill] sm:$0xff] %v9574_v50  ;;  %v11888_v34 = vmax.f32 %v9574_v50, 0.0 }
 0x5a4   : > { %v9555_v44 = vpop.f32.mrf.mxu0 }
 0x5a5   : > { %v3315_v15 = vadd.f32 %v9440_v27, %v3085_v29  ;;  %6775 = vmatmul.msk.f32.gmra.mxu1 %vm1440_vm1, %v9552_v16  ;;  %6810 = vmatmul.msk.f32.gmra.mxu3 %vm1440_vm1, %v9290_v22  ;;  %v12318_v27 = vld [vmem:[#allocation35_spill] sm:$0xff] }
 0x5a7   : > { %v3363_v59 = vmax.f32 %v3315_v15, 0.0  ;;  %6837 = vmatmul.msk.f32.gmra.mxu2 %vm4031_vm2, %v11885_v37  ;;  %6929 = vmatmul.msk.f32.gmra.mxu0 %vm1440_vm1, %v9057_v45  ;;  %v9588_v45 = vpop.f32.mrf.mxu1 }
 0x5a8   : > { %v9570_v38 = vpop.f32.mrf.mxu3 }
 0x5a9   : > { %v3411_v42 = vadd.f32 %v3363_v59, %v12318_v27  ;;  %v12320_v27 = vld [vmem:[#allocation21_spill] sm:$0xff] }
 0x5aa   : > { %v3087_v43 = vpop.f32.mrf.mxu2 }
 0x5ab   : > { %v9577_v29 = vmax.f32 %v3411_v42, 0.0  ;;  %v3088_v15 = vadd.f32 %v9526_v39, %v3087_v43 }
 0x5ac   : > { %v9582_v13 = vpop.f32.mrf.mxu0 }
 0x5ad   : > { %v3316_v37 = vadd.f32 %v9458_v30, %v3088_v15  ;;  %6776 = vmatmul.msk.f32.gmra.mxu1 %vm1440_vm1, %v9577_v29  ;;  %6811 = vmatmul.msk.f32.gmra.mxu3 %vm1440_vm1, %v9305_v49  ;;  %v9599_v30 = vadd.f32 %v9502_v10, %v9307_v7 }
 0x5af   : > { %v3364_v28 = vmax.f32 %v3316_v37, 0.0  ;;  %6838 = vmatmul.msk.f32.gmra.mxu2 %vm4031_vm2, %v11888_v34  ;;  %6930 = vmatmul.msk.f32.gmra.mxu0 %vm1440_vm1, %v9072_v46  ;;  %12319 = vst [vmem:[#allocation63_spill] sm:$0xff] %v9599_v30  ;;  %v11890_v50 = vmax.f32 %v9599_v30, 0.0 }
 0x5b0   : > { %v9595_v59 = vpop.f32.mrf.mxu3 }
 0x5b1   : > { %v3412_v42 = vadd.f32 %v3364_v28, %v12320_v27  ;;  %v9624_v27 = vpop.f32.mrf.mxu1 }
 0x5b2   : > { %v3090_v43 = vpop.f32.mrf.mxu2 }
 0x5b3   : > { %v9602_v15 = vmax.f32 %v3412_v42, 0.0  ;;  %v3091_v37 = vadd.f32 %v9526_v39, %v3090_v43  ;;  %v12322_v42 = vld [vmem:[#allocation24_spill] sm:$0xff] }
 0x5b4   : > { %v9611_v7 = vpop.f32.mrf.mxu0 }
 0x5b5   : > { %v3317_v34 = vadd.f32 %v9479_v4, %v3091_v37  ;;  %6777 = vmatmul.msk.f32.gmra.mxu1 %vm1440_vm1, %v9602_v15  ;;  %6812 = vmatmul.msk.f32.gmra.mxu3 %vm1440_vm1, %v9322_v2  ;;  %v9622_v4 = vadd.f32 %v9502_v10, %v9326_v24 }
 0x5b7   : > { %v3365_v46 = vmax.f32 %v3317_v34, 0.0  ;;  %6839 = vmatmul.msk.f32.gmra.mxu2 %vm4031_vm2, %v11890_v50  ;;  %6931 = vmatmul.msk.f32.gmra.mxu0 %vm1440_vm1, %v9087_v17  ;;  %12321 = vst [vmem:[#allocation54_spill] sm:$0xff] %v9622_v4  ;;  %v5204_v50 = vld [vmem:[%s11808_s19 + $0x30] sm:$0xff]  ;;  %v11892_v17 = vmax.f32 %v9622_v4, 0.0 }
 0x5b8   : > { %v9618_v28 = vpop.f32.mrf.mxu3  ;;  %5364 = vmatpush.msrb.mxu2 %v5204_v50  ;;  %v9648_v50 = vadd.f32 %v9502_v10, %v9352_v63 }
 0x5b9   : > { %v3413_v43 = vadd.f32 %v3365_v46, %v12322_v42 }
 0x5ba   : > { %v3093_v34 = vpop.f32.mrf.mxu2  ;;  %12323 = vst [vmem:[#allocation55_spill] sm:$0xff] %v9648_v50  ;;  %v11895_v4 = vmax.f32 %v9648_v50, 0.0 }
 0x5bb   : > { %v9627_v37 = vmax.f32 %v3413_v43, 0.0  ;;  %v3094_v30 = vadd.f32 %v9526_v39, %v3093_v34  ;;  %v9653_v34 = vpop.f32.mrf.mxu1 }
 0x5bc   : > { %v9651_v42 = vpop.f32.mrf.mxu0 }
 0x5bd   : > { %v3318_v58 = vadd.f32 %v9497_v57, %v3094_v30  ;;  %6778 = vmatmul.msk.f32.gmra.mxu1 %vm1440_vm1, %v9627_v37  ;;  %6813 = vmatmul.msk.f32.gmra.mxu3 %vm1440_vm1, %v9342_v32  ;;  %v12324_v57 = vld [vmem:[#allocation16_spill] sm:$0xff] }
 0x5bf   : > { %v3366_v24 = vmax.f32 %v3318_v58, 0.0  ;;  %6840 = vmatmul.msk.f32.gmra.mxu2 %vm4031_vm2, %v11892_v17  ;;  %6932 = vmatmul.msk.f32.gmra.mxu0 %vm1440_vm1, %v9106_v1  ;;  %v4838_v1 = vld [vmem:[%s11806_s17 + $0x8] sm:$0xff] }
 0x5c0   : > { %v9644_v46 = vpop.f32.mrf.mxu3  ;;  %5003 = vmatpush.msrb.mxu1 %v4838_v1 }
 0x5c1   : > { %v3414_v30 = vadd.f32 %v3366_v24, %v12324_v57 }
 0x5c2   : > { %v3096_v43 = vpop.f32.mrf.mxu2 }
 0x5c3   : > { %v9655_v58 = vmax.f32 %v3414_v30, 0.0  ;;  %v3097_v17 = vadd.f32 %v9526_v39, %v3096_v43  ;;  %v9676_v30 = vadd.f32 %v9502_v10, %v9378_v19  ;;  %v9685_v50 = vpop.f32.mrf.mxu1 }
 0x5c5   : > { %v3319_v63 = vadd.f32 %v9532_v55, %v3097_v17  ;;  %6779 = vmatmul.msk.f32.gmra.mxu1 %vm1440_vm1, %v9655_v58  ;;  %6814 = vmatmul.msk.f32.gmra.mxu3 %vm1440_vm1, %v9367_v60  ;;  %12325 = vst [vmem:[#allocation65_spill] sm:$0xff] %v9676_v30  ;;  %v12326_v55 = vld [vmem:[#allocation43_spill] sm:$0xff]  ;;  %v9681_v60 = vpop.f32.mrf.mxu0 }
 0x5c7   : > { %v3367_v24 = vmax.f32 %v3319_v63, 0.0  ;;  %6841 = vmatmul.msk.f32.gmra.mxu2 %vm4031_vm2, %v11895_v4  ;;  %6933 = vmatmul.msk.f32.gmra.mxu0 %vm1440_vm1, %v9125_v0  ;;  %v11899_v4 = vmax.f32 %v9676_v30, 0.0 }
 0x5c8   : > { %v9672_v57 = vpop.f32.mrf.mxu3 }
 0x5c9   : > { %v3415_v17 = vadd.f32 %v3367_v24, %v12326_v55  ;;  %v9701_v55 = vadd.f32 %v9502_v10, %v9401_v20 }
 0x5ca   : > { %v3099_v43 = vpop.f32.mrf.mxu2 }
 0x5cb   : > { %v9679_v1 = vmax.f32 %v3415_v17, 0.0  ;;  %v3100_v63 = vadd.f32 %v9526_v39, %v3099_v43  ;;  %12327 = vst [vmem:[#allocation56_spill] sm:$0xff] %v9701_v55  ;;  %v11902_v30 = vmax.f32 %v9701_v55, 0.0  ;;  %v9717_v20 = vpop.f32.mrf.mxu1 }
 0x5cd   : > { %v3320_v0 = vadd.f32 %v9555_v44, %v3100_v63  ;;  %6780 = vmatmul.msk.f32.gmra.mxu1 %vm1440_vm1, %v9679_v1  ;;  %6815 = vmatmul.msk.f32.gmra.mxu3 %vm1440_vm1, %v9384_v62  ;;  %v12328_v44 = vld [vmem:[#allocation30_spill] sm:$0xff]  ;;  %v9708_v62 = vpop.f32.mrf.mxu0 }
 0x5cf   : > { %v3368_v19 = vmax.f32 %v3320_v0, 0.0  ;;  %6842 = vmatmul.msk.f32.gmra.mxu2 %vm4031_vm2, %v11899_v4  ;;  %6934 = vmatmul.msk.f32.gmra.mxu0 %vm1440_vm1, %v9145_v56  ;;  %v3668_v56 = vadd.f32 %v9502_v10, %v9421_v8 }
 0x5d0   : > { %v9697_v24 = vpop.f32.mrf.mxu3 }
 0x5d1   : > { %v3416_v17 = vadd.f32 %v3368_v19, %v12328_v44  ;;  %v9727_v44 = vadd.f32 %v9512_v3, %v3668_v56 }
 0x5d2   : > { %v3102_v43 = vpop.f32.mrf.mxu2 }
 0x5d3   : > { %v9704_v63 = vmax.f32 %v3416_v17, 0.0  ;;  %v3103_v0 = vadd.f32 %v9526_v39, %v3102_v43  ;;  %v12329_v17 = vld [vmem:[#allocation33_spill] sm:$0xff] }
 0x5d5   : > { %v3321_v4 = vadd.f32 %v9582_v13, %v3103_v0  ;;  %6781 = vmatmul.msk.f32.gmra.mxu1 %vm1440_vm1, %v9704_v63  ;;  %6816 = vmatmul.msk.f32.gmra.mxu3 %vm1440_vm1, %v9404_v14  ;;  %v9741_v3 = vpop.f32.mrf.mxu0 }
 0x5d7   : > { %v3369_v19 = vmax.f32 %v3321_v4, 0.0  ;;  %6843 = vmatmul.msk.f32.gmra.mxu2 %vm4031_vm2, %v11902_v30  ;;  %6935 = vmatmul.msk.f32.gmra.mxu0 %vm1440_vm1, %v9168_v48  ;;  %v11903_v4 = vmax.f32 %v9727_v44, 0.0  ;;  %v3671_v48 = vadd.f32 %v9502_v10, %v9442_v23 }
 0x5d8   : > { %v9724_v13 = vpop.f32.mrf.mxu3 }
 0x5d9   : > { %v3417_v43 = vadd.f32 %v3369_v19, %v12329_v17  ;;  %v9751_v19 = vadd.f32 %v9545_v40, %v3671_v48  ;;  %v9753_v17 = vpop.f32.mrf.mxu1 }
 0x5da   : > { %v3105_v0 = vpop.f32.mrf.mxu2 }
 0x5db   : > { %v9730_v14 = vmax.f32 %v3417_v43, 0.0  ;;  %v3106_v8 = vadd.f32 %v9526_v39, %v3105_v0  ;;  %v12330_v43 = vld [vmem:[#allocation36_spill] sm:$0xff]  ;;  %v11905_v30 = vmax.f32 %v9751_v19, 0.0 }
 0x5dd   : > { %v3322_v55 = vadd.f32 %v9611_v7, %v3106_v8  ;;  %6782 = vmatmul.msk.f32.gmra.mxu1 %vm1440_vm1, %v9730_v14  ;;  %6817 = vmatmul.msk.f32.gmra.mxu3 %vm1440_vm1, %v9419_v35 }
 0x5df   : > { %v3370_v56 = vmax.f32 %v3322_v55, 0.0  ;;  %6844 = vmatmul.msk.f32.gmra.mxu2 %vm4031_vm2, %v11903_v4  ;;  %6936 = vmatmul.msk.f32.gmra.mxu0 %vm1440_vm1, %v9190_v26  ;;  %v3674_v26 = vadd.f32 %v9502_v10, %v9465_v52 }
 0x5e0   : > { %v9748_v7 = vpop.f32.mrf.mxu3 }
 0x5e1   : > { %v3418_v0 = vadd.f32 %v3370_v56, %v12330_v43  ;;  %v3271_v56 = vpop.f32.mrf.mxu0  ;;  %v12331_v43 = vld [vmem:[#allocation28_spill] sm:$0xff] }
 0x5e2   : > { %v3108_v23 = vpop.f32.mrf.mxu2 }
 0x5e3   : > { %v9756_v8 = vmax.f32 %v3418_v0, 0.0  ;;  %v3109_v55 = vadd.f32 %v9526_v39, %v3108_v23 }
 0x5e5   : > { %v3323_v4 = vadd.f32 %v9651_v42, %v3109_v55  ;;  %6783 = vmatmul.msk.f32.gmra.mxu1 %vm1440_vm1, %v9756_v8  ;;  %6818 = vmatmul.msk.f32.gmra.mxu3 %vm1440_vm1, %v9436_v53  ;;  %v9775_v42 = vadd.f32 %v9570_v38, %v3674_v26  ;;  %v9780_v55 = vpop.f32.mrf.mxu1  ;;  %v5203_v38 = vld [vmem:[%s11808_s19 + $0x28] sm:$0xff] }
 0x5e6   : > { %5365 = vmatpush.msrb.mxu2 %v5203_v38 }
 0x5e7   : > { %v3371_v40 = vmax.f32 %v3323_v4, 0.0  ;;  %6845 = vmatmul.msk.f32.gmra.mxu2 %vm4031_vm2, %v11905_v30  ;;  %6937 = vmatmul.msk.f32.gmra.mxu0 %vm1440_vm1, %v9206_v36  ;;  %v4337_v36 = vld [vmem:[%s11802_s13] sm:$0xff]  ;;  %v11907_v26 = vmax.f32 %v9775_v42, 0.0 }
 0x5e8   : > { %v9772_v48 = vpop.f32.mrf.mxu3  ;;  %4356 = vmatpush.msra.mxu3 %v4337_v36 }
 0x5e9   : > { %v9778_v0 = vadd.f32 %v3371_v40, %v12331_v43  ;;  %v3677_v43 = vadd.f32 %v9502_v10, %v9489_v6  ;;  %v3274_v30 = vpop.f32.mrf.mxu0 }
 0x5ea   : > { %v3111_v23 = vpop.f32.mrf.mxu2 }
 0x5eb   : > { %12332 = vst [vmem:[#allocation57_spill] sm:$0xff] %v9778_v0  ;;  %v11904_v52 = vmax.f32 %v9778_v0, 0.0  ;;  %v3112_v4 = vadd.f32 %v9526_v39, %v3111_v23 }
 0x5ed   : > { %v3324_v40 = vadd.f32 %v9681_v60, %v3112_v4  ;;  %6784 = vmatmul.msk.f32.gmra.mxu1 %vm1440_vm1, %v11904_v52  ;;  %6819 = vmatmul.msk.f32.gmra.mxu3 %vm1440_vm1, %v9454_v11  ;;  %v9807_v60 = vadd.f32 %v9595_v59, %v3677_v43  ;;  %v12333_v4 = vld [vmem:[#allocation31_spill] sm:$0xff]  ;;  %v3680_v59 = vadd.f32 %v9502_v10, %v9519_v54 }
 0x5ef   : > { %v3372_v23 = vmax.f32 %v3324_v40, 0.0  ;;  %6846 = vmatmul.msk.f32.gmra.mxu2 %vm4031_vm2, %v11907_v26  ;;  %6938 = vmatmul.msk.f32.gmra.mxu0 %vm1440_vm1, %v9221_v12  ;;  %v11910_v0 = vmax.f32 %v9807_v60, 0.0  ;;  %v9815_v26 = vpop.f32.mrf.mxu1 }
 0x5f0   : > { %v9804_v36 = vpop.f32.mrf.mxu3 }
 0x5f1   : > { %v9810_v38 = vadd.f32 %v3372_v23, %v12333_v4  ;;  %v12335_v23 = vld [vmem:[#allocation52_spill] sm:$0xff] }
 0x5f2   : > { %v3114_v52 = vpop.f32.mrf.mxu2 }
 0x5f3   : > { %12334 = vst [vmem:[#allocation67_spill] sm:$0xff] %v9810_v38  ;;  %v11908_v6 = vmax.f32 %v9810_v38, 0.0  ;;  %v3115_v40 = vadd.f32 %v9526_v39, %v3114_v52  ;;  %v3277_v38 = vpop.f32.mrf.mxu0 }
 0x5f5   : > { %v3325_v12 = vadd.f32 %v9708_v62, %v3115_v40  ;;  %6785 = vmatmul.msk.f32.gmra.mxu1 %vm1440_vm1, %v11908_v6  ;;  %6820 = vmatmul.msk.f32.gmra.mxu3 %vm1440_vm1, %v9472_v21  ;;  %v9833_v62 = vadd.f32 %v9618_v28, %v3680_v59 }
 0x5f7   : > { %v3373_v43 = vmax.f32 %v3325_v12, 0.0  ;;  %6847 = vmatmul.msk.f32.gmra.mxu2 %vm4031_vm2, %v11910_v0  ;;  %6939 = vmatmul.msk.f32.gmra.mxu0 %vm1440_vm1, %v9236_v9  ;;  %v11915_v12 = vmax.f32 %v9833_v62, 0.0  ;;  %v3683_v9 = vadd.f32 %v9502_v10, %v9558_v33  ;;  %v9849_v28 = vpop.f32.mrf.mxu1 }
 0x5f8   : > { %v9830_v52 = vpop.f32.mrf.mxu3 }
 0x5f9   : > { %v9836_v4 = vadd.f32 %v3373_v43, %v12335_v23  ;;  %v9859_v43 = vadd.f32 %v9644_v46, %v3683_v9  ;;  %v12337_v23 = vld [vmem:[#allocation34_spill] sm:$0xff] }
 0x5fa   : > { %v3117_v40 = vpop.f32.mrf.mxu2 }
 0x5fb   : > { %12336 = vst [vmem:[#allocation58_spill] sm:$0xff] %v9836_v4  ;;  %v11911_v6 = vmax.f32 %v9836_v4, 0.0  ;;  %v3118_v54 = vadd.f32 %v9526_v39, %v3117_v40  ;;  %v3280_v46 = vpop.f32.mrf.mxu0 }
 0x5fd   : > { %v3326_v0 = vadd.f32 %v9741_v3, %v3118_v54  ;;  %6786 = vmatmul.msk.f32.gmra.mxu1 %vm1440_vm1, %v11911_v6  ;;  %6821 = vmatmul.msk.f32.gmra.mxu3 %vm1440_vm1, %v9493_v51  ;;  %v11914_v6 = vmax.f32 %v9859_v43, 0.0 }
 0x5ff   : > { %v3374_v59 = vmax.f32 %v3326_v0, 0.0  ;;  %6848 = vmatmul.msk.f32.gmra.mxu2 %vm4031_vm2, %v11915_v12  ;;  %6940 = vmatmul.msk.f32.gmra.mxu0 %vm1440_vm1, %v9253_v5  ;;  %v3686_v5 = vadd.f32 %v9502_v10, %v9588_v45 }
 0x600   : > { %v9856_v3 = vpop.f32.mrf.mxu3 }
 0x601   : > { %v9862_v40 = vadd.f32 %v3374_v59, %v12337_v23  ;;  %v9882_v59 = vadd.f32 %v9672_v57, %v3686_v5  ;;  %v9884_v23 = vpop.f32.mrf.mxu1 }
 0x602   : > { %v3120_v54 = vpop.f32.mrf.mxu2 }
 0x603   : > { %v11913_v33 = vmax.f32 %v9862_v40, 0.0  ;;  %v3121_v0 = vadd.f32 %v9526_v39, %v3120_v54  ;;  %v12338_v54 = vmax.f32 %v9117_v25, 0.0  ;;  %v3689_v25 = vadd.f32 %v9502_v10, %v9624_v27  ;;  %v4597_v5 = vpop.f32.mrf.mxu0 }
 0x605   : > { %v3327_v4 = vadd.f32 %v3271_v56, %v3121_v0  ;;  %6787 = vmatmul.msk.f32.gmra.mxu1 %vm1440_vm1, %v11913_v33  ;;  %6822 = vmatmul.msk.f32.gmra.mxu3 %vm1440_vm1, %v9521_v61 }
 0x607   : > { %v3375_v9 = vmax.f32 %v3327_v4, 0.0  ;;  %6849 = vmatmul.msk.f32.gmra.mxu2 %vm4031_vm2, %v11914_v6  ;;  %6941 = vmatmul.msk.f32.gmra.mxu0 %vm1440_vm1, %v9273_v47  ;;  %v4837_v47 = vld [vmem:[%s11806_s17] sm:$0xff]  ;;  %v11924_v6 = vmax.f32 %v9882_v59, 0.0 }
 0x608   : > { %v9879_v56 = vpop.f32.mrf.mxu3  ;;  %5004 = vmatpush.msrb.mxu1 %v4837_v47 }
 0x609   : > { %v9888_v0 = vadd.f32 %v3375_v9, %v12338_v54  ;;  %v12339_v9 = vmax.f32 %v9137_v18, 0.0  ;;  %v9917_v27 = vpop.f32.mrf.mxu1  ;;  %v3692_v18 = vadd.f32 %v9502_v10, %v9653_v34 }
 0x60a   : > { %v3123_v45 = vpop.f32.mrf.mxu2 }
 0x60b   : > { %v11916_v4 = vmax.f32 %v9888_v0, 0.0  ;;  %v3124_v33 = vadd.f32 %v9526_v39, %v3123_v45 }
 0x60d   : > { %v3328_v12 = vadd.f32 %v3274_v30, %v3124_v33  ;;  %6788 = vmatmul.msk.f32.gmra.mxu1 %vm1440_vm1, %v11916_v4  ;;  %6823 = vmatmul.msk.f32.gmra.mxu3 %vm1440_vm1, %v9552_v16  ;;  %v9911_v33 = vadd.f32 %v9697_v24, %v3689_v25 }
 0x60f   : > { %v3376_v57 = vmax.f32 %v3328_v12, 0.0  ;;  %6850 = vmatmul.msk.f32.gmra.mxu2 %vm4031_vm2, %v11924_v6  ;;  %6942 = vmatmul.msk.f32.gmra.mxu0 %vm1440_vm1, %v9290_v22  ;;  %v11918_v4 = vmax.f32 %v9911_v33, 0.0 }
 0x610   : > { %v9908_v30 = vpop.f32.mrf.mxu3 }
 0x611   : > { %v9915_v54 = vadd.f32 %v3376_v57, %v12339_v9  ;;  %v12340_v57 = vmax.f32 %v9160_v31, 0.0  ;;  %v3695_v31 = vadd.f32 %v9502_v10, %v9685_v50  ;;  %v9976_v50 = vld [vmem:[%s11805_s16] ss:$0 sm:$0xff] }
 0x612   : > { %v3126_v45 = vpop.f32.mrf.mxu2 }
 0x613   : > { %v11917_v12 = vmax.f32 %v9915_v54, 0.0  ;;  %v3127_v47 = vadd.f32 %v9526_v39, %v3126_v45 }
 0x615   : > { %v3329_v22 = vadd.f32 %v3277_v38, %v3127_v47  ;;  %6789 = vmatmul.msk.f32.gmra.mxu1 %vm1440_vm1, %v11917_v12  ;;  %6824 = vmatmul.msk.f32.gmra.mxu3 %vm1440_vm1, %v9577_v29  ;;  %v9937_v38 = vadd.f32 %v9724_v13, %v3692_v18  ;;  %v4600_v47 = vpop.f32.mrf.mxu0  ;;  %v5202_v12 = vld [vmem:[%s11808_s19 + $0x20] sm:$0xff]  ;;  %v9971_v18 = vadd.f32 %v9748_v7, %v3695_v31 }
 0x616   : > { %5366 = vmatpush.msrb.mxu2 %v5202_v12 }
 0x617   : > { %v3377_v24 = vmax.f32 %v3329_v22, 0.0  ;;  %6851 = vmatmul.msk.f32.gmra.mxu2 %vm4031_vm2, %v11918_v4  ;;  %6943 = vmatmul.msk.f32.gmra.mxu0 %vm1440_vm1, %v9305_v49  ;;  %v11921_v49 = vmax.f32 %v9937_v38, 0.0  ;;  %v9949_v4 = vpop.f32.mrf.mxu1 }
 0x618   : > { %v9934_v25 = vpop.f32.mrf.mxu3 }
 0x619   : > { %v9941_v9 = vadd.f32 %v3377_v24, %v12340_v57  ;;  %v12341_v24 = vmax.f32 %v9183_v41, 0.0  ;;  %v3698_v41 = vadd.f32 %v9502_v10, %v9717_v20 }
 0x61a   : > { %v3129_v45 = vpop.f32.mrf.mxu2 }
 0x61b   : > { %v11919_v34 = vmax.f32 %v9941_v9, 0.0  ;;  %v3130_v22 = vadd.f32 %v9526_v39, %v3129_v45 }
 0x61d   : > { %v3330_v13 = vadd.f32 %v3280_v46, %v3130_v22  ;;  %6790 = vmatmul.msk.f32.gmra.mxu1 %vm1440_vm1, %v11919_v34  ;;  %6825 = vmatmul.msk.f32.gmra.mxu3 %vm1440_vm1, %v9602_v15  ;;  %v9966_v46 = vld [vmem:[%s11803_s14] ss:$0 sm:$0xff]  ;;  %v4598_v34 = vadd.f32 %v9976_v50, %v4597_v5  ;;  %v4603_v7 = vpop.f32.mrf.mxu0 }
 0x61e   : > { %v4604_v6 = vadd.f32 %v9976_v50, %v4603_v7 }
 0x61f   : > { %v3378_v39 = vmax.f32 %v3330_v13, 0.0  ;;  %6852 = vmatmul.msk.f32.gmra.mxu2 %vm4031_vm2, %v11921_v49  ;;  %6944 = vmatmul.msk.f32.gmra.mxu0 %vm1440_vm1, %v9322_v2  ;;  %v11922_v13 = vmax.f32 %v9971_v18, 0.0 }
 0x620   : > { %v9968_v12 = vpop.f32.mrf.mxu3 }
 0x621   : > { %v9980_v57 = vadd.f32 %v3378_v39, %v12341_v24  ;;  %v9993_v39 = vpop.f32.mrf.mxu1 }
 0x622   : > { %v4193_v2 = vpop.f32.mrf.mxu2 }
 0x623   : > { %12342 = vst [vmem:[#allocation68_spill] sm:$0xff] %v9980_v57  ;;  %v11920_v45 = vmax.f32 %v9980_v57, 0.0  ;;  %v4194_v22 = vadd.f32 %v9966_v46, %v4193_v2  ;;  %v10005_v2 = vadd.f32 %v9772_v48, %v3698_v41 }
 0x625   : > { %v4526_v31 = vmax.f32 %v4194_v22, 0.0  ;;  %6791 = vmatmul.msk.f32.gmra.mxu1 %vm1440_vm1, %v11920_v45  ;;  %6826 = vmatmul.msk.f32.gmra.mxu3 %vm1440_vm1, %v9627_v37  ;;  %v4606_v48 = vpop.f32.mrf.mxu0 }
 0x627   : > { %v9995_v24 = vadd.f32 %v4598_v34, %v4526_v31  ;;  %6853 = vmatmul.msk.f32.gmra.mxu2 %vm4031_vm2, %v11922_v13  ;;  %6945 = vmatmul.msk.f32.gmra.mxu0 %vm1440_vm1, %v9342_v32  ;;  %v11925_v34 = vmax.f32 %v10005_v2, 0.0  ;;  %v4601_v31 = vadd.f32 %v9976_v50, %v4600_v47  ;;  %v3701_v32 = vadd.f32 %v9502_v10, %v9753_v17 }
 0x628   : > { %v10002_v5 = vpop.f32.mrf.mxu3 }
 0x629   : > { %12343 = vst [vmem:[#allocation60_spill] sm:$0xff] %v9995_v24  ;;  %v11923_v45 = vmax.f32 %v9995_v24, 0.0  ;;  %v10030_v13 = vpop.f32.mrf.mxu1 }
 0x62a   : > { %v4196_v22 = vpop.f32.mrf.mxu2 }
 0x62b   : > { %v4197_v20 = vadd.f32 %v9966_v46, %v4196_v22  ;;  %v12345_v22 = vld [vmem:[#allocation59_spill] sm:$0xff] }
 0x62d   : > { %v4527_v49 = vmax.f32 %v4197_v20, 0.0  ;;  %6827 = vmatmul.msk.f32.gmra.mxu3 %vm1440_vm1, %v9655_v58  ;;  %6972 = vmatmul.msk.f32.vlgmr.msrb.gmra.mxu1 %vm4031_vm2, %v11923_v45  ;;  %v10028_v20 = vadd.f32 %v9804_v36, %v3701_v32  ;;  %v3704_v36 = vadd.f32 %v9502_v10, %v9780_v55 }
 0x62f   : > { %v10018_v41 = vadd.f32 %v4601_v31, %v4527_v49  ;;  %6854 = vmatmul.msk.f32.gmra.mxu2 %vm4031_vm2, %v11925_v34  ;;  %6946 = vmatmul.msk.f32.gmra.mxu0 %vm1440_vm1, %v12345_v22  ;;  %v11928_v31 = vmax.f32 %v10028_v20, 0.0  ;;  %v10053_v22 = vadd.f32 %v9830_v52, %v3704_v36  ;;  %v3707_v52 = vadd.f32 %v9502_v10, %v9815_v26 }
 0x630   : > { %v10025_v47 = vpop.f32.mrf.mxu3 }
 0x631   : > { %12344 = vst [vmem:[#allocation69_spill] sm:$0xff] %v10018_v41  ;;  %v11927_v17 = vmax.f32 %v10018_v41, 0.0 }
 0x632   : > { %v4199_v45 = vpop.f32.mrf.mxu2 }
 0x633   : > { %v4200_v49 = vadd.f32 %v9966_v46, %v4199_v45  ;;  %v12347_v45 = vld [vmem:[#allocation45_spill] sm:$0xff] }
 0x635   : > { %v4528_v34 = vmax.f32 %v4200_v49, 0.0  ;;  %6828 = vmatmul.msk.f32.gmra.mxu3 %vm1440_vm1, %v9679_v1  ;;  %6973 = vmatmul.msk.f32.gmra.mxu1 %vm4031_vm2, %v11927_v17  ;;  %v4609_v49 = vpop.f32.mrf.mxu0  ;;  %v10055_v17 = vpop.f32.mrf.mxu1 }
 0x637   : > { %v10043_v32 = vadd.f32 %v4604_v6, %v4528_v34  ;;  %6855 = vmatmul.msk.f32.gmra.mxu2 %vm4031_vm2, %v11928_v31  ;;  %6947 = vmatmul.msk.f32.gmra.mxu0 %vm1440_vm1, %v12347_v45  ;;  %v11932_v34 = vmax.f32 %v10053_v22, 0.0  ;;  %v4607_v31 = vadd.f32 %v9976_v50, %v4606_v48  ;;  %v10078_v45 = vadd.f32 %v9856_v3, %v3707_v52 }
 0x638   : > { %v10050_v7 = vpop.f32.mrf.mxu3  ;;  %v3710_v3 = vadd.f32 %v9502_v10, %v9849_v28  ;;  %v5201_v28 = vld [vmem:[%s11808_s19 + $0x18] sm:$0xff] }
 0x639   : > { %12346 = vst [vmem:[#allocation62_spill] sm:$0xff] %v10043_v32  ;;  %v11931_v55 = vmax.f32 %v10043_v32, 0.0  ;;  %5367 = vmatpush.msrb.mxu2 %v5201_v28 }
 0x63a   : > { %v4202_v41 = vpop.f32.mrf.mxu2 }
 0x63b   : > { %v4203_v6 = vadd.f32 %v9966_v46, %v4202_v41  ;;  %v12349_v41 = vld [vmem:[#allocation51_spill] sm:$0xff] }
 0x63d   : > { %v4529_v24 = vmax.f32 %v4203_v6, 0.0  ;;  %6829 = vmatmul.msk.f32.gmra.mxu3 %vm1440_vm1, %v9704_v63  ;;  %6974 = vmatmul.msk.f32.gmra.mxu1 %vm4031_vm2, %v11931_v55  ;;  %v4612_v32 = vpop.f32.mrf.mxu0 }
 0x63f   : > { %v10068_v36 = vadd.f32 %v4607_v31, %v4529_v24  ;;  %6856 = vmatmul.msk.f32.gmra.mxu2 %vm4031_vm2, %v11932_v34  ;;  %6948 = vmatmul.msk.f32.gmra.mxu0 %vm1440_vm1, %v12349_v41  ;;  %v11935_v24 = vmax.f32 %v10078_v45, 0.0  ;;  %v10083_v31 = vpop.f32.mrf.mxu1  ;;  %v4610_v34 = vadd.f32 %v9976_v50, %v4609_v49  ;;  %v10103_v41 = vadd.f32 %v9879_v56, %v3710_v3 }
 0x640   : > { %v10075_v48 = vpop.f32.mrf.mxu3  ;;  %v3713_v56 = vadd.f32 %v9502_v10, %v9884_v23 }
 0x641   : > { %12348 = vst [vmem:[#allocation70_spill] sm:$0xff] %v10068_v36  ;;  %v11934_v55 = vmax.f32 %v10068_v36, 0.0 }
 0x642   : > { %v4205_v6 = vpop.f32.mrf.mxu2 }
 0x643   : > { %v4206_v26 = vadd.f32 %v9966_v46, %v4205_v6 }
 0x645   : > { %v4530_v57 = vmax.f32 %v4206_v26, 0.0  ;;  %6830 = vmatmul.msk.f32.gmra.mxu3 %vm1440_vm1, %v9730_v14  ;;  %6975 = vmatmul.msk.f32.gmra.mxu1 %vm4031_vm2, %v11934_v55 }
 0x647   : > { %v10093_v52 = vadd.f32 %v4610_v34, %v4530_v57  ;;  %6857 = vmatmul.msk.f32.gmra.mxu2 %vm4031_vm2, %v11935_v24  ;;  %6949 = vmatmul.msk.f32.gmra.mxu0 %vm1440_vm1, %v9419_v35  ;;  %v11939_v57 = vmax.f32 %v10103_v41, 0.0  ;;  %v4613_v34 = vadd.f32 %v9976_v50, %v4612_v32  ;;  %v4615_v35 = vpop.f32.mrf.mxu0  ;;  %v10119_v3 = vpop.f32.mrf.mxu1 }
 0x648   : > { %v10100_v49 = vpop.f32.mrf.mxu3 }
 0x649   : > { %12350 = vst [vmem:[#allocation64_spill] sm:$0xff] %v10093_v52  ;;  %v11936_v26 = vmax.f32 %v10093_v52, 0.0  ;;  %v12352_v52 = vld [vmem:[#allocation61_spill] sm:$0xff] }
 0x64a   : > { %v4208_v6 = vpop.f32.mrf.mxu2 }
 0x64b   : > { %v4209_v55 = vadd.f32 %v9966_v46, %v4208_v6 }
 0x64d   : > { %v4531_v24 = vmax.f32 %v4209_v55, 0.0  ;;  %6831 = vmatmul.msk.f32.gmra.mxu3 %vm1440_vm1, %v9756_v8  ;;  %6976 = vmatmul.msk.f32.gmra.mxu1 %vm4031_vm2, %v11936_v26  ;;  %v10131_v55 = vadd.f32 %v9908_v30, %v3713_v56 }
 0x64f   : > { %v10121_v6 = vadd.f32 %v4613_v34, %v4531_v24  ;;  %6858 = vmatmul.msk.f32.gmra.mxu2 %vm4031_vm2, %v11939_v57  ;;  %6950 = vmatmul.msk.f32.gmra.mxu0 %vm1440_vm1, %v9436_v53  ;;  %v11941_v24 = vmax.f32 %v10131_v55, 0.0  ;;  %v4616_v34 = vadd.f32 %v9976_v50, %v4615_v35  ;;  %v12353_v57 = vmax.f32 %v12352_v52, 0.0  ;;  %v4618_v30 = vpop.f32.mrf.mxu0  ;;  %v10157_v35 = vpop.f32.mrf.mxu1 }
 0x650   : > { %v10128_v32 = vpop.f32.mrf.mxu3  ;;  %v3716_v53 = vadd.f32 %v9502_v10, %v9917_v27 }
 0x651   : > { %12351 = vst [vmem:[#allocation71_spill] sm:$0xff] %v10121_v6  ;;  %v11940_v26 = vmax.f32 %v10121_v6, 0.0 }
 0x652   : > { %v4211_v28 = vpop.f32.mrf.mxu2 }
 0x653   : > { %v4212_v23 = vadd.f32 %v9966_v46, %v4211_v28 }
 0x655   : > { %v4532_v36 = vmax.f32 %v4212_v23, 0.0  ;;  %6884 = vmatmul.msk.f32.vlgmr.msra.gmra.mxu3 %vm4031_vm2, %v12353_v57  ;;  %6977 = vmatmul.msk.f32.gmra.mxu1 %vm4031_vm2, %v11940_v26  ;;  %v10155_v57 = vadd.f32 %v9934_v25, %v3716_v53 }
 0x657   : > { %v10145_v56 = vadd.f32 %v4616_v34, %v4532_v36  ;;  %6859 = vmatmul.msk.f32.gmra.mxu2 %vm4031_vm2, %v11941_v24  ;;  %6951 = vmatmul.msk.f32.gmra.mxu0 %vm1440_vm1, %v9454_v11  ;;  %v11945_v23 = vmax.f32 %v10155_v57, 0.0  ;;  %v4619_v34 = vadd.f32 %v9976_v50, %v4618_v30  ;;  %v12355_v24 = vld [vmem:[#allocation47_spill] sm:$0xff]  ;;  %v3719_v11 = vadd.f32 %v9502_v10, %v9949_v4 }
 0x658   : > { %v10152_v52 = vpop.f32.mrf.mxu3  ;;  %v12356_v6 = vmax.f32 %v12355_v24, 0.0  ;;  %v10183_v24 = vpop.f32.mrf.mxu0 }
 0x659   : > { %12354 = vst [vmem:[#allocation66_spill] sm:$0xff] %v10145_v56  ;;  %v11944_v27 = vmax.f32 %v10145_v56, 0.0 }
 0x65a   : > { %v4214_v28 = vpop.f32.mrf.mxu2 }
 0x65b   : > { %v4215_v36 = vadd.f32 %v9966_v46, %v4214_v28  ;;  %v10187_v28 = vpop.f32.mrf.mxu1 }
 0x65d   : > { %v4533_v26 = vmax.f32 %v4215_v36, 0.0  ;;  %6885 = vmatmul.msk.f32.gmra.mxu3 %vm4031_vm2, %v12356_v6  ;;  %6978 = vmatmul.msk.f32.gmra.mxu1 %vm4031_vm2, %v11944_v27  ;;  %v10181_v6 = vadd.f32 %v9968_v12, %v3719_v11  ;;  %v12359_v36 = vld [vmem:[#allocation53_spill] sm:$0xff] }
 0x65f   : > { %v10171_v25 = vadd.f32 %v4619_v34, %v4533_v26  ;;  %6860 = vmatmul.msk.f32.gmra.mxu2 %vm4031_vm2, %v11945_v23  ;;  %6952 = vmatmul.msk.f32.gmra.mxu0 %vm1440_vm1, %v9472_v21  ;;  %12358 = vst [vmem:[#allocation11_spill] sm:$0xff] %v10181_v6  ;;  %v11946_v26 = vmax.f32 %v10181_v6, 0.0  ;;  %v12360_v34 = vmax.f32 %v12359_v36, 0.0  ;;  %v3722_v21 = vadd.f32 %v9502_v10, %v9993_v39  ;;  %v12362_v39 = vld [vmem:[#allocation63_spill] sm:$0xff] }
 0x660   : > { %v10178_v53 = vpop.f32.mrf.mxu3  ;;  %v12363_v23 = vmax.f32 %v12362_v39, 0.0 }
 0x661   : > { %12357 = vst [vmem:[#allocation5_spill] sm:$0xff] %v10171_v25  ;;  %v11943_v4 = vmax.f32 %v10171_v25, 0.0  ;;  %v10207_v11 = vadd.f32 %v10002_v5, %v3722_v21  ;;  %v12365_v25 = vld [vmem:[#allocation54_spill] sm:$0xff] }
 0x662   : > { %v10185_v30 = vpop.f32.mrf.mxu2 }
 0x663   : > { %12361 = vst [vmem:[#allocation13_spill] sm:$0xff] %v10207_v11  ;;  %v3742_v27 = vpop.f32.mrf.mxu1 }
 0x665   : > { %6886 = vmatmul.msk.f32.gmra.mxu3 %vm4031_vm2, %v12360_v34  ;;  %6979 = vmatmul.msk.f32.gmra.mxu1 %vm4031_vm2, %v11943_v4  ;;  %v10211_v34 = vpop.f32.mrf.mxu0  ;;  %v11948_v4 = vmax.f32 %v10207_v11, 0.0 }
 0x667   : > { %6861 = vmatmul.msk.f32.gmra.mxu2 %vm4031_vm2, %v11946_v26  ;;  %6953 = vmatmul.msk.f32.gmra.mxu0 %vm1440_vm1, %v9493_v51  ;;  %v3725_v26 = vadd.f32 %v9502_v10, %v10030_v13  ;;  %v12366_v13 = vmax.f32 %v12365_v25, 0.0  ;;  %v5200_v25 = vld [vmem:[%s11808_s19 + $0x10] sm:$0xff] }
 0x668   : > { %v10204_v12 = vpop.f32.mrf.mxu3  ;;  %5368 = vmatpush.msrb.mxu2 %v5200_v25 }
 0x669   : > { %v10227_v5 = vadd.f32 %v10025_v47, %v3725_v26 }
 0x66a   : > { %v10209_v36 = vpop.f32.mrf.mxu2 }
 0x66b   : > { %12364 = vst [vmem:[#allocation72_spill] sm:$0xff] %v10227_v5  ;;  %v11951_v39 = vmax.f32 %v10227_v5, 0.0  ;;  %v3745_v56 = vpop.f32.mrf.mxu1 }
 0x66d   : > { %6887 = vmatmul.msk.f32.gmra.mxu3 %vm4031_vm2, %v12363_v23  ;;  %v10232_v23 = vpop.f32.mrf.mxu0 }
 0x66f   : > { %6862 = vmatmul.msk.f32.gmra.mxu2 %vm4031_vm2, %v11948_v4  ;;  %6954 = vmatmul.msk.f32.gmra.mxu0 %vm1440_vm1, %v9521_v61  ;;  %v3728_v4 = vadd.f32 %v9502_v10, %v10055_v17 }
 0x670   : > { %v10224_v51 = vpop.f32.mrf.mxu3 }
 0x671   : > { %v10247_v47 = vadd.f32 %v10050_v7, %v3728_v4 }
 0x672   : > { %v10229_v21 = vpop.f32.mrf.mxu2 }
 0x673   : > { %12367 = vst [vmem:[#allocation8_spill] sm:$0xff] %v10247_v47  ;;  %v11953_v17 = vmax.f32 %v10247_v47, 0.0  ;;  %v3748_v25 = vpop.f32.mrf.mxu1 }
 0x675   : > { %6888 = vmatmul.msk.f32.gmra.mxu3 %vm4031_vm2, %v12366_v13  ;;  %v12368_v13 = vld [vmem:[#allocation55_spill] sm:$0xff] }
 0x676   : > { %v12369_v5 = vmax.f32 %v12368_v13, 0.0 }
 0x677   : > { %6863 = vmatmul.msk.f32.gmra.mxu2 %vm4031_vm2, %v11951_v39  ;;  %6955 = vmatmul.msk.f32.gmra.mxu0 %vm1440_vm1, %v9552_v16  ;;  %v3731_v16 = vadd.f32 %v9502_v10, %v10083_v31  ;;  %v10260_v39 = vpop.f32.mrf.mxu0  ;;  %v12371_v31 = vld [vmem:[#allocation65_spill] sm:$0xff] }
 0x678   : > { %v10244_v61 = vpop.f32.mrf.mxu3  ;;  %v12372_v11 = vmax.f32 %v12371_v31, 0.0 }
 0x679   : > { %v10270_v4 = vadd.f32 %v10075_v48, %v3731_v16 }
 0x67a   : > { %v10249_v26 = vpop.f32.mrf.mxu2 }
 0x67b   : > { %12370 = vst [vmem:[#allocation73_spill] sm:$0xff] %v10270_v4 }
 0x67d   : > { %6889 = vmatmul.msk.f32.gmra.mxu3 %vm4031_vm2, %v12369_v5  ;;  %v11956_v5 = vmax.f32 %v10270_v4, 0.0 }
 0x67f   : > { %6864 = vmatmul.msk.f32.gmra.mxu2 %vm4031_vm2, %v11953_v17  ;;  %6956 = vmatmul.msk.f32.gmra.mxu0 %vm1440_vm1, %v9577_v29  ;;  %v3734_v17 = vadd.f32 %v9502_v10, %v10119_v3  ;;  %v10290_v16 = vpop.f32.mrf.mxu0  ;;  %v12374_v3 = vld [vmem:[#allocation56_spill] sm:$0xff] }
 0x680   : > { %v10267_v7 = vpop.f32.mrf.mxu3  ;;  %v12375_v6 = vmax.f32 %v12374_v3, 0.0 }
 0x681   : > { %v10288_v48 = vadd.f32 %v10100_v49, %v3734_v17 }
 0x682   : > { %v10272_v13 = vpop.f32.mrf.mxu2 }
 0x683   : > { %12373 = vst [vmem:[#allocation32_spill] sm:$0xff] %v10288_v48  ;;  %v11958_v47 = vmax.f32 %v10288_v48, 0.0 }
 0x685   : > { %6890 = vmatmul.msk.f32.gmra.mxu3 %vm4031_vm2, %v12372_v11  ;;  %v3751_v11 = vpop.f32.mrf.mxu1 }
 0x687   : > { %6865 = vmatmul.msk.f32.gmra.mxu2 %vm4031_vm2, %v11956_v5  ;;  %6957 = vmatmul.msk.f32.gmra.mxu0 %vm1440_vm1, %v9602_v15  ;;  %v3737_v5 = vadd.f32 %v9502_v10, %v10157_v35  ;;  %v10312_v3 = vpop.f32.mrf.mxu0  ;;  %v12377_v35 = vmax.f32 %v9727_v44, 0.0 }
 0x688   : > { %v10285_v29 = vpop.f32.mrf.mxu3 }
 0x689   : > { %v10308_v49 = vadd.f32 %v10128_v32, %v3737_v5 }
 0x68a   : > { %v10292_v31 = vpop.f32.mrf.mxu2 }
 0x68b   : > { %12376 = vst [vmem:[#allocation17_spill] sm:$0xff] %v10308_v49 }
 0x68d   : > { %6891 = vmatmul.msk.f32.gmra.mxu3 %vm4031_vm2, %v12375_v6  ;;  %v11959_v6 = vmax.f32 %v10308_v49, 0.0  ;;  %v3754_v4 = vpop.f32.mrf.mxu1 }
 0x68f   : > { %6866 = vmatmul.msk.f32.gmra.mxu2 %vm4031_vm2, %v11958_v47  ;;  %6958 = vmatmul.msk.f32.gmra.mxu0 %vm1440_vm1, %v9627_v37  ;;  %v3740_v47 = vadd.f32 %v9502_v10, %v10187_v28  ;;  %v12379_v28 = vmax.f32 %v9751_v19, 0.0 }
 0x690   : > { %v10305_v15 = vpop.f32.mrf.mxu3 }
 0x691   : > { %v10328_v32 = vadd.f32 %v10152_v52, %v3740_v47 }
 0x692   : > { %v10310_v17 = vpop.f32.mrf.mxu2 }
 0x693   : > { %12378 = vst [vmem:[#allocation18_spill] sm:$0xff] %v10328_v32  ;;  %v11963_v44 = vmax.f32 %v10328_v32, 0.0 }
 0x695   : > { %6892 = vmatmul.msk.f32.gmra.mxu3 %vm4031_vm2, %v12377_v35  ;;  %v10333_v35 = vpop.f32.mrf.mxu0  ;;  %v3757_v49 = vpop.f32.mrf.mxu1 }
 0x697   : > { %6867 = vmatmul.msk.f32.gmra.mxu2 %vm4031_vm2, %v11959_v6  ;;  %6959 = vmatmul.msk.f32.gmra.mxu0 %vm1440_vm1, %v9655_v58  ;;  %v3743_v6 = vadd.f32 %v9502_v10, %v3742_v27  ;;  %v3746_v27 = vadd.f32 %v9502_v10, %v3745_v56  ;;  %v5199_v56 = vld [vmem:[%s11808_s19 + $0x8] sm:$0xff] }
 0x698   : > { %v10325_v37 = vpop.f32.mrf.mxu3  ;;  %5369 = vmatpush.msrb.mxu2 %v5199_v56 }
 0x699   : > { %v10347_v52 = vadd.f32 %v10178_v53, %v3743_v6  ;;  %v10366_v6 = vadd.f32 %v10204_v12, %v3746_v27 }
 0x69a   : > { %v10330_v5 = vpop.f32.mrf.mxu2 }
 0x69b   : > { %12380 = vst [vmem:[#allocation12_spill] sm:$0xff] %v10347_v52  ;;  %v11962_v19 = vmax.f32 %v10347_v52, 0.0 }
 0x69c   : > { %12382 = vst [vmem:[#allocation3_spill] sm:$0xff] %v10366_v6 }
 0x69d   : > { %6893 = vmatmul.msk.f32.gmra.mxu3 %vm4031_vm2, %v12379_v28  ;;  %v12381_v28 = vmax.f32 %v9775_v42, 0.0  ;;  %v10356_v32 = vpop.f32.mrf.mxu0  ;;  %v3760_v53 = vpop.f32.mrf.mxu1 }
 0x69f   : > { %6868 = vmatmul.msk.f32.gmra.mxu2 %vm4031_vm2, %v11963_v44  ;;  %6960 = vmatmul.msk.f32.gmra.mxu0 %vm1440_vm1, %v9679_v1 }
 0x6a0   : > { %v10344_v58 = vpop.f32.mrf.mxu3 }
 0x6a2   : > { %v10349_v47 = vpop.f32.mrf.mxu2 }
 0x6a5   : > { %6894 = vmatmul.msk.f32.gmra.mxu3 %vm4031_vm2, %v12381_v28  ;;  %v11964_v28 = vmax.f32 %v10366_v6, 0.0  ;;  %v10388_v56 = vpop.f32.mrf.mxu0 }
 0x6a7   : > { %6869 = vmatmul.msk.f32.gmra.mxu2 %vm4031_vm2, %v11962_v19  ;;  %6961 = vmatmul.msk.f32.gmra.mxu0 %vm1440_vm1, %v9704_v63  ;;  %v12383_v19 = vmax.f32 %v9807_v60, 0.0  ;;  %v3749_v63 = vadd.f32 %v9502_v10, %v3748_v25  ;;  %v3763_v60 = vpop.f32.mrf.mxu1  ;;  %v12385_v10 = vmax.f32 %v9833_v62, 0.0 }
 0x6a8   : > { %v10363_v1 = vpop.f32.mrf.mxu3 }
 0x6a9   : > { %v10386_v27 = vadd.f32 %v10224_v51, %v3749_v63 }
 0x6aa   : > { %v10368_v42 = vpop.f32.mrf.mxu2 }
 0x6ab   : > { %12384 = vst [vmem:[#allocation14_spill] sm:$0xff] %v10386_v27 }
 0x6ad   : > { %6895 = vmatmul.msk.f32.gmra.mxu3 %vm4031_vm2, %v12383_v19  ;;  %v11966_v19 = vmax.f32 %v10386_v27, 0.0 }
 0x6af   : > { %6870 = vmatmul.msk.f32.gmra.mxu2 %vm4031_vm2, %v11964_v28  ;;  %6962 = vmatmul.msk.f32.gmra.mxu0 %vm1440_vm1, %v9730_v14  ;;  %v10399_v14 = vld [vmem:[%s11801_s12] ss:$0 sm:$0xff]  ;;  %v3766_v28 = vpop.f32.mrf.mxu1 }
 0x6b0   : > { %v10383_v12 = vpop.f32.mrf.mxu3  ;;  %v3752_v25 = vadd.f32 %v10399_v14, %v3751_v11  ;;  %v12387_v11 = vmax.f32 %v9859_v43, 0.0 }
 0x6b2   : > { %v10390_v44 = vpop.f32.mrf.mxu2  ;;  %v10410_v62 = vadd.f32 %v10244_v61, %v3752_v25 }
 0x6b4   : > { %12386 = vst [vmem:[#allocation7_spill] sm:$0xff] %v10410_v62  ;;  %v11969_v6 = vmax.f32 %v10410_v62, 0.0 }
 0x6b5   : > { %6896 = vmatmul.msk.f32.gmra.mxu3 %vm4031_vm2, %v12385_v10  ;;  %v10414_v10 = vpop.f32.mrf.mxu0 }
 0x6b7   : > { %6871 = vmatmul.msk.f32.gmra.mxu2 %vm4031_vm2, %v11966_v19  ;;  %6963 = vmatmul.msk.f32.gmra.mxu0 %vm1440_vm1, %v9756_v8  ;;  %v3755_v19 = vadd.f32 %v10399_v14, %v3754_v4  ;;  %v12388_v8 = vld [vmem:[#allocation57_spill] sm:$0xff]  ;;  %v12391_v4 = vmax.f32 %v9882_v59, 0.0 }
 0x6b8   : > { %v10407_v51 = vpop.f32.mrf.mxu3  ;;  %v12389_v61 = vmax.f32 %v12388_v8, 0.0  ;;  %v3769_v8 = vpop.f32.mrf.mxu1 }
 0x6b9   : > { %v10430_v27 = vadd.f32 %v10267_v7, %v3755_v19 }
 0x6ba   : > { %v10412_v63 = vpop.f32.mrf.mxu2 }
 0x6bb   : > { %12390 = vst [vmem:[#allocation40_spill] sm:$0xff] %v10430_v27  ;;  %v11972_v43 = vmax.f32 %v10430_v27, 0.0 }
 0x6bd   : > { %6897 = vmatmul.msk.f32.gmra.mxu3 %vm4031_vm2, %v12387_v11  ;;  %v10435_v11 = vpop.f32.mrf.mxu0 }
 0x6bf   : > { %6872 = vmatmul.msk.f32.gmra.mxu2 %vm4031_vm2, %v11969_v6  ;;  %6964 = vmatmul.msk.f32.gmra.mxu0 %vm1440_vm1, %v12389_v61  ;;  %v3758_v6 = vadd.f32 %v10399_v14, %v3757_v49  ;;  %v12392_v61 = vld [vmem:[#allocation67_spill] sm:$0xff]  ;;  %v12396_v49 = vmax.f32 %v9911_v33, 0.0 }
 0x6c0   : > { %v10427_v25 = vpop.f32.mrf.mxu3  ;;  %v12393_v7 = vmax.f32 %v12392_v61, 0.0  ;;  %v12397_v61 = vld [vmem:[#allocation58_spill] sm:$0xff] }
 0x6c1   : > { %v10450_v62 = vadd.f32 %v10285_v29, %v3758_v6  ;;  %v3772_v6 = vpop.f32.mrf.mxu1 }
 0x6c2   : > { %v10432_v52 = vpop.f32.mrf.mxu2 }
 0x6c3   : > { %12394 = vst [vmem:[#allocation20_spill] sm:$0xff] %v10450_v62  ;;  %v11974_v59 = vmax.f32 %v10450_v62, 0.0 }
 0x6c5   : > { %6898 = vmatmul.msk.f32.gmra.mxu3 %vm4031_vm2, %v12391_v4  ;;  %v3761_v4 = vadd.f32 %v10399_v14, %v3760_v53 }
 0x6c7   : > { %6873 = vmatmul.msk.f32.gmra.mxu2 %vm4031_vm2, %v11972_v43  ;;  %6965 = vmatmul.msk.f32.gmra.mxu0 %vm1440_vm1, %v12393_v7  ;;  %v10459_v43 = vpop.f32.mrf.mxu0  ;;  %v12398_v7 = vmax.f32 %v12397_v61, 0.0  ;;  %v10470_v27 = vadd.f32 %v10305_v15, %v3761_v4  ;;  %v3764_v61 = vadd.f32 %v10399_v14, %v3763_v60  ;;  %v12402_v15 = vmax.f32 %v9862_v40, 0.0 }
 0x6c8   : > { %v10447_v19 = vpop.f32.mrf.mxu3  ;;  %v12403_v40 = vmax.f32 %v9971_v18, 0.0 }
 0x6c9   : > { %12399 = vst [vmem:[#allocation4_spill] sm:$0xff] %v10470_v27  ;;  %v4013_v53 = vmax.f32 %v10470_v27, 0.0  ;;  %v3775_v60 = vpop.f32.mrf.mxu1 }
 0x6ca   : > { %v10452_v48 = vpop.f32.mrf.mxu2 }
 0x6cb   : > { %12395 = vst [vmem:[#allocation27_spill] sm:$0xff] %v10452_v48 }
 0x6cd   : > { %6899 = vmatmul.msk.f32.gmra.mxu3 %vm4031_vm2, %v12396_v49  ;;  %v12401_v49 = vmax.f32 %v9937_v38, 0.0 }
 0x6cf   : > { %6874 = vmatmul.msk.f32.gmra.mxu2 %vm4031_vm2, %v11974_v59  ;;  %6966 = vmatmul.msk.f32.gmra.mxu0 %vm1440_vm1, %v12398_v7  ;;  %v4218_v59 = vadd.f32 %v9966_v46, %v10185_v30  ;;  %v3966_v7 = vadd.f32 %v10325_v37, %v3764_v61  ;;  %v10488_v62 = vpop.f32.mrf.mxu0  ;;  %v4622_v30 = vadd.f32 %v9976_v50, %v10183_v24  ;;  %v12404_v24 = vmax.f32 %v9888_v0, 0.0 }
 0x6d0   : > { %v10467_v29 = vpop.f32.mrf.mxu3  ;;  %v4221_v37 = vadd.f32 %v9966_v46, %v10209_v36  ;;  %v3767_v61 = vadd.f32 %v10399_v14, %v3766_v28  ;;  %v4625_v0 = vadd.f32 %v9976_v50, %v10211_v34  ;;  %v12407_v34 = vmax.f32 %v9915_v54, 0.0 }
 0x6d1   : > { %v4014_v27 = vmax.f32 %v3966_v7, 0.0  ;;  %v3778_v7 = vpop.f32.mrf.mxu1 }
 0x6d2   : > { %v10472_v33 = vpop.f32.mrf.mxu2 }
 0x6d3   : > { %12400 = vst [vmem:[#allocation19_spill] sm:$0xff] %v10472_v33 }
 0x6d5   : > { %6900 = vmatmul.msk.f32.gmra.mxu3 %vm4031_vm2, %v12401_v49 }
 0x6d7   : > { %6875 = vmatmul.msk.f32.gmra.mxu2 %vm4031_vm2, %v4013_v53  ;;  %6967 = vmatmul.msk.f32.gmra.mxu0 %vm1440_vm1, %v12402_v15  ;;  %v3967_v15 = vadd.f32 %v10344_v58, %v3767_v61  ;;  %v10518_v28 = vpop.f32.mrf.mxu0  ;;  %v4224_v58 = vadd.f32 %v9966_v46, %v10229_v21  ;;  %v4628_v21 = vadd.f32 %v9976_v50, %v10232_v23  ;;  %v12409_v23 = vmax.f32 %v9941_v9, 0.0 }
 0x6d8   : > { %v4358_v4 = vpop.f32.mrf.mxu3  ;;  %v12411_v9 = vmax.f32 %v10053_v22, 0.0 }
 0x6d9   : > { %v4486_v38 = vadd.f32 %v4358_v4, %v4218_v59 }
 0x6da   : > { %v10490_v49 = vpop.f32.mrf.mxu2 }
 0x6db   : > { %v4534_v33 = vmax.f32 %v4486_v38, 0.0  ;;  %v4015_v38 = vmax.f32 %v3967_v15, 0.0 }
 0x6dd   : > { %v10494_v48 = vadd.f32 %v4622_v30, %v4534_v33  ;;  %6901 = vmatmul.msk.f32.gmra.mxu3 %vm4031_vm2, %v12403_v40  ;;  %v5198_v33 = vld [vmem:[%s11808_s19] sm:$0xff]  ;;  %v12406_v40 = vmax.f32 %v10005_v2, 0.0 }
 0x6de   : > { %5370 = vmatpush.msrb.mxu2 %v5198_v33 }
 0x6df   : > { %v12006_v59 = vmax.f32 %v10494_v48, 0.0  ;;  %6876 = vmatmul.msk.f32.gmra.mxu2 %vm4031_vm2, %v4014_v27  ;;  %6968 = vmatmul.msk.f32.gmra.mxu0 %vm1440_vm1, %v12404_v24 }
 0x6e0   : > { %v4361_v18 = vpop.f32.mrf.mxu3 }
 0x6e1   : > { %v4487_v4 = vadd.f32 %v4361_v18, %v4221_v37  ;;  %6980 = vmatmul.msk.f32.gmra.mxu1 %vm4031_vm2, %v12006_v59  ;;  %v3770_v37 = vadd.f32 %v10399_v14, %v3769_v8 }
 0x6e2   : > { %v10514_v36 = vpop.f32.mrf.mxu2 }
 0x6e3   : > { %v4535_v27 = vmax.f32 %v4487_v4, 0.0  ;;  %v3968_v33 = vadd.f32 %v10363_v1, %v3770_v37  ;;  %v10541_v4 = vpop.f32.mrf.mxu0  ;;  %v4227_v1 = vadd.f32 %v9966_v46, %v10249_v26 }
 0x6e5   : > { %v10520_v30 = vadd.f32 %v4625_v0, %v4535_v27  ;;  %6902 = vmatmul.msk.f32.gmra.mxu3 %vm4031_vm2, %v12406_v40  ;;  %v4016_v15 = vmax.f32 %v3968_v33, 0.0  ;;  %v12408_v0 = vmax.f32 %v10028_v20, 0.0  ;;  %v3773_v27 = vadd.f32 %v10399_v14, %v3772_v6 }
 0x6e6   : > { %v4631_v6 = vadd.f32 %v9976_v50, %v10260_v39  ;;  %v12412_v39 = vld [vmem:[#allocation68_spill] sm:$0xff] }
 0x6e7   : > { %12405 = vst [vmem:[#allocation22_spill] sm:$0xff] %v10520_v30  ;;  %v11985_v61 = vmax.f32 %v10520_v30, 0.0  ;;  %6877 = vmatmul.msk.f32.gmra.mxu2 %vm4031_vm2, %v4015_v38  ;;  %6969 = vmatmul.msk.f32.gmra.mxu0 %vm1440_vm1, %v12407_v34  ;;  %v3781_v38 = vpop.f32.mrf.mxu1  ;;  %v3969_v37 = vadd.f32 %v10383_v12, %v3773_v27  ;;  %v4230_v12 = vadd.f32 %v9966_v46, %v10272_v13 }
 0x6e8   : > { %v4364_v24 = vpop.f32.mrf.mxu3 }
 0x6e9   : > { %v4488_v18 = vadd.f32 %v4364_v24, %v4224_v58  ;;  %6981 = vmatmul.msk.f32.gmra.mxu1 %vm4031_vm2, %v11985_v61  ;;  %v4017_v24 = vmax.f32 %v3969_v37, 0.0 }
 0x6ea   : > { %v10537_v2 = vpop.f32.mrf.mxu2 }
 0x6eb   : > { %v4536_v8 = vmax.f32 %v4488_v18, 0.0  ;;  %v3776_v18 = vadd.f32 %v10399_v14, %v3775_v60  ;;  %v4634_v60 = vadd.f32 %v9976_v50, %v10290_v16 }
 0x6ed   : > { %v10543_v54 = vadd.f32 %v4628_v21, %v4536_v8  ;;  %6903 = vmatmul.msk.f32.gmra.mxu3 %vm4031_vm2, %v12408_v0  ;;  %v10572_v21 = vpop.f32.mrf.mxu0  ;;  %v3970_v22 = vadd.f32 %v10407_v51, %v3776_v18  ;;  %v4233_v51 = vadd.f32 %v9966_v46, %v10292_v31 }
 0x6ef   : > { %v12004_v40 = vmax.f32 %v10543_v54, 0.0  ;;  %6878 = vmatmul.msk.f32.gmra.mxu2 %vm4031_vm2, %v4016_v15  ;;  %6970 = vmatmul.msk.f32.gmra.mxu0 %vm1440_vm1, %v12409_v23  ;;  %v12413_v15 = vmax.f32 %v12412_v39, 0.0 }
 0x6f0   : > { %v4367_v58 = vpop.f32.mrf.mxu3 }
 0x6f1   : > { %v4489_v20 = vadd.f32 %v4367_v58, %v4227_v1  ;;  %6982 = vmatmul.msk.f32.gmra.mxu1 %vm4031_vm2, %v12004_v40  ;;  %v3784_v1 = vpop.f32.mrf.mxu1  ;;  %v4018_v58 = vmax.f32 %v3970_v22, 0.0 }
 0x6f2   : > { %v10560_v26 = vpop.f32.mrf.mxu2 }
 0x6f3   : > { %v4537_v34 = vmax.f32 %v4489_v20, 0.0  ;;  %v12414_v20 = vmax.f32 %v10078_v45, 0.0 }
 0x6f5   : > { %v10564_v33 = vadd.f32 %v4631_v6, %v4537_v34  ;;  %6904 = vmatmul.msk.f32.gmra.mxu3 %vm4031_vm2, %v12411_v9  ;;  %v3779_v6 = vadd.f32 %v10399_v14, %v3778_v7 }
 0x6f7   : > { %12410 = vst [vmem:[#allocation9_spill] sm:$0xff] %v10564_v33  ;;  %v11983_v8 = vmax.f32 %v10564_v33, 0.0  ;;  %6879 = vmatmul.msk.f32.gmra.mxu2 %vm4031_vm2, %v4017_v24  ;;  %6971 = vmatmul.msk.f32.gmra.mxu0 %vm1440_vm1, %v12413_v15  ;;  %v3971_v16 = vadd.f32 %v10427_v25, %v3779_v6  ;;  %v12416_v15 = vmax.f32 %v10103_v41, 0.0  ;;  %v4236_v25 = vadd.f32 %v9966_v46, %v10310_v17 }
 0x6f8   : > { %v4370_v0 = vpop.f32.mrf.mxu3  ;;  %v3785_v6 = vadd.f32 %v10399_v14, %v3784_v1 }
 0x6f9   : > { %v4490_v27 = vadd.f32 %v4370_v0, %v4230_v12  ;;  %6983 = vmatmul.msk.f32.gmra.mxu1 %vm4031_vm2, %v11983_v8  ;;  %v4637_v12 = vadd.f32 %v9976_v50, %v10312_v3  ;;  %v5006_v31 = vpop.f32.mrf.mxu1  ;;  %v4019_v7 = vmax.f32 %v3971_v16, 0.0  ;;  %v3782_v0 = vadd.f32 %v10399_v14, %v3781_v38 }
 0x6fa   : > { %v10583_v13 = vpop.f32.mrf.mxu2  ;;  %v4643_v14 = vadd.f32 %v9976_v50, %v10356_v32 }
 0x6fb   : > { %v4538_v23 = vmax.f32 %v4490_v27, 0.0  ;;  %v3972_v3 = vadd.f32 %v10447_v19, %v3782_v0  ;;  %v4239_v19 = vadd.f32 %v9966_v46, %v10330_v5 }
 0x6fd   : > { %v10587_v37 = vadd.f32 %v4634_v60, %v4538_v23  ;;  %6905 = vmatmul.msk.f32.gmra.mxu3 %vm4031_vm2, %v12414_v20  ;;  %v4640_v23 = vadd.f32 %v9976_v50, %v10333_v35  ;;  %v4020_v38 = vmax.f32 %v3972_v3, 0.0  ;;  %v10636_v35 = vld [vmem:[%s11807_s18] ss:$0 sm:$0xff] }
 0x6ff   : > { %v12002_v34 = vmax.f32 %v10587_v37, 0.0  ;;  %6880 = vmatmul.msk.f32.gmra.mxu2 %vm4031_vm2, %v4018_v58 }
 0x700   : > { %v4373_v24 = vpop.f32.mrf.mxu3 }
 0x701   : > { %v4491_v9 = vadd.f32 %v4373_v24, %v4233_v51  ;;  %6984 = vmatmul.msk.f32.gmra.mxu1 %vm4031_vm2, %v12002_v34  ;;  %v5009_v58 = vpop.f32.mrf.mxu1  ;;  %v12417_v51 = vmax.f32 %v10131_v55, 0.0 }
 0x702   : > { %v10601_v45 = vpop.f32.mrf.mxu2 }
 0x703   : > { %v4539_v18 = vmax.f32 %v4491_v9, 0.0  ;;  %v3973_v9 = vadd.f32 %v10467_v29, %v3785_v6  ;;  %v4242_v29 = vadd.f32 %v9966_v46, %v10349_v47  ;;  %v5010_v47 = vadd.f32 %v10636_v35, %v5009_v58 }
 0x705   : > { %v10605_v39 = vadd.f32 %v4637_v12, %v4539_v18  ;;  %6906 = vmatmul.msk.f32.gmra.mxu3 %vm4031_vm2, %v12416_v15  ;;  %v5007_v12 = vadd.f32 %v10636_v35, %v5006_v31  ;;  %v4021_v18 = vmax.f32 %v3973_v9, 0.0  ;;  %v12419_v15 = vmax.f32 %v10155_v57, 0.0 }
 0x706   : > { %v4646_v57 = vadd.f32 %v9976_v50, %v10388_v56  ;;  %v4649_v9 = vadd.f32 %v9976_v50, %v10414_v10 }
 0x707   : > { %12415 = vst [vmem:[#allocation25_spill] sm:$0xff] %v10605_v39  ;;  %v11982_v22 = vmax.f32 %v10605_v39, 0.0  ;;  %6881 = vmatmul.msk.f32.gmra.mxu2 %vm4031_vm2, %v4019_v7  ;;  %7106 = vtanh.f32 %v5007_v12 }
 0x708   : > { %v4376_v27 = vpop.f32.mrf.mxu3  ;;  %7108 = vtanh.f32 %v5010_v47 }
 0x709   : > { %v4492_v60 = vadd.f32 %v4376_v27, %v4236_v25  ;;  %6985 = vmatmul.msk.f32.gmra.mxu1 %vm4031_vm2, %v11982_v22  ;;  %v5012_v25 = vpop.f32.mrf.mxu1 }
 0x70a   : > { %v10619_v41 = vpop.f32.mrf.mxu2 }
 0x70b   : > { %v4540_v17 = vmax.f32 %v4492_v60, 0.0 }
 0x70d   : > { %v10623_v20 = vadd.f32 %v4640_v23, %v4540_v17  ;;  %6907 = vmatmul.msk.f32.gmra.mxu3 %vm4031_vm2, %v12417_v51  ;;  %v12421_v23 = vld [vmem:[#allocation11_spill] sm:$0xff]  ;;  %v4245_v51 = vadd.f32 %v9966_v46, %v10368_v42  ;;  %v5013_v42 = vadd.f32 %v10636_v35, %v5012_v25  ;;  %v10693_v25 = vpop.f32.mrf.mxu0 }
 0x70e   : > { %v12422_v17 = vmax.f32 %v12421_v23, 0.0 }
 0x70f   : > { %v11999_v24 = vmax.f32 %v10623_v20, 0.0  ;;  %6882 = vmatmul.msk.f32.gmra.mxu2 %vm4031_vm2, %v4020_v38  ;;  %v7107_v38 = vpop.eup %7106  ;;  %7110 = vtanh.f32 %v5013_v42 }
 0x710   : > { %v4379_v16 = vpop.f32.mrf.mxu3 }
 0x711   : > { %v4493_v55 = vadd.f32 %v4379_v16, %v4239_v19  ;;  %6986 = vmatmul.msk.f32.gmra.mxu1 %vm4031_vm2, %v11999_v24  ;;  %v5015_v6 = vpop.f32.mrf.mxu1 }
 0x712   : > { %v10642_v5 = vpop.f32.mrf.mxu2  ;;  %v5016_v47 = vadd.f32 %v10636_v35, %v5015_v6 }
 0x713   : > { %v4541_v1 = vmax.f32 %v4493_v55, 0.0 }
 0x714   : > { %7112 = vtanh.f32 %v5016_v47 }
 0x715   : > { %v10647_v7 = vadd.f32 %v4643_v14, %v4541_v1  ;;  %6908 = vmatmul.msk.f32.gmra.mxu3 %vm4031_vm2, %v12419_v15  ;;  %v12424_v1 = vld [vmem:[#allocation13_spill] sm:$0xff]  ;;  %v4248_v15 = vadd.f32 %v9966_v46, %v10390_v44 }
 0x716   : > { %v12425_v12 = vmax.f32 %v12424_v1, 0.0  ;;  %v10716_v1 = vpop.f32.mrf.mxu0 }
 0x717   : > { %12418 = vst [vmem:[#allocation49_spill] sm:$0xff] %v10647_v7  ;;  %v11981_v0 = vmax.f32 %v10647_v7, 0.0  ;;  %6883 = vmatmul.msk.f32.gmra.mxu2 %vm4031_vm2, %v4021_v18  ;;  %v7109_v18 = vpop.eup %7108 }
 0x718   : > { %v4382_v32 = vpop.f32.mrf.mxu3 }
 0x719   : > { %v4494_v27 = vadd.f32 %v4382_v32, %v4242_v29  ;;  %6987 = vmatmul.msk.f32.gmra.mxu1 %vm4031_vm2, %v11981_v0 }
 0x71a   : > { %v10659_v31 = vpop.f32.mrf.mxu2 }
 0x71b   : > { %v4542_v3 = vmax.f32 %v4494_v27, 0.0 }
 0x71d   : > { %v10664_v60 = vadd.f32 %v4646_v57, %v4542_v3  ;;  %6909 = vmatmul.msk.f32.gmra.mxu3 %vm4031_vm2, %v12422_v17  ;;  %v4652_v57 = vadd.f32 %v9976_v50, %v10435_v11  ;;  %v5018_v3 = vpop.f32.mrf.mxu1  ;;  %v12427_v17 = vld [vmem:[#allocation72_spill] sm:$0xff] }
 0x71f   : > { %12420 = vst [vmem:[#allocation38_spill] sm:$0xff] %v10664_v60  ;;  %v11997_v19 = vmax.f32 %v10664_v60, 0.0  ;;  %7020 = vmatmul.msk.f32.vlgmr.msrb.gmra.mxu2 %vm5210_vm3, %v7107_v38  ;;  %v12428_v38 = vmax.f32 %v12427_v17, 0.0  ;;  %v4658_v17 = vadd.f32 %v9976_v50, %v10488_v62 }
 0x720   : > { %v4385_v56 = vpop.f32.mrf.mxu3 }
 0x721   : > { %v4495_v16 = vadd.f32 %v4385_v56, %v4245_v51  ;;  %6988 = vmatmul.msk.f32.gmra.mxu1 %vm4031_vm2, %v11997_v19  ;;  %v7111_v51 = vpop.eup %7110  ;;  %v4251_v56 = vadd.f32 %v9966_v46, %v10412_v63  ;;  %v5019_v63 = vadd.f32 %v10636_v35, %v5018_v3 }
 0x722   : > { %v10676_v58 = vpop.f32.mrf.mxu2 }
 0x723   : > { %v4543_v55 = vmax.f32 %v4495_v16, 0.0  ;;  %7114 = vtanh.f32 %v5019_v63 }
 0x725   : > { %v10681_v14 = vadd.f32 %v4649_v9, %v4543_v55  ;;  %6910 = vmatmul.msk.f32.gmra.mxu3 %vm4031_vm2, %v12425_v12  ;;  %v4655_v55 = vadd.f32 %v9976_v50, %v10459_v43  ;;  %v5021_v12 = vpop.f32.mrf.mxu1 }
 0x727   : > { %12423 = vst [vmem:[#allocation41_spill] sm:$0xff] %v10681_v14  ;;  %v11980_v29 = vmax.f32 %v10681_v14, 0.0  ;;  %7021 = vmatmul.msk.f32.gmra.mxu2 %vm5210_vm3, %v7109_v18 }
 0x728   : > { %v4388_v32 = vpop.f32.mrf.mxu3 }
 0x729   : > { %v4496_v10 = vadd.f32 %v4388_v32, %v4248_v15  ;;  %6989 = vmatmul.msk.f32.gmra.mxu1 %vm4031_vm2, %v11980_v29  ;;  %v12430_v15 = vld [vmem:[#allocation8_spill] sm:$0xff] }
 0x72a   : > { %v10695_v27 = vpop.f32.mrf.mxu2  ;;  %v12431_v32 = vmax.f32 %v12430_v15, 0.0 }
 0x72b   : > { %v4544_v44 = vmax.f32 %v4496_v10, 0.0  ;;  %v7113_v10 = vpop.eup %7112 }
 0x72d   : > { %v10700_v23 = vadd.f32 %v4652_v57, %v4544_v44  ;;  %6911 = vmatmul.msk.f32.gmra.mxu3 %vm4031_vm2, %v12428_v38  ;;  %v4254_v57 = vadd.f32 %v9966_v46, %v10432_v52  ;;  %v5024_v15 = vpop.f32.mrf.mxu1 }
 0x72f   : > { %12426 = vst [vmem:[#allocation44_spill] sm:$0xff] %v10700_v23  ;;  %v11995_v16 = vmax.f32 %v10700_v23, 0.0  ;;  %7022 = vmatmul.msk.f32.gmra.mxu2 %vm5210_vm3, %v7111_v51  ;;  %v5022_v51 = vadd.f32 %v10636_v35, %v5021_v12 }
 0x730   : > { %v4391_v11 = vpop.f32.mrf.mxu3 }
 0x731   : > { %v4497_v9 = vadd.f32 %v4391_v11, %v4251_v56  ;;  %6990 = vmatmul.msk.f32.gmra.mxu1 %vm4031_vm2, %v11995_v16  ;;  %v12433_v56 = vld [vmem:[#allocation73_spill] sm:$0xff]  ;;  %7116 = vtanh.f32 %v5022_v51 }
 0x732   : > { %v10712_v6 = vpop.f32.mrf.mxu2  ;;  %v12434_v11 = vmax.f32 %v12433_v56, 0.0 }
 0x733   : > { %v4545_v42 = vmax.f32 %v4497_v9, 0.0  ;;  %v7115_v9 = vpop.eup %7114 }
 0x735   : > { %v10719_v18 = vadd.f32 %v4655_v55, %v4545_v42  ;;  %6912 = vmatmul.msk.f32.gmra.mxu3 %vm4031_vm2, %v12431_v32  ;;  %v10741_v55 = vpop.f32.mrf.mxu0  ;;  %v12435_v42 = vld [vmem:[#allocation27_spill] sm:$0xff] }
 0x736   : > { %v4257_v63 = vadd.f32 %v9966_v46, %v12435_v42 }
 0x737   : > { %12429 = vst [vmem:[#allocation37_spill] sm:$0xff] %v10719_v18  ;;  %v11978_v44 = vmax.f32 %v10719_v18, 0.0  ;;  %7023 = vmatmul.msk.f32.gmra.mxu2 %vm5210_vm3, %v7113_v10  ;;  %v7117_v51 = vpop.eup %7116 }
 0x738   : > { %v4394_v43 = vpop.f32.mrf.mxu3 }
 0x739   : > { %v4498_v47 = vadd.f32 %v4394_v43, %v4254_v57  ;;  %6991 = vmatmul.msk.f32.gmra.mxu1 %vm4031_vm2, %v11978_v44  ;;  %v4661_v57 = vadd.f32 %v9976_v50, %v10518_v28 }
 0x73a   : > { %v10731_v3 = vpop.f32.mrf.mxu2 }
 0x73b   : > { %v4546_v38 = vmax.f32 %v4498_v47, 0.0  ;;  %v5025_v47 = vadd.f32 %v10636_v35, %v5024_v15 }
 0x73d   : > { %v10736_v52 = vadd.f32 %v4658_v17, %v4546_v38  ;;  %6913 = vmatmul.msk.f32.gmra.mxu3 %vm4031_vm2, %v12434_v11  ;;  %v12437_v38 = vld [vmem:[#allocation32_spill] sm:$0xff]  ;;  %v12439_v11 = vld [vmem:[#allocation19_spill] sm:$0xff]  ;;  %7118 = vtanh.f32 %v5025_v47 }
 0x73e   : > { %v12438_v56 = vmax.f32 %v12437_v38, 0.0 }
 0x73f   : > { %12432 = vst [vmem:[#allocation46_spill] sm:$0xff] %v10736_v52  ;;  %v11993_v32 = vmax.f32 %v10736_v52, 0.0  ;;  %7024 = vmatmul.msk.f32.gmra.mxu2 %vm5210_vm3, %v7115_v9  ;;  %v4260_v9 = vadd.f32 %v9966_v46, %v12439_v11  ;;  %v10782_v11 = vld [vmem:[%s11803_s14] ss:$0 sm:$0xff] }
 0x740   : > { %v4397_v62 = vpop.f32.mrf.mxu3 }
 0x741   : > { %v4499_v12 = vadd.f32 %v4397_v62, %v4257_v63  ;;  %6992 = vmatmul.msk.f32.gmra.mxu1 %vm4031_vm2, %v11993_v32  ;;  %v10764_v63 = vpop.f32.mrf.mxu0  ;;  %v5027_v62 = vpop.f32.mrf.mxu1  ;;  %v4293_v32 = vadd.f32 %v10782_v11, %v10695_v27 }
 0x742   : > { %v10750_v10 = vpop.f32.mrf.mxu2 }
 0x743   : > { %v4547_v43 = vmax.f32 %v4499_v12, 0.0  ;;  %v7119_v47 = vpop.eup %7118 }
 0x745   : > { %v10755_v17 = vadd.f32 %v4661_v57, %v4547_v43  ;;  %6914 = vmatmul.msk.f32.gmra.mxu3 %vm4031_vm2, %v12438_v56  ;;  %v4664_v57 = vadd.f32 %v9976_v50, %v10541_v4  ;;  %v5028_v43 = vadd.f32 %v10636_v35, %v5027_v62  ;;  %v12441_v56 = vld [vmem:[#allocation17_spill] sm:$0xff] }
 0x747   : > { %12436 = vst [vmem:[#allocation23_spill] sm:$0xff] %v10755_v17  ;;  %v11977_v42 = vmax.f32 %v10755_v17, 0.0  ;;  %7025 = vmatmul.msk.f32.gmra.mxu2 %vm5210_vm3, %v7117_v51  ;;  %v12442_v51 = vmax.f32 %v12441_v56, 0.0  ;;  %7120 = vtanh.f32 %v5028_v43  ;;  %v12444_v56 = vld [vmem:[#allocation18_spill] sm:$0xff] }
 0x748   : > { %v4400_v28 = vpop.f32.mrf.mxu3 }
 0x749   : > { %v4500_v15 = vadd.f32 %v4400_v28, %v4260_v9  ;;  %6993 = vmatmul.msk.f32.gmra.mxu1 %vm4031_vm2, %v11977_v42  ;;  %v4263_v9 = vadd.f32 %v10782_v11, %v10490_v49  ;;  %v10791_v62 = vpop.f32.mrf.mxu0 }
 0x74a   : > { %v10769_v12 = vpop.f32.mrf.mxu2 }
 0x74b   : > { %v4548_v46 = vmax.f32 %v4500_v15, 0.0 }
 0x74d   : > { %v10774_v38 = vadd.f32 %v4664_v57, %v4548_v46  ;;  %6915 = vmatmul.msk.f32.gmra.mxu3 %vm4031_vm2, %v12442_v51  ;;  %v10798_v57 = vld [vmem:[%s11805_s16] ss:$0 sm:$0xff]  ;;  %v12445_v51 = vmax.f32 %v12444_v56, 0.0 }
 0x74e   : > { %v4667_v49 = vadd.f32 %v10798_v57, %v10572_v21 }
 0x74f   : > { %12440 = vst [vmem:[#allocation39_spill] sm:$0xff] %v10774_v38  ;;  %v11990_v50 = vmax.f32 %v10774_v38, 0.0  ;;  %7026 = vmatmul.msk.f32.gmra.mxu2 %vm5210_vm3, %v7119_v47  ;;  %v7121_v47 = vpop.eup %7120 }
 0x750   : > { %v4403_v4 = vpop.f32.mrf.mxu3 }
 0x751   : > { %v4501_v28 = vadd.f32 %v4403_v4, %v4263_v9  ;;  %6994 = vmatmul.msk.f32.gmra.mxu1 %vm4031_vm2, %v11990_v50  ;;  %v4266_v9 = vadd.f32 %v10782_v11, %v10514_v36  ;;  %v12447_v36 = vld [vmem:[#allocation12_spill] sm:$0xff] }
 0x752   : > { %v10793_v15 = vpop.f32.mrf.mxu2 }
 0x753   : > { %v4549_v46 = vmax.f32 %v4501_v28, 0.0  ;;  %v4670_v28 = vadd.f32 %v10798_v57, %v10693_v25 }
 0x755   : > { %v10802_v43 = vadd.f32 %v4667_v49, %v4549_v46  ;;  %6916 = vmatmul.msk.f32.gmra.mxu3 %vm4031_vm2, %v12445_v51  ;;  %v10818_v46 = vpop.f32.mrf.mxu0  ;;  %v12448_v51 = vmax.f32 %v12447_v36, 0.0 }
 0x757   : > { %12443 = vst [vmem:[#allocation26_spill] sm:$0xff] %v10802_v43  ;;  %v11979_v4 = vmax.f32 %v10802_v43, 0.0  ;;  %7027 = vmatmul.msk.f32.gmra.mxu2 %vm5210_vm3, %v7121_v47 }
 0x758   : > { %v4406_v42 = vpop.f32.mrf.mxu3 }
 0x759   : > { %v4502_v44 = vadd.f32 %v4406_v42, %v4266_v9  ;;  %6995 = vmatmul.msk.f32.gmra.mxu1 %vm4031_vm2, %v11979_v4  ;;  %v4269_v42 = vadd.f32 %v10782_v11, %v10537_v2  ;;  %v12450_v2 = vld [vmem:[#allocation3_spill] sm:$0xff] }
 0x75a   : > { %v10814_v21 = vpop.f32.mrf.mxu2 }
 0x75b   : > { %v4550_v49 = vmax.f32 %v4502_v44, 0.0 }
 0x75d   : > { %v10820_v56 = vadd.f32 %v4670_v28, %v4550_v49  ;;  %6917 = vmatmul.msk.f32.gmra.mxu3 %vm4031_vm2, %v12448_v51  ;;  %v4673_v28 = vadd.f32 %v10798_v57, %v10716_v1  ;;  %v12451_v51 = vmax.f32 %v12450_v2, 0.0  ;;  %v12453_v2 = vld [vmem:[#allocation14_spill] sm:$0xff] }
 0x75e   : > { %v5030_v47 = vpop.f32.mrf.mxu1 }
 0x75f   : > { %12446 = vst [vmem:[#allocation48_spill] sm:$0xff] %v10820_v56  ;;  %v11988_v9 = vmax.f32 %v10820_v56, 0.0  ;;  %v5031_v4 = vadd.f32 %v10636_v35, %v5030_v47  ;;  %v10841_v47 = vpop.f32.mrf.mxu0 }
 0x760   : > { %v4409_v29 = vpop.f32.mrf.mxu3 }
 0x761   : > { %7122 = vtanh.f32 %v5031_v4  ;;  %v4503_v25 = vadd.f32 %v4409_v29, %v4269_v42  ;;  %6996 = vmatmul.msk.f32.gmra.mxu1 %vm4031_vm2, %v11988_v9  ;;  %v4272_v42 = vadd.f32 %v10782_v11, %v10560_v26 }
 0x762   : > { %v10832_v44 = vpop.f32.mrf.mxu2 }
 0x763   : > { %v4551_v49 = vmax.f32 %v4503_v25, 0.0 }
 0x765   : > { %v10836_v36 = vadd.f32 %v4673_v28, %v4551_v49  ;;  %6918 = vmatmul.msk.f32.gmra.mxu3 %vm4031_vm2, %v12451_v51  ;;  %v4676_v28 = vadd.f32 %v10798_v57, %v10741_v55  ;;  %v12454_v51 = vmax.f32 %v12453_v2, 0.0  ;;  %v12456_v2 = vld [vmem:[#allocation7_spill] sm:$0xff] }
 0x766   : > { %v5033_v4 = vpop.f32.mrf.mxu1 }
 0x767   : > { %12449 = vst [vmem:[#allocation6_spill] sm:$0xff] %v10836_v36  ;;  %v7123_v29 = vpop.eup %7122  ;;  %v11984_v0 = vmax.f32 %v10836_v36, 0.0  ;;  %v5034_v22 = vadd.f32 %v10636_v35, %v5033_v4 }
 0x768   : > { %v4412_v8 = vpop.f32.mrf.mxu3  ;;  %7028 = vmatmul.msk.f32.gmra.mxu2 %vm5210_vm3, %v7123_v29 }
 0x769   : > { %7124 = vtanh.f32 %v5034_v22  ;;  %v4504_v1 = vadd.f32 %v4412_v8, %v4272_v42  ;;  %6997 = vmatmul.msk.f32.gmra.mxu1 %vm4031_vm2, %v11984_v0  ;;  %v4275_v8 = vadd.f32 %v10782_v11, %v10583_v13  ;;  %v10864_v0 = vpop.f32.mrf.mxu0  ;;  %v4679_v13 = vadd.f32 %v10798_v57, %v10764_v63 }
 0x76a   : > { %v10851_v25 = vpop.f32.mrf.mxu2 }
 0x76b   : > { %v4552_v49 = vmax.f32 %v4504_v1, 0.0 }
 0x76d   : > { %v10855_v26 = vadd.f32 %v4676_v28, %v4552_v49  ;;  %6919 = vmatmul.msk.f32.gmra.mxu3 %vm4031_vm2, %v12454_v51  ;;  %v12457_v51 = vmax.f32 %v12456_v2, 0.0 }
 0x76e   : > { %v5036_v4 = vpop.f32.mrf.mxu1 }
 0x76f   : > { %12452 = vst [vmem:[#allocation42_spill] sm:$0xff] %v10855_v26  ;;  %v7125_v29 = vpop.eup %7124  ;;  %v11986_v22 = vmax.f32 %v10855_v26, 0.0  ;;  %v5037_v42 = vadd.f32 %v10636_v35, %v5036_v4  ;;  %v7320_v26 = vmov 0  }
 0x770   : > { %v4415_v61 = vpop.f32.mrf.mxu3  ;;  %7029 = vmatmul.msk.f32.gmra.mxu2 %vm5210_vm3, %v7125_v29  ;;  %7092 = vset.pattern.permute.xlu2 %v7320_v26 }
 0x771   : > { %7126 = vtanh.f32 %v5037_v42  ;;  %v4505_v55 = vadd.f32 %v4415_v61, %v4275_v8  ;;  %6998 = vmatmul.msk.f32.gmra.mxu1 %vm4031_vm2, %v11986_v22  ;;  %v4278_v61 = vadd.f32 %v10782_v11, %v10601_v45  ;;  %v4682_v45 = vadd.f32 %v10798_v57, %v10791_v62  ;;  %7091 = vset.pattern.permute.xlu1 %v7320_v26 }
 0x772   : > { %v10870_v1 = vpop.f32.mrf.mxu2  ;;  %7090 = vset.pattern.permute.xlu0 %v7320_v26 }
 0x773   : > { %v4553_v28 = vmax.f32 %v4505_v55, 0.0  ;;  %v10887_v55 = vpop.f32.mrf.mxu0 }
 0x775   : > { %v10874_v49 = vadd.f32 %v4679_v13, %v4553_v28  ;;  %6920 = vmatmul.msk.f32.gmra.mxu3 %vm4031_vm2, %v12457_v51  ;;  %v12459_v51 = vld [vmem:[#allocation40_spill] sm:$0xff] }
 0x776   : > { %v5039_v4 = vpop.f32.mrf.mxu1 }
 0x777   : > { %12455 = vst [vmem:[#allocation29_spill] sm:$0xff] %v10874_v49  ;;  %v7127_v29 = vpop.eup %7126  ;;  %v11987_v8 = vmax.f32 %v10874_v49, 0.0  ;;  %v5040_v42 = vadd.f32 %v10636_v35, %v5039_v4  ;;  %v12460_v4 = vmax.f32 %v12459_v51, 0.0 }
 0x778   : > { %v4418_v22 = vpop.f32.mrf.mxu3  ;;  %7030 = vmatmul.msk.f32.gmra.mxu2 %vm5210_vm3, %v7127_v29 }
 0x779   : > { %7128 = vtanh.f32 %v5040_v42  ;;  %v4506_v63 = vadd.f32 %v4418_v22, %v4278_v61  ;;  %6999 = vmatmul.msk.f32.gmra.mxu1 %vm4031_vm2, %v11987_v8  ;;  %v4281_v61 = vadd.f32 %v10782_v11, %v10619_v41 }
 0x77a   : > { %v10889_v13 = vpop.f32.mrf.mxu2 }
 0x77b   : > { %v4554_v28 = vmax.f32 %v4506_v63, 0.0  ;;  %v4696_v41 = vpop.f32.mrf.mxu0 }
 0x77d   : > { %v10893_v2 = vadd.f32 %v4682_v45, %v4554_v28  ;;  %6921 = vmatmul.msk.f32.gmra.mxu3 %vm4031_vm2, %v12460_v4  ;;  %v4685_v45 = vadd.f32 %v10798_v57, %v10818_v46  ;;  %v12462_v4 = vld [vmem:[#allocation20_spill] sm:$0xff] }
 0x77e   : > { %v5042_v29 = vpop.f32.mrf.mxu1 }
 0x77f   : > { %12458 = vst [vmem:[#allocation50_spill] sm:$0xff] %v10893_v2  ;;  %v7129_v22 = vpop.eup %7128  ;;  %v11989_v42 = vmax.f32 %v10893_v2, 0.0  ;;  %v5043_v8 = vadd.f32 %v10636_v35, %v5042_v29  ;;  %v12463_v29 = vmax.f32 %v12462_v4, 0.0 }
 0x780   : > { %v4421_v9 = vpop.f32.mrf.mxu3  ;;  %7031 = vmatmul.msk.f32.gmra.mxu2 %vm5210_vm3, %v7129_v22 }
 0x781   : > { %7130 = vtanh.f32 %v5043_v8  ;;  %v4507_v62 = vadd.f32 %v4421_v9, %v4281_v61  ;;  %7000 = vmatmul.msk.f32.gmra.mxu1 %vm4031_vm2, %v11989_v42  ;;  %v4284_v9 = vadd.f32 %v10782_v11, %v10642_v5 }
 0x782   : > { %v10906_v63 = vpop.f32.mrf.mxu2 }
 0x783   : > { %v4555_v28 = vmax.f32 %v4507_v62, 0.0 }
 0x785   : > { %v10910_v51 = vadd.f32 %v4685_v45, %v4555_v28  ;;  %6922 = vmatmul.msk.f32.gmra.mxu3 %vm4031_vm2, %v12463_v29  ;;  %v4688_v45 = vadd.f32 %v10798_v57, %v10841_v47  ;;  %v4699_v29 = vpop.f32.mrf.mxu0 }
 0x786   : > { %v5045_v22 = vpop.f32.mrf.mxu1 }
 0x787   : > { %12461 = vst [vmem:[#allocation15_spill] sm:$0xff] %v10910_v51  ;;  %v7131_v8 = vpop.eup %7130  ;;  %v11991_v61 = vmax.f32 %v10910_v51, 0.0  ;;  %v5046_v42 = vadd.f32 %v10636_v35, %v5045_v22 }
 0x788   : > { %v4424_v50 = vpop.f32.mrf.mxu3  ;;  %7032 = vmatmul.msk.f32.gmra.mxu2 %vm5210_vm3, %v7131_v8 }
 0x789   : > { %7132 = vtanh.f32 %v5046_v42  ;;  %v4508_v46 = vadd.f32 %v4424_v50, %v4284_v9  ;;  %7001 = vmatmul.msk.f32.gmra.mxu1 %vm4031_vm2, %v11991_v61  ;;  %v4287_v50 = vadd.f32 %v10782_v11, %v10659_v31 }
 0x78a   : > { %v10923_v62 = vpop.f32.mrf.mxu2 }
 0x78b   : > { %v4556_v28 = vmax.f32 %v4508_v46, 0.0  ;;  %v4691_v46 = vadd.f32 %v10798_v57, %v10864_v0 }
 0x78d   : > { %v10927_v5 = vadd.f32 %v4688_v45, %v4556_v28  ;;  %6923 = vmatmul.msk.f32.gmra.mxu3 %vm4031_vm2, %v4013_v53 }
 0x78e   : > { %v5048_v22 = vpop.f32.mrf.mxu1 }
 0x78f   : > { %12464 = vst [vmem:[#allocation10_spill] sm:$0xff] %v10927_v5  ;;  %v7133_v42 = vpop.eup %7132  ;;  %v11992_v8 = vmax.f32 %v10927_v5, 0.0  ;;  %v5049_v9 = vadd.f32 %v10636_v35, %v5048_v22  ;;  %v4290_v22 = vadd.f32 %v10782_v11, %v10676_v58 }
 0x790   : > { %v4427_v61 = vpop.f32.mrf.mxu3  ;;  %7033 = vmatmul.msk.f32.gmra.mxu2 %vm5210_vm3, %v7133_v42 }
 0x791   : > { %7134 = vtanh.f32 %v5049_v9  ;;  %v4509_v47 = vadd.f32 %v4427_v61, %v4287_v50  ;;  %7002 = vmatmul.msk.f32.gmra.mxu1 %vm4031_vm2, %v11992_v8  ;;  %v4702_v50 = vpop.f32.mrf.mxu0 }
 0x792   : > { %v10940_v53 = vpop.f32.mrf.mxu2 }
 0x793   : > { %v4557_v45 = vmax.f32 %v4509_v47, 0.0  ;;  %v4694_v47 = vadd.f32 %v10798_v57, %v10887_v55 }
 0x795   : > { %v10944_v31 = vadd.f32 %v4691_v46, %v4557_v45 }
 0x796   : > { %v5051_v28 = vpop.f32.mrf.mxu1 }
 0x797   : > { %12466 = vst [vmem:[#allocation35_spill] sm:$0xff] %v10944_v31  ;;  %v7135_v4 = vpop.eup %7134  ;;  %v11994_v42 = vmax.f32 %v10944_v31, 0.0  ;;  %v5052_v61 = vadd.f32 %v10636_v35, %v5051_v28 }
 0x798   : > { %v4430_v9 = vpop.f32.mrf.mxu3  ;;  %7034 = vmatmul.msk.f32.gmra.mxu2 %vm5210_vm3, %v7135_v4 }
 0x799   : > { %7136 = vtanh.f32 %v5052_v61  ;;  %v4510_v8 = vadd.f32 %v4430_v9, %v4290_v22  ;;  %7003 = vmatmul.msk.f32.gmra.mxu1 %vm4031_vm2, %v11994_v42  ;;  %v4705_v55 = vpop.f32.mrf.mxu0 }
 0x79a   : > { %v10954_v0 = vpop.f32.mrf.mxu2 }
 0x79b   : > { %v4558_v58 = vmax.f32 %v4510_v8, 0.0 }
 0x79d   : > { %v10958_v46 = vadd.f32 %v4694_v47, %v4558_v58  ;;  %v4697_v47 = vadd.f32 %v10798_v57, %v4696_v41 }
 0x79e   : > { %v5054_v45 = vpop.f32.mrf.mxu1 }
 0x79f   : > { %12467 = vst [vmem:[#allocation21_spill] sm:$0xff] %v10958_v46  ;;  %v7137_v28 = vpop.eup %7136  ;;  %v11996_v4 = vmax.f32 %v10958_v46, 0.0  ;;  %v5055_v22 = vadd.f32 %v10636_v35, %v5054_v45  ;;  %v4296_v45 = vadd.f32 %v10782_v11, %v10712_v6 }
 0x7a0   : > { %v4433_v61 = vpop.f32.mrf.mxu3  ;;  %7035 = vmatmul.msk.f32.gmra.mxu2 %vm5210_vm3, %v7137_v28 }
 0x7a1   : > { %7138 = vtanh.f32 %v5055_v22  ;;  %v4511_v9 = vadd.f32 %v4433_v61, %v4293_v32  ;;  %7004 = vmatmul.msk.f32.gmra.mxu1 %vm4031_vm2, %v11996_v4 }
 0x7a2   : > { %v10968_v8 = vpop.f32.mrf.mxu2 }
 0x7a3   : > { %v4559_v58 = vmax.f32 %v4511_v9, 0.0  ;;  %v4700_v9 = vadd.f32 %v10798_v57, %v4699_v29 }
 0x7a5   : > { %v10971_v27 = vadd.f32 %v4697_v47, %v4559_v58  ;;  %v4708_v58 = vpop.f32.mrf.mxu0 }
 0x7a6   : > { %v5057_v42 = vpop.f32.mrf.mxu1 }
 0x7a7   : > { %12468 = vst [vmem:[#allocation24_spill] sm:$0xff] %v10971_v27  ;;  %v7139_v16 = vpop.eup %7138  ;;  %v11998_v28 = vmax.f32 %v10971_v27, 0.0  ;;  %v5058_v32 = vadd.f32 %v10636_v35, %v5057_v42  ;;  %v4299_v42 = vadd.f32 %v10782_v11, %v10731_v3 }
 0x7a8   : > { %v4436_v22 = vpop.f32.mrf.mxu3  ;;  %7036 = vmatmul.msk.f32.gmra.mxu2 %vm5210_vm3, %v7139_v16 }
 0x7a9   : > { %7140 = vtanh.f32 %v5058_v32  ;;  %v4512_v61 = vadd.f32 %v4436_v22, %v4296_v45  ;;  %7005 = vmatmul.msk.f32.gmra.mxu1 %vm4031_vm2, %v11998_v28 }
 0x7aa   : > { %v10981_v41 = vpop.f32.mrf.mxu2 }
 0x7ab   : > { %v4560_v47 = vmax.f32 %v4512_v61, 0.0  ;;  %v4703_v61 = vadd.f32 %v10798_v57, %v4702_v50  ;;  %v4706_v50 = vadd.f32 %v10798_v57, %v4705_v55 }
 0x7ad   : > { %v10984_v6 = vadd.f32 %v4700_v9, %v4560_v47  ;;  %v4711_v3 = vpop.f32.mrf.mxu0 }
 0x7ae   : > { %v5060_v4 = vpop.f32.mrf.mxu1 }
 0x7af   : > { %12469 = vst [vmem:[#allocation16_spill] sm:$0xff] %v10984_v6  ;;  %v7141_v19 = vpop.eup %7140  ;;  %v12000_v16 = vmax.f32 %v10984_v6, 0.0  ;;  %v5061_v45 = vadd.f32 %v10636_v35, %v5060_v4  ;;  %v4302_v4 = vadd.f32 %v10782_v11, %v10750_v10 }
 0x7b0   : > { %v4439_v32 = vpop.f32.mrf.mxu3  ;;  %7037 = vmatmul.msk.f32.gmra.mxu2 %vm5210_vm3, %v7141_v19 }
 0x7b1   : > { %7142 = vtanh.f32 %v5061_v45  ;;  %v4513_v22 = vadd.f32 %v4439_v32, %v4299_v42  ;;  %7006 = vmatmul.msk.f32.gmra.mxu1 %vm4031_vm2, %v12000_v16 }
 0x7b2   : > { %v10994_v29 = vpop.f32.mrf.mxu2 }
 0x7b3   : > { %v4561_v9 = vmax.f32 %v4513_v22, 0.0 }
 0x7b5   : > { %v10997_v47 = vadd.f32 %v4703_v61, %v4561_v9 }
 0x7b6   : > { %v5063_v28 = vpop.f32.mrf.mxu1 }
 0x7b7   : > { %12470 = vst [vmem:[#allocation43_spill] sm:$0xff] %v10997_v47  ;;  %v7143_v24 = vpop.eup %7142  ;;  %v12001_v19 = vmax.f32 %v10997_v47, 0.0  ;;  %v5064_v42 = vadd.f32 %v10636_v35, %v5063_v28  ;;  %v4305_v28 = vadd.f32 %v10782_v11, %v10769_v12 }
 0x7b8   : > { %v4442_v45 = vpop.f32.mrf.mxu3  ;;  %7038 = vmatmul.msk.f32.gmra.mxu2 %vm5210_vm3, %v7143_v24 }
 0x7b9   : > { %7144 = vtanh.f32 %v5064_v42  ;;  %v4514_v32 = vadd.f32 %v4442_v45, %v4302_v4  ;;  %7007 = vmatmul.msk.f32.gmra.mxu1 %vm4031_vm2, %v12001_v19  ;;  %v4714_v42 = vpop.f32.mrf.mxu0 }
 0x7ba   : > { %v11008_v61 = vpop.f32.mrf.mxu2 }
 0x7bb   : > { %v4562_v22 = vmax.f32 %v4514_v32, 0.0  ;;  %v4709_v32 = vadd.f32 %v10798_v57, %v4708_v58 }
 0x7bd   : > { %v11010_v9 = vadd.f32 %v4706_v50, %v4562_v22 }
 0x7be   : > { %v5066_v10 = vpop.f32.mrf.mxu1 }
 0x7bf   : > { %12471 = vst [vmem:[#allocation30_spill] sm:$0xff] %v11010_v9  ;;  %v7145_v16 = vpop.eup %7144  ;;  %v12003_v24 = vmax.f32 %v11010_v9, 0.0  ;;  %v5067_v4 = vadd.f32 %v10636_v35, %v5066_v10  ;;  %v4308_v10 = vadd.f32 %v10782_v11, %v10793_v15 }
 0x7c0   : > { %v4445_v45 = vpop.f32.mrf.mxu3  ;;  %7039 = vmatmul.msk.f32.gmra.mxu2 %vm5210_vm3, %v7145_v16 }
 0x7c1   : > { %7146 = vtanh.f32 %v5067_v4  ;;  %v4515_v55 = vadd.f32 %v4445_v45, %v4305_v28  ;;  %7008 = vmatmul.msk.f32.gmra.mxu1 %vm4031_vm2, %v12003_v24  ;;  %v4717_v58 = vpop.f32.mrf.mxu0 }
 0x7c2   : > { %v11023_v12 = vpop.f32.mrf.mxu2 }
 0x7c3   : > { %v4563_v50 = vmax.f32 %v4515_v55, 0.0  ;;  %v4712_v55 = vadd.f32 %v10798_v57, %v4711_v3  ;;  %v4715_v3 = vadd.f32 %v10798_v57, %v4714_v42  ;;  %v4718_v42 = vadd.f32 %v10798_v57, %v4717_v58 }
 0x7c5   : > { %v11021_v22 = vadd.f32 %v4709_v32, %v4563_v50 }
 0x7c6   : > { %v5069_v19 = vpop.f32.mrf.mxu1 }
 0x7c7   : > { %12472 = vst [vmem:[#allocation33_spill] sm:$0xff] %v11021_v22  ;;  %v7147_v34 = vpop.eup %7146  ;;  %v12005_v16 = vmax.f32 %v11021_v22, 0.0  ;;  %v5070_v28 = vadd.f32 %v10636_v35, %v5069_v19  ;;  %v4311_v19 = vadd.f32 %v10782_v11, %v10814_v21 }
 0x7c8   : > { %v4448_v4 = vpop.f32.mrf.mxu3  ;;  %7040 = vmatmul.msk.f32.gmra.mxu2 %vm5210_vm3, %v7147_v34 }
 0x7c9   : > { %7148 = vtanh.f32 %v5070_v28  ;;  %v4516_v45 = vadd.f32 %v4448_v4, %v4308_v10  ;;  %7009 = vmatmul.msk.f32.gmra.mxu1 %vm4031_vm2, %v12005_v16 }
 0x7ca   : > { %v11039_v34 = vpop.f32.mrf.mxu2 }
 0x7cb   : > { %v4564_v32 = vmax.f32 %v4516_v45, 0.0 }
 0x7cd   : > { %v11034_v50 = vadd.f32 %v4712_v55, %v4564_v32  ;;  %v4720_v55 = vpop.f32.mrf.mxu0 }
 0x7ce   : > { %v5072_v15 = vpop.f32.mrf.mxu1  ;;  %v4721_v58 = vadd.f32 %v10798_v57, %v4720_v55 }
 0x7cf   : > { %12473 = vst [vmem:[#allocation36_spill] sm:$0xff] %v11034_v50  ;;  %v7149_v24 = vpop.eup %7148  ;;  %v12007_v40 = vmax.f32 %v11034_v50, 0.0  ;;  %v5073_v10 = vadd.f32 %v10636_v35, %v5072_v15  ;;  %v4314_v15 = vadd.f32 %v10782_v11, %v10832_v44 }
 0x7d0   : > { %v4451_v28 = vpop.f32.mrf.mxu3  ;;  %7041 = vmatmul.msk.f32.gmra.mxu2 %vm5210_vm3, %v7149_v24 }
 0x7d1   : > { %7150 = vtanh.f32 %v5073_v10  ;;  %v4517_v4 = vadd.f32 %v4451_v28, %v4311_v19  ;;  %7010 = vmatmul.msk.f32.gmra.mxu1 %vm4031_vm2, %v12007_v40 }
 0x7d2   : > { %v5390_v10 = vpop.f32.mrf.mxu2 }
 0x7d3   : > { %v4565_v45 = vmax.f32 %v4517_v4, 0.0 }
 0x7d5   : > { %v11047_v21 = vadd.f32 %v4715_v3, %v4565_v45  ;;  %v4723_v44 = vpop.f32.mrf.mxu0 }
 0x7d6   : > { %v5075_v32 = vpop.f32.mrf.mxu1 }
 0x7d7   : > { %12474 = vst [vmem:[#allocation28_spill] sm:$0xff] %v11047_v21  ;;  %v7151_v16 = vpop.eup %7150  ;;  %v12008_v59 = vmax.f32 %v11047_v21, 0.0  ;;  %v5076_v24 = vadd.f32 %v10636_v35, %v5075_v32  ;;  %v4317_v32 = vadd.f32 %v10782_v11, %v10851_v25 }
 0x7d8   : > { %v4454_v19 = vpop.f32.mrf.mxu3  ;;  %7042 = vmatmul.msk.f32.gmra.mxu2 %vm5210_vm3, %v7151_v16 }
 0x7d9   : > { %7152 = vtanh.f32 %v5076_v24  ;;  %v4518_v28 = vadd.f32 %v4454_v19, %v4314_v15  ;;  %7011 = vmatmul.msk.f32.gmra.mxu1 %vm4031_vm2, %v12008_v59 }
 0x7db   : > { %v4566_v4 = vmax.f32 %v4518_v28, 0.0  ;;  %v11069_v28 = vpop.f32.mrf.mxu2 }
 0x7dd   : > { %v11058_v3 = vadd.f32 %v4718_v42, %v4566_v4 }
 0x7de   : > { %v5078_v45 = vpop.f32.mrf.mxu1 }
 0x7df   : > { %12475 = vst [vmem:[#allocation31_spill] sm:$0xff] %v11058_v3  ;;  %v7153_v40 = vpop.eup %7152  ;;  %v12009_v16 = vmax.f32 %v11058_v3, 0.0  ;;  %v5079_v24 = vadd.f32 %v10636_v35, %v5078_v45  ;;  %v4320_v45 = vadd.f32 %v10782_v11, %v10870_v1 }
 0x7e0   : > { %v4457_v15 = vpop.f32.mrf.mxu3  ;;  %7043 = vmatmul.msk.f32.gmra.mxu2 %vm5210_vm3, %v7153_v40 }
 0x7e1   : > { %7154 = vtanh.f32 %v5079_v24  ;;  %v4519_v19 = vadd.f32 %v4457_v15, %v4317_v32  ;;  %7012 = vmatmul.msk.f32.gmra.mxu1 %vm4031_vm2, %v12009_v16  ;;  %v4726_v24 = vpop.f32.mrf.mxu0 }
 0x7e3   : > { %v4567_v42 = vmax.f32 %v4519_v19, 0.0  ;;  %v4724_v19 = vadd.f32 %v10798_v57, %v4723_v44 }
 0x7e5   : > { %v11071_v4 = vadd.f32 %v4721_v58, %v4567_v42 }
 0x7e6   : > { %v5081_v25 = vpop.f32.mrf.mxu1 }
 0x7e7   : > { %12476 = vst [vmem:[#allocation52_spill] sm:$0xff] %v11071_v4  ;;  %v7155_v59 = vpop.eup %7154  ;;  %v12012_v40 = vmax.f32 %v11071_v4, 0.0  ;;  %v5082_v32 = vadd.f32 %v10636_v35, %v5081_v25  ;;  %v4323_v25 = vadd.f32 %v10782_v11, %v10889_v13  ;;  %v4727_v13 = vadd.f32 %v10798_v57, %v4726_v24 }
 0x7e8   : > { %v4460_v15 = vpop.f32.mrf.mxu3  ;;  %7044 = vmatmul.msk.f32.gmra.mxu2 %vm5210_vm3, %v7155_v59 }
 0x7e9   : > { %7156 = vtanh.f32 %v5082_v32  ;;  %v4520_v55 = vadd.f32 %v4460_v15, %v4320_v45  ;;  %7013 = vmatmul.msk.f32.gmra.mxu1 %vm4031_vm2, %v12012_v40  ;;  %v11088_v45 = vld [vmem:[#allocation2] ss:$0 sm:$0xff]  ;;  %v4729_v15 = vpop.f32.mrf.mxu0 }
 0x7eb   : > { %v4568_v58 = vmax.f32 %v4520_v55, 0.0  ;;  %v5396_v42 = vpop.f32.mrf.mxu2  ;;  %v11096_v55 = vadd.f32 %v11088_v45, %v10994_v29  ;;  %v11112_v29 = vadd.f32 %v11088_v45, %v5390_v10 }
 0x7ed   : > { %v11082_v16 = vadd.f32 %v4724_v19, %v4568_v58 }
 0x7ee   : > { %v5084_v1 = vpop.f32.mrf.mxu1 }
 0x7ef   : > { %12477 = vst [vmem:[#allocation34_spill] sm:$0xff] %v11082_v16  ;;  %v7157_v21 = vpop.eup %7156  ;;  %v12013_v22 = vmax.f32 %v11082_v16, 0.0  ;;  %v5085_v59 = vadd.f32 %v10636_v35, %v5084_v1  ;;  %v11101_v1 = vadd.f32 %v11088_v45, %v10968_v8 }
 0x7f0   : > { %v4463_v32 = vpop.f32.mrf.mxu3  ;;  %7045 = vmatmul.msk.f32.gmra.mxu2 %vm5210_vm3, %v7157_v21  ;;  %v11105_v21 = vadd.f32 %v11088_v45, %v11023_v12 }
 0x7f1   : > { %7158 = vtanh.f32 %v5085_v59  ;;  %v4521_v44 = vadd.f32 %v4463_v32, %v4323_v25  ;;  %7014 = vmatmul.msk.f32.gmra.mxu1 %vm4031_vm2, %v12013_v22  ;;  %v5516_v59 = vmax.f32 %v11101_v1, %v11096_v55  ;;  %v4732_v4 = vpop.f32.mrf.mxu0 }
 0x7f3   : > { %v4569_v19 = vmax.f32 %v4521_v44, 0.0  ;;  %v5399_v58 = vpop.f32.mrf.mxu2  ;;  %v4326_v44 = vadd.f32 %v10782_v11, %v10906_v63  ;;  %v5518_v12 = vmax.f32 %v5516_v59, %v11105_v21  ;;  %v11128_v63 = vadd.f32 %v11088_v45, %v11008_v61 }
 0x7f4   : > { %v4730_v59 = vadd.f32 %v10798_v57, %v4729_v15 }
 0x7f5   : > { %v11107_v25 = vadd.f32 %v4727_v13, %v4569_v19  ;;  %v11120_v13 = vadd.f32 %v11088_v45, %v5396_v42 }
 0x7f6   : > { %v5087_v32 = vpop.f32.mrf.mxu1 }
 0x7f7   : > { %12478 = vst [vmem:[#allocation59_spill] sm:$0xff] %v11107_v25  ;;  %v7159_v24 = vpop.eup %7158  ;;  %v12015_v8 = vmax.f32 %v11107_v25, 0.0  ;;  %v5088_v40 = vadd.f32 %v10636_v35, %v5087_v32  ;;  %v5520_v32 = vmax.f32 %v5518_v12, %v11112_v29  ;;  %v11150_v12 = vadd.f32 %v11088_v45, %v11069_v28 }
 0x7f8   : > { %v4466_v19 = vpop.f32.mrf.mxu3  ;;  %7046 = vmatmul.msk.f32.gmra.mxu2 %vm5210_vm3, %v7159_v24  ;;  %v11134_v24 = vadd.f32 %v11088_v45, %v10981_v41 }
 0x7f9   : > { %7160 = vtanh.f32 %v5088_v40  ;;  %v4522_v10 = vadd.f32 %v4466_v19, %v4326_v44  ;;  %7015 = vmatmul.msk.f32.gmra.mxu1 %vm4031_vm2, %v12015_v8  ;;  %v11138_v40 = vadd.f32 %v11088_v45, %v11039_v34  ;;  %v5522_v44 = vmax.f32 %v5520_v32, %v11120_v13 }
 0x7fa   : > { %v5517_v15 = vmax.f32 %v11134_v24, %v11128_v63  ;;  %v4329_v34 = vadd.f32 %v10782_v11, %v10923_v62 }
 0x7fb   : > { %v4570_v22 = vmax.f32 %v4522_v10, 0.0  ;;  %v5402_v42 = vpop.f32.mrf.mxu2 }
 0x7fc   : > { %v11142_v61 = vadd.f32 %v11088_v45, %v5402_v42 }
 0x7fd   : > { %v11144_v19 = vadd.f32 %v4730_v59, %v4570_v22  ;;  %v5519_v22 = vmax.f32 %v5517_v15, %v11138_v40  ;;  %v11159_v59 = vadd.f32 %v11088_v45, %v5399_v58 }
 0x7fe   : > { %v5524_v41 = vmax.f32 %v5522_v44, %v11142_v61  ;;  %v5090_v10 = vpop.f32.mrf.mxu1  ;;  %v4733_v44 = vadd.f32 %v10798_v57, %v4732_v4 }
 0x7ff   : > { %12479 = vst [vmem:[#allocation45_spill] sm:$0xff] %v11144_v19  ;;  %v7161_v8 = vpop.eup %7160  ;;  %v12019_v32 = vmax.f32 %v11144_v19, 0.0  ;;  %v5091_v42 = vadd.f32 %v10636_v35, %v5090_v10  ;;  %v5521_v62 = vmax.f32 %v5519_v22, %v11150_v12 }
 0x800   : > { %v4469_v25 = vpop.f32.mrf.mxu3  ;;  %7047 = vmatmul.msk.f32.gmra.mxu2 %vm5210_vm3, %v7161_v8  ;;  %v4735_v8 = vpop.f32.mrf.mxu0 }
 0x801   : > { %7162 = vtanh.f32 %v5091_v42  ;;  %v4523_v28 = vadd.f32 %v4469_v25, %v4329_v34  ;;  %7016 = vmatmul.msk.f32.gmra.mxu1 %vm4031_vm2, %v12019_v32  ;;  %v5523_v15 = vmax.f32 %v5521_v62, %v11159_v59  ;;  %v4332_v32 = vadd.f32 %v10782_v11, %v10940_v53 }
 0x803   : > { %v4571_v16 = vmax.f32 %v4523_v28, 0.0  ;;  %v5405_v10 = vpop.f32.mrf.mxu2 }
 0x804   : > { %v11169_v58 = vadd.f32 %v11088_v45, %v5405_v10 }
 0x805   : > { %v11171_v47 = vadd.f32 %v4733_v44, %v4571_v16  ;;  %v4736_v16 = vadd.f32 %v10798_v57, %v4735_v8 }
 0x806   : > { %v5525_v25 = vmax.f32 %v5523_v15, %v11169_v58  ;;  %v5093_v34 = vpop.f32.mrf.mxu1 }
 0x807   : > { %12480 = vst [vmem:[#allocation51_spill] sm:$0xff] %v11171_v47  ;;  %v7163_v42 = vpop.eup %7162  ;;  %v12023_v22 = vmax.f32 %v11171_v47, 0.0  ;;  %v5094_v4 = vadd.f32 %v10636_v35, %v5093_v34 }
 0x808   : > { %v4472_v28 = vpop.f32.mrf.mxu3  ;;  %7048 = vmatmul.msk.f32.gmra.mxu2 %vm5210_vm3, %v7163_v42 }
 0x809   : > { %7164 = vtanh.f32 %v5094_v4  ;;  %v4524_v62 = vadd.f32 %v4472_v28, %v4332_v32  ;;  %7017 = vmatmul.msk.f32.gmra.mxu1 %vm4031_vm2, %v12023_v22  ;;  %v4335_v32 = vadd.f32 %v10782_v11, %v10954_v0  ;;  %v4738_v28 = vpop.f32.mrf.mxu0 }
 0x80b   : > { %v4572_v44 = vmax.f32 %v4524_v62, 0.0  ;;  %v5408_v10 = vpop.f32.mrf.mxu2 }
 0x80c   : > { %v11184_v15 = vadd.f32 %v11088_v45, %v5408_v10 }
 0x80d   : > { %v11186_v53 = vadd.f32 %v4736_v16, %v4572_v44 }
 0x80e   : > { %v5526_v34 = vmax.f32 %v5524_v41, %v11184_v15  ;;  %v5096_v19 = vpop.f32.mrf.mxu1  ;;  %v4739_v41 = vadd.f32 %v10798_v57, %v4738_v28 }
 0x80f   : > { %12481 = vst [vmem:[#allocation61_spill] sm:$0xff] %v11186_v53  ;;  %v7165_v3 = vpop.eup %7164  ;;  %v12024_v42 = vmax.f32 %v11186_v53, 0.0  ;;  %v5097_v4 = vadd.f32 %v10636_v35, %v5096_v19 }
 0x810   : > { %v4475_v8 = vpop.f32.mrf.mxu3  ;;  %7049 = vmatmul.msk.f32.gmra.mxu2 %vm5210_vm3, %v7165_v3 }
 0x811   : > { %7166 = vtanh.f32 %v5097_v4  ;;  %v4525_v62 = vadd.f32 %v4475_v8, %v4335_v32  ;;  %7018 = vmatmul.msk.f32.gmra.mxu1 %vm4031_vm2, %v12024_v42  ;;  %v11208_v32 = vld [vmem:[%s11807_s18] ss:$0 sm:$0xff] }
 0x813   : > { %v4573_v16 = vmax.f32 %v4525_v62, 0.0  ;;  %v5411_v44 = vpop.f32.mrf.mxu2 }
 0x814   : > { %v11199_v11 = vadd.f32 %v11088_v45, %v5411_v44 }
 0x815   : > { %v11201_v0 = vadd.f32 %v4739_v41, %v4573_v16 }
 0x816   : > { %v5527_v35 = vmax.f32 %v5525_v25, %v11199_v11  ;;  %v5099_v19 = vpop.f32.mrf.mxu1 }
 0x817   : > { %12482 = vst [vmem:[#allocation47_spill] sm:$0xff] %v11201_v0  ;;  %v7167_v10 = vpop.eup %7166  ;;  %v12022_v3 = vmax.f32 %v11201_v0, 0.0  ;;  %v5100_v57 = vadd.f32 %v11208_v32, %v5099_v19 }
 0x818   : > { %7050 = vmatmul.msk.f32.gmra.mxu2 %vm5210_vm3, %v7167_v10 }
 0x819   : > { %7168 = vtanh.f32 %v5100_v57  ;;  %7019 = vmatmul.msk.f32.gmra.mxu1 %vm4031_vm2, %v12022_v3 }
 0x81b   : > { %v5414_v4 = vpop.f32.mrf.mxu2 }
 0x81c   : > { %v11216_v25 = vadd.f32 %v11088_v45, %v5414_v4 }
 0x81e   : > { %v5528_v28 = vmax.f32 %v5526_v34, %v11216_v25  ;;  %v5102_v8 = vpop.f32.mrf.mxu1 }
 0x81f   : > { %v7169_v62 = vpop.eup %7168  ;;  %v5103_v41 = vadd.f32 %v11208_v32, %v5102_v8 }
 0x820   : > { %7051 = vmatmul.msk.f32.gmra.mxu2 %vm5210_vm3, %v7169_v62 }
 0x821   : > { %7170 = vtanh.f32 %v5103_v41 }
 0x823   : > { %v5417_v16 = vpop.f32.mrf.mxu2 }
 0x824   : > { %v11222_v44 = vadd.f32 %v11088_v45, %v5417_v16 }
 0x826   : > { %v5529_v19 = vmax.f32 %v5527_v35, %v11222_v44  ;;  %v5105_v10 = vpop.f32.mrf.mxu1 }
 0x827   : > { %v7171_v57 = vpop.eup %7170  ;;  %v5106_v4 = vadd.f32 %v11208_v32, %v5105_v10 }
 0x828   : > { %7052 = vmatmul.msk.f32.gmra.mxu2 %vm5210_vm3, %v7171_v57 }
 0x829   : > { %7172 = vtanh.f32 %v5106_v4 }
 0x82b   : > { %v5420_v34 = vpop.f32.mrf.mxu2 }
 0x82c   : > { %v11228_v3 = vadd.f32 %v11088_v45, %v5420_v34 }
 0x82e   : > { %v5530_v8 = vmax.f32 %v5528_v28, %v11228_v3  ;;  %v5108_v62 = vpop.f32.mrf.mxu1 }
 0x82f   : > { %v7173_v41 = vpop.eup %7172  ;;  %v5109_v16 = vadd.f32 %v11208_v32, %v5108_v62 }
 0x830   : > { %7053 = vmatmul.msk.f32.gmra.mxu2 %vm5210_vm3, %v7173_v41 }
 0x831   : > { %7174 = vtanh.f32 %v5109_v16 }
 0x833   : > { %v5423_v35 = vpop.f32.mrf.mxu2 }
 0x834   : > { %v11234_v22 = vadd.f32 %v11088_v45, %v5423_v35 }
 0x836   : > { %v5531_v10 = vmax.f32 %v5529_v19, %v11234_v22  ;;  %v5111_v57 = vpop.f32.mrf.mxu1 }
 0x837   : > { %v7175_v4 = vpop.eup %7174  ;;  %v5112_v34 = vadd.f32 %v11208_v32, %v5111_v57 }
 0x838   : > { %7054 = vmatmul.msk.f32.gmra.mxu2 %vm5210_vm3, %v7175_v4 }
 0x839   : > { %7176 = vtanh.f32 %v5112_v34 }
 0x83b   : > { %v5426_v28 = vpop.f32.mrf.mxu2 }
 0x83c   : > { %v11240_v42 = vadd.f32 %v11088_v45, %v5426_v28 }
 0x83e   : > { %v5532_v62 = vmax.f32 %v5530_v8, %v11240_v42  ;;  %v5114_v41 = vpop.f32.mrf.mxu1 }
 0x83f   : > { %v7177_v16 = vpop.eup %7176  ;;  %v5115_v35 = vadd.f32 %v11208_v32, %v5114_v41 }
 0x840   : > { %7055 = vmatmul.msk.f32.gmra.mxu2 %vm5210_vm3, %v7177_v16 }
 0x841   : > { %7178 = vtanh.f32 %v5115_v35 }
 0x843   : > { %v5429_v19 = vpop.f32.mrf.mxu2 }
 0x844   : > { %v11246_v0 = vadd.f32 %v11088_v45, %v5429_v19 }
 0x846   : > { %v5533_v57 = vmax.f32 %v5531_v10, %v11246_v0  ;;  %v5117_v4 = vpop.f32.mrf.mxu1 }
 0x847   : > { %v7179_v34 = vpop.eup %7178  ;;  %v5118_v28 = vadd.f32 %v11208_v32, %v5117_v4 }
 0x848   : > { %7056 = vmatmul.msk.f32.gmra.mxu2 %vm5210_vm3, %v7179_v34 }
 0x849   : > { %7180 = vtanh.f32 %v5118_v28 }
 0x84b   : > { %v5432_v8 = vpop.f32.mrf.mxu2 }
 0x84c   : > { %v11252_v47 = vadd.f32 %v11088_v45, %v5432_v8 }
 0x84e   : > { %v5534_v41 = vmax.f32 %v5532_v62, %v11252_v47  ;;  %v5120_v16 = vpop.f32.mrf.mxu1 }
 0x84f   : > { %v7181_v35 = vpop.eup %7180  ;;  %v5121_v19 = vadd.f32 %v11208_v32, %v5120_v16 }
 0x850   : > { %7057 = vmatmul.msk.f32.gmra.mxu2 %vm5210_vm3, %v7181_v35 }
 0x851   : > { %7182 = vtanh.f32 %v5121_v19 }
 0x853   : > { %v5435_v10 = vpop.f32.mrf.mxu2 }
 0x854   : > { %v11258_v53 = vadd.f32 %v11088_v45, %v5435_v10 }
 0x856   : > { %v5535_v4 = vmax.f32 %v5533_v57, %v11258_v53  ;;  %v5123_v34 = vpop.f32.mrf.mxu1 }
 0x857   : > { %v7183_v28 = vpop.eup %7182  ;;  %v5124_v8 = vadd.f32 %v11208_v32, %v5123_v34 }
 0x858   : > { %7058 = vmatmul.msk.f32.gmra.mxu2 %vm5210_vm3, %v7183_v28 }
 0x859   : > { %7184 = vtanh.f32 %v5124_v8 }
 0x85b   : > { %v5438_v62 = vpop.f32.mrf.mxu2 }
 0x85c   : > { %v11264_v27 = vadd.f32 %v11088_v45, %v5438_v62 }
 0x85e   : > { %v5536_v16 = vmax.f32 %v5534_v41, %v11264_v27  ;;  %v5126_v35 = vpop.f32.mrf.mxu1 }
 0x85f   : > { %v7185_v19 = vpop.eup %7184  ;;  %v5127_v10 = vadd.f32 %v11208_v32, %v5126_v35 }
 0x860   : > { %7059 = vmatmul.msk.f32.gmra.mxu2 %vm5210_vm3, %v7185_v19 }
 0x861   : > { %7186 = vtanh.f32 %v5127_v10 }
 0x863   : > { %v5441_v57 = vpop.f32.mrf.mxu2 }
 0x864   : > { %v11270_v31 = vadd.f32 %v11088_v45, %v5441_v57 }
 0x866   : > { %v5537_v34 = vmax.f32 %v5535_v4, %v11270_v31  ;;  %v5129_v28 = vpop.f32.mrf.mxu1 }
 0x867   : > { %v7187_v8 = vpop.eup %7186  ;;  %v5130_v62 = vadd.f32 %v11208_v32, %v5129_v28 }
 0x868   : > { %7060 = vmatmul.msk.f32.gmra.mxu2 %vm5210_vm3, %v7187_v8 }
 0x869   : > { %7188 = vtanh.f32 %v5130_v62 }
 0x86b   : > { %v5444_v41 = vpop.f32.mrf.mxu2 }
 0x86c   : > { %v11276_v51 = vadd.f32 %v11088_v45, %v5444_v41 }
 0x86e   : > { %v5538_v35 = vmax.f32 %v5536_v16, %v11276_v51  ;;  %v5132_v19 = vpop.f32.mrf.mxu1 }
 0x86f   : > { %v7189_v10 = vpop.eup %7188  ;;  %v5133_v57 = vadd.f32 %v11208_v32, %v5132_v19 }
 0x870   : > { %7061 = vmatmul.msk.f32.gmra.mxu2 %vm5210_vm3, %v7189_v10 }
 0x871   : > { %7190 = vtanh.f32 %v5133_v57 }
 0x873   : > { %v5447_v4 = vpop.f32.mrf.mxu2 }
 0x874   : > { %v11282_v49 = vadd.f32 %v11088_v45, %v5447_v4 }
 0x876   : > { %v5539_v28 = vmax.f32 %v5537_v34, %v11282_v49  ;;  %v5135_v8 = vpop.f32.mrf.mxu1 }
 0x877   : > { %v7191_v62 = vpop.eup %7190  ;;  %v5136_v41 = vadd.f32 %v11208_v32, %v5135_v8 }
 0x878   : > { %7062 = vmatmul.msk.f32.gmra.mxu2 %vm5210_vm3, %v7191_v62 }
 0x879   : > { %7192 = vtanh.f32 %v5136_v41 }
 0x87b   : > { %v5450_v16 = vpop.f32.mrf.mxu2 }
 0x87c   : > { %v11288_v36 = vadd.f32 %v11088_v45, %v5450_v16 }
 0x87e   : > { %v5540_v19 = vmax.f32 %v5538_v35, %v11288_v36  ;;  %v5138_v10 = vpop.f32.mrf.mxu1 }
 0x87f   : > { %v7193_v57 = vpop.eup %7192  ;;  %v5139_v4 = vadd.f32 %v11208_v32, %v5138_v10 }
 0x880   : > { %7063 = vmatmul.msk.f32.gmra.mxu2 %vm5210_vm3, %v7193_v57 }
 0x881   : > { %7194 = vtanh.f32 %v5139_v4 }
 0x883   : > { %v5453_v34 = vpop.f32.mrf.mxu2 }
 0x884   : > { %v11294_v43 = vadd.f32 %v11088_v45, %v5453_v34 }
 0x886   : > { %v5541_v8 = vmax.f32 %v5539_v28, %v11294_v43  ;;  %v5141_v62 = vpop.f32.mrf.mxu1 }
 0x887   : > { %v7195_v41 = vpop.eup %7194  ;;  %v5142_v16 = vadd.f32 %v11208_v32, %v5141_v62 }
 0x888   : > { %7064 = vmatmul.msk.f32.gmra.mxu2 %vm5210_vm3, %v7195_v41 }
 0x889   : > { %7196 = vtanh.f32 %v5142_v16 }
 0x88b   : > { %v5456_v35 = vpop.f32.mrf.mxu2 }
 0x88c   : > { %v11300_v17 = vadd.f32 %v11088_v45, %v5456_v35 }
 0x88e   : > { %v5542_v10 = vmax.f32 %v5540_v19, %v11300_v17  ;;  %v5144_v57 = vpop.f32.mrf.mxu1 }
 0x88f   : > { %v7197_v4 = vpop.eup %7196  ;;  %v5145_v34 = vadd.f32 %v11208_v32, %v5144_v57 }
 0x890   : > { %7065 = vmatmul.msk.f32.gmra.mxu2 %vm5210_vm3, %v7197_v4 }
 0x891   : > { %7198 = vtanh.f32 %v5145_v34 }
 0x893   : > { %v5459_v28 = vpop.f32.mrf.mxu2 }
 0x894   : > { %v11306_v18 = vadd.f32 %v11088_v45, %v5459_v28 }
 0x896   : > { %v5543_v62 = vmax.f32 %v5541_v8, %v11306_v18  ;;  %v5147_v41 = vpop.f32.mrf.mxu1 }
 0x897   : > { %v7199_v16 = vpop.eup %7198  ;;  %v5148_v35 = vadd.f32 %v11208_v32, %v5147_v41 }
 0x898   : > { %7066 = vmatmul.msk.f32.gmra.mxu2 %vm5210_vm3, %v7199_v16 }
 0x899   : > { %7200 = vtanh.f32 %v5148_v35 }
 0x89b   : > { %v5462_v19 = vpop.f32.mrf.mxu2 }
 0x89c   : > { %v11312_v14 = vadd.f32 %v11088_v45, %v5462_v19 }
 0x89e   : > { %v5544_v57 = vmax.f32 %v5542_v10, %v11312_v14 }
 0x89f   : > { %v7201_v4 = vpop.eup %7200 }
 0x8a0   : > { %7067 = vmatmul.msk.f32.gmra.mxu2 %vm5210_vm3, %v7201_v4 }
 0x8a3   : > { %v5465_v34 = vpop.f32.mrf.mxu2 }
 0x8a4   : > { %v11317_v28 = vadd.f32 %v11088_v45, %v5465_v34 }
 0x8a6   : > { %v5545_v8 = vmax.f32 %v5543_v62, %v11317_v28  ;;  %v6133_v62 = vld [vmem:[%s11810_s21 + $0x18] sm:$0xff] }
 0x8a7   : > { %6156 = vmatpush.msrb.mxu3 %v6133_v62 }
 0x8ab   : > { %v5468_v7 = vpop.f32.mrf.mxu2 }
 0x8ac   : > { %v11321_v32 = vadd.f32 %v11088_v45, %v5468_v7 }
 0x8ae   : > { %v5546_v41 = vmax.f32 %v5544_v57, %v11321_v32 }
 0x8b3   : > { %v5471_v16 = vpop.f32.mrf.mxu2 }
 0x8b4   : > { %v11325_v35 = vadd.f32 %v11088_v45, %v5471_v16 }
 0x8b6   : > { %v5547_v10 = vmax.f32 %v5545_v8, %v11325_v35 }
 0x8bb   : > { %v5474_v19 = vpop.f32.mrf.mxu2 }
 0x8bc   : > { %v11329_v4 = vadd.f32 %v11088_v45, %v5474_v19 }
 0x8be   : > { %v5548_v34 = vmax.f32 %v5546_v41, %v11329_v4 }
 0x8c3   : > { %v5477_v7 = vpop.f32.mrf.mxu2 }
 0x8c4   : > { %v11336_v57 = vadd.f32 %v11088_v45, %v5477_v7 }
 0x8c6   : > { %v5549_v16 = vmax.f32 %v5547_v10, %v11336_v57 }
 0x8cb   : > { %v5480_v39 = vpop.f32.mrf.mxu2 }
 0x8cc   : > { %v11340_v8 = vadd.f32 %v11088_v45, %v5480_v39 }
 0x8ce   : > { %v5550_v19 = vmax.f32 %v5548_v34, %v11340_v8 }
 0x8d3   : > { %v5483_v33 = vpop.f32.mrf.mxu2 }
 0x8d4   : > { %v11344_v41 = vadd.f32 %v11088_v45, %v5483_v33 }
 0x8d6   : > { %v5551_v30 = vmax.f32 %v5549_v16, %v11344_v41 }
 0x8db   : > { %v5486_v50 = vpop.f32.mrf.mxu2 }
 0x8e3   : > { %v5489_v62 = vpop.f32.mrf.mxu2 }
 0x8e4   : > { %v11348_v9 = vadd.f32 %v11088_v45, %v5489_v62 }
 0x8e6   : > { %v5553_v7 = vmax.f32 %v5551_v30, %v11348_v9  ;;  %v11360_v30 = vadd.f32 %v11088_v45, %v5486_v50 }
 0x8eb   : > { %v5492_v10 = vpop.f32.mrf.mxu2 }
 0x8f3   : > { %v5495_v6 = vpop.f32.mrf.mxu2 }
 0x8f4   : > { %v11352_v39 = vadd.f32 %v11088_v45, %v5495_v6  ;;  %v11363_v6 = vadd.f32 %v11088_v45, %v5492_v10 }
 0x8f6   : > { %v5555_v34 = vmax.f32 %v5553_v7, %v11352_v39 }
 0x8fb   : > { %v5498_v46 = vpop.f32.mrf.mxu2 }
 0x8fc   : > { %v11373_v56 = vadd.f32 %v11088_v45, %v5498_v46 }
 0x903   : > { %v5501_v5 = vpop.f32.mrf.mxu2 }
 0x904   : > { %v11356_v33 = vadd.f32 %v11088_v45, %v5501_v5  ;;  %v6132_v5 = vld [vmem:[%s11810_s21 + $0x10] sm:$0xff] }
 0x905   : > { %6157 = vmatpush.msrb.mxu3 %v6132_v5 }
 0x906   : > { %v5557_v16 = vmax.f32 %v5555_v34, %v11356_v33  ;;  %v5552_v34 = vmax.f32 %v5550_v19, %v11360_v30 }
 0x908   : > { %v5554_v50 = vmax.f32 %v5552_v34, %v11363_v6 }
 0x90b   : > { %v5504_v2 = vpop.f32.mrf.mxu2 }
 0x90c   : > { %v11378_v10 = vadd.f32 %v11088_v45, %v5504_v2 }
 0x913   : > { %v5507_v62 = vpop.f32.mrf.mxu2 }
 0x914   : > { %v11366_v7 = vadd.f32 %v11088_v45, %v5507_v62  ;;  %v5556_v62 = vmax.f32 %v5554_v50, %v11373_v56 }
 0x916   : > { %v5559_v26 = vmax.f32 %v5557_v16, %v11366_v7  ;;  %v5558_v52 = vmax.f32 %v5556_v62, %v11378_v10 }
 0x91b   : > { %v5510_v38 = vpop.f32.mrf.mxu2 }
 0x91c   : > { %v11383_v23 = vadd.f32 %v11088_v45, %v5510_v38 }
 0x91e   : > { %v11386_v19 = vmax.f32 %v5558_v52, %v11383_v23 }
 0x920   : > { %v5650_v16 = vsub.f32 %v11120_v13, %v11386_v19  ;;  %v5606_v2 = vsub.f32 %v11105_v21, %v11386_v19  ;;  %v5562_v5 = vsub.f32 %v11101_v1, %v11386_v19  ;;  %v5584_v34 = vsub.f32 %v11096_v55, %v11386_v19 }
 0x921   : > { %v5716_v38 = vsub.f32 %v11216_v25, %v11386_v19  ;;  %v5782_v52 = vsub.f32 %v11252_v47, %v11386_v19  ;;  %v5672_v13 = vsub.f32 %v11142_v61, %v11386_v19  ;;  %v5694_v21 = vsub.f32 %v11184_v15, %v11386_v19 }
 0x922   : > { %v5652_v50 = vmul.f32 1.442695, %v5650_v16  ;;  %v5608_v62 = vmul.f32 1.442695, %v5606_v2  ;;  %v5564_v46 = vmul.f32 1.442695, %v5562_v5  ;;  %v5628_v1 = vsub.f32 %v11112_v29, %v11386_v19 }
 0x923   : > { %v5586_v60 = vmul.f32 1.442695, %v5584_v34  ;;  %v5848_v55 = vsub.f32 %v11288_v36, %v11386_v19  ;;  %v5738_v47 = vsub.f32 %v11228_v3, %v11386_v19  ;;  %v5760_v25 = vsub.f32 %v11240_v42, %v11386_v19  ;;  %v5513_v61 = vpop.f32.mrf.mxu2 }
 0x924   : > { %7202 = vpow2.f32 %v5652_v50  ;;  %v5804_v16 = vsub.f32 %v11264_v27, %v11386_v19  ;;  %v5630_v29 = vmul.f32 1.442695, %v5628_v1  ;;  %v5718_v2 = vmul.f32 1.442695, %v5716_v38 }
 0x925   : > { %7204 = vpow2.f32 %v5608_v62  ;;  %v5826_v36 = vsub.f32 %v11276_v51, %v11386_v19  ;;  %v11421_v5 = vadd.f32 %v11088_v45, %v5513_v61  ;;  %v5696_v62 = vmul.f32 1.442695, %v5694_v21 }
 0x926   : > { %7206 = vpow2.f32 %v5564_v46  ;;  %v5784_v42 = vmul.f32 1.442695, %v5782_v52  ;;  %v5762_v15 = vmul.f32 1.442695, %v5760_v25 }
 0x927   : > { %7208 = vpow2.f32 %v5586_v60  ;;  %v5674_v60 = vmul.f32 1.442695, %v5672_v13  ;;  %v11432_v50 = vmax.f32 %v5559_v26, %v11421_v5  ;;  %v5850_v26 = vmul.f32 1.442695, %v5848_v55 }
 0x928   : > { %7210 = vpow2.f32 %v5630_v29  ;;  %v5740_v29 = vmul.f32 1.442695, %v5738_v47 }
 0x929   : > { %7212 = vpow2.f32 %v5718_v2  ;;  %v5651_v13 = vsub.f32 %v11159_v59, %v11432_v50  ;;  %v5695_v2 = vsub.f32 %v11199_v11, %v11432_v50  ;;  %v5717_v21 = vsub.f32 %v11222_v44, %v11432_v50 }
 0x92a   : > { %v7203_v46 = vpop.eup %7202  ;;  %7214 = vpow2.f32 %v5674_v60  ;;  %v5585_v52 = vsub.f32 %v11128_v63, %v11432_v50  ;;  %v5673_v47 = vsub.f32 %v11169_v58, %v11432_v50  ;;  %v5761_v55 = vsub.f32 %v11246_v0, %v11432_v50 }
 0x92b   : > { %v7205_v27 = vpop.eup %7204  ;;  %5660 = vperm.xlu2 %7092, %v7203_v46   ;;  %7216 = vpow2.f32 %v5696_v62  ;;  %v5783_v25 = vsub.f32 %v11258_v53, %v11432_v50  ;;  %v5739_v63 = vsub.f32 %v11234_v22, %v11432_v50  ;;  %v5828_v58 = vmul.f32 1.442695, %v5826_v36 }
 0x92c   : > { %v7207_v38 = vpop.eup %7206  ;;  %5616 = vperm.xlu1 %7091, %v7205_v27   ;;  %7218 = vpow2.f32 %v5784_v42  ;;  %v5806_v42 = vmul.f32 1.442695, %v5804_v16  ;;  %v5588_v62 = vmul.f32 1.442695, %v5585_v52  ;;  %v5805_v16 = vsub.f32 %v11270_v31, %v11432_v50 }
 0x92d   : > { %v7209_v45 = vpop.eup %7208  ;;  %5572 = vperm.xlu0 %7090, %v7207_v38   ;;  %7220 = vpow2.f32 %v5740_v29  ;;  %v5980_v59 = vsub.f32 %v11360_v30, %v11386_v19  ;;  %v12488_v53 = vsub.f32 %v11383_v23, %v11386_v19 }
 0x92e   : > { %v5590_v1 = vadd.f32 %v7209_v45, %v7207_v38  ;;  %v7211_v34 = vpop.eup %7210  ;;  %v5563_v38 = vsub.f32 %v11134_v24, %v11432_v50  ;;  %7222 = vpow2.f32 %v5762_v15  ;;  %v5607_v24 = vsub.f32 %v11138_v40, %v11432_v50 }
 0x92f   : > { %v7213_v51 = vpop.eup %7212  ;;  %7224 = vpow2.f32 %v5850_v26  ;;  %v5849_v15 = vsub.f32 %v11294_v43, %v11432_v50  ;;  %v12483_v26 = vsub.f32 %v11321_v32, %v11386_v19  ;;  %v5654_v32 = vmul.f32 1.442695, %v5651_v13 }
 0x930   : > { %v5612_v61 = vadd.f32 %v7205_v27, %v5590_v1  ;;  %v7215_v27 = vpop.eup %7214  ;;  %7226 = vpow2.f32 %v5806_v42  ;;  %v5982_v11 = vmul.f32 1.442695, %v5980_v59 }
 0x931   : > { %7228 = vpow2.f32 %v5828_v58  ;;  %v5937_v58 = vsub.f32 %v11336_v57, %v11432_v50  ;;  %v5852_v23 = vmul.f32 1.442695, %v5849_v15  ;;  %v12491_v57 = vsub.f32 %v11348_v9, %v11432_v50 }
 0x932   : > { %v5634_v3 = vadd.f32 %v7211_v34, %v5612_v61  ;;  %v5566_v61 = vmul.f32 1.442695, %v5563_v38  ;;  %v5916_v38 = vmul.f32 1.442695, %v12483_v26  ;;  %7230 = vpow2.f32 %v5588_v62 }
 0x933   : > { %5726 = vperm.xlu2 %7092, %v7213_v51  }
 0x934   : > { %v5656_v60 = vadd.f32 %v7203_v46, %v5634_v3  ;;  %5638 = vperm.xlu1 %7091, %v7211_v34   ;;  %v7217_v46 = vpop.eup %7216  ;;  %v5827_v34 = vsub.f32 %v11282_v49, %v11432_v50  ;;  %7232 = vpow2.f32 %v5566_v61 }
 0x935   : > { %5594 = vperm.xlu0 %7090, %v7209_v45   ;;  %v7219_v36 = vpop.eup %7218  ;;  %7234 = vpow2.f32 %v5916_v38 }
 0x936   : > { %v5678_v3 = vadd.f32 %v7215_v27, %v5656_v60  ;;  %v5629_v60 = vsub.f32 %v11150_v12, %v11432_v50  ;;  %v7221_v52 = vpop.eup %7220  ;;  %v5915_v12 = vsub.f32 %v11325_v35, %v11432_v50  ;;  %v12490_v35 = vsub.f32 %v11344_v41, %v11432_v50 }
 0x937   : > { %v7223_v42 = vpop.eup %7222  ;;  %v12492_v41 = vsub.f32 %v11352_v39, %v11432_v50 }
 0x938   : > { %v5700_v45 = vadd.f32 %v7217_v46, %v5678_v3  ;;  %v5893_v3 = vsub.f32 %v11317_v28, %v11432_v50 }
 0x93a   : > { %v5722_v29 = vadd.f32 %v7213_v51, %v5700_v45  ;;  %v5610_v51 = vmul.f32 1.442695, %v5607_v24  ;;  %v12484_v45 = vsub.f32 %v11300_v17, %v11386_v19  ;;  %v7225_v24 = vpop.eup %7224  ;;  %v6025_v17 = vsub.f32 %v11356_v33, %v11432_v50 }
 0x93b   : > { %5792 = vperm.xlu2 %7092, %v7219_v36   ;;  %v7227_v61 = vpop.eup %7226 }
 0x93c   : > { %5682 = vperm.xlu1 %7091, %v7215_v27   ;;  %v5744_v1 = vadd.f32 %v7221_v52, %v5722_v29  ;;  %v5872_v40 = vmul.f32 1.442695, %v12484_v45  ;;  %v5632_v29 = vmul.f32 1.442695, %v5629_v60  ;;  %7236 = vpow2.f32 %v5610_v51  ;;  %v7229_v60 = vpop.eup %7228 }
 0x93d   : > { %5704 = vperm.xlu0 %7090, %v7217_v46   ;;  %v12485_v46 = vsub.f32 %v11312_v14, %v11386_v19  ;;  %v11492_v38 = vpop.eup %7230  ;;  %v5676_v14 = vmul.f32 1.442695, %v5673_v47  ;;  %v5698_v47 = vmul.f32 1.442695, %v5695_v2  ;;  %v6024_v2 = vsub.f32 %v11373_v56, %v11386_v19 }
 0x93e   : > { %v5766_v27 = vadd.f32 %v7223_v42, %v5744_v1  ;;  %v6047_v1 = vsub.f32 %v11366_v7, %v11432_v50  ;;  %7238 = vpow2.f32 %v5872_v40  ;;  %v5764_v56 = vmul.f32 1.442695, %v5761_v55 }
 0x93f   : > { %v5894_v26 = vmul.f32 1.442695, %v12485_v46  ;;  %7240 = vpow2.f32 %v5632_v29  ;;  %v11494_v46 = vpop.eup %7232  ;;  %v12487_v29 = vsub.f32 %v11340_v8, %v11386_v19  ;;  %v5742_v8 = vmul.f32 1.442695, %v5739_v63 }
 0x940   : > { %v5788_v45 = vadd.f32 %v7219_v36, %v5766_v27  ;;  %v12486_v36 = vsub.f32 %v11329_v4, %v11386_v19  ;;  %v5591_v40 = vadd.f32 %v11494_v46, %v11492_v38  ;;  %v7235_v51 = vpop.eup %7234  ;;  %v6002_v4 = vsub.f32 %v11363_v6, %v11386_v19 }
 0x941   : > { %7242 = vpow2.f32 %v5894_v26  ;;  %v5960_v26 = vmul.f32 1.442695, %v12487_v29  ;;  %v6026_v22 = vmul.f32 1.442695, %v6024_v2  ;;  %v6050_v39 = vmul.f32 1.442695, %v6047_v1 }
 0x942   : > { %v5810_v62 = vadd.f32 %v7227_v61, %v5788_v45  ;;  %v5938_v27 = vmul.f32 1.442695, %v12486_v36  ;;  %7244 = vpow2.f32 %v5654_v32  ;;  %v11511_v30 = vpop.eup %7236 }
 0x943   : > { %5858 = vperm.xlu2 %7092, %v7225_v24   ;;  %7246 = vpow2.f32 %v5676_v14  ;;  %v5613_v6 = vadd.f32 %v11511_v30, %v5591_v40 }
 0x944   : > { %5748 = vperm.xlu1 %7091, %v7221_v52   ;;  %v5832_v13 = vadd.f32 %v7229_v60, %v5810_v62  ;;  %v5720_v52 = vmul.f32 1.442695, %v5717_v21  ;;  %v7239_v62 = vpop.eup %7238  ;;  %7248 = vpow2.f32 %v5938_v27  ;;  %v6004_v21 = vmul.f32 1.442695, %v6002_v4 }
 0x945   : > { %5770 = vperm.xlu0 %7090, %v7223_v42   ;;  %v11519_v42 = vpop.eup %7240  ;;  %7250 = vpow2.f32 %v5698_v47  ;;  %v5808_v4 = vmul.f32 1.442695, %v5805_v16 }
 0x946   : > { %v5854_v32 = vadd.f32 %v7225_v24, %v5832_v13  ;;  %7252 = vpow2.f32 %v5960_v26  ;;  %v6046_v24 = vsub.f32 %v11378_v10, %v11386_v19  ;;  %v5635_v14 = vadd.f32 %v11519_v42, %v5613_v6 }
 0x947   : > { %v7243_v44 = vpop.eup %7242  ;;  %7254 = vpow2.f32 %v5720_v52  ;;  %v5786_v10 = vmul.f32 1.442695, %v5783_v25  ;;  %v6070_v25 = vmul.f32 1.442695, %v12488_v53  ;;  %v5830_v26 = vmul.f32 1.442695, %v5827_v34 }
 0x948   : > { %v5876_v45 = vadd.f32 %v7239_v62, %v5854_v32  ;;  %v11527_v36 = vpop.eup %7244  ;;  %7256 = vpow2.f32 %v5982_v11  ;;  %v6048_v0 = vmul.f32 1.442695, %v6046_v24  ;;  %v12489_v34 = vsub.f32 %v11306_v18, %v11432_v50 }
 0x949   : > { %v5657_v63 = vadd.f32 %v11527_v36, %v5635_v14  ;;  %v11533_v59 = vpop.eup %7246  ;;  %7258 = vpow2.f32 %v5742_v8  ;;  %v5918_v18 = vmul.f32 1.442695, %v5915_v12  ;;  %v5962_v12 = vmul.f32 1.442695, %v12490_v35 }
 0x94a   : > { %v5898_v27 = vadd.f32 %v7243_v44, %v5876_v45  ;;  %v7249_v40 = vpop.eup %7248  ;;  %7260 = vpow2.f32 %v6004_v21  ;;  %v5874_v6 = vmul.f32 1.442695, %v12489_v34  ;;  %v5896_v21 = vmul.f32 1.442695, %v5893_v3 }
 0x94b   : > { %5924 = vperm.xlu2 %7092, %v7235_v51   ;;  %v5679_v55 = vadd.f32 %v11533_v59, %v5657_v63  ;;  %v11539_v47 = vpop.eup %7250  ;;  %7262 = vpow2.f32 %v5764_v56  ;;  %v5940_v3 = vmul.f32 1.442695, %v5937_v58  ;;  %v5984_v58 = vmul.f32 1.442695, %v12491_v57 }
 0x94c   : > { %5814 = vperm.xlu1 %7091, %v7227_v61   ;;  %v5920_v13 = vadd.f32 %v7235_v51, %v5898_v27  ;;  %v7253_v29 = vpop.eup %7252  ;;  %7264 = vpow2.f32 %v6026_v22 }
 0x94d   : > { %5836 = vperm.xlu0 %7090, %v7229_v60   ;;  %v5701_v60 = vadd.f32 %v11539_v47, %v5679_v55  ;;  %v11548_v51 = vpop.eup %7254  ;;  %7266 = vpow2.f32 %v5786_v10 }
 0x94e   : > { %v5942_v61 = vadd.f32 %v7249_v40, %v5920_v13  ;;  %v7257_v32 = vpop.eup %7256  ;;  %7268 = vpow2.f32 %v6048_v0 }
 0x94f   : > { %v5723_v31 = vadd.f32 %v11548_v51, %v5701_v60  ;;  %v11554_v16 = vpop.eup %7258  ;;  %7270 = vpow2.f32 %v5808_v4  ;;  %v6069_v60 = vsub.f32 %v11421_v5, %v11432_v50 }
 0x950   : > { %v5964_v52 = vadd.f32 %v7253_v29, %v5942_v61  ;;  %v7261_v11 = vpop.eup %7260  ;;  %7272 = vpow2.f32 %v6070_v25 }
 0x951   : > { %v5745_v2 = vadd.f32 %v11554_v16, %v5723_v31  ;;  %v11560_v49 = vpop.eup %7262  ;;  %7274 = vpow2.f32 %v5830_v26  ;;  %v6028_v26 = vmul.f32 1.442695, %v6025_v17 }
 0x952   : > { %v5986_v19 = vadd.f32 %v7257_v32, %v5964_v52  ;;  %v7265_v45 = vpop.eup %7264  ;;  %7276 = vpow2.f32 %v5852_v23  ;;  %v6072_v23 = vmul.f32 1.442695, %v6069_v60 }
 0x953   : > { %5946 = vperm.xlu2 %7092, %v7249_v40   ;;  %v5767_v43 = vadd.f32 %v11560_v49, %v5745_v2  ;;  %v11566_v15 = vpop.eup %7266  ;;  %7278 = vpow2.f32 %v5874_v6  ;;  %v6131_v40 = vld [vmem:[%s11810_s21 + $0x8] sm:$0xff] }
 0x954   : > { %5880 = vperm.xlu1 %7091, %v7239_v62   ;;  %v6008_v8 = vadd.f32 %v7261_v11, %v5986_v19  ;;  %v7269_v14 = vpop.eup %7268  ;;  %7280 = vpow2.f32 %v5896_v21  ;;  %6158 = vmatpush.msrb.mxu3 %v6131_v40  ;;  %v12497_v21 = vld [vmem:[#allocation64_spill] sm:$0xff] }
 0x955   : > { %5902 = vperm.xlu0 %7090, %v7243_v44   ;;  %v5789_v62 = vadd.f32 %v11566_v15, %v5767_v43  ;;  %v11572_v56 = vpop.eup %7270  ;;  %7282 = vpow2.f32 %v5918_v18 }
 0x956   : > { %v6030_v24 = vadd.f32 %v7265_v45, %v6008_v8  ;;  %v11577_v27 = vpop.eup %7272  ;;  %7284 = vpow2.f32 %v5940_v3 }
 0x957   : > { %v5811_v22 = vadd.f32 %v11572_v56, %v5789_v62  ;;  %v7275_v63 = vpop.eup %7274  ;;  %7286 = vpow2.f32 %v5962_v12 }
 0x958   : > { %v6052_v44 = vadd.f32 %v7269_v14, %v6030_v24  ;;  %v7277_v13 = vpop.eup %7276  ;;  %7288 = vpow2.f32 %v5984_v58  ;;  %v12498_v24 = vmax.f32 %v12497_v21, 0.0  ;;  %v12504_v58 = vmax.f32 %v10623_v20, 0.0 }
 0x959   : > { %v5833_v10 = vadd.f32 %v7275_v63, %v5811_v22  ;;  %v7279_v55 = vpop.eup %7278 }
 0x95a   : > { %v11581_v28 = vadd.f32 %v11577_v27, %v6052_v44  ;;  %v7281_v61 = vpop.eup %7280 }
 0x95b   : > { %6012 = vperm.xlu2 %7092, %v7261_v11   ;;  %v5855_v0 = vadd.f32 %v7277_v13, %v5833_v10  ;;  %v7283_v25 = vpop.eup %7282 }
 0x95c   : > { %5968 = vperm.xlu1 %7091, %v7253_v29   ;;  %v6006_v29 = vmul.f32 1.442695, %v12492_v41  ;;  %v7285_v52 = vpop.eup %7284 }
 0x95d   : > { %5990 = vperm.xlu0 %7090, %v7257_v32   ;;  %v5877_v4 = vadd.f32 %v7279_v55, %v5855_v0  ;;  %v7287_v31 = vpop.eup %7286 }
 0x95e   : > { %7290 = vpow2.f32 %v6006_v29  ;;  %v7289_v19 = vpop.eup %7288 }
 0x95f   : > { %v5899_v53 = vadd.f32 %v7281_v61, %v5877_v4  ;;  %7292 = vpow2.f32 %v6028_v26 }
 0x960   : > { %7294 = vpow2.f32 %v6050_v39 }
 0x961   : > { %v5921_v9 = vadd.f32 %v7283_v25, %v5899_v53  ;;  %7296 = vpow2.f32 %v6072_v23 }
 0x963   : > { %6034 = vperm.xlu2 %7092, %v7265_v45   ;;  %v5943_v32 = vadd.f32 %v7285_v52, %v5921_v9  ;;  %v12495_v45 = vld [vmem:[#allocation62_spill] sm:$0xff] }
 0x964   : > { %6056 = vperm.xlu1 %7091, %v7269_v14   ;;  %v7291_v17 = vpop.eup %7290  ;;  %v12496_v43 = vmax.f32 %v12495_v45, 0.0 }
 0x965   : > { %5599 = vperm.xlu0 %7090, %v11492_v38   ;;  %v5965_v5 = vadd.f32 %v7287_v31, %v5943_v32  ;;  %v7293_v2 = vpop.eup %7292  ;;  %v12509_v32 = vld [vmem:[#allocation46_spill] sm:$0xff] }
 0x966   : > { %v7295_v50 = vpop.eup %7294  ;;  %v12510_v20 = vmax.f32 %v12509_v32, 0.0 }
 0x967   : > { %v5987_v33 = vadd.f32 %v7289_v19, %v5965_v5  ;;  %v7297_v38 = vpop.eup %7296 }
 0x969   : > { %v6009_v11 = vadd.f32 %v7291_v17, %v5987_v33  ;;  %v12511_v33 = vld [vmem:[#allocation39_spill] sm:$0xff] }
 0x96b   : > { %5577 = vperm.xlu2 %7092, %v11494_v46   ;;  %v6031_v7 = vadd.f32 %v7293_v2, %v6009_v11 }
 0x96c   : > { %5643 = vperm.xlu1 %7091, %v11519_v42  }
 0x96d   : > { %5665 = vperm.xlu0 %7090, %v11527_v36   ;;  %v6053_v1 = vadd.f32 %v7295_v50, %v6031_v7 }
 0x96f   : > { %v6075_v34 = vadd.f32 %v7297_v38, %v6053_v1  ;;  %v12513_v1 = vld [vmem:[#allocation48_spill] sm:$0xff] }
 0x973   : > { %5621 = vperm.xlu2 %7092, %v11511_v30  }
 0x974   : > { %5709 = vperm.xlu1 %7091, %v11539_v47  }
 0x975   : > { %5731 = vperm.xlu0 %7090, %v11548_v51  }
 0x97b   : > { %5687 = vperm.xlu2 %7092, %v11533_v59  }
 0x97c   : > { %5775 = vperm.xlu1 %7091, %v11560_v49   ;;  %v12493_v49 = vld [vmem:[#allocation60_spill] sm:$0xff] }
 0x97d   : > { %5797 = vperm.xlu0 %7090, %v11566_v15   ;;  %v12494_v6 = vmax.f32 %v12493_v49, 0.0 }
 0x983   : > { %5753 = vperm.xlu2 %7092, %v11554_v16  }
 0x984   : > { %5841 = vperm.xlu1 %7091, %v7275_v63  }
 0x985   : > { %5885 = vperm.xlu0 %7090, %v7279_v55   ;;  %v5661_v46 = vpop.permute.xlu2 %5660  ;;  %v12503_v55 = vmax.f32 %v10587_v37, 0.0 }
 0x98b   : > { %5819 = vperm.xlu2 %7092, %v11572_v56   ;;  %v12499_v56 = vld [vmem:[#allocation66_spill] sm:$0xff] }
 0x98c   : > { %5863 = vperm.xlu1 %7091, %v7277_v13   ;;  %v12500_v18 = vmax.f32 %v12499_v56, 0.0  ;;  %v12502_v13 = vmax.f32 %v10543_v54, 0.0  ;;  %v12505_v54 = vld [vmem:[#allocation38_spill] sm:$0xff] }
 0x98d   : > { %5973 = vperm.xlu0 %7090, %v7287_v31   ;;  %v5727_v30 = vpop.permute.xlu2 %5726 }
 0x98e   : > { %v5734_v4 = vmul.f32 %v5727_v30, %v12504_v58 }
 0x993   : > { %5907 = vperm.xlu2 %7092, %v7281_v61  }
 0x994   : > { %5929 = vperm.xlu1 %7091, %v7283_v25   ;;  %v12506_v25 = vmax.f32 %v12505_v54, 0.0 }
 0x995   : > { %6092 = vperm.xlu0 %7090, %v11581_v28   ;;  %v5793_v42 = vpop.permute.xlu2 %5792 }
 0x996   : > { %v5800_v31 = vmul.f32 %v5793_v42, %v12510_v20  ;;  %v12517_v42 = vld [vmem:[#allocation50_spill] sm:$0xff]  ;;  %v12535_v20 = vld [vmem:[#allocation5_spill] sm:$0xff] }
 0x997   : > { %v12518_v49 = vmax.f32 %v12517_v42, 0.0 }
 0x99b   : > { %5995 = vperm.xlu2 %7092, %v7289_v19  }
 0x99c   : > { %5951 = vperm.xlu1 %7091, %v7285_v52   ;;  %v12507_v52 = vld [vmem:[#allocation44_spill] sm:$0xff] }
 0x99d   : > { %6097 = vperm.xlu0 %7090, %v6075_v34   ;;  %v5859_v47 = vpop.permute.xlu2 %5858  ;;  %v12508_v37 = vmax.f32 %v12507_v52, 0.0 }
 0x99e   : > { %v5617_v36 = vpop.permute.xlu1 %5616 }
 0x99f   : > { %v5573_v59 = vpop.permute.xlu0 %5572  ;;  %v5624_v14 = vmul.f32 %v5617_v36, %v12498_v24  ;;  %v12521_v24 = vld [vmem:[#allocation21_spill] sm:$0xff] }
 0x9a0   : > { %v5580_v8 = vmul.f32 %v5573_v59, %v12494_v6 }
 0x9a3   : > { %6039 = vperm.xlu2 %7092, %v7293_v2  }
 0x9a4   : > { %6017 = vperm.xlu1 %7091, %v7291_v17   ;;  %v12512_v17 = vmax.f32 %v12511_v33, 0.0 }
 0x9a5   : > { %6078 = vperm.xlu0 %7090, %v11577_v27   ;;  %v5925_v63 = vpop.permute.xlu2 %5924  ;;  %v12501_v27 = vmax.f32 %v10494_v48, 0.0  ;;  %v6130_v48 = vld [vmem:[%s11810_s21] sm:$0xff] }
 0x9a6   : > { %v5639_v51 = vpop.permute.xlu1 %5638  ;;  %6159 = vmatpush.msrb.mxu3 %v6130_v48  ;;  %v12529_v48 = vld [vmem:[#allocation70_spill] sm:$0xff] }
 0x9a7   : > { %v5595_v16 = vpop.permute.xlu0 %5594  ;;  %v5646_v44 = vmul.f32 %v5639_v51, %v12500_v18  ;;  %v5668_v28 = vmul.f32 %v5661_v46, %v12501_v27  ;;  %v12515_v46 = vld [vmem:[#allocation42_spill] sm:$0xff] }
 0x9a8   : > { %v5602_v15 = vmul.f32 %v5595_v16, %v12496_v43  ;;  %v12516_v30 = vmax.f32 %v12515_v46, 0.0  ;;  %v12519_v43 = vld [vmem:[#allocation10_spill] sm:$0xff] }
 0x9aa   : > { %v5604_v62 = vadd.f32 %v5602_v15, %v5580_v8  ;;  %v5866_v36 = vmul.f32 %v5859_v47, %v12516_v30  ;;  %v12520_v15 = vmax.f32 %v12519_v43, 0.0 }
 0x9ac   : > { %v5626_v22 = vadd.f32 %v5624_v14, %v5604_v62  ;;  %6083 = vperm.xlu1 %7091, %v7297_v38   ;;  %v12514_v38 = vmax.f32 %v12513_v1, 0.0  ;;  %v12522_v14 = vmax.f32 %v12521_v24, 0.0  ;;  %v12545_v24 = vld [vmem:[#allocation41_spill] sm:$0xff] }
 0x9ad   : > { %6061 = vperm.xlu0 %7090, %v7295_v50   ;;  %v5947_v53 = vpop.permute.xlu2 %5946 }
 0x9ae   : > { %v5683_v3 = vpop.permute.xlu1 %5682  ;;  %v5648_v10 = vadd.f32 %v5646_v44, %v5626_v22  ;;  %v5932_v62 = vmul.f32 %v5925_v63, %v12522_v14  ;;  %v12523_v44 = vld [vmem:[#allocation16_spill] sm:$0xff]  ;;  %v12546_v14 = vmax.f32 %v12545_v24, 0.0  ;;  %v12567_v24 = vld [vmem:[#allocation34_spill] sm:$0xff] }
 0x9af   : > { %v5690_v35 = vmul.f32 %v5683_v3, %v12502_v13  ;;  %v5705_v12 = vpop.permute.xlu0 %5704  ;;  %v12524_v22 = vmax.f32 %v12523_v44, 0.0 }
 0x9b0   : > { %v5670_v40 = vadd.f32 %v5668_v28, %v5648_v10  ;;  %v5712_v57 = vmul.f32 %v5705_v12, %v12503_v55  ;;  %v12525_v10 = vld [vmem:[#allocation30_spill] sm:$0xff] }
 0x9b1   : > { %v5954_v47 = vmul.f32 %v5947_v53, %v12524_v22  ;;  %v12526_v13 = vmax.f32 %v12525_v10, 0.0  ;;  %v12531_v53 = vld [vmem:[#allocation69_spill] sm:$0xff]  ;;  %v12549_v10 = vld [vmem:[#allocation23_spill] sm:$0xff] }
 0x9b2   : > { %v5692_v0 = vadd.f32 %v5690_v35, %v5670_v40  ;;  %v12532_v54 = vmax.f32 %v12531_v53, 0.0 }
 0x9b4   : > { %v5714_v61 = vadd.f32 %v5712_v57, %v5692_v0  ;;  %v12527_v0 = vld [vmem:[#allocation36_spill] sm:$0xff] }
 0x9b5   : > { %v11647_v7 = vpop.permute.xlu2 %6012  ;;  %v12528_v55 = vmax.f32 %v12527_v0, 0.0 }
 0x9b6   : > { %v5749_v41 = vpop.permute.xlu1 %5748  ;;  %v5736_v29 = vadd.f32 %v5734_v4, %v5714_v61 }
 0x9b7   : > { %v5756_v60 = vmul.f32 %v5749_v41, %v12506_v25  ;;  %v5771_v26 = vpop.permute.xlu0 %5770  ;;  %v12530_v41 = vmax.f32 %v12529_v48, 0.0  ;;  %v12553_v48 = vld [vmem:[#allocation6_spill] sm:$0xff] }
 0x9b8   : > { %v5778_v39 = vmul.f32 %v5771_v26, %v12508_v37  ;;  %v12533_v37 = vld [vmem:[#allocation71_spill] sm:$0xff] }
 0x9b9   : > { %v5758_v9 = vadd.f32 %v5756_v60, %v5736_v29 }
 0x9bb   : > { %v5780_v23 = vadd.f32 %v5778_v39, %v5758_v9  ;;  %v12534_v39 = vmax.f32 %v12533_v37, 0.0 }
 0x9bd   : > { %v5802_v5 = vadd.f32 %v5800_v31, %v5780_v23  ;;  %v11659_v56 = vpop.permute.xlu2 %6034  ;;  %v12536_v31 = vmax.f32 %v12535_v20, 0.0 }
 0x9be   : > { %v5815_v19 = vpop.permute.xlu1 %5814 }
 0x9bf   : > { %v5822_v11 = vmul.f32 %v5815_v19, %v12512_v17  ;;  %v5837_v2 = vpop.permute.xlu0 %5836 }
 0x9c0   : > { %v5844_v34 = vmul.f32 %v5837_v2, %v12514_v38 }
 0x9c1   : > { %v5824_v50 = vadd.f32 %v5822_v11, %v5802_v5  ;;  %v12537_v11 = vld [vmem:[#allocation22_spill] sm:$0xff] }
 0x9c2   : > { %v12538_v2 = vmax.f32 %v12537_v11, 0.0 }
 0x9c3   : > { %v5846_v59 = vadd.f32 %v5844_v34, %v5824_v50  ;;  %v12539_v34 = vld [vmem:[#allocation9_spill] sm:$0xff] }
 0x9c4   : > { %v12540_v46 = vmax.f32 %v12539_v34, 0.0  ;;  %v6173_v34 = vld [vmem:[%s11812_s23 + $0x20] sm:$0xff] }
 0x9c5   : > { %v5868_v51 = vadd.f32 %v5866_v36, %v5846_v59  ;;  %v5578_v63 = vpop.permute.xlu2 %5577  ;;  %v12541_v36 = vld [vmem:[#allocation25_spill] sm:$0xff] }
 0x9c6   : > { %v5881_v16 = vpop.permute.xlu1 %5880  ;;  %v5581_v25 = vmul.f32 %v5578_v63, %v12532_v54  ;;  %v12542_v59 = vmax.f32 %v12541_v36, 0.0  ;;  %v12555_v54 = vld [vmem:[#allocation29_spill] sm:$0xff] }
 0x9c7   : > { %v5888_v6 = vmul.f32 %v5881_v16, %v12518_v49  ;;  %v5903_v8 = vpop.permute.xlu0 %5902 }
 0x9c8   : > { %v5910_v21 = vmul.f32 %v5903_v8, %v12520_v15  ;;  %v12543_v8 = vld [vmem:[#allocation49_spill] sm:$0xff] }
 0x9c9   : > { %v5890_v45 = vadd.f32 %v5888_v6, %v5868_v51 }
 0x9cb   : > { %v5912_v18 = vadd.f32 %v5910_v21, %v5890_v45  ;;  %v12544_v45 = vmax.f32 %v12543_v8, 0.0  ;;  %v12565_v8 = vld [vmem:[#allocation43_spill] sm:$0xff] }
 0x9cd   : > { %v5934_v27 = vadd.f32 %v5932_v62, %v5912_v18  ;;  %v5622_v26 = vpop.permute.xlu2 %5621  ;;  %v12547_v18 = vld [vmem:[#allocation37_spill] sm:$0xff] }
 0x9ce   : > { %v5969_v28 = vpop.permute.xlu1 %5968  ;;  %v5625_v32 = vmul.f32 %v5622_v26, %v12534_v39  ;;  %v12548_v44 = vmax.f32 %v12547_v18, 0.0 }
 0x9cf   : > { %v5956_v3 = vadd.f32 %v5954_v47, %v5934_v27  ;;  %v5976_v35 = vmul.f32 %v5969_v28, %v12526_v13  ;;  %v5991_v12 = vpop.permute.xlu0 %5990  ;;  %v12550_v13 = vmax.f32 %v12549_v10, 0.0 }
 0x9d0   : > { %v5998_v57 = vmul.f32 %v5991_v12, %v12528_v55 }
 0x9d1   : > { %v5978_v40 = vadd.f32 %v5976_v35, %v5956_v3 }
 0x9d3   : > { %v11667_v58 = vadd.f32 %v5998_v57, %v5978_v40  ;;  %v12551_v57 = vld [vmem:[#allocation26_spill] sm:$0xff] }
 0x9d4   : > { %v12552_v63 = vmax.f32 %v12551_v57, 0.0 }
 0x9d5   : > { %v5688_v1 = vpop.permute.xlu2 %5687 }
 0x9d6   : > { %v11669_v4 = vpop.permute.xlu1 %6056  ;;  %v5691_v30 = vmul.f32 %v5688_v1, %v12540_v46  ;;  %v12563_v46 = vld [vmem:[#allocation31_spill] sm:$0xff] }
 0x9d7   : > { %v5600_v61 = vpop.permute.xlu0 %5599 }
 0x9d8   : > { %v5603_v29 = vmul.f32 %v5600_v61, %v12530_v41  ;;  %v12554_v41 = vmax.f32 %v12553_v48, 0.0 }
 0x9da   : > { %v5605_v52 = vadd.f32 %v5603_v29, %v5581_v25  ;;  %v12556_v25 = vmax.f32 %v12555_v54, 0.0 }
 0x9dc   : > { %v5627_v5 = vadd.f32 %v5625_v32, %v5605_v52  ;;  %v12557_v32 = vld [vmem:[#allocation15_spill] sm:$0xff] }
 0x9dd   : > { %v5754_v15 = vpop.permute.xlu2 %5753  ;;  %v12558_v20 = vmax.f32 %v12557_v32, 0.0 }
 0x9de   : > { %v5644_v60 = vpop.permute.xlu1 %5643  ;;  %v5757_v62 = vmul.f32 %v5754_v15, %v12546_v14 }
 0x9df   : > { %v5666_v9 = vpop.permute.xlu0 %5665  ;;  %v5647_v23 = vmul.f32 %v5644_v60, %v12536_v31 }
 0x9e0   : > { %v5669_v50 = vmul.f32 %v5666_v9, %v12538_v2 }
 0x9e1   : > { %v5649_v19 = vadd.f32 %v5647_v23, %v5627_v5  ;;  %v6176_v23 = vld [vmem:[%s11812_s23 + $0x38] sm:$0xff]  ;;  %v6175_v5 = vld [vmem:[%s11812_s23 + $0x30] sm:$0xff] }
 0x9e2   : > { %6195 = vmatpush.msra.mxu3 %v6176_v23 }
 0x9e3   : > { %v5671_v38 = vadd.f32 %v5669_v50, %v5649_v19  ;;  %v12561_v50 = vld [vmem:[#allocation24_spill] sm:$0xff] }
 0x9e4   : > { %6196 = vmatpush.msra.mxu3 %v6175_v5  ;;  %v12562_v1 = vmax.f32 %v12561_v50, 0.0 }
 0x9e5   : > { %v5693_v16 = vadd.f32 %v5691_v30, %v5671_v38  ;;  %v5820_v12 = vpop.permute.xlu2 %5819  ;;  %v12564_v30 = vmax.f32 %v12563_v46, 0.0 }
 0x9e6   : > { %v5710_v33 = vpop.permute.xlu1 %5709  ;;  %v5823_v61 = vmul.f32 %v5820_v12, %v12552_v63 }
 0x9e7   : > { %v5732_v17 = vpop.permute.xlu0 %5731  ;;  %v5713_v51 = vmul.f32 %v5710_v33, %v12542_v59  ;;  %v6174_v33 = vld [vmem:[%s11812_s23 + $0x28] sm:$0xff]  ;;  %v6020_v36 = vmul.f32 %v11647_v7, %v12564_v30  ;;  %v12568_v7 = vmax.f32 %v12567_v24, 0.0 }
 0x9e8   : > { %v5735_v43 = vmul.f32 %v5732_v17, %v12544_v45  ;;  %v12559_v17 = vld [vmem:[#allocation35_spill] sm:$0xff]  ;;  %6197 = vmatpush.msra.mxu3 %v6174_v33  ;;  %v12566_v45 = vmax.f32 %v12565_v8, 0.0 }
 0x9e9   : > { %v5715_v6 = vadd.f32 %v5713_v51, %v5693_v16  ;;  %v12560_v11 = vmax.f32 %v12559_v17, 0.0  ;;  %v6042_v14 = vmul.f32 %v11659_v56, %v12568_v7  ;;  %v12579_v33 = vld [vmem:[#allocation59_spill] sm:$0xff] }
 0x9ea   : > { %6198 = vmatpush.msra.mxu3 %v6173_v34  ;;  %v12580_v17 = vmax.f32 %v12579_v33, 0.0  ;;  %v12581_v30 = vld [vmem:[#allocation51_spill] sm:$0xff] }
 0x9eb   : > { %v5737_v21 = vadd.f32 %v5735_v43, %v5715_v6  ;;  %v6170_v24 = vld [vmem:[%s11812_s23 + $0x8] sm:$0xff]  ;;  %v6169_v7 = vld [vmem:[%s11812_s23] sm:$0xff] }
 0x9ed   : > { %v5759_v28 = vadd.f32 %v5757_v62, %v5737_v21  ;;  %v5908_v37 = vpop.permute.xlu2 %5907 }
 0x9ee   : > { %v5776_v42 = vpop.permute.xlu1 %5775  ;;  %v5911_v2 = vmul.f32 %v5908_v37, %v12560_v11 }
 0x9ef   : > { %v5798_v49 = vpop.permute.xlu0 %5797  ;;  %v5779_v22 = vmul.f32 %v5776_v42, %v12548_v44  ;;  %v6172_v42 = vld [vmem:[%s11812_s23 + $0x18] sm:$0xff] }
 0x9f0   : > { %v5801_v35 = vmul.f32 %v5798_v49, %v12550_v13  ;;  %v6022_v49 = vadd.f32 %v6020_v36, %v11667_v58  ;;  %6199 = vmatpush.msra.mxu3 %v6172_v42  ;;  %v12582_v36 = vmax.f32 %v12581_v30, 0.0 }
 0x9f1   : > { %v5781_v3 = vadd.f32 %v5779_v22, %v5759_v28 }
 0x9f2   : > { %v6044_v22 = vadd.f32 %v6042_v14, %v6022_v49  ;;  %v6215_v14 = vld [vmem:[%s11814_s25 + $0x18] sm:$0xff] }
 0x9f3   : > { %v5803_v40 = vadd.f32 %v5801_v35, %v5781_v3  ;;  %v12571_v3 = vld [vmem:[#allocation33_spill] sm:$0xff] }
 0x9f4   : > { %v12572_v10 = vmax.f32 %v12571_v3, 0.0 }
 0x9f5   : > { %v5825_v53 = vadd.f32 %v5823_v61, %v5803_v40  ;;  %v5996_v62 = vpop.permute.xlu2 %5995 }
 0x9f6   : > { %v5842_v47 = vpop.permute.xlu1 %5841 }
 0x9f7   : > { %v5886_v27 = vpop.permute.xlu0 %5885  ;;  %v5845_v29 = vmul.f32 %v5842_v47, %v12554_v41  ;;  %v12569_v47 = vld [vmem:[#allocation45_spill] sm:$0xff]  ;;  %v12573_v41 = vld [vmem:[#allocation28_spill] sm:$0xff] }
 0x9f8   : > { %v5889_v31 = vmul.f32 %v5886_v27, %v12558_v20  ;;  %v12570_v27 = vmax.f32 %v12569_v47, 0.0 }
 0x9f9   : > { %v5847_v26 = vadd.f32 %v5845_v29, %v5825_v53  ;;  %v12574_v29 = vmax.f32 %v12573_v41, 0.0 }
 0x9fa   : > { %v6064_v58 = vmul.f32 %v11669_v4, %v12570_v27  ;;  %v12575_v4 = vld [vmem:[#allocation52_spill] sm:$0xff] }
 0x9fb   : > { %v5999_v53 = vmul.f32 %v5996_v62, %v12574_v29  ;;  %v12576_v54 = vmax.f32 %v12575_v4, 0.0  ;;  %v6214_v62 = vld [vmem:[%s11814_s25 + $0x10] sm:$0xff] }
 0x9fc   : > { %v6066_v63 = vadd.f32 %v6064_v58, %v6044_v22 }
 0x9fe   : > { %v5864_v0 = vpop.permute.xlu1 %5863 }
 0x9ff   : > { %v5974_v55 = vpop.permute.xlu0 %5973  ;;  %v5867_v60 = vmul.f32 %v5864_v0, %v12556_v25 }
 0xa00   : > { %v5977_v13 = vmul.f32 %v5974_v55, %v12572_v10  ;;  %v12577_v55 = vld [vmem:[#allocation61_spill] sm:$0xff]  ;;  %v6212_v10 = vld [vmem:[%s11814_s25] sm:$0xff] }
 0xa01   : > { %v5869_v9 = vadd.f32 %v5867_v60, %v5847_v26  ;;  %v12578_v26 = vmax.f32 %v12577_v55, 0.0 }
 0xa03   : > { %v5891_v19 = vadd.f32 %v5889_v31, %v5869_v9 }
 0xa05   : > { %v5913_v51 = vadd.f32 %v5911_v2, %v5891_v19 }
 0xa06   : > { %v5930_v52 = vpop.permute.xlu1 %5929 }
 0xa07   : > { %v6093_v39 = vpop.permute.xlu0 %6092  ;;  %v5933_v38 = vmul.f32 %v5930_v52, %v12562_v1 }
 0xa08   : > { %7298 = vrcp.f32 %v6093_v39  ;;  %v6111_v35 = vand.u32 2147483648, %v6093_v39  ;;  %vm6105_vm5 = vweird.f32 %v6093_v39  ;;  %v6109_v57 = vand.u32 2147483647, %v6093_v39 }
 0xa09   : > { %v5935_v21 = vadd.f32 %v5933_v38, %v5913_v51  ;;  %v12583_v51 = vld [vmem:[#allocation47_spill] sm:$0xff] }
 0xa0a   : > { %v6112_v52 = vor.u32 1.1754944e-38, %v6111_v35  ;;  %vm6110_vm7 = vcmp.eq.f32.partialorder %v6109_v57, 8.507059e+37 }
 0xa0e   : > { %v7299_v59 = vpop.eup %7298  ;;  %v5952_v16 = vpop.permute.xlu1 %5951 }
 0xa0f   : > { %v6101_v6 = vmul.f32 %v7299_v59, %v6093_v39  ;;  %v5955_v43 = vmul.f32 %v5952_v16, %v12566_v45  ;;  %v6098_v15 = vpop.permute.xlu0 %6097  ;;  %vm6106_vm4 = vweird.f32 %v7299_v59  ;;  %v6040_v39 = vpop.permute.xlu2 %6039  ;;  %v12584_v16 = vmax.f32 %v12583_v51, 0.0 }
 0xa10   : > { %7300 = vrcp.f32 %v6098_v15  ;;  %vm6107_vm6 = vmor %vm6105_vm5, %vm6106_vm4  ;;  %v6043_v11 = vmul.f32 %v6040_v39, %v12580_v17  ;;  %v6126_v50 = vand.u32 2147483648, %v6098_v15  ;;  %vm6120_vm9 = vweird.f32 %v6098_v15 }
 0xa11   : > { %v6102_v18 = vsub.f32 1.0, %v6101_v6  ;;  %v5957_v44 = vadd.f32 %v5955_v43, %v5935_v21  ;;  %v6124_v34 = vand.u32 2147483647, %v6098_v15 }
 0xa12   : > { %v6127_v8 = vor.u32 1.1754944e-38, %v6126_v50 }
 0xa13   : > { %v6103_v28 = vmul.f32 %v7299_v59, %v6102_v18  ;;  %v5979_v0 = vadd.f32 %v5977_v13, %v5957_v44  ;;  %vm6125_vm11 = vcmp.eq.f32.partialorder %v6124_v34, 8.507059e+37  ;;  %v6213_v18 = vld [vmem:[%s11814_s25 + $0x8] sm:$0xff]  ;;  %v7103_v44 = vld [vmem:[%s11811_s22] ss:$0 sm:$0xff] }
 0xa14   : > { %v7104_v13 = vld [vmem:[%s11813_s24] ss:$0 sm:$0xff] }
 0xa15   : > { %v6104_v12 = vadd.f32 %v7299_v59, %v6103_v28  ;;  %v6001_v32 = vadd.f32 %v5999_v53, %v5979_v0 }
 0xa16   : > { %v7301_v40 = vpop.eup %7300  ;;  %v6018_v56 = vpop.permute.xlu1 %6017 }
 0xa17   : > { %v6116_v61 = vmul.f32 %v7301_v40, %v6098_v15  ;;  %v6079_v48 = vpop.permute.xlu0 %6078  ;;  %v6021_v25 = vmul.f32 %v6018_v56, %v12576_v54  ;;  %v6108_v60 = vsel %vm6107_vm6, %v7299_v59, %v6104_v12  ;;  %vm6121_vm8 = vweird.f32 %v7301_v40  ;;  %v6171_v15 = vld [vmem:[%s11812_s23 + $0x10] sm:$0xff] }
 0xa18   : > { %v6086_v9 = vmul.f32 %v6079_v48, %v12578_v26  ;;  %v6113_v23 = vsel %vm6110_vm7, %v6112_v52, %v6108_v60  ;;  %vm6122_vm10 = vmor %vm6120_vm9, %vm6121_vm8  ;;  %6200 = vmatpush.msra.mxu3 %v6171_v15 }
 0xa19   : > { %v6117_v37 = vsub.f32 1.0, %v6116_v61  ;;  %v6023_v5 = vadd.f32 %v6021_v25, %v6001_v32 }
 0xa1a   : > { %v6088_v20 = vadd.f32 %v6086_v9, %v6066_v63  ;;  %6201 = vmatpush.msra.mxu3 %v6170_v24  ;;  %v7105_v63 = vld [vmem:[%s11815_s26] ss:$0 sm:$0xff] }
 0xa1b   : > { %v6118_v31 = vmul.f32 %v7301_v40, %v6117_v37  ;;  %v6045_v46 = vadd.f32 %v6043_v11, %v6023_v5 }
 0xa1c   : > { %v6114_v19 = vmul.f32 %v6113_v23, %v6088_v20  ;;  %6202 = vmatpush.msra.mxu3 %v6169_v7 }
 0xa1d   : > { %v6119_v2 = vadd.f32 %v7301_v40, %v6118_v31 }
 0xa1e   : > { %7068 = vmatmul.msk.f32.vlgmr.msrb.gmra.mxu3 %vm4031_vm2, %v6114_v19  ;;  %v6084_v1 = vpop.permute.xlu1 %6083 }
 0xa1f   : > { %v6062_v38 = vpop.permute.xlu0 %6061  ;;  %v6087_v42 = vmul.f32 %v6084_v1, %v12584_v16  ;;  %v6123_v49 = vsel %vm6122_vm10, %v7301_v40, %v6119_v2  ;;  %6238 = vmatpush.msrb.mxu3 %v6215_v14 }
 0xa20   : > { %v6065_v59 = vmul.f32 %v6062_v38, %v12582_v36  ;;  %v6128_v43 = vsel %vm6125_vm11, %v6127_v8, %v6123_v49 }
 0xa21   : > { %6239 = vmatpush.msrb.mxu3 %v6214_v62 }
 0xa22   : > { %v6067_v6 = vadd.f32 %v6065_v59, %v6045_v46 }
 0xa23   : > { %6240 = vmatpush.msrb.mxu3 %v6213_v18 }
 0xa24   : > { %v6089_v45 = vadd.f32 %v6087_v42, %v6067_v6 }
 0xa25   : > { %6241 = vmatpush.msrb.mxu3 %v6212_v10 }
 0xa26   : > { %v6129_v21 = vmul.f32 %v6128_v43, %v6089_v45 }
 0xa28   : > { %7069 = vmatmul.msk.f32.gmra.mxu3 %vm4031_vm2, %v6129_v21 }
 0xaa1   : > { %v6161_v22 = vpop.f32.mrf.mxu3 }
 0xaa2   : > { %v6162_v47 = vadd.f32 %v7103_v44, %v6161_v22 }
 0xaa4   : > { %v6167_v27 = vmax.f32 %v6162_v47, 0.0 }
 0xaa6   : > { %7070 = vmatmul.msk.f32.vlgmr.msra.gmra.mxu3 %vm5210_vm3, %v6167_v27 }
 0xaab   : > { %v6164_v58 = vpop.f32.mrf.mxu3 }
 0xaac   : > { %v6165_v28 = vadd.f32 %v7103_v44, %v6164_v58 }
 0xaae   : > { %v6168_v3 = vmax.f32 %v6165_v28, 0.0 }
 0xab0   : > { %7071 = vmatmul.msk.f32.gmra.mxu3 %vm5210_vm3, %v6168_v3 }
 0xb29   : > { %v6204_v35 = vpop.f32.mrf.mxu3 }
 0xb2a   : > { %v6205_v12 = vadd.f32 %v7104_v13, %v6204_v35 }
 0xb2c   : > { %v6210_v40 = vmax.f32 %v6205_v12, 0.0 }
 0xb2e   : > { %7072 = vmatmul.msk.f32.vlgmr.msrb.gmra.mxu3 %vm4031_vm2, %v6210_v40 }
 0xb33   : > { %v6207_v0 = vpop.f32.mrf.mxu3 }
 0xb34   : > { %v6208_v56 = vadd.f32 %v7104_v13, %v6207_v0 }
 0xb36   : > { %v6211_v57 = vmax.f32 %v6208_v56, 0.0 }
 0xb38   : > { %7073 = vmatmul.msk.f32.gmra.mxu3 %vm4031_vm2, %v6211_v57 }
 0xbb1   : > { %v6243_v61 = vpop.f32.mrf.mxu3 }
 0xbb2   : > { %v6244_v48 = vadd.f32 %v7105_v63, %v6243_v61 }
 0xbb4   : > { %6250 = vst.msk [vmem:[%s820_s5] sm:$0xff] %vm6249_vm12, %v6244_v48 }
 0xbbb   : > { %v6246_v41 = vpop.f32.mrf.mxu3 }
 0xbbc   : > { %v6247_v29 = vadd.f32 %v7105_v63, %v6246_v41 }
 0xbbe   : > { %6251 = vst.msk [vmem:[%s820_s5 + $0x8] sm:$0xff] %vm6249_vm12, %v6247_v29 }
 0xbbf PF: > { %s39_s8 = sadd.s32 1, %s7318_s8  }
 0xbc0   : > { %p36_p4 = scmp.ge.s32.totalorder %s39_s8, 4  }
 0xbc2   :  { %38 = sbr.rel (!%p36_p4) target bundleno = 13 (0xd), region = 164 }

</bundles_post_ra>
